<compile_context>
chip_gen: v6e
topology: v6e:2x2x1
jax: 0.10.0
libtpu: 0.0.40
codegen_flags: <defaults>
</compile_context>

<pallas_src>
import jax
import jax.numpy as jnp
import numpy as np
from jax.experimental import pallas as pl
from jax.experimental.pallas import tpu as pltpu

# ---------------- configuration (mirrors ConvLayers.__init__ args) -----------
N_BLOCKS = 4                      # independent 128-node blocks
BLOCKS_PER_STEP = 2               # blocks processed per grid step (static unroll)
N_PER_BLOCK = 128                 # nodes per block  -> MXU M dim = 128
G_PER_BLOCK = 4                   # graphs per block -> 32 nodes / graph
POS_DIM = 3
POS_PAD = 8                       # coords zero-padded to 8 for aligned matmul K
N_ATOM_EMBEDDINGS = 16            # n_atom_embeddings (input node feature dim)
N_EDGE_FEATURES = 16              # n_edge_features (Gaussian smearing bins)
ATOM_EMBEDDING_SIZES = (32, 32)   # atom_embedding_sizes -> two SAGEConv layers
CUTOFF = 7.0                      # RadiusInteractionGraph(7.0, 32)
SKIP_CONNECTIONS = True           # skip applied only when dims match (layer 2)
# batch_norm=False, dropout=0.0, readout_pooling='add', readout_mlp_layer_sizes=[]
# -> no BN, no dropout, no readout MLP; n_outputs = ATOM_EMBEDDING_SIZES[-1]

F_IN = N_ATOM_EMBEDDINGS
F1, F2 = ATOM_EMBEDDING_SIZES
F_OUT = F2

# GaussianSmearing(0.0, CUTOFF, N_EDGE_FEATURES): fixed (non-learned) constants.
RBF_OFFSETS = np.linspace(0.0, CUTOFF, N_EDGE_FEATURES).astype(np.float32)
DELTA = float(RBF_OFFSETS[1] - RBF_OFFSETS[0])
RBF_COEFF = float(-0.5 / DELTA ** 2)
RBF_Q = float(np.exp(2.0 * RBF_COEFF * DELTA * DELTA))    # = exp(-1): t_{k+1}/t_k
RBF_SPLIT = N_EDGE_FEATURES // 2                          # second anchor bin

# packed parameter slab layout (rows, all sections 8-row aligned)
K1 = F_IN + N_EDGE_FEATURES + F_IN      # 48  = cat width of layer 1
K2 = F1 + N_EDGE_FEATURES + F1          # 80  = cat width of layer 2
def _round8(v): return ((v + 7) // 8) * 8
OFF_W1 = 0
OFF_B1 = OFF_W1 + K1                    # 48
OFF_W2 = _round8(OFF_B1 + 1)            # 56
OFF_B2 = OFF_W2 + K2                    # 136
PARAM_ROWS = _round8(OFF_B2 + 1)        # 144

# TODO(synk): radius_graph's max_num_neighbors=32 truncation is not enforced
# (it can never bind with 32 nodes/graph); the dense mask keeps all in-radius pairs.
# TODO(synk): sqrt(d2=0) on the diagonal is fine forward; mask with an epsilon
# before sqrt if this kernel is ever differentiated.


def convlayers_kernel(pos_ref, x_ref, adjb_ref, pool_ref, par_ref, out_ref):
    # packed parameters (shared by all sub-blocks of this step); static slices.
    w1 = par_ref[OFF_W1:OFF_W1 + K1, :]
    b1 = par_ref[OFF_B1:OFF_B1 + 1, :]
    w2 = par_ref[OFF_W2:OFF_W2 + K2, :]
    b2 = par_ref[OFF_B2:OFF_B2 + 1, :]
    cutoff2 = CUTOFF * CUTOFF

    # Static unroll over independent node-blocks: two serial chains with no
    # cross-dependencies so the scheduler can interleave MXU/EUP/VPU/XLU work
    # (the kernel is latency-bound at these tile sizes).
    for s in range(BLOCKS_PER_STEP):
        p = pos_ref[s]                                     # [N, 8] padded xyz
        x = x_ref[s]                                       # [N, F_IN]
        adjb = adjb_ref[s]                                 # [N, N] same-graph mask
        pool = pool_ref[s]                                 # [G, N]

        # ---- RadiusInteractionGraph: squared distances via MXU gram matrix --
        pt = p.T                                           # [8, N] (one tiny transpose)
        gram = jnp.dot(p, pt, preferred_element_type=jnp.float32)     # [N, N]
        sq_r = jnp.sum(p * p, axis=1, keepdims=True)       # [N, 1]
        sq_c = jnp.sum(pt * pt, axis=0, keepdims=True)     # [1, N]
        d2 = jnp.maximum(sq_r + sq_c - 2.0 * gram, 0.0)    # [N, N]

        # cutoff compared on d2 (adjacency never waits on the sqrt);
        # adjm = in-radius & same-graph & no-self-loop {0,1} mask.
        adjm = jnp.where(d2 <= cutoff2, adjb, 0.0)

        # ---- GaussianSmearing aggregated over neighbors (ratio recurrence) --
        # Out-of-radius pairs are masked out of the anchor, so clamping d2 only
        # keeps the ratio t finite for far masked pairs (0 * inf -> NaN guard).
        d2c = jnp.minimum(d2, cutoff2)
        dist = jnp.sqrt(d2c)
        # t_k = rbf_{k+1}/rbf_k = t_0 * q^k; all intermediates bounded in f32.
        t0 = jnp.exp(RBF_COEFF * (DELTA * DELTA - 2.0 * DELTA * dist))

        cols = []
        for a in (0, RBF_SPLIT):
            # Fresh anchor per half: the a=0 anchor underflows for d near the
            # cutoff, but the bins it covers (k < RBF_SPLIT) are then <= ~1e-9,
            # and the a=RBF_SPLIT anchor never underflows for d in [0, cutoff].
            if a == 0:
                rbf = adjm * jnp.exp(RBF_COEFF * d2c)                  # mask*rbf_0
            else:
                diff = dist - float(RBF_OFFSETS[a])
                rbf = adjm * jnp.exp(RBF_COEFF * diff * diff)          # mask*rbf_a
            t = t0 * float(RBF_Q ** a)                                 # t_a
            hi = RBF_SPLIT if a == 0 else N_EDGE_FEATURES
            for k in range(a, hi):
                cols.append(jnp.sum(rbf, axis=1, keepdims=True))       # [N, 1]
                if k + 1 < hi:
                    rbf = rbf * t
                    t = t * RBF_Q
        agg_e = jnp.concatenate(cols, axis=1)              # [N, E]

        # ---- SAGEConv stack: one fused matmul per layer (cat @ W_cat + b) ---
        # (the 2.0 duplicated-edge weight is pre-folded into W_n / W_e rows)
        # layer 1 (16 -> 32): relu, no skip (dims differ)
        agg_h1 = jnp.dot(adjm, x, preferred_element_type=jnp.float32)
        cat1 = jnp.concatenate([agg_h1, agg_e, x], axis=1)             # [N, K1]
        h = jnp.maximum(
            jnp.dot(cat1, w1, preferred_element_type=jnp.float32) + b1, 0.0)

        # layer 2 (32 -> 32): relu, then skip connection
        agg_h2 = jnp.dot(adjm, h, preferred_element_type=jnp.float32)
        cat2 = jnp.concatenate([agg_h2, agg_e, h], axis=1)             # [N, K2]
        h2 = jnp.maximum(
            jnp.dot(cat2, w2, preferred_element_type=jnp.float32) + b2, 0.0)
        if SKIP_CONNECTIONS and F1 == F2:
            h2 = h + h2

        # ---- global_add_pool: [G, N] @ [N, F_out] ---------------------------
        out_ref[s] = jnp.dot(pool, h2, preferred_element_type=jnp.float32)


def conv_layers_forward(pos_pad, x, adj_base, pool_mat, params_slab):
    B, N, _ = pos_pad.shape
    G = pool_mat.shape[1]
    assert B % BLOCKS_PER_STEP == 0
    return pl.pallas_call(
        convlayers_kernel,
        out_shape=jax.ShapeDtypeStruct((B, G, F_OUT), jnp.float32),
        grid=(B // BLOCKS_PER_STEP,),
        in_specs=[
            pl.BlockSpec((BLOCKS_PER_STEP, N, POS_PAD), lambda i: (i, 0, 0)),
            pl.BlockSpec((BLOCKS_PER_STEP, N, F_IN), lambda i: (i, 0, 0)),
            pl.BlockSpec((BLOCKS_PER_STEP, N, N), lambda i: (i, 0, 0)),
            pl.BlockSpec((BLOCKS_PER_STEP, G, N), lambda i: (i, 0, 0)),
            pl.BlockSpec((PARAM_ROWS, F_OUT), lambda i: (0, 0)),
        ],
        out_specs=pl.BlockSpec((BLOCKS_PER_STEP, G, F_OUT), lambda i: (i, 0, 0)),
        compiler_params=pltpu.CompilerParams(
            dimension_semantics=("parallel",)),
    )(pos_pad, x, adj_base, pool_mat, params_slab)


def init_params(key):
    dims = [F_IN] + list(ATOM_EMBEDDING_SIZES)
    params = []
    for i, (fin, fout) in enumerate(zip(dims[:-1], dims[1:])):
        k1, k2, k3 = jax.random.split(jax.random.fold_in(key, i), 3)
        s_n = (2.0 / (fin + fout)) ** 0.5
        s_e = (2.0 / (N_EDGE_FEATURES + fout)) ** 0.5
        wn = jax.random.normal(k1, (fin, fout), jnp.float32) * s_n
        we = jax.random.normal(k2, (N_EDGE_FEATURES, fout), jnp.float32) * s_e
        wr = jax.random.normal(k3, (fin, fout), jnp.float32) * s_n
        b = jnp.zeros((1, fout), jnp.float32)
        params.append((wn, we, wr, b))
    return params


def pack_params(params):
    """Pack [2*wn; 2*we; wr] per layer + biases into one [PARAM_ROWS, F_OUT] slab.

    The factor 2 reproduces cat([edge_index, edge_index.flip(0)]) duplicating
    every directed edge with aggr='add'; folding it into the neighbor/edge weight
    rows lets the kernel use the raw 0/1 adjacency mask and an unscaled agg_e.
    """
    (w1n, w1e, w1r, b1), (w2n, w2e, w2r, b2) = params
    w1_cat = jnp.concatenate([2.0 * w1n, 2.0 * w1e, w1r], axis=0)   # [K1, F1]
    w2_cat = jnp.concatenate([2.0 * w2n, 2.0 * w2e, w2r], axis=0)   # [K2, F2]
    slab = jnp.zeros((PARAM_ROWS, F_OUT), jnp.float32)
    slab = slab.at[OFF_W1:OFF_W1 + K1, :].set(w1_cat)
    slab = slab.at[OFF_B1, :].set(b1[0])
    slab = slab.at[OFF_W2:OFF_W2 + K2, :].set(w2_cat)
    slab = slab.at[OFF_B2, :].set(b2[0])
    return slab


def reference_forward(pos, x, batch_ids, params, pool_mat):
    """Pure-numpy (float64) dense reference of the same forward pass (one block)."""
    pos = np.asarray(pos, np.float64)
    h = np.asarray(x, np.float64)
    bid = np.asarray(batch_ids)
    d2 = ((pos[:, None, :] - pos[None, :, :]) ** 2).sum(-1)
    dist = np.sqrt(d2)
    mask = (bid[:, None] == bid[None, :]) & (~np.eye(len(bid), dtype=bool)) \
        & (dist <= CUTOFF)
    adj = np.where(mask, 2.0, 0.0)
    offs = np.asarray(RBF_OFFSETS, np.float64)
    rbf = np.exp(RBF_COEFF * (dist[:, :, None] - offs[None, None, :]) ** 2)
    agg_e = (adj[:, :, None] * rbf).sum(1)
    for (wn, we, wr, b) in params:
        wn, we, wr, b = (np.asarray(a, np.float64) for a in (wn, we, wr, b))
        h_in = h
        out = (adj @ h) @ wn + agg_e @ we + h @ wr + b
        out = np.maximum(out, 0.0)
        if SKIP_CONNECTIONS and h_in.shape[-1] == out.shape[-1]:
            out = h_in + out
        h = out
    return np.asarray(pool_mat, np.float64) @ h


if __name__ == "__main__":
    key = jax.random.PRNGKey(0)
    kpos, kx, kp = jax.random.split(key, 3)

    nodes_per_graph = N_PER_BLOCK // G_PER_BLOCK                    # 32
    bid = jnp.repeat(jnp.arange(G_PER_BLOCK, dtype=jnp.int32),
                     nodes_per_graph)                               # [128]

    pos = jax.random.uniform(kpos, (N_BLOCKS, N_PER_BLOCK, POS_DIM),
                             jnp.float32, 0.0, 6.0)
    x = jax.random.normal(kx, (N_BLOCKS, N_PER_BLOCK, F_IN), jnp.float32)
    params = init_params(kp)

    # plain-JAX glue: masks, pooling one-hot, coord padding, packed parameters
    same = bid[:, None] == bid[None, :]
    adjb_2d = (same & ~jnp.eye(N_PER_BLOCK, dtype=bool)).astype(jnp.float32)
    adj_base = jnp.broadcast_to(adjb_2d, (N_BLOCKS, N_PER_BLOCK, N_PER_BLOCK))
    pool_2d = (jnp.arange(G_PER_BLOCK)[:, None] == bid[None, :]
               ).astype(jnp.float32)                                # [G, N]
    pool_mat = jnp.broadcast_to(pool_2d, (N_BLOCKS, G_PER_BLOCK, N_PER_BLOCK))

    pos_pad = jnp.pad(pos, ((0, 0), (0, 0), (0, POS_PAD - POS_DIM)))
    params_slab = pack_params(params)

    out = jax.block_until_ready(conv_layers_forward(
        pos_pad, x, adj_base, pool_mat, params_slab))

    assert out.shape == (N_BLOCKS, G_PER_BLOCK, F_OUT), out.shape
    assert bool(jnp.all(jnp.isfinite(out)))

    max_rel_err = 0.0
    bid_np = np.asarray(bid)
    pool_np = np.asarray(pool_2d)
    for b in range(N_BLOCKS):
        ref = reference_forward(np.asarray(pos[b]), np.asarray(x[b]),
                                bid_np, params, pool_np)
        got = np.asarray(out[b], np.float64)
        rel = float(np.max(np.abs(got - ref)) / (np.max(np.abs(ref)) + 1e-9))
        max_rel_err = max(max_rel_err, rel)
    assert max_rel_err < 1e-2, f"relative error too large: {max_rel_err}"

    print("KERNEL_OK")
</pallas_src>

<mosaic_0001>
module attributes {stable_mosaic.version = 11 : i64} {
  func.func @convlayers_kernel(%arg0: i32, %arg1: memref<2x128x8xf32, #tpu.memory_space<vmem>>, %arg2: memref<2x128x16xf32, #tpu.memory_space<vmem>>, %arg3: memref<2x128x128xf32, #tpu.memory_space<vmem>>, %arg4: memref<2x4x128xf32, #tpu.memory_space<vmem>>, %arg5: memref<144x32xf32, #tpu.memory_space<vmem>>, %arg6: memref<2x4x32xf32, #tpu.memory_space<vmem>>) attributes {dimension_semantics = [#tpu.dimension_semantics<parallel>], iteration_bounds = array<i64: 2>, scalar_prefetch = 0 : i64, scratch_operands = 0 : i64, tpu.core_type = #tpu.core_type<tc>, window_params = [{transform_indices = @transform_0, window_bounds = array<i64: 2, 128, 8>}, {transform_indices = @transform_1, window_bounds = array<i64: 2, 128, 16>}, {transform_indices = @transform_2, window_bounds = array<i64: 2, 128, 128>}, {transform_indices = @transform_3, window_bounds = array<i64: 2, 4, 128>}, {pipeline_mode = #tpu.pipeline_mode<synchronous>, transform_indices = @transform_4, window_bounds = array<i64: 144, 32>}, {transform_indices = @transform_5, window_bounds = array<i64: 2, 4, 32>}]} {
    %c0 = arith.constant 0 : index
    %c0_0 = arith.constant 0 : index
    %0 = vector.load %arg5[%c0, %c0_0] : memref<144x32xf32, #tpu.memory_space<vmem>>, vector<48x32xf32>
    %c48 = arith.constant 48 : index
    %c0_1 = arith.constant 0 : index
    %1 = vector.load %arg5[%c48, %c0_1] : memref<144x32xf32, #tpu.memory_space<vmem>>, vector<1x32xf32>
    %c56 = arith.constant 56 : index
    %c0_2 = arith.constant 0 : index
    %2 = vector.load %arg5[%c56, %c0_2] : memref<144x32xf32, #tpu.memory_space<vmem>>, vector<80x32xf32>
    %c136 = arith.constant 136 : index
    %c0_3 = arith.constant 0 : index
    %3 = vector.load %arg5[%c136, %c0_3] : memref<144x32xf32, #tpu.memory_space<vmem>>, vector<1x32xf32>
    %c0_4 = arith.constant 0 : index
    %c0_5 = arith.constant 0 : index
    %c0_6 = arith.constant 0 : index
    %4 = vector.load %arg1[%c0_4, %c0_5, %c0_6] : memref<2x128x8xf32, #tpu.memory_space<vmem>>, vector<1x128x8xf32>
    %5 = vector.shape_cast %4 : vector<1x128x8xf32> to vector<128x8xf32>
    %c0_7 = arith.constant 0 : index
    %c0_8 = arith.constant 0 : index
    %c0_9 = arith.constant 0 : index
    %6 = vector.load %arg2[%c0_7, %c0_8, %c0_9] : memref<2x128x16xf32, #tpu.memory_space<vmem>>, vector<1x128x16xf32>
    %7 = vector.shape_cast %6 : vector<1x128x16xf32> to vector<128x16xf32>
    %c0_10 = arith.constant 0 : index
    %c0_11 = arith.constant 0 : index
    %c0_12 = arith.constant 0 : index
    %8 = vector.load %arg3[%c0_10, %c0_11, %c0_12] : memref<2x128x128xf32, #tpu.memory_space<vmem>>, vector<1x128x128xf32>
    %9 = vector.shape_cast %8 : vector<1x128x128xf32> to vector<128x128xf32>
    %c0_13 = arith.constant 0 : index
    %c0_14 = arith.constant 0 : index
    %c0_15 = arith.constant 0 : index
    %10 = vector.load %arg4[%c0_13, %c0_14, %c0_15] : memref<2x4x128xf32, #tpu.memory_space<vmem>>, vector<1x4x128xf32>
    %11 = vector.shape_cast %10 : vector<1x4x128xf32> to vector<4x128xf32>
    %12 = tpu.transpose %5, [1, 0] : vector<128x8xf32> -> vector<8x128xf32>
    %cst = arith.constant dense<0.000000e+00> : vector<128x128xf32>
    %13 = tpu.matmul %5, %12, %cst {dimension_numbers = #tpu.dot_dimension_numbers<[1], [0], [0], [1], [0, 0, 1, 1], [], []>} : vector<128x8xf32>, vector<8x128xf32>, vector<128x128xf32> -> vector<128x128xf32>
    %14 = arith.mulf %5, %5 : vector<128x8xf32>
    %cst_16 = arith.constant dense<0.000000e+00> : vector<128xf32>
    %15 = vector.multi_reduction <add>, %14, %cst_16 [1] : vector<128x8xf32> to vector<128xf32>
    %16 = vector.shape_cast %15 : vector<128xf32> to vector<128x1xf32>
    %17 = arith.mulf %12, %12 : vector<8x128xf32>
    %cst_17 = arith.constant dense<0.000000e+00> : vector<128xf32>
    %18 = vector.multi_reduction <add>, %17, %cst_17 [0] : vector<8x128xf32> to vector<128xf32>
    %19 = vector.shape_cast %18 : vector<128xf32> to vector<1x128xf32>
    %20 = vector.broadcast %16 : vector<128x1xf32> to vector<128x128xf32>
    %21 = vector.broadcast %19 : vector<1x128xf32> to vector<128x128xf32>
    %22 = arith.addf %20, %21 : vector<128x128xf32>
    %cst_18 = arith.constant 2.000000e+00 : f32
    %23 = vector.broadcast %cst_18 : f32 to vector<128x128xf32>
    %24 = arith.mulf %23, %13 : vector<128x128xf32>
    %25 = arith.subf %22, %24 : vector<128x128xf32>
    %cst_19 = arith.constant 0.000000e+00 : f32
    %26 = vector.broadcast %cst_19 : f32 to vector<128x128xf32>
    %27 = arith.maximumf %25, %26 : vector<128x128xf32>
    %cst_20 = arith.constant 4.900000e+01 : f32
    %28 = vector.broadcast %cst_20 : f32 to vector<128x128xf32>
    %29 = arith.cmpf ole, %27, %28 : vector<128x128xf32>
    %cst_21 = arith.constant 0.000000e+00 : f32
    %30 = vector.broadcast %cst_21 : f32 to vector<128x128xf32>
    %31 = arith.select %29, %9, %30 : vector<128x128xi1>, vector<128x128xf32>
    %cst_22 = arith.constant 4.900000e+01 : f32
    %32 = vector.broadcast %cst_22 : f32 to vector<128x128xf32>
    %33 = arith.minimumf %27, %32 : vector<128x128xf32>
    %34 = math.sqrt %33 : vector<128x128xf32>
    %cst_23 = arith.constant 0.933333337 : f32
    %35 = vector.broadcast %cst_23 : f32 to vector<128x128xf32>
    %36 = arith.mulf %35, %34 : vector<128x128xf32>
    %cst_24 = arith.constant 0.217777774 : f32
    %37 = vector.broadcast %cst_24 : f32 to vector<128x128xf32>
    %38 = arith.subf %37, %36 : vector<128x128xf32>
    %cst_25 = arith.constant -2.29591846 : f32
    %39 = vector.broadcast %cst_25 : f32 to vector<128x128xf32>
    %40 = arith.mulf %39, %38 : vector<128x128xf32>
    %41 = math.exp %40 : vector<128x128xf32>
    %cst_26 = arith.constant -2.29591846 : f32
    %42 = vector.broadcast %cst_26 : f32 to vector<128x128xf32>
    %43 = arith.mulf %42, %33 : vector<128x128xf32>
    %44 = math.exp %43 : vector<128x128xf32>
    %45 = arith.mulf %31, %44 : vector<128x128xf32>
    %cst_27 = arith.constant 1.000000e+00 : f32
    %46 = vector.broadcast %cst_27 : f32 to vector<128x128xf32>
    %47 = arith.mulf %41, %46 : vector<128x128xf32>
    %cst_28 = arith.constant dense<0.000000e+00> : vector<128xf32>
    %48 = vector.multi_reduction <add>, %45, %cst_28 [1] : vector<128x128xf32> to vector<128xf32>
    %49 = vector.shape_cast %48 : vector<128xf32> to vector<128x1xf32>
    %50 = arith.mulf %45, %47 : vector<128x128xf32>
    %cst_29 = arith.constant 0.36787945 : f32
    %51 = vector.broadcast %cst_29 : f32 to vector<128x128xf32>
    %52 = arith.mulf %47, %51 : vector<128x128xf32>
    %cst_30 = arith.constant dense<0.000000e+00> : vector<128xf32>
    %53 = vector.multi_reduction <add>, %50, %cst_30 [1] : vector<128x128xf32> to vector<128xf32>
    %54 = vector.shape_cast %53 : vector<128xf32> to vector<128x1xf32>
    %55 = arith.mulf %50, %52 : vector<128x128xf32>
    %cst_31 = arith.constant 0.36787945 : f32
    %56 = vector.broadcast %cst_31 : f32 to vector<128x128xf32>
    %57 = arith.mulf %52, %56 : vector<128x128xf32>
    %cst_32 = arith.constant dense<0.000000e+00> : vector<128xf32>
    %58 = vector.multi_reduction <add>, %55, %cst_32 [1] : vector<128x128xf32> to vector<128xf32>
    %59 = vector.shape_cast %58 : vector<128xf32> to vector<128x1xf32>
    %60 = arith.mulf %55, %57 : vector<128x128xf32>
    %cst_33 = arith.constant 0.36787945 : f32
    %61 = vector.broadcast %cst_33 : f32 to vector<128x128xf32>
    %62 = arith.mulf %57, %61 : vector<128x128xf32>
    %cst_34 = arith.constant dense<0.000000e+00> : vector<128xf32>
    %63 = vector.multi_reduction <add>, %60, %cst_34 [1] : vector<128x128xf32> to vector<128xf32>
    %64 = vector.shape_cast %63 : vector<128xf32> to vector<128x1xf32>
    %65 = arith.mulf %60, %62 : vector<128x128xf32>
    %cst_35 = arith.constant 0.36787945 : f32
    %66 = vector.broadcast %cst_35 : f32 to vector<128x128xf32>
    %67 = arith.mulf %62, %66 : vector<128x128xf32>
    %cst_36 = arith.constant dense<0.000000e+00> : vector<128xf32>
    %68 = vector.multi_reduction <add>, %65, %cst_36 [1] : vector<128x128xf32> to vector<128xf32>
    %69 = vector.shape_cast %68 : vector<128xf32> to vector<128x1xf32>
    %70 = arith.mulf %65, %67 : vector<128x128xf32>
    %cst_37 = arith.constant 0.36787945 : f32
    %71 = vector.broadcast %cst_37 : f32 to vector<128x128xf32>
    %72 = arith.mulf %67, %71 : vector<128x128xf32>
    %cst_38 = arith.constant dense<0.000000e+00> : vector<128xf32>
    %73 = vector.multi_reduction <add>, %70, %cst_38 [1] : vector<128x128xf32> to vector<128xf32>
    %74 = vector.shape_cast %73 : vector<128xf32> to vector<128x1xf32>
    %75 = arith.mulf %70, %72 : vector<128x128xf32>
    %cst_39 = arith.constant 0.36787945 : f32
    %76 = vector.broadcast %cst_39 : f32 to vector<128x128xf32>
    %77 = arith.mulf %72, %76 : vector<128x128xf32>
    %cst_40 = arith.constant dense<0.000000e+00> : vector<128xf32>
    %78 = vector.multi_reduction <add>, %75, %cst_40 [1] : vector<128x128xf32> to vector<128xf32>
    %79 = vector.shape_cast %78 : vector<128xf32> to vector<128x1xf32>
    %80 = arith.mulf %75, %77 : vector<128x128xf32>
    %cst_41 = arith.constant dense<0.000000e+00> : vector<128xf32>
    %81 = vector.multi_reduction <add>, %80, %cst_41 [1] : vector<128x128xf32> to vector<128xf32>
    %82 = vector.shape_cast %81 : vector<128xf32> to vector<128x1xf32>
    %cst_42 = arith.constant 3.73333335 : f32
    %83 = vector.broadcast %cst_42 : f32 to vector<128x128xf32>
    %84 = arith.subf %34, %83 : vector<128x128xf32>
    %cst_43 = arith.constant -2.29591846 : f32
    %85 = vector.broadcast %cst_43 : f32 to vector<128x128xf32>
    %86 = arith.mulf %85, %84 : vector<128x128xf32>
    %87 = arith.mulf %86, %84 : vector<128x128xf32>
    %88 = math.exp %87 : vector<128x128xf32>
    %89 = arith.mulf %31, %88 : vector<128x128xf32>
    %cst_44 = arith.constant 3.35462624E-4 : f32
    %90 = vector.broadcast %cst_44 : f32 to vector<128x128xf32>
    %91 = arith.mulf %41, %90 : vector<128x128xf32>
    %cst_45 = arith.constant dense<0.000000e+00> : vector<128xf32>
    %92 = vector.multi_reduction <add>, %89, %cst_45 [1] : vector<128x128xf32> to vector<128xf32>
    %93 = vector.shape_cast %92 : vector<128xf32> to vector<128x1xf32>
    %94 = arith.mulf %89, %91 : vector<128x128xf32>
    %cst_46 = arith.constant 0.36787945 : f32
    %95 = vector.broadcast %cst_46 : f32 to vector<128x128xf32>
    %96 = arith.mulf %91, %95 : vector<128x128xf32>
    %cst_47 = arith.constant dense<0.000000e+00> : vector<128xf32>
    %97 = vector.multi_reduction <add>, %94, %cst_47 [1] : vector<128x128xf32> to vector<128xf32>
    %98 = vector.shape_cast %97 : vector<128xf32> to vector<128x1xf32>
    %99 = arith.mulf %94, %96 : vector<128x128xf32>
    %cst_48 = arith.constant 0.36787945 : f32
    %100 = vector.broadcast %cst_48 : f32 to vector<128x128xf32>
    %101 = arith.mulf %96, %100 : vector<128x128xf32>
    %cst_49 = arith.constant dense<0.000000e+00> : vector<128xf32>
    %102 = vector.multi_reduction <add>, %99, %cst_49 [1] : vector<128x128xf32> to vector<128xf32>
    %103 = vector.shape_cast %102 : vector<128xf32> to vector<128x1xf32>
    %104 = arith.mulf %99, %101 : vector<128x128xf32>
    %cst_50 = arith.constant 0.36787945 : f32
    %105 = vector.broadcast %cst_50 : f32 to vector<128x128xf32>
    %106 = arith.mulf %101, %105 : vector<128x128xf32>
    %cst_51 = arith.constant dense<0.000000e+00> : vector<128xf32>
    %107 = vector.multi_reduction <add>, %104, %cst_51 [1] : vector<128x128xf32> to vector<128xf32>
    %108 = vector.shape_cast %107 : vector<128xf32> to vector<128x1xf32>
    %109 = arith.mulf %104, %106 : vector<128x128xf32>
    %cst_52 = arith.constant 0.36787945 : f32
    %110 = vector.broadcast %cst_52 : f32 to vector<128x128xf32>
    %111 = arith.mulf %106, %110 : vector<128x128xf32>
    %cst_53 = arith.constant dense<0.000000e+00> : vector<128xf32>
    %112 = vector.multi_reduction <add>, %109, %cst_53 [1] : vector<128x128xf32> to vector<128xf32>
    %113 = vector.shape_cast %112 : vector<128xf32> to vector<128x1xf32>
    %114 = arith.mulf %109, %111 : vector<128x128xf32>
    %cst_54 = arith.constant 0.36787945 : f32
    %115 = vector.broadcast %cst_54 : f32 to vector<128x128xf32>
    %116 = arith.mulf %111, %115 : vector<128x128xf32>
    %cst_55 = arith.constant dense<0.000000e+00> : vector<128xf32>
    %117 = vector.multi_reduction <add>, %114, %cst_55 [1] : vector<128x128xf32> to vector<128xf32>
    %118 = vector.shape_cast %117 : vector<128xf32> to vector<128x1xf32>
    %119 = arith.mulf %114, %116 : vector<128x128xf32>
    %cst_56 = arith.constant 0.36787945 : f32
    %120 = vector.broadcast %cst_56 : f32 to vector<128x128xf32>
    %121 = arith.mulf %116, %120 : vector<128x128xf32>
    %cst_57 = arith.constant dense<0.000000e+00> : vector<128xf32>
    %122 = vector.multi_reduction <add>, %119, %cst_57 [1] : vector<128x128xf32> to vector<128xf32>
    %123 = vector.shape_cast %122 : vector<128xf32> to vector<128x1xf32>
    %124 = arith.mulf %119, %121 : vector<128x128xf32>
    %cst_58 = arith.constant dense<0.000000e+00> : vector<128xf32>
    %125 = vector.multi_reduction <add>, %124, %cst_58 [1] : vector<128x128xf32> to vector<128xf32>
    %126 = vector.shape_cast %125 : vector<128xf32> to vector<128x1xf32>
    %127 = tpu.concatenate %49, %54, %59, %64, %69, %74, %79, %82, %93, %98, %103, %108, %113, %118, %123, %126 in 1 : vector<128x1xf32>, vector<128x1xf32>, vector<128x1xf32>, vector<128x1xf32>, vector<128x1xf32>, vector<128x1xf32>, vector<128x1xf32>, vector<128x1xf32>, vector<128x1xf32>, vector<128x1xf32>, vector<128x1xf32>, vector<128x1xf32>, vector<128x1xf32>, vector<128x1xf32>, vector<128x1xf32>, vector<128x1xf32> -> vector<128x16xf32>
    %cst_59 = arith.constant dense<0.000000e+00> : vector<128x16xf32>
    %128 = tpu.matmul %31, %7, %cst_59 {dimension_numbers = #tpu.dot_dimension_numbers<[1], [0], [0], [1], [0, 0, 1, 1], [], []>} : vector<128x128xf32>, vector<128x16xf32>, vector<128x16xf32> -> vector<128x16xf32>
    %129 = tpu.concatenate %128, %127, %7 in 1 : vector<128x16xf32>, vector<128x16xf32>, vector<128x16xf32> -> vector<128x48xf32>
    %cst_60 = arith.constant dense<0.000000e+00> : vector<128x32xf32>
    %130 = tpu.matmul %129, %0, %cst_60 {dimension_numbers = #tpu.dot_dimension_numbers<[1], [0], [0], [1], [0, 0, 1, 1], [], []>} : vector<128x48xf32>, vector<48x32xf32>, vector<128x32xf32> -> vector<128x32xf32>
    %131 = vector.broadcast %1 : vector<1x32xf32> to vector<128x32xf32>
    %132 = arith.addf %130, %131 : vector<128x32xf32>
    %cst_61 = arith.constant 0.000000e+00 : f32
    %133 = vector.broadcast %cst_61 : f32 to vector<128x32xf32>
    %134 = arith.maximumf %132, %133 : vector<128x32xf32>
    %cst_62 = arith.constant dense<0.000000e+00> : vector<128x32xf32>
    %135 = tpu.matmul %31, %134, %cst_62 {dimension_numbers = #tpu.dot_dimension_numbers<[1], [0], [0], [1], [0, 0, 1, 1], [], []>} : vector<128x128xf32>, vector<128x32xf32>, vector<128x32xf32> -> vector<128x32xf32>
    %136 = tpu.concatenate %135, %127, %134 in 1 : vector<128x32xf32>, vector<128x16xf32>, vector<128x32xf32> -> vector<128x80xf32>
    %cst_63 = arith.constant dense<0.000000e+00> : vector<128x32xf32>
    %137 = tpu.matmul %136, %2, %cst_63 {dimension_numbers = #tpu.dot_dimension_numbers<[1], [0], [0], [1], [0, 0, 1, 1], [], []>} : vector<128x80xf32>, vector<80x32xf32>, vector<128x32xf32> -> vector<128x32xf32>
    %138 = vector.broadcast %3 : vector<1x32xf32> to vector<128x32xf32>
    %139 = arith.addf %137, %138 : vector<128x32xf32>
    %cst_64 = arith.constant 0.000000e+00 : f32
    %140 = vector.broadcast %cst_64 : f32 to vector<128x32xf32>
    %141 = arith.maximumf %139, %140 : vector<128x32xf32>
    %142 = arith.addf %134, %141 : vector<128x32xf32>
    %cst_65 = arith.constant dense<0.000000e+00> : vector<4x32xf32>
    %143 = tpu.matmul %11, %142, %cst_65 {dimension_numbers = #tpu.dot_dimension_numbers<[1], [0], [0], [1], [0, 0, 1, 1], [], []>} : vector<4x128xf32>, vector<128x32xf32>, vector<4x32xf32> -> vector<4x32xf32>
    %c0_66 = arith.constant 0 : index
    %c0_67 = arith.constant 0 : index
    %c0_68 = arith.constant 0 : index
    %144 = vector.load %arg6[%c0_66, %c0_67, %c0_68] : memref<2x4x32xf32, #tpu.memory_space<vmem>>, vector<1x4x32xf32>
    %145 = vector.shape_cast %144 : vector<1x4x32xf32> to vector<4x32xf32>
    %146 = vector.shape_cast %143 : vector<4x32xf32> to vector<1x4x32xf32>
    tpu.vector_store %arg6[%c0_66, %c0_67, %c0_68], %146 {strides = array<i32>} : memref<2x4x32xf32, #tpu.memory_space<vmem>>, vector<1x4x32xf32>,
    %c1 = arith.constant 1 : index
    %c0_69 = arith.constant 0 : index
    %c0_70 = arith.constant 0 : index
    %147 = vector.load %arg1[%c1, %c0_69, %c0_70] : memref<2x128x8xf32, #tpu.memory_space<vmem>>, vector<1x128x8xf32>
    %148 = vector.shape_cast %147 : vector<1x128x8xf32> to vector<128x8xf32>
    %c1_71 = arith.constant 1 : index
    %c0_72 = arith.constant 0 : index
    %c0_73 = arith.constant 0 : index
    %149 = vector.load %arg2[%c1_71, %c0_72, %c0_73] : memref<2x128x16xf32, #tpu.memory_space<vmem>>, vector<1x128x16xf32>
    %150 = vector.shape_cast %149 : vector<1x128x16xf32> to vector<128x16xf32>
    %c1_74 = arith.constant 1 : index
    %c0_75 = arith.constant 0 : index
    %c0_76 = arith.constant 0 : index
    %151 = vector.load %arg3[%c1_74, %c0_75, %c0_76] : memref<2x128x128xf32, #tpu.memory_space<vmem>>, vector<1x128x128xf32>
    %152 = vector.shape_cast %151 : vector<1x128x128xf32> to vector<128x128xf32>
    %c1_77 = arith.constant 1 : index
    %c0_78 = arith.constant 0 : index
    %c0_79 = arith.constant 0 : index
    %153 = vector.load %arg4[%c1_77, %c0_78, %c0_79] : memref<2x4x128xf32, #tpu.memory_space<vmem>>, vector<1x4x128xf32>
    %154 = vector.shape_cast %153 : vector<1x4x128xf32> to vector<4x128xf32>
    %155 = tpu.transpose %148, [1, 0] : vector<128x8xf32> -> vector<8x128xf32>
    %cst_80 = arith.constant dense<0.000000e+00> : vector<128x128xf32>
    %156 = tpu.matmul %148, %155, %cst_80 {dimension_numbers = #tpu.dot_dimension_numbers<[1], [0], [0], [1], [0, 0, 1, 1], [], []>} : vector<128x8xf32>, vector<8x128xf32>, vector<128x128xf32> -> vector<128x128xf32>
    %157 = arith.mulf %148, %148 : vector<128x8xf32>
    %cst_81 = arith.constant dense<0.000000e+00> : vector<128xf32>
    %158 = vector.multi_reduction <add>, %157, %cst_81 [1] : vector<128x8xf32> to vector<128xf32>
    %159 = vector.shape_cast %158 : vector<128xf32> to vector<128x1xf32>
    %160 = arith.mulf %155, %155 : vector<8x128xf32>
    %cst_82 = arith.constant dense<0.000000e+00> : vector<128xf32>
    %161 = vector.multi_reduction <add>, %160, %cst_82 [0] : vector<8x128xf32> to vector<128xf32>
    %162 = vector.shape_cast %161 : vector<128xf32> to vector<1x128xf32>
    %163 = vector.broadcast %159 : vector<128x1xf32> to vector<128x128xf32>
    %164 = vector.broadcast %162 : vector<1x128xf32> to vector<128x128xf32>
    %165 = arith.addf %163, %164 : vector<128x128xf32>
    %cst_83 = arith.constant 2.000000e+00 : f32
    %166 = vector.broadcast %cst_83 : f32 to vector<128x128xf32>
    %167 = arith.mulf %166, %156 : vector<128x128xf32>
    %168 = arith.subf %165, %167 : vector<128x128xf32>
    %cst_84 = arith.constant 0.000000e+00 : f32
    %169 = vector.broadcast %cst_84 : f32 to vector<128x128xf32>
    %170 = arith.maximumf %168, %169 : vector<128x128xf32>
    %cst_85 = arith.constant 4.900000e+01 : f32
    %171 = vector.broadcast %cst_85 : f32 to vector<128x128xf32>
    %172 = arith.cmpf ole, %170, %171 : vector<128x128xf32>
    %cst_86 = arith.constant 0.000000e+00 : f32
    %173 = vector.broadcast %cst_86 : f32 to vector<128x128xf32>
    %174 = arith.select %172, %152, %173 : vector<128x128xi1>, vector<128x128xf32>
    %cst_87 = arith.constant 4.900000e+01 : f32
    %175 = vector.broadcast %cst_87 : f32 to vector<128x128xf32>
    %176 = arith.minimumf %170, %175 : vector<128x128xf32>
    %177 = math.sqrt %176 : vector<128x128xf32>
    %cst_88 = arith.constant 0.933333337 : f32
    %178 = vector.broadcast %cst_88 : f32 to vector<128x128xf32>
    %179 = arith.mulf %178, %177 : vector<128x128xf32>
    %cst_89 = arith.constant 0.217777774 : f32
    %180 = vector.broadcast %cst_89 : f32 to vector<128x128xf32>
    %181 = arith.subf %180, %179 : vector<128x128xf32>
    %cst_90 = arith.constant -2.29591846 : f32
    %182 = vector.broadcast %cst_90 : f32 to vector<128x128xf32>
    %183 = arith.mulf %182, %181 : vector<128x128xf32>
    %184 = math.exp %183 : vector<128x128xf32>
    %cst_91 = arith.constant -2.29591846 : f32
    %185 = vector.broadcast %cst_91 : f32 to vector<128x128xf32>
    %186 = arith.mulf %185, %176 : vector<128x128xf32>
    %187 = math.exp %186 : vector<128x128xf32>
    %188 = arith.mulf %174, %187 : vector<128x128xf32>
    %cst_92 = arith.constant 1.000000e+00 : f32
    %189 = vector.broadcast %cst_92 : f32 to vector<128x128xf32>
    %190 = arith.mulf %184, %189 : vector<128x128xf32>
    %cst_93 = arith.constant dense<0.000000e+00> : vector<128xf32>
    %191 = vector.multi_reduction <add>, %188, %cst_93 [1] : vector<128x128xf32> to vector<128xf32>
    %192 = vector.shape_cast %191 : vector<128xf32> to vector<128x1xf32>
    %193 = arith.mulf %188, %190 : vector<128x128xf32>
    %cst_94 = arith.constant 0.36787945 : f32
    %194 = vector.broadcast %cst_94 : f32 to vector<128x128xf32>
    %195 = arith.mulf %190, %194 : vector<128x128xf32>
    %cst_95 = arith.constant dense<0.000000e+00> : vector<128xf32>
    %196 = vector.multi_reduction <add>, %193, %cst_95 [1] : vector<128x128xf32> to vector<128xf32>
    %197 = vector.shape_cast %196 : vector<128xf32> to vector<128x1xf32>
    %198 = arith.mulf %193, %195 : vector<128x128xf32>
    %cst_96 = arith.constant 0.36787945 : f32
    %199 = vector.broadcast %cst_96 : f32 to vector<128x128xf32>
    %200 = arith.mulf %195, %199 : vector<128x128xf32>
    %cst_97 = arith.constant dense<0.000000e+00> : vector<128xf32>
    %201 = vector.multi_reduction <add>, %198, %cst_97 [1] : vector<128x128xf32> to vector<128xf32>
    %202 = vector.shape_cast %201 : vector<128xf32> to vector<128x1xf32>
    %203 = arith.mulf %198, %200 : vector<128x128xf32>
    %cst_98 = arith.constant 0.36787945 : f32
    %204 = vector.broadcast %cst_98 : f32 to vector<128x128xf32>
    %205 = arith.mulf %200, %204 : vector<128x128xf32>
    %cst_99 = arith.constant dense<0.000000e+00> : vector<128xf32>
    %206 = vector.multi_reduction <add>, %203, %cst_99 [1] : vector<128x128xf32> to vector<128xf32>
    %207 = vector.shape_cast %206 : vector<128xf32> to vector<128x1xf32>
    %208 = arith.mulf %203, %205 : vector<128x128xf32>
    %cst_100 = arith.constant 0.36787945 : f32
    %209 = vector.broadcast %cst_100 : f32 to vector<128x128xf32>
    %210 = arith.mulf %205, %209 : vector<128x128xf32>
    %cst_101 = arith.constant dense<0.000000e+00> : vector<128xf32>
    %211 = vector.multi_reduction <add>, %208, %cst_101 [1] : vector<128x128xf32> to vector<128xf32>
    %212 = vector.shape_cast %211 : vector<128xf32> to vector<128x1xf32>
    %213 = arith.mulf %208, %210 : vector<128x128xf32>
    %cst_102 = arith.constant 0.36787945 : f32
    %214 = vector.broadcast %cst_102 : f32 to vector<128x128xf32>
    %215 = arith.mulf %210, %214 : vector<128x128xf32>
    %cst_103 = arith.constant dense<0.000000e+00> : vector<128xf32>
    %216 = vector.multi_reduction <add>, %213, %cst_103 [1] : vector<128x128xf32> to vector<128xf32>
    %217 = vector.shape_cast %216 : vector<128xf32> to vector<128x1xf32>
    %218 = arith.mulf %213, %215 : vector<128x128xf32>
    %cst_104 = arith.constant 0.36787945 : f32
    %219 = vector.broadcast %cst_104 : f32 to vector<128x128xf32>
    %220 = arith.mulf %215, %219 : vector<128x128xf32>
    %cst_105 = arith.constant dense<0.000000e+00> : vector<128xf32>
    %221 = vector.multi_reduction <add>, %218, %cst_105 [1] : vector<128x128xf32> to vector<128xf32>
    %222 = vector.shape_cast %221 : vector<128xf32> to vector<128x1xf32>
    %223 = arith.mulf %218, %220 : vector<128x128xf32>
    %cst_106 = arith.constant dense<0.000000e+00> : vector<128xf32>
    %224 = vector.multi_reduction <add>, %223, %cst_106 [1] : vector<128x128xf32> to vector<128xf32>
    %225 = vector.shape_cast %224 : vector<128xf32> to vector<128x1xf32>
    %cst_107 = arith.constant 3.73333335 : f32
    %226 = vector.broadcast %cst_107 : f32 to vector<128x128xf32>
    %227 = arith.subf %177, %226 : vector<128x128xf32>
    %cst_108 = arith.constant -2.29591846 : f32
    %228 = vector.broadcast %cst_108 : f32 to vector<128x128xf32>
    %229 = arith.mulf %228, %227 : vector<128x128xf32>
    %230 = arith.mulf %229, %227 : vector<128x128xf32>
    %231 = math.exp %230 : vector<128x128xf32>
    %232 = arith.mulf %174, %231 : vector<128x128xf32>
    %cst_109 = arith.constant 3.35462624E-4 : f32
    %233 = vector.broadcast %cst_109 : f32 to vector<128x128xf32>
    %234 = arith.mulf %184, %233 : vector<128x128xf32>
    %cst_110 = arith.constant dense<0.000000e+00> : vector<128xf32>
    %235 = vector.multi_reduction <add>, %232, %cst_110 [1] : vector<128x128xf32> to vector<128xf32>
    %236 = vector.shape_cast %235 : vector<128xf32> to vector<128x1xf32>
    %237 = arith.mulf %232, %234 : vector<128x128xf32>
    %cst_111 = arith.constant 0.36787945 : f32
    %238 = vector.broadcast %cst_111 : f32 to vector<128x128xf32>
    %239 = arith.mulf %234, %238 : vector<128x128xf32>
    %cst_112 = arith.constant dense<0.000000e+00> : vector<128xf32>
    %240 = vector.multi_reduction <add>, %237, %cst_112 [1] : vector<128x128xf32> to vector<128xf32>
    %241 = vector.shape_cast %240 : vector<128xf32> to vector<128x1xf32>
    %242 = arith.mulf %237, %239 : vector<128x128xf32>
    %cst_113 = arith.constant 0.36787945 : f32
    %243 = vector.broadcast %cst_113 : f32 to vector<128x128xf32>
    %244 = arith.mulf %239, %243 : vector<128x128xf32>
    %cst_114 = arith.constant dense<0.000000e+00> : vector<128xf32>
    %245 = vector.multi_reduction <add>, %242, %cst_114 [1] : vector<128x128xf32> to vector<128xf32>
    %246 = vector.shape_cast %245 : vector<128xf32> to vector<128x1xf32>
    %247 = arith.mulf %242, %244 : vector<128x128xf32>
    %cst_115 = arith.constant 0.36787945 : f32
    %248 = vector.broadcast %cst_115 : f32 to vector<128x128xf32>
    %249 = arith.mulf %244, %248 : vector<128x128xf32>
    %cst_116 = arith.constant dense<0.000000e+00> : vector<128xf32>
    %250 = vector.multi_reduction <add>, %247, %cst_116 [1] : vector<128x128xf32> to vector<128xf32>
    %251 = vector.shape_cast %250 : vector<128xf32> to vector<128x1xf32>
    %252 = arith.mulf %247, %249 : vector<128x128xf32>
    %cst_117 = arith.constant 0.36787945 : f32
    %253 = vector.broadcast %cst_117 : f32 to vector<128x128xf32>
    %254 = arith.mulf %249, %253 : vector<128x128xf32>
    %cst_118 = arith.constant dense<0.000000e+00> : vector<128xf32>
    %255 = vector.multi_reduction <add>, %252, %cst_118 [1] : vector<128x128xf32> to vector<128xf32>
    %256 = vector.shape_cast %255 : vector<128xf32> to vector<128x1xf32>
    %257 = arith.mulf %252, %254 : vector<128x128xf32>
    %cst_119 = arith.constant 0.36787945 : f32
    %258 = vector.broadcast %cst_119 : f32 to vector<128x128xf32>
    %259 = arith.mulf %254, %258 : vector<128x128xf32>
    %cst_120 = arith.constant dense<0.000000e+00> : vector<128xf32>
    %260 = vector.multi_reduction <add>, %257, %cst_120 [1] : vector<128x128xf32> to vector<128xf32>
    %261 = vector.shape_cast %260 : vector<128xf32> to vector<128x1xf32>
    %262 = arith.mulf %257, %259 : vector<128x128xf32>
    %cst_121 = arith.constant 0.36787945 : f32
    %263 = vector.broadcast %cst_121 : f32 to vector<128x128xf32>
    %264 = arith.mulf %259, %263 : vector<128x128xf32>
    %cst_122 = arith.constant dense<0.000000e+00> : vector<128xf32>
    %265 = vector.multi_reduction <add>, %262, %cst_122 [1] : vector<128x128xf32> to vector<128xf32>
    %266 = vector.shape_cast %265 : vector<128xf32> to vector<128x1xf32>
    %267 = arith.mulf %262, %264 : vector<128x128xf32>
    %cst_123 = arith.constant dense<0.000000e+00> : vector<128xf32>
    %268 = vector.multi_reduction <add>, %267, %cst_123 [1] : vector<128x128xf32> to vector<128xf32>
    %269 = vector.shape_cast %268 : vector<128xf32> to vector<128x1xf32>
    %270 = tpu.concatenate %192, %197, %202, %207, %212, %217, %222, %225, %236, %241, %246, %251, %256, %261, %266, %269 in 1 : vector<128x1xf32>, vector<128x1xf32>, vector<128x1xf32>, vector<128x1xf32>, vector<128x1xf32>, vector<128x1xf32>, vector<128x1xf32>, vector<128x1xf32>, vector<128x1xf32>, vector<128x1xf32>, vector<128x1xf32>, vector<128x1xf32>, vector<128x1xf32>, vector<128x1xf32>, vector<128x1xf32>, vector<128x1xf32> -> vector<128x16xf32>
    %cst_124 = arith.constant dense<0.000000e+00> : vector<128x16xf32>
    %271 = tpu.matmul %174, %150, %cst_124 {dimension_numbers = #tpu.dot_dimension_numbers<[1], [0], [0], [1], [0, 0, 1, 1], [], []>} : vector<128x128xf32>, vector<128x16xf32>, vector<128x16xf32> -> vector<128x16xf32>
    %272 = tpu.concatenate %271, %270, %150 in 1 : vector<128x16xf32>, vector<128x16xf32>, vector<128x16xf32> -> vector<128x48xf32>
    %cst_125 = arith.constant dense<0.000000e+00> : vector<128x32xf32>
    %273 = tpu.matmul %272, %0, %cst_125 {dimension_numbers = #tpu.dot_dimension_numbers<[1], [0], [0], [1], [0, 0, 1, 1], [], []>} : vector<128x48xf32>, vector<48x32xf32>, vector<128x32xf32> -> vector<128x32xf32>
    %274 = vector.broadcast %1 : vector<1x32xf32> to vector<128x32xf32>
    %275 = arith.addf %273, %274 : vector<128x32xf32>
    %cst_126 = arith.constant 0.000000e+00 : f32
    %276 = vector.broadcast %cst_126 : f32 to vector<128x32xf32>
    %277 = arith.maximumf %275, %276 : vector<128x32xf32>
    %cst_127 = arith.constant dense<0.000000e+00> : vector<128x32xf32>
    %278 = tpu.matmul %174, %277, %cst_127 {dimension_numbers = #tpu.dot_dimension_numbers<[1], [0], [0], [1], [0, 0, 1, 1], [], []>} : vector<128x128xf32>, vector<128x32xf32>, vector<128x32xf32> -> vector<128x32xf32>
    %279 = tpu.concatenate %278, %270, %277 in 1 : vector<128x32xf32>, vector<128x16xf32>, vector<128x32xf32> -> vector<128x80xf32>
    %cst_128 = arith.constant dense<0.000000e+00> : vector<128x32xf32>
    %280 = tpu.matmul %279, %2, %cst_128 {dimension_numbers = #tpu.dot_dimension_numbers<[1], [0], [0], [1], [0, 0, 1, 1], [], []>} : vector<128x80xf32>, vector<80x32xf32>, vector<128x32xf32> -> vector<128x32xf32>
    %281 = vector.broadcast %3 : vector<1x32xf32> to vector<128x32xf32>
    %282 = arith.addf %280, %281 : vector<128x32xf32>
    %cst_129 = arith.constant 0.000000e+00 : f32
    %283 = vector.broadcast %cst_129 : f32 to vector<128x32xf32>
    %284 = arith.maximumf %282, %283 : vector<128x32xf32>
    %285 = arith.addf %277, %284 : vector<128x32xf32>
    %cst_130 = arith.constant dense<0.000000e+00> : vector<4x32xf32>
    %286 = tpu.matmul %154, %285, %cst_130 {dimension_numbers = #tpu.dot_dimension_numbers<[1], [0], [0], [1], [0, 0, 1, 1], [], []>} : vector<4x128xf32>, vector<128x32xf32>, vector<4x32xf32> -> vector<4x32xf32>
    %c1_131 = arith.constant 1 : index
    %c0_132 = arith.constant 0 : index
    %c0_133 = arith.constant 0 : index
    %287 = vector.load %arg6[%c1_131, %c0_132, %c0_133] : memref<2x4x32xf32, #tpu.memory_space<vmem>>, vector<1x4x32xf32>
    %288 = vector.shape_cast %287 : vector<1x4x32xf32> to vector<4x32xf32>
    %289 = vector.shape_cast %286 : vector<4x32xf32> to vector<1x4x32xf32>
    tpu.vector_store %arg6[%c1_131, %c0_132, %c0_133], %289 {strides = array<i32>} : memref<2x4x32xf32, #tpu.memory_space<vmem>>, vector<1x4x32xf32>,
    return
  }
  func.func @transform_0(%arg0: i32) -> (i32, i32, i32) {
    %c0_i32 = arith.constant 0 : i32
    %c0_i32_0 = arith.constant 0 : i32
    %c0_i32_1 = arith.constant 0 : i32
    return %arg0, %c0_i32, %c0_i32_0 : i32, i32, i32
  }
  func.func @transform_1(%arg0: i32) -> (i32, i32, i32) {
    %c0_i32 = arith.constant 0 : i32
    %c0_i32_0 = arith.constant 0 : i32
    %c0_i32_1 = arith.constant 0 : i32
    return %arg0, %c0_i32, %c0_i32_0 : i32, i32, i32
  }
  func.func @transform_2(%arg0: i32) -> (i32, i32, i32) {
    %c0_i32 = arith.constant 0 : i32
    %c0_i32_0 = arith.constant 0 : i32
    %c0_i32_1 = arith.constant 0 : i32
    return %arg0, %c0_i32, %c0_i32_0 : i32, i32, i32
  }
  func.func @transform_3(%arg0: i32) -> (i32, i32, i32) {
    %c0_i32 = arith.constant 0 : i32
    %c0_i32_0 = arith.constant 0 : i32
    %c0_i32_1 = arith.constant 0 : i32
    return %arg0, %c0_i32, %c0_i32_0 : i32, i32, i32
  }
  func.func @transform_4(%arg0: i32) -> (i32, i32) {
    %c0_i32 = arith.constant 0 : i32
    %c0_i32_0 = arith.constant 0 : i32
    %c0_i32_1 = arith.constant 0 : i32
    return %c0_i32, %c0_i32_0 : i32, i32
  }
  func.func @transform_5(%arg0: i32) -> (i32, i32, i32) {
    %c0_i32 = arith.constant 0 : i32
    %c0_i32_0 = arith.constant 0 : i32
    %c0_i32_1 = arith.constant 0 : i32
    return %arg0, %c0_i32, %c0_i32_0 : i32, i32, i32
  }
}

</mosaic_0001>

<bundles_post_ra>
// kernel: tpu_custom_call.1
= control target key start
LH: loop header
LB: loop body
LE: loop exit
PB: predicated region body
PF: predicated region fallthrough
CT: control target
= control target key end

     0   :  { %10 = vsyncpa [#allocation3], 0  ;;  %s14119_s0 = inlined_call_operand.vmem [shape: f32[4,128,8], index: 0, kind: input, shape index: {}]   ;;  %s14120_s1 = inlined_call_operand.vmem [shape: f32[4,128,16], index: 1, kind: input, shape index: {}]   ;;  %s14121_s2 = inlined_call_operand.vmem [shape: f32[4,128,128], index: 2, kind: input, shape index: {}]   ;;  %s14122_s3 = inlined_call_operand.vmem [shape: f32[4,4,128], index: 3, kind: input, shape index: {}]   ;;  %s14123_s4 = inlined_call_operand.vmem [shape: f32[144,32], index: 4, kind: input, shape index: {}]   ;;  %s14124_s5 = inlined_call_operand.hbm [shape: f32[4,4,32], index: 5, kind: output, shape index: {}]  }
   0x1   :  { %12 = vsyncpa [#allocation3 + $0x1], 0  ;;  %s8197_s18 = smov 0   ;;  %s8199_s19 = smov 0  }
   0x2   :  { %s8201_s20 = smov 0   ;;  %s8203_s21 = smov 0  }
   0x3 LB: > { %s8218_s22 = sadd.s32 4294967295, %s8157_s21   ;;  %s6648_s23 = sadd.s32 4294967294, %s8157_s21   ;;  %s8157_s21 = sphi %s8203_s21, %s15152_s21   ;;  %s8153_s20 = sphi %s8201_s20, %s15151_s20   ;;  %s8149_s19 = sphi %s8199_s19, %s15150_s19   ;;  %s8145_s18 = sphi %s8197_s18, %s15149_s18  }
   0x4   : > { %s8222_s24 = sadd.s32 1, %s8157_s21   ;;  %s150_s25 = sadd.s32 1, %s8153_s20 }
   0x5   : > { %s147_s26 = ssub.s32 %s8157_s21, %s8222_s24  ;;  %p160_p0 = scmp.ne.s32.totalorder %s8153_s20, %s8149_s19 }
   0x6   : > { %p148_p1 = scmp.eq.s32.totalorder %s147_s26, 0  ;;  %p161_p2 = scmp.eq.s32.totalorder %s8218_s22, 1 }
   0x7   : > { %p166_p3 = scmp.ne.s32.totalorder %s8149_s19, %s8145_s18  ;;  %p167_p4 = scmp.eq.s32.totalorder %s6648_s23, 1 }
   0x8   : > { %s8233_s27 = scalar_select %p148_p1, %s8153_s20, %s150_s25  }
   0x9   : > { %p8235_p5 = por %p161_p2, %p160_p0  ;;  %p8239_p6 = por %p167_p4, %p166_p3 }
   0xa   : > { %p6651_p7 = scmp.ge.s32.totalorder %s8157_s21, 1  ;;  %p227_p8 = scmp.lt.s32.totalorder %s8157_s21, 3 }
   0xc   : > { %p228_p9 = pnand %p6651_p7, %p227_p8 }
   0xe   : > { %231 = sbr.rel (%p228_p9) target bundleno = 3593 (0xe09), region = 40 }
  0x13   : > { %s6653_s30 = sshll.u32 %s8218_s22, 1  ;;  %vm14127_vm0 = vcmask 64512   ;;  %s8159_s16 = smov 16  }
  0x14   : > { %p274_p10 = scmp.lt.s32.totalorder %s6653_s30, 3  ;;  %s8160_s17 = smov 32  }
  0x15   : > { %s270_s25 = sand.u32 1, %s8149_s19   ;;  %s6916_s7 = sshll.u32 %s8218_s22, 7 }
  0x16   : > { %s15154_s30 = smov (!%p274_p10, %s6653_s30), 3  ;;  %s14073_s11 = scalar_lea.hbm %s14124_s5, %s6916_s7 }
  0x17   : > { %s8249_s6 = sshll.u32 %s15154_s30, 7  ;;  %s6663_s13 = sshll.u32 %s15154_s30, 2 }
  0x18   : > { %s8255_s9 = scalar_lea.vmem %s14119_s0, %s8249_s6  ;;  %s8364_s12 = scalar_lea.vmem %s14120_s1, %s8249_s6 }
  0x19   : > { %v319_v0 = vld [vmem:[%s8255_s9] sm:$0xff]  ;;  %v8259_v1 = vld [vmem:[%s8255_s9 + $0x8] sm:$0xff]  ;;  %v8265_v4 = vld [vmem:[%s8255_s9 + $0x10] sm:$0xff]  ;;  %s8434_s15 = scalar_lea.vmem %s14121_s2, %s8249_s6  ;;  %s8161_s6 = smov 48  }
  0x1a   : > { %368 = vxpose.xlu0.b32.start [1/16] (narrow) %v319_v0, 8  ;;  %v594_v2 = vmul.f32 %v319_v0, %v319_v0  ;;  %v595_v3 = vmul.f32 %v8259_v1, %v8259_v1  ;;  %7211 = vmatprep.mubr.msk.f32.mxu0 %vm14127_vm0, %v319_v0  ;;  %v596_v7 = vmul.f32 %v8265_v4, %v8265_v4  ;;  %v8273_v8 = vld [vmem:[%s8255_s9 + $0x18] sm:$0xff]  ;;  %v8280_v11 = vld [vmem:[%s8255_s9 + $0x20] sm:$0xff]  ;;  %v8287_v14 = vld [vmem:[%s8255_s9 + $0x28] sm:$0xff]  ;;  %s11349_s23 = scalar_lea.vmem %s14122_s3, %s6663_s13  ;;  %s8164_s22 = smov [#allocation2]  }
  0x1b   : > { %v597_v10 = vmul.f32 %v8273_v8, %v8273_v8  ;;  %v598_v13 = vmul.f32 %v8280_v11, %v8280_v11  ;;  %v599_v16 = vmul.f32 %v8287_v14, %v8287_v14  ;;  %v8294_v17 = vld [vmem:[%s8255_s9 + $0x30] sm:$0xff]  ;;  %v8301_v20 = vld [vmem:[%s8255_s9 + $0x38] sm:$0xff]  ;;  %v8308_v23 = vld [vmem:[%s8255_s9 + $0x40] sm:$0xff]  ;;  %s8101_s30 = sshll.u32 %s8164_s22, 4  ;;  %s8102_s30 = int_to_ptr.vmem [resolvable:$false] %s8101_s30 }
  0x1c   : > { %v610_v5 = vsel %vm14127_vm0, %v594_v2, 0.0  ;;  %v613_v6 = vsel %vm14127_vm0, %v595_v3, 0.0  ;;  %v616_v9 = vsel %vm14127_vm0, %v596_v7, 0.0  ;;  %v600_v19 = vmul.f32 %v8294_v17, %v8294_v17  ;;  %v8315_v26 = vld [vmem:[%s8255_s9 + $0x48] sm:$0xff]  ;;  %v8322_v29 = vld [vmem:[%s8255_s9 + $0x50] sm:$0xff]  ;;  %v8329_v32 = vld [vmem:[%s8255_s9 + $0x58] sm:$0xff] }
  0x1d   : > { %611 = vadd.xlane.f32.xlu1 %v610_v5  ;;  %v619_v12 = vsel %vm14127_vm0, %v597_v10, 0.0  ;;  %v622_v15 = vsel %vm14127_vm0, %v598_v13, 0.0  ;;  %v625_v18 = vsel %vm14127_vm0, %v599_v16, 0.0  ;;  %v601_v22 = vmul.f32 %v8301_v20, %v8301_v20  ;;  %v8336_v35 = vld [vmem:[%s8255_s9 + $0x60] sm:$0xff]  ;;  %v8343_v38 = vld [vmem:[%s8255_s9 + $0x68] sm:$0xff]  ;;  %v8350_v41 = vld [vmem:[%s8255_s9 + $0x70] sm:$0xff] }
  0x1e   : > { %369 = vxpose.xlu0.b32.cont [2/16] (narrow) %v8259_v1, 8  ;;  %v628_v21 = vsel %vm14127_vm0, %v600_v19, 0.0  ;;  %v602_v25 = vmul.f32 %v8308_v23, %v8308_v23  ;;  %v603_v28 = vmul.f32 %v8315_v26, %v8315_v26  ;;  %v604_v31 = vmul.f32 %v8322_v29, %v8322_v29  ;;  %v334_v44 = vld [vmem:[%s8255_s9 + $0x78] sm:$0xff]  ;;  %v349_v49 = vld [vmem:[%s8364_s12 + $0x70] sm:$0xff]  ;;  %v348_v50 = vld [vmem:[%s8364_s12 + $0x68] sm:$0xff]  ;;  %s8103_s14 = scalar_lea.vmem %s8102_s30, 256 }
  0x1f   : > { %v631_v24 = vsel %vm14127_vm0, %v601_v22, 0.0  ;;  %v605_v34 = vmul.f32 %v8329_v32, %v8329_v32  ;;  %v606_v37 = vmul.f32 %v8336_v35, %v8336_v35  ;;  %v607_v40 = vmul.f32 %v8343_v38, %v8343_v38  ;;  %v350_v48 = vld [vmem:[%s8364_s12 + $0x78] sm:$0xff]  ;;  %v347_v51 = vld [vmem:[%s8364_s12 + $0x60] sm:$0xff]  ;;  %v345_v53 = vld [vmem:[%s8364_s12 + $0x50] sm:$0xff] }
  0x20   : > { %v634_v27 = vsel %vm14127_vm0, %v602_v25, 0.0  ;;  %v637_v30 = vsel %vm14127_vm0, %v603_v28, 0.0  ;;  %v640_v33 = vsel %vm14127_vm0, %v604_v31, 0.0  ;;  %v608_v43 = vmul.f32 %v8350_v41, %v8350_v41  ;;  %7235 = vmatprep.subr.mxu1 %v350_v48  ;;  %v346_v52 = vld [vmem:[%s8364_s12 + $0x58] sm:$0xff]  ;;  %v344_v54 = vld [vmem:[%s8364_s12 + $0x48] sm:$0xff]  ;;  %v343_v55 = vld [vmem:[%s8364_s12 + $0x40] sm:$0xff] }
  0x21   : > { %614 = vadd.xlane.f32.xlu1 %v613_v6  ;;  %v643_v36 = vsel %vm14127_vm0, %v605_v34, 0.0  ;;  %v646_v39 = vsel %vm14127_vm0, %v606_v37, 0.0  ;;  %v649_v42 = vsel %vm14127_vm0, %v607_v40, 0.0  ;;  %v609_v46 = vmul.f32 %v334_v44, %v334_v44  ;;  %7236 = vmatpush3.msra.mxu1 %v350_v48  ;;  %v342_v56 = vld [vmem:[%s8364_s12 + $0x38] sm:$0xff]  ;;  %v341_v57 = vld [vmem:[%s8364_s12 + $0x30] sm:$0xff]  ;;  %v340_v58 = vld [vmem:[%s8364_s12 + $0x28] sm:$0xff] }
  0x22   : > { %370 = vxpose.xlu0.b32.cont [3/16] (narrow) %v8265_v4, 8  ;;  %v652_v45 = vsel %vm14127_vm0, %v608_v43, 0.0  ;;  %7237 = vmatprep.subr.mxu1 %v349_v49  ;;  %v339_v60 = vld [vmem:[%s8364_s12 + $0x20] sm:$0xff]  ;;  %v338_v61 = vld [vmem:[%s8364_s12 + $0x18] sm:$0xff]  ;;  %v337_v62 = vld [vmem:[%s8364_s12 + $0x10] sm:$0xff] }
  0x23   : > { %v655_v47 = vsel %vm14127_vm0, %v609_v46, 0.0  ;;  %7238 = vmatpush3.msra.mxu1 %v349_v49  ;;  %v336_v63 = vld [vmem:[%s8364_s12 + $0x8] sm:$0xff]  ;;  %v335_v0 = vld [vmem:[%s8364_s12] sm:$0xff] }
  0x24   : > { %7239 = vmatprep.subr.mxu1 %v348_v50 }
  0x25   : > { %617 = vadd.xlane.f32.xlu1 %v616_v9  ;;  %7240 = vmatpush3.msra.mxu1 %v348_v50 }
  0x26   : > { %371 = vxpose.xlu0.b32.cont [4/16] (narrow) %v8273_v8, 8  ;;  %7241 = vmatprep.subr.mxu1 %v347_v51 }
  0x27   : > { %7242 = vmatpush3.msra.mxu1 %v347_v51 }
  0x28   : > { %7243 = vmatprep.subr.mxu1 %v346_v52 }
  0x29   : > { %620 = vadd.xlane.f32.xlu1 %v619_v12  ;;  %7244 = vmatpush3.msra.mxu1 %v346_v52 }
  0x2a   : > { %372 = vxpose.xlu0.b32.cont [5/16] (narrow) %v8280_v11, 8  ;;  %7245 = vmatprep.subr.mxu1 %v345_v53 }
  0x2b   : > { %7246 = vmatpush3.msra.mxu1 %v345_v53 }
  0x2c   : > { %7247 = vmatprep.subr.mxu1 %v344_v54 }
  0x2d   : > { %623 = vadd.xlane.f32.xlu1 %v622_v15  ;;  %7248 = vmatpush3.msra.mxu1 %v344_v54 }
  0x2e   : > { %373 = vxpose.xlu0.b32.cont [6/16] (narrow) %v8287_v14, 8  ;;  %7249 = vmatprep.subr.mxu1 %v343_v55 }
  0x2f   : > { %7250 = vmatpush3.msra.mxu1 %v343_v55 }
  0x30   : > { %7251 = vmatprep.subr.mxu1 %v342_v56 }
  0x31   : > { %626 = vadd.xlane.f32.xlu1 %v625_v18  ;;  %7252 = vmatpush3.msra.mxu1 %v342_v56 }
  0x32   : > { %374 = vxpose.xlu0.b32.cont [7/16] (narrow) %v8294_v17, 8  ;;  %7253 = vmatprep.subr.mxu1 %v341_v57 }
  0x33   : > { %7254 = vmatpush3.msra.mxu1 %v341_v57  ;;  %v8462_v57 = vld [vmem:[%s8434_s15 + $0x10] sm:$0xff] }
  0x34   : > { %7255 = vmatprep.subr.mxu1 %v340_v58 }
  0x35   : > { %629 = vadd.xlane.f32.xlu1 %v628_v21  ;;  %7256 = vmatpush3.msra.mxu1 %v340_v58 }
  0x36   : > { %375 = vxpose.xlu0.b32.cont [8/16] (narrow) %v8301_v20, 8  ;;  %7257 = vmatprep.subr.mxu1 %v339_v60 }
  0x37   : > { %7258 = vmatpush3.msra.mxu1 %v339_v60 }
  0x38   : > { %7259 = vmatprep.subr.mxu1 %v338_v61 }
  0x39   : > { %632 = vadd.xlane.f32.xlu1 %v631_v24  ;;  %7260 = vmatpush3.msra.mxu1 %v338_v61 }
  0x3a   : > { %376 = vxpose.xlu0.b32.cont [9/16] (narrow) %v8308_v23, 8  ;;  %7261 = vmatprep.subr.mxu1 %v337_v62 }
  0x3b   : > { %7262 = vmatpush3.msra.mxu1 %v337_v62 }
  0x3c   : > { %7263 = vmatprep.subr.mxu1 %v336_v63 }
  0x3d   : > { %635 = vadd.xlane.f32.xlu1 %v634_v27  ;;  %7264 = vmatpush3.msra.mxu1 %v336_v63 }
  0x3e   : > { %377 = vxpose.xlu0.b32.cont [10/16] (narrow) %v8315_v26, 8  ;;  %7265 = vmatprep.subr.mxu1 %v335_v0 }
  0x3f   : > { %7266 = vmatpush3.msra.mxu1 %v335_v0 }
  0x41   : > { %638 = vadd.xlane.f32.xlu1 %v637_v30 }
  0x42   : > { %378 = vxpose.xlu0.b32.cont [11/16] (narrow) %v8322_v29, 8 }
  0x45   : > { %641 = vadd.xlane.f32.xlu1 %v640_v33 }
  0x46   : > { %379 = vxpose.xlu0.b32.cont [12/16] (narrow) %v8329_v32, 8 }
  0x49   : > { %644 = vadd.xlane.f32.xlu1 %v643_v36 }
  0x4a   : > { %380 = vxpose.xlu0.b32.cont [13/16] (narrow) %v8336_v35, 8 }
  0x4d   : > { %647 = vadd.xlane.f32.xlu1 %v646_v39 }
  0x4e   : > { %381 = vxpose.xlu0.b32.cont [14/16] (narrow) %v8343_v38, 8 }
  0x51   : > { %650 = vadd.xlane.f32.xlu1 %v649_v42 }
  0x52   : > { %382 = vxpose.xlu0.b32.cont [15/16] (narrow) %v8350_v41, 8 }
  0x55   : > { %653 = vadd.xlane.f32.xlu1 %v652_v45 }
  0x56   : > { %383 = vxpose.xlu0.b32.end [16/16] (narrow) %v334_v44, 8 }
  0x59   : > { %656 = vadd.xlane.f32.xlu1 %v655_v47  ;;  %v8447_v47 = vld [vmem:[%s8434_s15 + $0x8] sm:$0xff] }
  0x96   : > { %v384_v59 = vpop.trf.xlu0 }
  0x97   : > { %7209 = vmatprep.subr.mxu0 %v384_v59  ;;  %v658_v7 = vmul.f32 %v384_v59, %v384_v59 }
  0x98   : > { %7210 = vmatpush3.msra.mxu0 %v384_v59 }
  0x99   : > { %7212 = vmatmul.mubr.msk.f32.vlgmr.msra.gmra.mxu0 %vm14127_vm0, %v8259_v1  ;;  %v659_v9 = vrot.slane %v658_v7, 4 }
  0x9a   : > { %7214 = vmatprep.mubr.msk.f32.mxu0 %vm14127_vm0, %v8265_v4 }
  0x9d   : > { %7215 = vmatmul.mubr.msk.f32.gmra.mxu0 %vm14127_vm0, %v8273_v8 }
  0x9e   : > { %7217 = vmatprep.mubr.msk.f32.mxu0 %vm14127_vm0, %v8280_v11  ;;  %v660_v11 = vadd.f32 %v659_v9, %v658_v7 }
  0xa0   : > { %v661_v12 = vrot.slane %v660_v11, 2 }
  0xa1   : > { %7218 = vmatmul.mubr.msk.f32.gmra.mxu0 %vm14127_vm0, %v8287_v14 }
  0xa2   : > { %7220 = vmatprep.mubr.msk.f32.mxu0 %vm14127_vm0, %v8294_v17  ;;  %v662_v14 = vadd.f32 %v661_v12, %v660_v11  ;;  %v8493_v11 = vld [vmem:[%s8434_s15 + $0x28] sm:$0xff] }
  0xa4   : > { %v663_v16 = vrot.slane %v662_v14, 1 }
  0xa5   : > { %7221 = vmatmul.mubr.msk.f32.gmra.mxu0 %vm14127_vm0, %v8301_v20 }
  0xa6   : > { %7223 = vmatprep.mubr.msk.f32.mxu0 %vm14127_vm0, %v8308_v23  ;;  %v612_v1 = vpop.xlane.xlu1 %611  ;;  %v8413_v17 = vadd.f32 %v663_v16, %v662_v14 }
  0xa8   : > { %v665_v23 = vadd.f32 %v8413_v17, %v612_v1 }
  0xa9   : > { %7224 = vmatmul.mubr.msk.f32.gmra.mxu0 %vm14127_vm0, %v8315_v26 }
  0xaa   : > { %7226 = vmatprep.mubr.msk.f32.mxu0 %vm14127_vm0, %v8322_v29  ;;  %v615_v2 = vpop.xlane.xlu1 %614 }
  0xab   : > { %v666_v20 = vadd.f32 %v8413_v17, %v615_v2 }
  0xad   : > { %7227 = vmatmul.mubr.msk.f32.gmra.mxu0 %vm14127_vm0, %v8329_v32 }
  0xae   : > { %7229 = vmatprep.mubr.msk.f32.mxu0 %vm14127_vm0, %v8336_v35  ;;  %v618_v3 = vpop.xlane.xlu1 %617 }
  0xaf   : > { %v667_v35 = vadd.f32 %v8413_v17, %v618_v3  ;;  %v8476_v3 = vld [vmem:[%s8434_s15 + $0x18] sm:$0xff] }
  0xb1   : > { %7230 = vmatmul.mubr.msk.f32.gmra.mxu0 %vm14127_vm0, %v8343_v38  ;;  %v8438_v38 = vld [vmem:[%s8434_s15] sm:$0xff] }
  0xb2   : > { %7232 = vmatprep.mubr.msk.f32.mxu0 %vm14127_vm0, %v8350_v41  ;;  %v621_v4 = vpop.xlane.xlu1 %620 }
  0xb3   : > { %v668_v36 = vadd.f32 %v8413_v17, %v621_v4 }
  0xb5   : > { %7233 = vmatmul.mubr.msk.f32.gmra.mxu0 %vm14127_vm0, %v334_v44 }
  0xb6   : > { %v624_v5 = vpop.xlane.xlu1 %623 }
  0xb7   : > { %v669_v43 = vadd.f32 %v8413_v17, %v624_v5  ;;  %v8480_v5 = vld [vmem:[%s8434_s15 + $0x20] sm:$0xff] }
  0xba   : > { %v627_v6 = vpop.xlane.xlu1 %626 }
  0xbb   : > { %v670_v45 = vadd.f32 %v8413_v17, %v627_v6 }
  0xbe   : > { %v630_v8 = vpop.xlane.xlu1 %629 }
  0xbf   : > { %v671_v61 = vadd.f32 %v8413_v17, %v630_v8 }
  0xc2   : > { %v633_v10 = vpop.xlane.xlu1 %632 }
  0xc3   : > { %v672_v49 = vadd.f32 %v8413_v17, %v633_v10 }
  0xc6   : > { %v8411_v13 = vpop.xlane.xlu1 %635 }
  0xca   : > { %v639_v15 = vpop.xlane.xlu1 %638 }
  0xcb   : > { %v674_v0 = vadd.f32 %v8413_v17, %v639_v15 }
  0xce   : > { %v8415_v18 = vpop.xlane.xlu1 %641 }
  0xd2   : > { %v8421_v29 = vpop.xlane.xlu1 %644 }
  0xd6   : > { %v648_v46 = vpop.xlane.xlu1 %647 }
  0xda   : > { %v651_v1 = vpop.xlane.xlu1 %650 }
 0x159   : > { %v7213_v19 = vpop.f32.mrf.mxu0 }
 0x15a   : > { %v682_v21 = vmul.f32 2.0, %v7213_v19 }
 0x15b   : > { %v515_v22 = vpop.f32.mrf.mxu0 }
 0x15c   : > { %v698_v24 = vsub.f32 %v666_v20, %v682_v21  ;;  %v681_v25 = vmul.f32 2.0, %v515_v22  ;;  %v654_v20 = vpop.xlane.xlu1 %653 }
 0x15d   : > { %v7216_v26 = vpop.f32.mrf.mxu0 }
 0x15e   : > { %v8419_v27 = vmax.f32 %v698_v24, 0.0  ;;  %v697_v28 = vsub.f32 %v665_v23, %v681_v25  ;;  %v684_v30 = vmul.f32 2.0, %v7216_v26  ;;  %v673_v26 = vadd.f32 %v8413_v17, %v8411_v13 }
 0x15f   : > { %v525_v31 = vpop.f32.mrf.mxu0  ;;  %v8531_v13 = vadd.f32 %v8413_v17, %v651_v1 }
 0x160   : > { %14338 = vst [vmem:[#allocation5_spill] sm:$0xff] %v8419_v27  ;;  %v8424_v32 = vmin.f32 %v8419_v27, 49.0  ;;  %v8426_v33 = vmax.f32 %v697_v28, 0.0  ;;  %v683_v34 = vmul.f32 2.0, %v525_v31  ;;  %v700_v39 = vsub.f32 %v668_v36, %v684_v30 }
 0x161   : > { %v7219_v37 = vpop.f32.mrf.mxu0  ;;  %vm14125_vm2 = vcmp.le.f32.partialorder %v8419_v27, 49.0  ;;  %v8520_v28 = vadd.f32 %v8413_v17, %v8415_v18  ;;  %v676_v31 = vadd.f32 %v8413_v17, %v8421_v29  ;;  %v8715_v27 = vld [vmem:[%s8434_s15 + $0x68] sm:$0xff] }
 0x162   : > { %7761 = vrsqrt.f32 %v8424_v32  ;;  %v699_v40 = vsub.f32 %v667_v35, %v683_v34  ;;  %v686_v41 = vmul.f32 2.0, %v7219_v37  ;;  %vm729_vm1 = vcmp.le.f32.partialorder %v8426_v33, 49.0  ;;  %v657_v35 = vpop.xlane.xlu1 %656 }
 0x163   : > { %v535_v42 = vpop.f32.mrf.mxu0  ;;  %7267 = vmatprep.mubr.msk.f32.mxu1 %vm729_vm1, %v8438_v38  ;;  %v8457_v52 = vmin.f32 %v8426_v33, 49.0  ;;  %v8459_v53 = vmax.f32 %v700_v39, 0.0  ;;  %v970_v8 = vmul.f32 -2.2959185, %v8424_v32  ;;  %vm786_vm7 = vcmp.eq.f32.partialorder %v8424_v32, inf }
 0x164   : > { %v685_v44 = vmul.f32 2.0, %v535_v42  ;;  %v8451_v50 = vmax.f32 %v699_v40, 0.0  ;;  %7268 = vmatmul.mubr.msk.f32.vlgmr.msra.gmra.mxu1 %vm14125_vm2, %v8447_v47  ;;  %v702_v54 = vsub.f32 %v670_v45, %v686_v41  ;;  %v8526_v34 = vadd.f32 %v8413_v17, %v648_v46  ;;  %v8538_v40 = vld [vmem:[%s8434_s15 + $0x30] sm:$0xff] }
 0x165   : > { %v7222_v48 = vpop.f32.mrf.mxu0  ;;  %14340 = vst [vmem:[#allocation7_spill] sm:$0xff] %v8459_v53  ;;  %7763 = vrsqrt.f32 %v8457_v52  ;;  %vm14223_vm4 = vcmp.le.f32.partialorder %v8459_v53, 49.0  ;;  %v987_v19 = vmul.f32 1.442695, %v970_v8  ;;  %v789_v36 = vand.u32 2147483648, %v8424_v32 }
 0x166   : > { %14339 = vst [vmem:[#allocation6_spill] sm:$0xff] %v8451_v50  ;;  %v701_v51 = vsub.f32 %v669_v43, %v685_v44  ;;  %v688_v55 = vmul.f32 2.0, %v7222_v48  ;;  %vm731_vm3 = vcmp.le.f32.partialorder %v8451_v50, 49.0  ;;  %v8470_v2 = vmax.f32 %v702_v54, 0.0 }
 0x167   : > { %v545_v56 = vpop.f32.mrf.mxu0  ;;  %7270 = vmatprep.mubr.msk.f32.mxu1 %vm731_vm3, %v8462_v57  ;;  %vm788_vm8 = vcmp.eq.f32.partialorder %v8424_v32, 0.0  ;;  %v8535_v18 = vmin.f32 %v8459_v53, 49.0  ;;  %v8541_v41 = vadd.f32 %v8413_v17, %v654_v20  ;;  %v8546_v43 = vmin.f32 %v8451_v50, 49.0 }
 0x168   : > { %v8464_v58 = vmax.f32 %v701_v51, 0.0  ;;  %v704_v59 = vsub.f32 %v672_v49, %v688_v55  ;;  %v687_v62 = vmul.f32 2.0, %v545_v56  ;;  %14342 = vst [vmem:[#allocation9_spill] sm:$0xff] %v8470_v2  ;;  %7271 = vmatmul.mubr.msk.f32.gmra.mxu1 %vm14223_vm4, %v8476_v3  ;;  %vm14221_vm6 = vcmp.le.f32.partialorder %v8470_v2, 49.0 }
 0x169   : > { %v7225_v60 = vpop.f32.mrf.mxu0  ;;  %v8549_v45 = vadd.f32 %v8413_v17, %v657_v35  ;;  %v8558_v46 = vsel %vm14125_vm2, %v8447_v47, 0.0  ;;  %vm779_vm10 = vcmp.eq.f32.partialorder %v8457_v52, inf  ;;  %v8566_v17 = vld [vmem:[%s8434_s15 + $0x38] sm:$0xff]  ;;  %v782_v47 = vand.u32 2147483648, %v8457_v52  ;;  %v8630_v35 = vld [vmem:[%s8434_s15 + $0x48] sm:$0xff] }
 0x16a   : > { %14341 = vst [vmem:[#allocation8_spill] sm:$0xff] %v8464_v58  ;;  %v690_v63 = vmul.f32 2.0, %v7225_v60  ;;  %v8482_v6 = vmax.f32 %v704_v59, 0.0  ;;  %v703_v7 = vsub.f32 %v671_v61, %v687_v62  ;;  %vm14222_vm5 = vcmp.le.f32.partialorder %v8464_v58, 49.0 }
 0x16b   : > { %v555_v4 = vpop.f32.mrf.mxu0  ;;  %7273 = vmatprep.mubr.msk.f32.mxu1 %vm14222_vm5, %v8480_v5  ;;  %v8579_v56 = vmin.f32 %v8464_v58, 49.0  ;;  %v8586_v60 = vsel %vm729_vm1, %v8438_v38, 0.0  ;;  %vm781_vm2 = vcmp.eq.f32.partialorder %v8457_v52, 0.0 }
 0x16c   : > { %14343 = vst [vmem:[#allocation10_spill] sm:$0xff] %v8482_v6  ;;  %v706_v9 = vsub.f32 %v674_v0, %v690_v63  ;;  %v8497_v14 = vmin.f32 %v8482_v6, 49.0  ;;  %v8499_v15 = vmax.f32 %v703_v7, 0.0  ;;  %7274 = vmatmul.mubr.msk.f32.gmra.mxu1 %vm14221_vm6, %v8493_v11  ;;  %v689_v25 = vmul.f32 2.0, %v555_v4 }
 0x16d   : > { %v7228_v12 = vpop.f32.mrf.mxu0  ;;  %vm14219_vm11 = vcmp.le.f32.partialorder %v8482_v6, 49.0 }
 0x16e   : > { %14344 = vst [vmem:[#allocation11_spill] sm:$0xff] %v8499_v15  ;;  %v8501_v16 = vmax.f32 %v706_v9, 0.0  ;;  %7765 = vrsqrt.f32 %v8497_v14  ;;  %v8509_v22 = vmin.f32 %v8499_v15, 49.0  ;;  %v692_v29 = vmul.f32 2.0, %v7228_v12  ;;  %v8605_v9 = vld [vmem:[%s8434_s15 + $0x40] sm:$0xff] }
 0x16f   : > { %v7762_v10 = vpop.eup %7761  ;;  %v565_v23 = vpop.f32.mrf.mxu0  ;;  %7767 = vpow2.f32 %v987_v19  ;;  %v705_v44 = vsub.f32 %v673_v26, %v689_v25  ;;  %vm14220_vm9 = vcmp.le.f32.partialorder %v8499_v15, 49.0  ;;  %vm828_vm12 = vcmp.eq.f32.partialorder %v8497_v14, inf }
 0x170   : > { %14345 = vst [vmem:[#allocation12_spill] sm:$0xff] %v8501_v16  ;;  %v785_v21 = vmul.f32 %v7762_v10, %v8424_v32  ;;  %v8512_v24 = vmin.f32 %v8501_v16, 49.0  ;;  %7769 = vrsqrt.f32 %v8509_v22  ;;  %v691_v49 = vmul.f32 2.0, %v565_v23  ;;  %7276 = vmatprep.mubr.msk.f32.mxu1 %vm14220_vm9, %v8538_v40 }
 0x171   : > { %v7231_v37 = vpop.f32.mrf.mxu0  ;;  %v708_v55 = vsub.f32 %v676_v31, %v692_v29  ;;  %7277 = vmatmul.mubr.msk.f32.gmra.mxu1 %vm14219_vm11, %v8566_v17  ;;  %v8581_v59 = vmax.f32 %v705_v44, 0.0  ;;  %vm830_vm13 = vcmp.eq.f32.partialorder %v8497_v14, 0.0  ;;  %v831_v0 = vand.u32 2147483648, %v8497_v14 }
 0x172   : > { %v787_v30 = vsel %vm786_vm7, %v8424_v32, %v785_v21  ;;  %7771 = vrsqrt.f32 %v8512_v24  ;;  %v7764_v39 = vpop.eup %7763  ;;  %v8552_v32 = vmin.f32 %v8470_v2, 49.0  ;;  %vm821_vm14 = vcmp.eq.f32.partialorder %v8509_v22, inf }
 0x173   : > { %v8543_v42 = vsel %vm788_vm8, %v789_v36, %v787_v30  ;;  %v778_v48 = vmul.f32 %v7764_v39, %v8457_v52  ;;  %v575_v51 = vpop.f32.mrf.mxu0  ;;  %7773 = vrsqrt.f32 %v8535_v18  ;;  %14346 = vst [vmem:[#allocation13_spill] sm:$0xff] %v8581_v59  ;;  %v707_v1 = vsub.f32 %v8520_v28, %v691_v49 }
 0x174   : > { %v8570_v54 = vmul.f32 0.93333334, %v8543_v42  ;;  %7775 = vrsqrt.f32 %v8546_v43  ;;  %v693_v61 = vmul.f32 2.0, %v575_v51  ;;  %vm823_vm15 = vcmp.eq.f32.partialorder %v8509_v22, 0.0 }
 0x175   : > { %7777 = vrsqrt.f32 %v8552_v32  ;;  %v8594_v63 = vsel %vm779_vm10, %v8457_v52, %v778_v48  ;;  %v8602_v8 = vmax.f32 %v708_v55, 0.0  ;;  %v7234_v10 = vpop.f32.mrf.mxu0  ;;  %v824_v19 = vand.u32 2147483648, %v8509_v22  ;;  %v8650_v55 = vld [vmem:[%s8434_s15 + $0x50] sm:$0xff] }
 0x176   : > { %vm842_vm7 = vcmp.eq.f32.partialorder %v8512_v24, inf  ;;  %vm844_vm8 = vcmp.eq.f32.partialorder %v8512_v24, 0.0  ;;  %v8611_v20 = vmin.f32 %v8581_v59, 49.0  ;;  %v694_v25 = vmul.f32 2.0, %v7231_v37 }
 0x177   : > { %14347 = vst [vmem:[#allocation14_spill] sm:$0xff] %v8602_v8  ;;  %v709_v26 = vsub.f32 %v8526_v34, %v693_v61  ;;  %vm14218_vm10 = vcmp.le.f32.partialorder %v8581_v59, 49.0  ;;  %v8624_v31 = vmax.f32 %v707_v1, 0.0  ;;  %v845_v37 = vand.u32 2147483648, %v8512_v24  ;;  %v585_v44 = vpop.f32.mrf.mxu0 }
 0x178   : > { %7279 = vmatprep.mubr.msk.f32.mxu1 %vm14218_vm10, %v8605_v9  ;;  %v8636_v39 = vmin.f32 %v8602_v8, 49.0  ;;  %v696_v29 = vmul.f32 2.0, %v7234_v10  ;;  %7779 = vrsqrt.f32 %v8611_v20  ;;  %v838_v33 = vand.u32 2147483648, %v8611_v20 }
 0x179   : > { %14348 = vst [vmem:[#allocation15_spill] sm:$0xff] %v8624_v31  ;;  %v8657_v1 = vmax.f32 %v709_v26, 0.0 }
 0x17a   : > { %7781 = vrsqrt.f32 %v8636_v39 }
 0x17b   : > { %v7766_v62 = vpop.eup %7765  ;;  %14350 = vst [vmem:[#allocation17_spill] sm:$0xff] %v8657_v1  ;;  %7783 = vrsqrt.f32 %v8579_v56 }
 0x17c   : > { %v827_v7 = vmul.f32 %v7766_v62, %v8497_v14  ;;  %v7768_v12 = vpop.eup %7767 }
 0x17d   : > { %v7770_v21 = vpop.eup %7769  ;;  %v8647_v51 = vmul.f32 %v7768_v12, %v8558_v46  ;;  %v695_v12 = vmul.f32 2.0, %v585_v44  ;;  %v8683_v44 = vmin.f32 %v8624_v31, 49.0 }
 0x17e   : > { %v829_v23 = vsel %vm828_vm12, %v8497_v14, %v827_v7  ;;  %v820_v30 = vmul.f32 %v7770_v21, %v8509_v22  ;;  %vm14217_vm12 = vcmp.le.f32.partialorder %v8501_v16, 49.0  ;;  %v14360_v16 = vand.u32 2147483648, %v8546_v43 }
 0x17f   : > { %v8621_v28 = vsel %vm830_vm13, %v831_v0, %v829_v23  ;;  %v7772_v34 = vpop.eup %7771  ;;  %7280 = vmatmul.mubr.msk.f32.gmra.mxu1 %vm14217_vm12, %v8630_v35  ;;  %v710_v0 = vsub.f32 %v8531_v13, %v694_v25  ;;  %1035 = vadd.xlane.f32.xlu1 %v8647_v51  ;;  %vm14216_vm13 = vcmp.le.f32.partialorder %v8624_v31, 49.0  ;;  %v712_v13 = vsub.f32 %v8549_v45, %v696_v29  ;;  %v8675_v23 = vld [vmem:[%s8434_s15 + $0x60] sm:$0xff]  ;;  %v8688_v29 = vld [vmem:[%s8434_s15 + $0x58] sm:$0xff] }
 0x180   : > { %v896_v36 = vmul.f32 0.93333334, %v8621_v28  ;;  %v822_v48 = vsel %vm821_vm14, %v8509_v22, %v820_v30  ;;  %v841_v49 = vmul.f32 %v7772_v34, %v8512_v24  ;;  %7282 = vmatprep.mubr.msk.f32.mxu1 %vm14216_vm13, %v8650_v55  ;;  %v7774_v25 = vpop.eup %7773  ;;  %v711_v34 = vsub.f32 %v8541_v41, %v695_v12 }
 0x181   : > { %v8654_v62 = vsel %vm823_vm15, %v824_v19, %v822_v48  ;;  %v8685_v45 = vmax.f32 %v710_v0, 0.0  ;;  %vm14215_vm14 = vcmp.le.f32.partialorder %v8602_v8, 49.0  ;;  %vm14130_vm15 = vcmp.le.f32.partialorder %v8657_v1, 49.0 }
 0x182   : > { %v912_v61 = vsub.f32 0.21777777, %v896_v36  ;;  %14349 = vst [vmem:[#allocation16_spill] sm:$0xff] %v8654_v62  ;;  %v895_v7 = vmul.f32 0.93333334, %v8654_v62  ;;  %v843_v10 = vsel %vm842_vm7, %v8512_v24, %v841_v49  ;;  %v8703_v0 = vsel %vm781_vm2, %v782_v47, %v8594_v63  ;;  %v365_v63 = vld [vmem:[%s8434_s15 + $0x70] sm:$0xff] }
 0x183   : > { %v8667_v19 = vsel %vm844_vm8, %v845_v37, %v843_v10  ;;  %v969_v36 = vmul.f32 -2.2959185, %v8457_v52  ;;  %v8680_v37 = vpop.eup %7775  ;;  %14352 = vst [vmem:[#allocation19_spill] sm:$0xff] %v8685_v45  ;;  %7283 = vmatmul.mubr.msk.f32.gmra.mxu1 %vm14215_vm14, %v8688_v29  ;;  %v972_v12 = vmul.f32 -2.2959185, %v8535_v18  ;;  %v8712_v4 = vmax.f32 %v712_v13, 0.0 }
 0x184   : > { %v928_v21 = vmul.f32 -2.2959185, %v912_v61  ;;  %14351 = vst [vmem:[#allocation18_spill] sm:$0xff] %v8667_v19  ;;  %v911_v26 = vsub.f32 0.21777777, %v895_v7  ;;  %v8692_v48 = vpop.eup %7777  ;;  %v8705_v7 = vmax.f32 %v711_v34, 0.0  ;;  %7285 = vmatprep.mubr.msk.f32.mxu1 %vm14130_vm15, %v8675_v23 }
 0x185   : > { %v898_v30 = vmul.f32 0.93333334, %v8667_v19  ;;  %v985_v10 = vmul.f32 1.442695, %v969_v36  ;;  %14354 = vst [vmem:[#allocation21_spill] sm:$0xff] %v8712_v4  ;;  %vm14213_vm2 = vcmp.le.f32.partialorder %v8685_v45, 49.0  ;;  %v7780_v19 = vpop.eup %7779 }
 0x186   : > { %v951_v41 = vmul.f32 1.442695, %v928_v21  ;;  %v927_v49 = vmul.f32 -2.2959185, %v911_v26  ;;  %14353 = vst [vmem:[#allocation20_spill] sm:$0xff] %v8705_v7  ;;  %v799_v21 = vmul.f32 %v7774_v25, %v8535_v18  ;;  %vm800_vm7 = vcmp.eq.f32.partialorder %v8535_v18, inf }
 0x187   : > { %v914_v61 = vsub.f32 0.21777777, %v898_v30  ;;  %7785 = vpow2.f32 %v985_v10  ;;  %v991_v52 = vmul.f32 1.442695, %v972_v12  ;;  %v971_v47 = vmul.f32 -2.2959185, %v8546_v43  ;;  %7286 = vmatmul.mubr.msk.f32.gmra.mxu1 %vm14213_vm2, %v8715_v27 }
 0x188   : > { %v949_v26 = vmul.f32 1.442695, %v927_v49  ;;  %v889_v34 = vmul.f32 0.93333334, %v8703_v0  ;;  %v803_v36 = vand.u32 2147483648, %v8535_v18  ;;  %7787 = vrsqrt.f32 %v8683_v44 }
 0x189   : > { %v930_v30 = vmul.f32 -2.2959185, %v914_v61  ;;  %vm802_vm8 = vcmp.eq.f32.partialorder %v8535_v18, 0.0  ;;  %7789 = vpow2.f32 %v951_v41  ;;  %v989_v25 = vmul.f32 1.442695, %v971_v47  ;;  %v366_v41 = vld [vmem:[%s8434_s15 + $0x78] sm:$0xff] }
 0x18a   : > { %vm14131_vm0 = vcmp.le.f32.partialorder %v8705_v7, 49.0  ;;  %v14355_v49 = vsub.f32 0.21777777, %v8570_v54  ;;  %7791 = vpow2.f32 %v949_v26  ;;  %v974_v12 = vmul.f32 -2.2959185, %v8552_v32 }
 0x18b   : > { %v955_v13 = vmul.f32 1.442695, %v930_v30  ;;  %7288 = vmatprep.mubr.msk.f32.mxu1 %vm14131_vm0, %v365_v63  ;;  %v801_v62 = vsel %vm800_vm7, %v8535_v18, %v799_v21  ;;  %7793 = vpow2.f32 %v991_v52  ;;  %vm14209_vm15 = vcmp.le.f32.partialorder %v8712_v4, 49.0 }
 0x18c   : > { %v922_v61 = vmul.f32 -2.2959185, %v14355_v49  ;;  %v976_v30 = vmul.f32 -2.2959185, %v8497_v14  ;;  %v905_v47 = vsub.f32 0.21777777, %v889_v34  ;;  %7795 = vpow2.f32 %v989_v25  ;;  %7289 = vmatmul.mubr.msk.f32.gmra.mxu1 %vm14209_vm15, %v366_v41  ;;  %v7782_v14 = vpop.eup %7781 }
 0x18d   : > { %v995_v54 = vmul.f32 1.442695, %v974_v12  ;;  %v973_v26 = vmul.f32 -2.2959185, %v8579_v56  ;;  %7797 = vpow2.f32 %v955_v13  ;;  %v8743_v63 = vmin.f32 %v8685_v45, 49.0  ;;  %7359 = vmatprep.mubr.msk.f32.mxu1 %vm729_vm1, %v8438_v38  ;;  %v8754_v38 = vpop.eup %7783 }
 0x18e   : > { %v999_v21 = vmul.f32 1.442695, %v976_v30  ;;  %v975_v52 = vmul.f32 -2.2959185, %v8509_v22  ;;  %v978_v25 = vmul.f32 -2.2959185, %v8512_v24  ;;  %v834_v13 = vmul.f32 %v7780_v19, %v8611_v20 }
 0x18f   : > { %7799 = vpow2.f32 %v995_v54  ;;  %v993_v34 = vmul.f32 1.442695, %v973_v26  ;;  %v939_v49 = vmul.f32 1.442695, %v922_v61  ;;  %vm835_vm7 = vcmp.eq.f32.partialorder %v8611_v20, inf }
 0x190   : > { %7801 = vpow2.f32 %v999_v21  ;;  %v997_v12 = vmul.f32 1.442695, %v975_v52  ;;  %v1003_v41 = vmul.f32 1.442695, %v978_v25  ;;  %vm837_vm0 = vcmp.eq.f32.partialorder %v8611_v20, 0.0 }
 0x191   : > { %7803 = vpow2.f32 %v993_v34  ;;  %v836_v22 = vsel %vm835_vm7, %v8611_v20, %v834_v13  ;;  %v977_v24 = vmul.f32 -2.2959185, %v8611_v20  ;;  %v6681_v61 = vadd.f32 -3.7333333, %v8543_v42 }
 0x192   : > { %7805 = vpow2.f32 %v997_v12  ;;  %v8761_v19 = vsel %vm802_vm8, %v803_v36, %v801_v62  ;;  %vm793_vm1 = vcmp.eq.f32.partialorder %v8546_v43, inf  ;;  %v839_v30 = vsel %vm837_vm0, %v838_v33, %v836_v22 }
 0x193   : > { %7807 = vpow2.f32 %v1003_v41  ;;  %v855_v54 = vmul.f32 %v7782_v14, %v8636_v39  ;;  %v897_v26 = vmul.f32 0.93333334, %v839_v30  ;;  %v1001_v21 = vmul.f32 1.442695, %v977_v24 }
 0x194   : > { %7809 = vrsqrt.f32 %v8743_v63  ;;  %v6688_v52 = vadd.f32 -3.7333333, %v839_v30  ;;  %v7786_v34 = vpop.eup %7785  ;;  %v921_v25 = vmul.f32 -2.2959185, %v905_v47  ;;  %v792_v42 = vmul.f32 %v8680_v37, %v8546_v43 }
 0x195   : > { %7811 = vpow2.f32 %v939_v49  ;;  %v1514_v18 = vmul.f32 -2.2959185, %v6681_v61  ;;  %v7788_v20 = vpop.eup %7787  ;;  %v8769_v62 = vmul.f32 %v7786_v34, %v8586_v60  ;;  %v913_v36 = vsub.f32 0.21777777, %v897_v26 }
 0x196   : > { %v1521_v12 = vmul.f32 -2.2959185, %v6688_v52  ;;  %vm856_vm0 = vcmp.eq.f32.partialorder %v8636_v39, inf  ;;  %v8772_v14 = vpop.eup %7789  ;;  %v859_v47 = vand.u32 2147483648, %v8636_v39  ;;  %v980_v33 = vmul.f32 -2.2959185, %v8636_v39 }
 0x197   : > { %v1530_v13 = vmul.f32 %v6681_v61, %v1514_v18  ;;  %v857_v41 = vsel %vm856_vm0, %v8636_v39, %v855_v54  ;;  %v8777_v37 = vpop.eup %7791  ;;  %vm795_vm8 = vcmp.eq.f32.partialorder %v8546_v43, 0.0  ;;  %1033 = vadd.xlane.f32.xlu0 %v8769_v62  ;;  %v929_v49 = vmul.f32 -2.2959185, %v913_v36 }
 0x198   : > { %14356 = vst [vmem:[#allocation22_spill] sm:$0xff] %v8777_v37  ;;  %7813 = vpow2.f32 %v1001_v21  ;;  %v1537_v22 = vmul.f32 %v6688_v52, %v1521_v12  ;;  %vm858_vm7 = vcmp.eq.f32.partialorder %v8636_v39, 0.0  ;;  %v7794_v24 = vpop.eup %7793  ;;  %v8785_v61 = vsel %vm14223_vm4, %v8476_v3, 0.0 }
 0x199   : > { %v8790_v30 = vsel %vm731_vm3, %v8462_v57, 0.0  ;;  %v1547_v54 = vmul.f32 1.442695, %v1530_v13  ;;  %v8792_v26 = vsel %vm858_vm7, %v859_v47, %v857_v41  ;;  %v7796_v34 = vpop.eup %7795  ;;  %v8795_v21 = vmul.f32 %v7794_v24, %v8785_v61 }
 0x19a   : > { %14357 = vst [vmem:[#allocation23_spill] sm:$0xff] %v8792_v26  ;;  %v953_v52 = vmul.f32 1.442695, %v929_v49  ;;  %v1561_v39 = vmul.f32 1.442695, %v1537_v22  ;;  %v8797_v36 = vpop.eup %7797  ;;  %v8803_v12 = vmul.f32 %v7796_v34, %v8790_v30  ;;  %v794_v41 = vsel %vm793_vm1, %v8546_v43, %v792_v42 }
 0x19b   : > { %v1007_v18 = vmul.f32 1.442695, %v980_v33  ;;  %14358 = vst [vmem:[#allocation24_spill] sm:$0xff] %v8797_v36  ;;  %v8800_v3 = vmul.f32 0.93333334, %v8761_v19  ;;  %7815 = vpow2.f32 %v1547_v54  ;;  %1039 = vadd.xlane.f32.xlu0 %v8795_v21  ;;  %v848_v33 = vmul.f32 %v7788_v20, %v8683_v44 }
 0x19c   : > { %v937_v57 = vmul.f32 1.442695, %v921_v25  ;;  %v7800_v13 = vpop.eup %7799  ;;  %7817 = vpow2.f32 %v953_v52  ;;  %v6691_v47 = vadd.f32 -3.7333333, %v8792_v26  ;;  %v8812_v22 = vmin.f32 %v8657_v1, 49.0  ;;  %1037 = vadd.xlane.f32.xlu1 %v8803_v12 }
 0x19d   : > { %v7802_v49 = vpop.eup %7801  ;;  %v8818_v25 = vsel %vm14221_vm6, %v8493_v11, 0.0  ;;  %v8823_v42 = vsel %vm14219_vm11, %v8566_v17, 0.0  ;;  %7819 = vpow2.f32 %v1561_v39  ;;  %v8829_v54 = vsel %vm14220_vm9, %v8538_v40, 0.0 }
 0x19e   : > { %v7804_v24 = vpop.eup %7803  ;;  %v1024_v20 = vmul.f32 %v7802_v49, %v8823_v42  ;;  %7821 = vpow2.f32 %v1007_v18  ;;  %v1524_v34 = vmul.f32 -2.2959185, %v6691_v47  ;;  %v8832_v11 = vmul.f32 %v7800_v13, %v8818_v25 }
 0x19f   : > { %v7806_v52 = vpop.eup %7805  ;;  %v8837_v17 = vsel %vm14217_vm12, %v8630_v35, 0.0  ;;  %7823 = vpow2.f32 %v937_v57  ;;  %vm849_vm1 = vcmp.eq.f32.partialorder %v8683_v44, inf  ;;  %v908_v6 = vsub.f32 0.21777777, %v8800_v3 }
 0x1a0   : > { %14359 = vst [vmem:[#allocation25_spill] sm:$0xff] %v8837_v17  ;;  %v7808_v39 = vpop.eup %7807  ;;  %1047 = vadd.xlane.f32.xlu0 %v1024_v20  ;;  %v8841_v49 = vmul.f32 %v8772_v14, %v1024_v20  ;;  %v1023_v40 = vmul.f32 %v7806_v52, %v8829_v54  ;;  %v1540_v18 = vmul.f32 %v6691_v47, %v1524_v34  ;;  %v852_v20 = vand.u32 2147483648, %v8683_v44 }
 0x1a1   : > { %v850_v10 = vsel %vm849_vm1, %v8683_v44, %v848_v33  ;;  %v7810_v13 = vpop.eup %7809  ;;  %v8850_v35 = vsel %vm795_vm8, %v14360_v16, %v794_v41  ;;  %1043 = vadd.xlane.f32.xlu1 %v8832_v11  ;;  %v1026_v57 = vmul.f32 %v7808_v39, %v8837_v17  ;;  %v8860_v47 = vsel %vm14222_vm5, %v8480_v5, 0.0 }
 0x1a2   : > { %v8855_v15 = vpop.eup %7811  ;;  %v8863_v3 = vmul.f32 %v8777_v37, %v1023_v40  ;;  %v1567_v33 = vmul.f32 1.442695, %v1540_v18  ;;  %vm851_vm0 = vcmp.eq.f32.partialorder %v8683_v44, 0.0  ;;  %v8867_v16 = vmul.f32 %v7804_v24, %v8860_v47 }
 0x1a3   : > { %v8870_v43 = vmul.f32 %v8797_v36, %v1026_v57  ;;  %v853_v41 = vsel %vm851_vm0, %v852_v20, %v850_v10  ;;  %v979_v34 = vmul.f32 -2.2959185, %v8683_v44  ;;  %v891_v52 = vmul.f32 0.93333334, %v8850_v35 }
 0x1a4   : > { %7825 = vrsqrt.f32 %v8812_v22  ;;  %1045 = vadd.xlane.f32.xlu0 %v1023_v40  ;;  %v899_v5 = vmul.f32 0.93333334, %v853_v41  ;;  %v6690_v39 = vadd.f32 -3.7333333, %v853_v41  ;;  %v8878_v24 = vmul.f32 %v8855_v15, %v8647_v51 }
 0x1a5   : > { %14361 = vst [vmem:[#allocation26_spill] sm:$0xff] %v8870_v43  ;;  %v7814_v2 = vpop.eup %7813  ;;  %1041 = vadd.xlane.f32.xlu1 %v8867_v16  ;;  %7827 = vpow2.f32 %v1567_v33  ;;  %v1005_v18 = vmul.f32 1.442695, %v979_v34  ;;  %v6680_v10 = vadd.f32 -3.7333333, %v8703_v0  ;;  %vm807_vm8 = vcmp.eq.f32.partialorder %v8579_v56, inf }
 0x1a6   : > { %v915_v44 = vsub.f32 0.21777777, %v899_v5  ;;  %v1523_v20 = vmul.f32 -2.2959185, %v6690_v39  ;;  %v753_v40 = vsel %vm14218_vm10, %v8605_v9, 0.0  ;;  %v869_v58 = vmul.f32 %v7810_v13, %v8743_v63 }
 0x1a7   : > { %7829 = vpow2.f32 %v1005_v18  ;;  %v1513_v41 = vmul.f32 -2.2959185, %v6680_v10  ;;  %v806_v51 = vmul.f32 %v8754_v38, %v8579_v56  ;;  %v1025_v33 = vmul.f32 %v7814_v2, %v753_v40 }
 0x1a8   : > { %v7816_v53 = vpop.eup %7815  ;;  %1051 = vadd.xlane.f32.xlu0 %v1026_v57  ;;  %v931_v34 = vmul.f32 -2.2959185, %v915_v44  ;;  %v1539_v0 = vmul.f32 %v6690_v39, %v1523_v20  ;;  %v924_v5 = vmul.f32 -2.2959185, %v908_v6  ;;  %v907_v26 = vsub.f32 0.21777777, %v891_v52 }
 0x1a9   : > { %v8888_v50 = vpop.eup %7817  ;;  %1099 = vadd.xlane.f32.xlu1 %v8878_v24  ;;  %v1529_v59 = vmul.f32 %v6680_v10, %v1513_v41  ;;  %vm870_vm7 = vcmp.eq.f32.partialorder %v8743_v63, inf  ;;  %v8901_v6 = vmul.f32 %v7816_v53, %v8558_v46  ;;  %v756_v20 = vsel %vm14215_vm14, %v8688_v29, 0.0 }
 0x1aa   : > { %v7820_v9 = vpop.eup %7819  ;;  %v8893_v13 = vmul.f32 0.00033546262, %v8888_v50  ;;  %v8896_v18 = vmul.f32 %v8888_v50, %v1025_v33  ;;  %v957_v38 = vmul.f32 1.442695, %v931_v34  ;;  %v1565_v2 = vmul.f32 1.442695, %v1539_v0 }
 0x1ab   : > { %v7822_v57 = vpop.eup %7821  ;;  %v8898_v39 = vmul.f32 %v7820_v9, %v753_v40  ;;  %v1545_v52 = vmul.f32 1.442695, %v1529_v59  ;;  %v871_v10 = vsel %vm870_vm7, %v8743_v63, %v869_v58  ;;  %v873_v41 = vand.u32 2147483648, %v8743_v63 }
 0x1ac   : > { %14362 = vst [vmem:[#allocation27_spill] sm:$0xff] %v8896_v18  ;;  %v8904_v44 = vpop.eup %7823  ;;  %1049 = vadd.xlane.f32.xlu0 %v1025_v33  ;;  %7831 = vpow2.f32 %v957_v38  ;;  %v982_v34 = vmul.f32 -2.2959185, %v8743_v63  ;;  %v1082_v53 = vmul.f32 0.36787945, %v8855_v15  ;;  %vm872_vm1 = vcmp.eq.f32.partialorder %v8743_v63, 0.0 }
 0x1ad   : > { %14363 = vst [vmem:[#allocation28_spill] sm:$0xff] %v8898_v39  ;;  %v8913_v40 = vmul.f32 %v8893_v13, %v8898_v39  ;;  %1611 = vadd.xlane.f32.xlu1 %v8901_v6  ;;  %7833 = vpow2.f32 %v1565_v2  ;;  %v8918_v58 = vmul.f32 %v7822_v57, %v756_v20  ;;  %v8920_v46 = vsel %vm872_vm1, %v873_v41, %v871_v10 }
 0x1ae   : > { %7835 = vpow2.f32 %v1545_v52  ;;  %14366 = vst [vmem:[#allocation31_spill] sm:$0xff] %v8920_v46  ;;  %v943_v59 = vmul.f32 1.442695, %v924_v5  ;;  %v923_v29 = vmul.f32 -2.2959185, %v907_v26  ;;  %v808_v33 = vsel %vm807_vm8, %v8579_v56, %v806_v51 }
 0x1af   : > { %14364 = vst [vmem:[#allocation29_spill] sm:$0xff] %v8913_v40  ;;  %14365 = vst [vmem:[#allocation30_spill] sm:$0xff] %v8918_v58  ;;  %v1065_v0 = vmul.f32 %v8904_v44, %v8769_v62  ;;  %v6693_v9 = vadd.f32 -3.7333333, %v8920_v46  ;;  %v810_v38 = vand.u32 2147483648, %v8579_v56  ;;  %v813_v57 = vmul.f32 %v8692_v48, %v8552_v32 }
 0x1b0   : > { %1055 = vadd.xlane.f32.xlu0 %v8918_v58  ;;  %v1011_v63 = vmul.f32 1.442695, %v982_v34  ;;  %vm809_vm0 = vcmp.eq.f32.partialorder %v8579_v56, 0.0  ;;  %v1130_v62 = vmul.f32 %v1082_v53, %v8878_v24  ;;  %7837 = vpow2.f32 %v943_v59 }
 0x1b1   : > { %v7826_v2 = vpop.eup %7825  ;;  %1097 = vadd.xlane.f32.xlu1 %v1065_v0  ;;  %v1526_v26 = vmul.f32 -2.2959185, %v6693_v9  ;;  %v8933_v51 = vsel %vm809_vm0, %v810_v38, %v808_v33  ;;  %v6683_v52 = vadd.f32 -3.7333333, %v8761_v19  ;;  %v1081_v41 = vmul.f32 0.36787945, %v8904_v44 }
 0x1b2   : > { %v7828_v5 = vpop.eup %7827  ;;  %v941_v8 = vmul.f32 1.442695, %v923_v29  ;;  %v755_v56 = vsel %vm14216_vm13, %v8650_v55, 0.0  ;;  %7839 = vpow2.f32 %v1011_v63  ;;  %vm814_vm8 = vcmp.eq.f32.partialorder %v8552_v32, inf }
 0x1b3   : > { %v8937_v10 = vmul.f32 %v7828_v5, %v756_v20  ;;  %v1542_v34 = vmul.f32 %v6693_v9, %v1526_v26  ;;  %v1516_v48 = vmul.f32 -2.2959185, %v6683_v52  ;;  %v862_v19 = vmul.f32 %v7826_v2, %v8812_v22 }
 0x1b4   : > { %v7830_v46 = vpop.eup %7829  ;;  %v815_v20 = vsel %vm814_vm8, %v8552_v32, %v813_v57  ;;  %v893_v59 = vmul.f32 0.93333334, %v8933_v51  ;;  %v8947_v9 = vmul.f32 0.36787945, %v1082_v53  ;;  %vm863_vm7 = vcmp.eq.f32.partialorder %v8812_v22, inf }
 0x1b5   : > { %14367 = vst [vmem:[#allocation32_spill] sm:$0xff] %v8937_v10  ;;  %v1027_v33 = vmul.f32 %v7830_v46, %v755_v56  ;;  %1163 = vadd.xlane.f32.xlu1 %v1130_v62  ;;  %v1571_v24 = vmul.f32 1.442695, %v1542_v34  ;;  %v1129_v29 = vmul.f32 %v1081_v41, %v1065_v0  ;;  %7841 = vpow2.f32 %v941_v8 }
 0x1b6   : > { %v864_v55 = vsel %vm863_vm7, %v8812_v22, %v862_v19  ;;  %v866_v38 = vand.u32 2147483648, %v8812_v22  ;;  %v817_v46 = vand.u32 2147483648, %v8552_v32  ;;  %v1532_v63 = vmul.f32 %v6683_v52, %v1516_v48 }
 0x1b7   : > { %1053 = vadd.xlane.f32.xlu0 %v1027_v33  ;;  %7843 = vpow2.f32 %v1571_v24  ;;  %vm865_vm1 = vcmp.eq.f32.partialorder %v8812_v22, 0.0  ;;  %vm816_vm0 = vcmp.eq.f32.partialorder %v8552_v32, 0.0  ;;  %v6682_v0 = vadd.f32 -3.7333333, %v8850_v35 }
 0x1b8   : > { %v8957_v53 = vsel %vm865_vm1, %v866_v38, %v864_v55  ;;  %v818_v57 = vsel %vm816_vm0, %v817_v46, %v815_v20  ;;  %v909_v26 = vsub.f32 0.21777777, %v893_v59  ;;  %v1594_v24 = vmul.f32 0.00033546262, %v8855_v15 }
 0x1b9   : > { %v8954_v2 = vpop.eup %7831  ;;  %1161 = vadd.xlane.f32.xlu1 %v1129_v29  ;;  %14368 = vst [vmem:[#allocation33_spill] sm:$0xff] %v8957_v53  ;;  %v1194_v32 = vmul.f32 %v8947_v9, %v1130_v62  ;;  %v6692_v19 = vadd.f32 -3.7333333, %v8957_v53  ;;  %v1551_v55 = vmul.f32 1.442695, %v1532_v63  ;;  %vm14374_vm8 = vcmp.le.f32.partialorder %v8657_v1, 49.0 }
 0x1ba   : > { %v7834_v8 = vpop.eup %7833  ;;  %v8961_v5 = vmul.f32 0.00033546262, %v8954_v2  ;;  %v8964_v34 = vmul.f32 %v8954_v2, %v1027_v33  ;;  %v981_v20 = vmul.f32 -2.2959185, %v8812_v22  ;;  %v1515_v59 = vmul.f32 -2.2959185, %v6682_v0 }
 0x1bb   : > { %v7836_v52 = vpop.eup %7835  ;;  %v8966_v48 = vmul.f32 %v7834_v8, %v755_v56  ;;  %v1525_v33 = vmul.f32 -2.2959185, %v6692_v19  ;;  %v894_v56 = vmul.f32 0.93333334, %v818_v57  ;;  %v925_v15 = vmul.f32 -2.2959185, %v909_v26 }
 0x1bc   : > { %14369 = vst [vmem:[#allocation34_spill] sm:$0xff] %v8964_v34  ;;  %v1577_v35 = vmul.f32 %v7836_v52, %v8586_v60  ;;  %v1642_v62 = vmul.f32 %v1594_v24, %v8901_v6  ;;  %v8980_v8 = vmul.f32 0.36787945, %v1081_v41  ;;  %7845 = vpow2.f32 %v1551_v55 }
 0x1bd   : > { %14370 = vst [vmem:[#allocation35_spill] sm:$0xff] %v8966_v48  ;;  %v8975_v38 = vmul.f32 %v8961_v5, %v8966_v48  ;;  %1227 = vadd.xlane.f32.xlu1 %v1194_v32  ;;  %v8977_v46 = vpop.eup %7837  ;;  %v1541_v60 = vmul.f32 %v6692_v19, %v1525_v33  ;;  %v1009_v63 = vmul.f32 1.442695, %v981_v20  ;;  %v1531_v52 = vmul.f32 %v6682_v0, %v1515_v59 }
 0x1be   : > { %1609 = vadd.xlane.f32.xlu0 %v1577_v35  ;;  %v1068_v22 = vmul.f32 %v8977_v46, %v8795_v21  ;;  %v910_v48 = vsub.f32 0.21777777, %v894_v56  ;;  %v758_v26 = vsel %vm14213_vm2, %v8715_v27, 0.0  ;;  %v1593_v6 = vmul.f32 0.00033546262, %v8904_v44 }
 0x1bf   : > { %14371 = vst [vmem:[#allocation36_spill] sm:$0xff] %v8975_v38  ;;  %v7840_v31 = vpop.eup %7839  ;;  %v1569_v10 = vmul.f32 1.442695, %v1541_v60  ;;  %v8989_v41 = vmul.f32 %v8980_v8, %v1129_v29  ;;  %v1549_v0 = vmul.f32 1.442695, %v1531_v52  ;;  %vm14248_vm2 = vcmask 48128  }
 0x1c0   : > { %v8993_v21 = vmul.f32 %v7840_v31, %v758_v26  ;;  %v945_v55 = vmul.f32 1.442695, %v925_v15  ;;  %v926_v59 = vmul.f32 -2.2959185, %v910_v48  ;;  %v1658_v27 = vmul.f32 0.36787945, %v1594_v24 }
 0x1c1   : > { %1103 = vadd.xlane.f32.xlu1 %v1068_v22  ;;  %7847 = vpow2.f32 %v1569_v10  ;;  %v9000_v44 = vmul.f32 0.36787945, %v8947_v9  ;;  %v6685_v10 = vadd.f32 -3.7333333, %v818_v57  ;;  %v1641_v29 = vmul.f32 %v1593_v6, %v1577_v35 }
 0x1c2   : > { %1675 = vadd.xlane.f32.xlu0 %v1642_v62  ;;  %v8991_v19 = vpop.eup %7841  ;;  %14372 = vst [vmem:[#allocation37_spill] sm:$0xff] %v8993_v21  ;;  %7849 = vpow2.f32 %v1009_v63  ;;  %v6684_v56 = vadd.f32 -3.7333333, %v8933_v51  ;;  %v947_v15 = vmul.f32 1.442695, %v926_v59  ;;  %v1706_v63 = vmul.f32 %v1658_v27, %v1642_v62 }
 0x1c3   : > { %7851 = vpow2.f32 %v945_v55  ;;  %v1067_v31 = vmul.f32 %v8991_v19, %v8803_v12  ;;  %v1518_v60 = vmul.f32 -2.2959185, %v6685_v10  ;;  %v9006_v52 = vmul.f32 %v9000_v44, %v1194_v32 }
 0x1c4   : > { %v7844_v20 = vpop.eup %7843  ;;  %7853 = vpow2.f32 %v1549_v0  ;;  %v1517_v48 = vmul.f32 -2.2959185, %v6684_v56  ;;  %v1084_v9 = vmul.f32 0.36787945, %v8977_v46  ;;  %v757_v51 = vsel %vm14374_vm8, %v8675_v23, 0.0 }
 0x1c5   : > { %v8995_v33 = vmul.f32 %v7844_v20, %v758_v26  ;;  %1225 = vadd.xlane.f32.xlu1 %v8989_v41  ;;  %7855 = vpow2.f32 %v947_v15  ;;  %v1534_v35 = vmul.f32 %v6685_v10, %v1518_v60  ;;  %v9016_v32 = vmul.f32 0.36787945, %v1593_v6 }
 0x1c6   : > { %1059 = vadd.xlane.f32.xlu0 %v8993_v21  ;;  %v1533_v24 = vmul.f32 %v6684_v56, %v1517_v48  ;;  %v9014_v0 = vmul.f32 %v1084_v9, %v1068_v22  ;;  %v1722_v56 = vmul.f32 0.36787945, %v1658_v27  ;;  %v9032_v60 = vmul.f32 0.00033546262, %v8977_v46 }
 0x1c7   : > { %14373 = vst [vmem:[#allocation38_spill] sm:$0xff] %v8995_v33  ;;  %v1555_v48 = vmul.f32 1.442695, %v1534_v35  ;;  %v9024_v10 = vmul.f32 %v9016_v32, %v1641_v29  ;;  %v1083_v27 = vmul.f32 0.36787945, %v8991_v19  ;;  %vm14247_vm14 = vcmask 56320  }
 0x1c8   : > { %v1553_v12 = vmul.f32 1.442695, %v1533_v24  ;;  %v1770_v15 = vmul.f32 %v1722_v56, %v1706_v63  ;;  %vm14246_vm13 = vcmask 72704   ;;  %vm14245_vm12 = vcmask 80896  }
 0x1c9   : > { %1101 = vadd.xlane.f32.xlu1 %v1067_v31  ;;  %v7846_v57 = vpop.eup %7845  ;;  %v1131_v46 = vmul.f32 %v1083_v27, %v1067_v31  ;;  %v1087_v31 = vmul.f32 0.36787945, %v8777_v37  ;;  %vm14464_vm10 = vcmask 64512   ;;  %vm14238_vm11 = vcmask 89088  }
 0x1ca   : > { %1673 = vadd.xlane.f32.xlu0 %v1641_v29  ;;  %v1580_v62 = vmul.f32 %v7846_v57, %v8785_v61  ;;  %7857 = vpow2.f32 %v1553_v12  ;;  %vm14236_vm9 = vcmask 97280   ;;  %vm14467_vm6 = vcmask 64512  }
 0x1cb   : > { %7859 = vpow2.f32 %v1555_v48  ;;  %v1088_v48 = vmul.f32 0.36787945, %v8772_v14  ;;  %v1151_v21 = vmul.f32 0.36787945, %v1087_v31  ;;  %vm14233_vm5 = vcmask 121856  }
 0x1cc   : > { %vm14477_vm4 = vcmask 64512  }
 0x1cd   : > { %1291 = vadd.xlane.f32.xlu1 %v9006_v52  ;;  %v1215_v58 = vmul.f32 0.36787945, %v1151_v21  ;;  %v1152_v39 = vmul.f32 0.36787945, %v1088_v48 }
 0x1ce   : > { %1739 = vadd.xlane.f32.xlu0 %v1706_v63  ;;  %v7848_v26 = vpop.eup %7847 }
 0x1cf   : > { %v7850_v55 = vpop.eup %7849  ;;  %v9018_v20 = vmul.f32 %v7848_v26, %v757_v51 }
 0x1d0   : > { %v7852_v59 = vpop.eup %7851  ;;  %v9021_v23 = vmul.f32 %v7850_v55, %v757_v51  ;;  %v9048_v51 = vmul.f32 %v9032_v60, %v1580_v62 }
 0x1d1   : > { %14375 = vst [vmem:[#allocation39_spill] sm:$0xff] %v9018_v20  ;;  %1167 = vadd.xlane.f32.xlu1 %v9014_v0  ;;  %v9027_v61 = vmul.f32 %v7852_v59, %v8867_v16  ;;  %v7854_v22 = vpop.eup %7853  ;;  %v1085_v6 = vmul.f32 0.36787945, %v7852_v59  ;;  %v1597_v57 = vmul.f32 0.00033546262, %v7852_v59  ;;  %v9099_v20 = vmin.f32 %v8705_v7, 49.0 }
 0x1d2   : > { %1615 = vadd.xlane.f32.xlu0 %v1580_v62  ;;  %14376 = vst [vmem:[#allocation40_spill] sm:$0xff] %v9021_v23  ;;  %v9036_v24 = vmul.f32 %v7854_v22, %v8790_v30  ;;  %v9045_v63 = vpop.eup %7855  ;;  %v9051_v30 = vmul.f32 0.36787945, %v8980_v8  ;;  %v9057_v59 = vmul.f32 0.36787945, %v1722_v56  ;;  %v9076_v56 = vmul.f32 %v1088_v48, %v8841_v49 }
 0x1d3   : > { %v9039_v29 = vmul.f32 %v1085_v6, %v9027_v61  ;;  %v1149_v16 = vmul.f32 0.36787945, %v1085_v6  ;;  %v1661_v55 = vmul.f32 0.36787945, %v1597_v57  ;;  %v9063_v62 = vmul.f32 %v9045_v63, %v8832_v11  ;;  %14378 = vst [vmem:[#allocation42_spill] sm:$0xff] %v9099_v20 }
 0x1d4   : > { %v9067_v8 = vmul.f32 %v9051_v30, %v8989_v41  ;;  %v9070_v22 = vmul.f32 0.36787945, %v9000_v44  ;;  %v9079_v6 = vmul.f32 %v1087_v31, %v8863_v3  ;;  %7861 = vrsqrt.f32 %v9099_v20 }
 0x1d5   : > { %1737 = vadd.xlane.f32.xlu1 %v9024_v10  ;;  %v9043_v12 = vmul.f32 %v1149_v16, %v9039_v29  ;;  %v1725_v41 = vmul.f32 0.36787945, %v1661_v55  ;;  %v1213_v53 = vmul.f32 0.36787945, %v1149_v16  ;;  %v1216_v16 = vmul.f32 0.36787945, %v1152_v39 }
 0x1d6   : > { %1057 = vadd.xlane.f32.xlu0 %v9021_v23  ;;  %v9093_v45 = vmul.f32 %v9070_v22, %v9006_v52  ;;  %v9116_v23 = vmul.f32 0.36787945, %v9016_v32  ;;  %v9119_v31 = vmul.f32 %v1151_v21, %v9079_v6  ;;  %v9134_v32 = vmul.f32 %v1152_v39, %v9076_v56 }
 0x1d7   : > { %v7858_v35 = vpop.eup %7857  ;;  %v1789_v33 = vmul.f32 0.36787945, %v1725_v41  ;;  %vm877_vm7 = vcmp.eq.f32.partialorder %v9099_v20, inf  ;;  %vm879_vm1 = vcmp.eq.f32.partialorder %v9099_v20, 0.0 }
 0x1d8   : > { %v9055_v26 = vmul.f32 %v7858_v35, %v8860_v47  ;;  %v9086_v35 = vmul.f32 0.36787945, %v1084_v9  ;;  %v7860_v44 = vpop.eup %7859  ;;  %v9103_v9 = vmul.f32 0.36787945, %v1083_v27  ;;  %14380 = vst [vmem:[#allocation44_spill] sm:$0xff] %v9119_v31  ;;  %14384 = vst [vmem:[#allocation48_spill] sm:$0xff] %v9134_v32  ;;  %v9141_v48 = vmul.f32 %v9116_v23, %v9024_v10 }
 0x1d9   : > { %1613 = vadd.xlane.f32.xlu1 %v9036_v24  ;;  %v9109_v52 = vmul.f32 %v7860_v44, %v8818_v25  ;;  %v9128_v25 = vmul.f32 %v1215_v58, %v9119_v31  ;;  %v1595_v44 = vmul.f32 0.00033546262, %v8991_v19  ;;  %v9148_v37 = vmul.f32 %v1216_v16, %v9134_v32 }
 0x1da   : > { %1803 = vadd.xlane.f32.xlu0 %v1770_v15  ;;  %v9073_v47 = vmul.f32 %v1597_v57, %v9055_v26  ;;  %v9089_v57 = vmul.f32 %v9057_v59, %v1770_v15  ;;  %v9137_v21 = vmul.f32 %v9103_v9, %v1131_v46  ;;  %v9150_v31 = vmul.f32 0.36787945, %v1216_v16 }
 0x1db   : > { %14382 = vst [vmem:[#allocation46_spill] sm:$0xff] %v9128_v25  ;;  %14386 = vst [vmem:[#allocation50_spill] sm:$0xff] %v9148_v37  ;;  %v9159_v19 = vmul.f32 0.36787945, %v9032_v60  ;;  %v9166_v16 = vmul.f32 0.36787945, %v9045_v63 }
 0x1dc   : > { %v9084_v11 = vmul.f32 %v1661_v55, %v9073_v47  ;;  %v1853_v55 = vmul.f32 0.36787945, %v1789_v33  ;;  %v1090_v60 = vmul.f32 0.36787945, %v8797_v36  ;;  %v9178_v17 = vmul.f32 0.36787945, %v1595_v44 }
 0x1dd   : > { %1679 = vadd.xlane.f32.xlu1 %v9048_v51 }
 0x1de   : > { %1165 = vadd.xlane.f32.xlu0 %v1131_v46  ;;  %v9096_v1 = vmul.f32 %v1725_v41, %v9084_v11  ;;  %v9113_v41 = vmul.f32 %v9086_v35, %v9014_v0  ;;  %v9131_v0 = vmul.f32 %v1213_v53, %v9043_v12  ;;  %v1089_v46 = vmul.f32 0.36787945, %v8888_v50 }
 0x1df   : > { %v1273_v50 = vmul.f32 0.36787945, %v9051_v30 }
 0x1e0   : > { %14377 = vst [vmem:[#allocation41_spill] sm:$0xff] %v9096_v1  ;;  %v9106_v15 = vmul.f32 %v1789_v33, %v9096_v1  ;;  %v1279_v33 = vmul.f32 0.36787945, %v1215_v58  ;;  %14383 = vst [vmem:[#allocation47_spill] sm:$0xff] %v9131_v0  ;;  %v1277_v58 = vmul.f32 0.36787945, %v1213_v53  ;;  %v9163_v53 = vmul.f32 %v9150_v31, %v9148_v37 }
 0x1e1   : > { %1289 = vadd.xlane.f32.xlu1 %v9067_v8  ;;  %v1153_v37 = vmul.f32 0.36787945, %v1089_v46  ;;  %v7862_v36 = vpop.eup %7861 }
 0x1e2   : > { %1107 = vadd.xlane.f32.xlu0 %v9063_v62  ;;  %14379 = vst [vmem:[#allocation43_spill] sm:$0xff] %v9106_v15  ;;  %v9122_v27 = vmul.f32 %v1853_v55, %v9106_v15  ;;  %v9145_v15 = vmul.f32 %v1279_v33, %v9128_v25  ;;  %v9155_v39 = vmul.f32 %v1277_v58, %v9131_v0  ;;  %v1341_v10 = vmul.f32 0.36787945, %v1277_v58 }
 0x1e3   : > { %v1643_v25 = vmul.f32 %v1595_v44, %v9036_v24  ;;  %v9173_v0 = vmul.f32 %v1089_v46, %v8896_v18  ;;  %v9185_v24 = vmul.f32 %v9166_v16, %v9063_v62  ;;  %v9198_v44 = vmin.f32 %v8712_v4, 49.0 }
 0x1e4   : > { %14381 = vst [vmem:[#allocation45_spill] sm:$0xff] %v9122_v27  ;;  %14385 = vst [vmem:[#allocation49_spill] sm:$0xff] %v9145_v15  ;;  %v9170_v32 = vmul.f32 %v1341_v10, %v9155_v39  ;;  %v1405_v58 = vmul.f32 0.36787945, %v1341_v10  ;;  %v9189_v10 = vmul.f32 %v9159_v19, %v9048_v51  ;;  %v1154_v46 = vmul.f32 0.36787945, %v1090_v60 }
 0x1e5   : > { %1355 = vadd.xlane.f32.xlu1 %v9093_v45  ;;  %14387 = vst [vmem:[#allocation51_spill] sm:$0xff] %v9155_v39  ;;  %14389 = vst [vmem:[#allocation53_spill] sm:$0xff] %v9173_v0  ;;  %v9195_v30 = vmul.f32 %v1153_v37, %v9173_v0  ;;  %v1321_v62 = vmul.f32 %v1273_v50, %v9067_v8  ;;  %v9204_v51 = vmul.f32 0.36787945, %v9070_v22  ;;  %v1343_v18 = vmul.f32 0.36787945, %v1279_v33 }
 0x1e6   : > { %1867 = vadd.xlane.f32.xlu0 %v9089_v57  ;;  %14388 = vst [vmem:[#allocation52_spill] sm:$0xff] %v9170_v32  ;;  %v9181_v1 = vmul.f32 %v1405_v58, %v9170_v32  ;;  %14393 = vst [vmem:[#allocation57_spill] sm:$0xff] %v9198_v44  ;;  %v1917_v58 = vmul.f32 0.36787945, %v1853_v55  ;;  %v1218_v0 = vmul.f32 0.36787945, %v1154_v46  ;;  %v9216_v32 = vmul.f32 %v9178_v17, %v1643_v25 }
 0x1e7   : > { %14392 = vst [vmem:[#allocation56_spill] sm:$0xff] %v9195_v30  ;;  %v6687_v8 = vadd.f32 -3.7333333, %v8621_v28  ;;  %7863 = vrsqrt.f32 %v9198_v44  ;;  %vm884_vm0 = vcmp.eq.f32.partialorder %v9198_v44, inf  ;;  %vm886_vm8 = vcmp.eq.f32.partialorder %v9198_v44, 0.0 }
 0x1e8   : > { %14390 = vst [vmem:[#allocation54_spill] sm:$0xff] %v9181_v1  ;;  %v9207_v1 = vmul.f32 0.36787945, %v8893_v13  ;;  %v9213_v55 = vmul.f32 %v1917_v58, %v9122_v27  ;;  %v9224_v13 = vmul.f32 %v1343_v18, %v9145_v15  ;;  %v1981_v28 = vmul.f32 0.36787945, %v1917_v58 }
 0x1e9   : > { %1231 = vadd.xlane.f32.xlu1 %v9113_v41  ;;  %v9236_v27 = vmul.f32 0.36787945, %v1273_v50  ;;  %v1212_v15 = vmul.f32 0.36787945, %v9086_v35 }
 0x1ea   : > { %1619 = vadd.xlane.f32.xlu0 %v9109_v52  ;;  %v9221_v22 = vmul.f32 %v9207_v1, %v8913_v40  ;;  %v1407_v40 = vmul.f32 0.36787945, %v1343_v18  ;;  %v9254_v18 = vmul.f32 0.36787945, %v9103_v9  ;;  %v880_v9 = vand.u32 2147483648, %v9099_v20 }
 0x1ed   : > { %1801 = vadd.xlane.f32.xlu1 %v9141_v48 }
 0x1ee   : > { %1229 = vadd.xlane.f32.xlu0 %v9137_v21 }
 0x1f1   : > { %1677 = vadd.xlane.f32.xlu1 %v1643_v25  ;;  %v876_v25 = vmul.f32 %v7862_v36, %v9099_v20  ;;  %v9247_v36 = vmul.f32 %v1981_v28, %v9213_v55 }
 0x1f2   : > { %1105 = vadd.xlane.f32.xlu0 %v9027_v61  ;;  %v9192_v61 = vmul.f32 %v1090_v60, %v8870_v43  ;;  %v1217_v60 = vmul.f32 0.36787945, %v1153_v37  ;;  %v1091_v37 = vmul.f32 0.36787945, %v8954_v2  ;;  %v1520_v2 = vmul.f32 -2.2959185, %v6687_v8 }
 0x1f3   : > { %14395 = vst [vmem:[#allocation59_spill] sm:$0xff] %v9247_v36  ;;  %v9250_v43 = vmul.f32 %v1407_v40, %v9224_v13  ;;  %v878_v50 = vsel %vm877_vm7, %v9099_v20, %v876_v25  ;;  %v1344_v40 = vmul.f32 0.36787945, %v9150_v31  ;;  %v1260_v25 = vmul.f32 %v1212_v15, %v9113_v41 }
 0x1f4   : > { %14391 = vst [vmem:[#allocation55_spill] sm:$0xff] %v9192_v61  ;;  %v9210_v39 = vmul.f32 %v1154_v46, %v9192_v61  ;;  %v9231_v46 = vmul.f32 %v1217_v60, %v9195_v30  ;;  %v9240_v61 = vmul.f32 %v1091_v37, %v8964_v34  ;;  %v9244_v30 = vmul.f32 %v9204_v51, %v9093_v45 }
 0x1f5   : > { %1743 = vadd.xlane.f32.xlu1 %v9189_v10  ;;  %14396 = vst [vmem:[#allocation60_spill] sm:$0xff] %v9250_v43  ;;  %v9263_v45 = vmul.f32 0.36787945, %v9116_v23  ;;  %v1281_v58 = vmul.f32 0.36787945, %v1217_v60  ;;  %v1536_v34 = vmul.f32 %v6687_v8, %v1520_v2  ;;  %v9278_v43 = vsel %vm879_vm1, %v880_v9, %v878_v50 }
 0x1f6   : > { %1171 = vadd.xlane.f32.xlu0 %v9185_v24  ;;  %14394 = vst [vmem:[#allocation58_spill] sm:$0xff] %v9210_v39  ;;  %v9228_v33 = vmul.f32 %v1218_v0, %v9210_v39  ;;  %v1155_v39 = vmul.f32 0.36787945, %v1091_v37  ;;  %v9269_v37 = vmul.f32 %v9236_v27, %v1321_v62  ;;  %v9282_v31 = vmul.f32 %v9254_v18, %v9137_v21 }
 0x1f7   : > { %v9276_v23 = vmul.f32 %v1281_v58, %v9231_v46  ;;  %v1345_v60 = vmul.f32 0.36787945, %v1281_v58  ;;  %v9288_v41 = vmul.f32 0.36787945, %v1212_v15  ;;  %v1408_v2 = vmul.f32 0.36787945, %v1344_v40 }
 0x1f8   : > { %v9257_v35 = vmul.f32 %v1155_v39, %v9240_v61  ;;  %v1219_v28 = vmul.f32 0.36787945, %v1155_v39  ;;  %v9292_v39 = vmul.f32 %v9263_v45, %v9141_v48  ;;  %v9295_v50 = vmul.f32 0.36787945, %v9057_v59 }
 0x1f9   : > { %1353 = vadd.xlane.f32.xlu1 %v1321_v62  ;;  %14398 = vst [vmem:[#allocation62_spill] sm:$0xff] %v9276_v23  ;;  %v9298_v21 = vmul.f32 %v1345_v60, %v9276_v23  ;;  %v1409_v58 = vmul.f32 0.36787945, %v1345_v60  ;;  %v1282_v9 = vmul.f32 0.36787945, %v1218_v0  ;;  %vm2073_vm7 = vcmask 7168  }
 0x1fa   : > { %1741 = vadd.xlane.f32.xlu0 %v9216_v32  ;;  %14397 = vst [vmem:[#allocation61_spill] sm:$0xff] %v9257_v35  ;;  %v9285_v62 = vmul.f32 %v1219_v28, %v9257_v35  ;;  %v1283_v8 = vmul.f32 0.36787945, %v1219_v28  ;;  %v1559_v20 = vmul.f32 1.442695, %v1536_v34  ;;  %v7864_v28 = vpop.eup %7863  ;;  %vm14427_vm1 = vcmp.le.f32.partialorder %v8705_v7, 49.0 }
 0x1fb   : > { %v9307_v48 = vmul.f32 %v1409_v58, %v9298_v21  ;;  %v1729_v59 = vmul.f32 0.36787945, %v9207_v1  ;;  %v903_v60 = vmul.f32 0.93333334, %v9278_v43  ;;  %v9317_v34 = vmul.f32 0.36787945, %v9166_v16 }
 0x1fc   : > { %v9301_v35 = vmul.f32 %v1283_v8, %v9285_v62  ;;  %v1347_v15 = vmul.f32 0.36787945, %v1283_v8  ;;  %v1346_v1 = vmul.f32 0.36787945, %v1282_v9  ;;  %7865 = vpow2.f32 %v1559_v20 }
 0x1fd   : > { %1419 = vadd.xlane.f32.xlu1 %v9244_v30  ;;  %14401 = vst [vmem:[#allocation65_spill] sm:$0xff] %v9307_v48  ;;  %v9326_v58 = vmul.f32 %v1729_v59, %v9221_v22  ;;  %v1793_v23 = vmul.f32 0.36787945, %v1729_v59  ;;  %v1724_v48 = vmul.f32 0.36787945, %v9159_v19  ;;  %v9353_v19 = vmul.f32 %v9317_v34, %v9185_v24 }
 0x1fe   : > { %1617 = vadd.xlane.f32.xlu0 %v9055_v26  ;;  %v9273_v26 = vmul.f32 %v1344_v40, %v9163_v53  ;;  %14399 = vst [vmem:[#allocation63_spill] sm:$0xff] %v9301_v35  ;;  %v9310_v40 = vmul.f32 %v1282_v9, %v9228_v33  ;;  %v9320_v0 = vmul.f32 %v1347_v15, %v9301_v35  ;;  %v1411_v8 = vmul.f32 0.36787945, %v1347_v15 }
 0x1ff   : > { %14404 = vst [vmem:[#allocation68_spill] sm:$0xff] %v9326_v58  ;;  %v883_v15 = vmul.f32 %v7864_v28, %v9198_v44  ;;  %v9341_v35 = vmul.f32 %v1793_v23, %v9326_v58  ;;  %v1410_v9 = vmul.f32 0.36787945, %v1346_v1  ;;  %v919_v59 = vsub.f32 0.21777777, %v903_v60 }
 0x200   : > { %v9304_v36 = vmul.f32 %v1408_v2, %v9273_v26  ;;  %14402 = vst [vmem:[#allocation66_spill] sm:$0xff] %v9310_v40  ;;  %14403 = vst [vmem:[#allocation67_spill] sm:$0xff] %v9320_v0  ;;  %v9323_v2 = vmul.f32 %v9288_v41, %v1260_v25  ;;  %v9334_v16 = vmul.f32 %v1411_v8, %v9320_v0  ;;  %v9357_v8 = vmul.f32 0.00033546262, %v9045_v63 }
 0x201   : > { %1295 = vadd.xlane.f32.xlu1 %v1260_v25  ;;  %v9338_v25 = vmul.f32 %v1346_v1, %v9310_v40  ;;  %14407 = vst [vmem:[#allocation71_spill] sm:$0xff] %v9341_v35  ;;  %v1772_v28 = vmul.f32 %v1724_v48, %v9189_v10  ;;  %v885_v60 = vsel %vm884_vm0, %v9198_v44, %v883_v15  ;;  %v935_v1 = vmul.f32 -2.2959185, %v919_v59 }
 0x202   : > { %1417 = vadd.xlane.f32.xlu0 %v9269_v37  ;;  %14400 = vst [vmem:[#allocation64_spill] sm:$0xff] %v9304_v36  ;;  %v9330_v36 = vmul.f32 %v9295_v50, %v9089_v57  ;;  %14405 = vst [vmem:[#allocation69_spill] sm:$0xff] %v9334_v16  ;;  %v9346_v57 = vmul.f32 0.36787945, %v9178_v17  ;;  %v887_v17 = vand.u32 2147483648, %v9198_v44  ;;  %v9373_v10 = vmul.f32 %v9357_v8, %v9109_v52 }
 0x203   : > { %14406 = vst [vmem:[#allocation70_spill] sm:$0xff] %v9338_v25  ;;  %v9349_v20 = vmul.f32 %v1410_v9, %v9338_v25  ;;  %v9363_v9 = vmul.f32 0.36787945, %v1724_v48  ;;  %v1402_v24 = vmul.f32 0.36787945, %v9204_v51  ;;  %vm14232_vm0 = vcmask 15360  }
 0x204   : > { %v9369_v63 = vmul.f32 %v9346_v57, %v9216_v32  ;;  %v888_v15 = vsel %vm886_vm8, %v887_v17, %v885_v60  ;;  %v1667_v59 = vmul.f32 0.36787945, %v8961_v5  ;;  %v1857_v48 = vmul.f32 0.36787945, %v1793_v23 }
 0x205   : > { %1865 = vadd.xlane.f32.xlu1 %v9292_v39  ;;  %14408 = vst [vmem:[#allocation72_spill] sm:$0xff] %v9349_v20  ;;  %v904_v20 = vmul.f32 0.93333334, %v888_v15  ;;  %v6695_v25 = vadd.f32 -3.7333333, %v888_v15  ;;  %v9382_v16 = vmul.f32 %v9363_v9, %v1772_v28  ;;  %v1450_v52 = vmul.f32 %v1402_v24, %v9244_v30  ;;  %v14412_v30 = vld [vmem:[#allocation16_spill] sm:$0xff] }
 0x206   : > { %1293 = vadd.xlane.f32.xlu0 %v9282_v31  ;;  %v9379_v51 = vmul.f32 %v1667_v59, %v8975_v38  ;;  %v965_v44 = vmul.f32 1.442695, %v935_v1  ;;  %v9386_v5 = vmul.f32 %v1857_v48, %v9341_v35  ;;  %v1921_v60 = vmul.f32 0.36787945, %v1857_v48 }
 0x207   : > { %v920_v32 = vsub.f32 0.21777777, %v904_v20  ;;  %v1528_v58 = vmul.f32 -2.2959185, %v6695_v25  ;;  %v1849_v15 = vmul.f32 0.36787945, %v9263_v45 }
 0x208   : > { %14409 = vst [vmem:[#allocation73_spill] sm:$0xff] %v9379_v51  ;;  %14410 = vst [vmem:[#allocation74_spill] sm:$0xff] %v9386_v5  ;;  %v1401_v23 = vmul.f32 0.36787945, %v9236_v27  ;;  %v9392_v20 = vmul.f32 %v1921_v60, %v9386_v5  ;;  %v1985_v1 = vmul.f32 0.36787945, %v1921_v60  ;;  %7867 = vpow2.f32 %v965_v44 }
 0x209   : > { %1931 = vadd.xlane.f32.xlu1 %v9330_v36  ;;  %v7866_v17 = vpop.eup %7865  ;;  %v936_v40 = vmul.f32 -2.2959185, %v920_v32  ;;  %v1544_v0 = vmul.f32 %v6695_v25, %v1528_v58  ;;  %v6686_v24 = vadd.f32 -3.7333333, %v14412_v30  ;;  %v9412_v25 = vmul.f32 0.36787945, %v9254_v18  ;;  %v1036_v18 = vpop.xlane.xlu1 %1035 }
 0x20a   : > { %1359 = vadd.xlane.f32.xlu0 %v9323_v2  ;;  %14411 = vst [vmem:[#allocation75_spill] sm:$0xff] %v9392_v20  ;;  %v9396_v35 = vmul.f32 %v7866_v17, %v8823_v42  ;;  %v9402_v58 = vmul.f32 %v1985_v1, %v9392_v20  ;;  %v1897_v42 = vmul.f32 %v1849_v15, %v9292_v39  ;;  %v9416_v32 = vmul.f32 0.36787945, %v9295_v50 }
 0x20b   : > { %v967_v38 = vmul.f32 1.442695, %v936_v40  ;;  %v1575_v48 = vmul.f32 1.442695, %v1544_v0  ;;  %v1519_v40 = vmul.f32 -2.2959185, %v6686_v24  ;;  %v1449_v0 = vmul.f32 %v1401_v23, %v9269_v37 }
 0x20c   : > { %14414 = vst [vmem:[#allocation76_spill] sm:$0xff] %v9402_v58  ;;  %v9433_v50 = vmul.f32 %v9416_v32, %v9330_v36  ;;  %v9447_v1 = vmul.f32 0.36787945, %v9357_v8  ;;  %vm2107_vm8 = vcmask 23552  }
 0x20d   : > { %1807 = vadd.xlane.f32.xlu1 %v1772_v28  ;;  %v1731_v28 = vmul.f32 0.36787945, %v1667_v59  ;;  %7869 = vpow2.f32 %v967_v38  ;;  %v6694_v59 = vadd.f32 -3.7333333, %v9278_v43  ;;  %v1535_v38 = vmul.f32 %v6686_v24, %v1519_v40 }
 0x20e   : > { %1235 = vadd.xlane.f32.xlu0 %v9353_v19  ;;  %7871 = vpow2.f32 %v1575_v48  ;;  %v9453_v24 = vmul.f32 0.36787945, %v1849_v15 }
 0x20f   : > { %v9399_v45 = vmul.f32 %v1731_v28, %v9379_v51  ;;  %v1795_v27 = vmul.f32 0.36787945, %v1731_v28  ;;  %v1527_v37 = vmul.f32 -2.2959185, %v6694_v59  ;;  %v1557_v43 = vmul.f32 1.442695, %v1535_v38 }
 0x211   : > { %1683 = vadd.xlane.f32.xlu1 %v9373_v10  ;;  %14413 = vst [vmem:[#allocation16_spill] sm:$0xff] %v9399_v45  ;;  %v9407_v44 = vmul.f32 %v1795_v27, %v9399_v45  ;;  %v1543_v17 = vmul.f32 %v6694_v59, %v1527_v37  ;;  %v1859_v28 = vmul.f32 0.36787945, %v1795_v27  ;;  %7873 = vpow2.f32 %v1557_v43 }
 0x212   : > { %1805 = vadd.xlane.f32.xlu0 %v9369_v63  ;;  %v9482_v37 = vmul.f32 0.36787945, %v9346_v57 }
 0x213   : > { %14415 = vst [vmem:[#allocation77_spill] sm:$0xff] %v9407_v44  ;;  %v9472_v59 = vmul.f32 %v1859_v28, %v9407_v44  ;;  %v1923_v43 = vmul.f32 0.36787945, %v1859_v28 }
 0x215   : > { %1467 = vadd.xlane.f32.xlu1 %v1450_v52  ;;  %v9423_v52 = vmul.f32 0.36787945, %v9288_v41  ;;  %v9429_v60 = vpop.eup %7867  ;;  %v9440_v41 = vmul.f32 0.36787945, %v9317_v34  ;;  %v8017_v34 = vld [vmem:[%s8434_s15 + $0x78] sm:$0xff]  ;;  %14418 = vst [vmem:[#allocation80_spill] sm:$0xff] %v9472_v59  ;;  %v9494_v4 = vmul.f32 %v1923_v43, %v9472_v59 }
 0x216   : > { %1871 = vadd.xlane.f32.xlu0 %v9382_v16  ;;  %v9458_v48 = vsel %vm14209_vm15, %v8017_v34, 0.0  ;;  %v1987_v28 = vmul.f32 0.36787945, %v1923_v43  ;;  %vm14249_vm15 = vcmask 39936  }
 0x217   : > { %v9463_v8 = vmul.f32 %v9440_v41, %v9353_v19  ;;  %14420 = vst [vmem:[#allocation82_spill] sm:$0xff] %v9494_v4  ;;  %v1404_v7 = vmul.f32 0.36787945, %v9423_v52 }
 0x219   : > { %1169 = vadd.xlane.f32.xlu1 %v9039_v29  ;;  %v9420_v29 = vmul.f32 %v9412_v25, %v9282_v31  ;;  %v9437_v31 = vmul.f32 %v9423_v52, %v9323_v2  ;;  %v1573_v2 = vmul.f32 1.442695, %v1543_v17  ;;  %v9486_v17 = vmul.f32 %v9447_v1, %v9373_v10 }
 0x21a   : > { %1623 = vadd.xlane.f32.xlu0 %v9396_v35  ;;  %v9502_v10 = vmul.f32 %v9482_v37, %v9369_v63 }
 0x21b   : > { %7875 = vpow2.f32 %v1573_v2  ;;  %v9489_v2 = vmul.f32 %v9453_v24, %v1897_v42  ;;  %v1452_v52 = vmul.f32 %v1404_v7, %v9437_v31 }
 0x21d   : > { %1929 = vadd.xlane.f32.xlu1 %v1897_v42  ;;  %v14421_v42 = vld [vmem:[#allocation18_spill] sm:$0xff] }
 0x21e   : > { %1465 = vadd.xlane.f32.xlu0 %v1449_v0  ;;  %v1607_v0 = vmul.f32 0.00033546262, %v9429_v60 }
 0x220   : > { %v9425_v39 = vpop.xlane.xlu0 %1033 }
 0x221   : > { %1111 = vadd.xlane.f32.xlu1 %v8841_v49  ;;  %v9444_v49 = vpop.eup %7869 }
 0x222   : > { %1357 = vadd.xlane.f32.xlu0 %v9420_v29  ;;  %14416 = vst [vmem:[#allocation78_spill] sm:$0xff] %v9444_v49  ;;  %v7872_v30 = vpop.eup %7871  ;;  %v1608_v27 = vmul.f32 0.00033546262, %v9444_v49  ;;  %v9509_v49 = vmul.f32 %v1987_v28, %v9494_v4 }
 0x223   : > { %v9466_v40 = vmul.f32 %v7872_v30, %v9458_v48  ;;  %v1671_v30 = vmul.f32 0.36787945, %v1607_v0  ;;  %v7874_v45 = vpop.eup %7873 }
 0x224   : > { %v9442_v23 = vpop.xlane.xlu0 %1039  ;;  %v1672_v57 = vmul.f32 0.36787945, %v1608_v27  ;;  %14423 = vst [vmem:[#allocation83_spill] sm:$0xff] %v9509_v49 }
 0x225   : > { %v9450_v36 = vpop.xlane.xlu1 %1037  ;;  %1995 = vadd.xlane.f32.xlu1 %v9433_v50  ;;  %14417 = vst [vmem:[#allocation79_spill] sm:$0xff] %v9466_v40  ;;  %v9479_v19 = vmul.f32 %v1608_v27, %v9466_v40  ;;  %v6689_v40 = vadd.f32 -3.7333333, %v14421_v42  ;;  %v1735_v44 = vmul.f32 0.36787945, %v1671_v30 }
 0x226   : > { %1423 = vadd.xlane.f32.xlu0 %v9437_v31  ;;  %v1736_v59 = vmul.f32 0.36787945, %v1672_v57  ;;  %v1977_v31 = vmul.f32 0.36787945, %v9453_v24 }
 0x227   : > { %14419 = vst [vmem:[#allocation81_spill] sm:$0xff] %v9479_v19  ;;  %v9506_v5 = vmul.f32 %v1672_v57, %v9479_v19  ;;  %v1522_v19 = vmul.f32 -2.2959185, %v6689_v40  ;;  %v1799_v57 = vmul.f32 0.36787945, %v1735_v44 }
 0x228   : > { %v1800_v43 = vmul.f32 0.36787945, %v1736_v59  ;;  %v7876_v49 = vpop.eup %7875  ;;  %v2025_v24 = vmul.f32 %v1977_v31, %v9489_v2 }
 0x229   : > { %v9469_v15 = vpop.xlane.xlu0 %1047  ;;  %1681 = vadd.xlane.f32.xlu1 %v9073_v47  ;;  %14422 = vst [vmem:[#allocation18_spill] sm:$0xff] %v9506_v5  ;;  %v9516_v27 = vmul.f32 %v1736_v59, %v9506_v5  ;;  %v1538_v5 = vmul.f32 %v6689_v40, %v1522_v19  ;;  %v1863_v51 = vmul.f32 0.36787945, %v1799_v57 }
 0x22a   : > { %1299 = vadd.xlane.f32.xlu0 %v9463_v8  ;;  %v9475_v38 = vpop.xlane.xlu1 %1043  ;;  %v1864_v28 = vmul.f32 0.36787945, %v1800_v43 }
 0x22b   : > { %14425 = vst [vmem:[#allocation85_spill] sm:$0xff] %v9516_v27  ;;  %v9520_v20 = vmul.f32 %v1800_v43, %v9516_v27  ;;  %v9540_v27 = vmul.f32 %v7874_v45, %v8829_v54  ;;  %v1563_v19 = vmul.f32 1.442695, %v1538_v5  ;;  %v1726_v5 = vmul.f32 0.36787945, %v9447_v1 }
 0x22c   : > { %v1928_v43 = vmul.f32 0.36787945, %v1864_v28 }
 0x22d   : > { %v9491_v34 = vpop.xlane.xlu0 %1045  ;;  %1747 = vadd.xlane.f32.xlu1 %v9486_v17  ;;  %14426 = vst [vmem:[#allocation86_spill] sm:$0xff] %v9520_v20  ;;  %7877 = vpow2.f32 %v1563_v19 }
 0x22e   : > { %1993 = vadd.xlane.f32.xlu0 %v9489_v2  ;;  %v9497_v47 = vpop.xlane.xlu1 %1041  ;;  %v9609_v2 = vmul.f32 0.36787945, %v1726_v5 }
 0x231   : > { %v9511_v58 = vpop.xlane.xlu0 %1051  ;;  %1233 = vadd.xlane.f32.xlu1 %v9043_v12 }
 0x232   : > { %14424 = vst [vmem:[#allocation84_spill] sm:$0xff] %v9511_v58  ;;  %1869 = vadd.xlane.f32.xlu0 %v9502_v10  ;;  %v1100_v63 = vpop.xlane.xlu1 %1099  ;;  %v8018_v58 = vld [vmem:[%s8434_s15 + $0x70] sm:$0xff] }
 0x233   : > { %v2075_v42 = vsel %vm2073_vm7, %v1036_v18, %v1100_v63  ;;  %v9527_v12 = vsel %vm14427_vm1, %v8018_v58, 0.0  ;;  %v9537_v63 = vmul.f32 %v1864_v28, %v9520_v20  ;;  %v1978_v58 = vmul.f32 0.36787945, %v9416_v32 }
 0x234   : > { %v9534_v59 = vmul.f32 %v7876_v49, %v9527_v12  ;;  %v1992_v49 = vmul.f32 0.36787945, %v1928_v43  ;;  %v9559_v32 = vmul.f32 0.36787945, %v9363_v9  ;;  %vm14250_vm1 = vcmask 31744  }
 0x235   : > { %v9522_v4 = vpop.xlane.xlu0 %1049  ;;  %1109 = vadd.xlane.f32.xlu1 %v8863_v3  ;;  %14429 = vst [vmem:[#allocation88_spill] sm:$0xff] %v9537_v63  ;;  %v9548_v3 = vmul.f32 %v1928_v43, %v9537_v63  ;;  %v1927_v43 = vmul.f32 0.36787945, %v1863_v51 }
 0x236   : > { %1745 = vadd.xlane.f32.xlu0 %v9084_v11  ;;  %v9531_v18 = vpop.xlane.xlu1 %1611  ;;  %14428 = vst [vmem:[#allocation87_spill] sm:$0xff] %v9534_v59  ;;  %v9545_v11 = vmul.f32 %v1607_v0, %v9534_v59  ;;  %v9575_v7 = vmul.f32 %v9559_v32, %v9382_v16 }
 0x237   : > { %14431 = vst [vmem:[#allocation90_spill] sm:$0xff] %v9548_v3  ;;  %v9556_v45 = vmul.f32 %v1992_v49, %v9548_v3 }
 0x238   : > { %14430 = vst [vmem:[#allocation89_spill] sm:$0xff] %v9545_v11  ;;  %v9553_v54 = vmul.f32 %v1671_v30, %v9545_v11 }
 0x239   : > { %1175 = vadd.xlane.f32.xlu1 %v9076_v56  ;;  %14433 = vst [vmem:[#allocation92_spill] sm:$0xff] %v9556_v45  ;;  %v9562_v40 = vpop.xlane.xlu0 %1055  ;;  %v2026_v56 = vmul.f32 %v1978_v58, %v9433_v50  ;;  %v1991_v50 = vmul.f32 0.36787945, %v1927_v43 }
 0x23a   : > { %1621 = vadd.xlane.f32.xlu0 %v9540_v27  ;;  %v1098_v28 = vpop.xlane.xlu1 %1097  ;;  %14432 = vst [vmem:[#allocation91_spill] sm:$0xff] %v9553_v54  ;;  %14434 = vst [vmem:[#allocation93_spill] sm:$0xff] %v9562_v40  ;;  %v9568_v30 = vmul.f32 %v1735_v44, %v9553_v54  ;;  %v14460_v40 = vld [vmem:[#allocation56_spill] sm:$0xff] }
 0x23b   : > { %v2074_v0 = vsel %vm2073_vm7, %v9425_v39, %v1098_v28 }
 0x23c   : > { %14435 = vst [vmem:[#allocation94_spill] sm:$0xff] %v9568_v30  ;;  %v9571_v9 = vmul.f32 %v1799_v57, %v9568_v30 }
 0x23d   : > { %2043 = vadd.xlane.f32.xlu1 %v2026_v56 }
 0x23e   : > { %1471 = vadd.xlane.f32.xlu0 %v1452_v52  ;;  %v1164_v49 = vpop.xlane.xlu1 %1163  ;;  %14436 = vst [vmem:[#allocation95_spill] sm:$0xff] %v9571_v9  ;;  %v9581_v44 = vmul.f32 %v1863_v51, %v9571_v9  ;;  %v1774_v51 = vmul.f32 %v1726_v5, %v9486_v17  ;;  %v14440_v17 = vld [vmem:[#allocation41_spill] sm:$0xff]  ;;  %v14452_v9 = vld [vmem:[#allocation52_spill] sm:$0xff] }
 0x23f   : > { %v2092_v39 = vsel %vm14232_vm0, %v2075_v42, %v1164_v49  ;;  %v9591_v42 = vmul.f32 0.00033546262, %v8772_v14 }
 0x240   : > { %14437 = vst [vmem:[#allocation96_spill] sm:$0xff] %v9581_v44  ;;  %v9583_v58 = vpop.xlane.xlu0 %1053  ;;  %v9588_v16 = vmul.f32 %v1927_v43, %v9581_v44 }
 0x241   : > { %1935 = vadd.xlane.f32.xlu1 %v9575_v7  ;;  %v9604_v14 = vmul.f32 %v9591_v42, %v9396_v35 }
 0x242   : > { %1173 = vadd.xlane.f32.xlu0 %v9079_v6  ;;  %v1162_v57 = vpop.xlane.xlu1 %1161  ;;  %14438 = vst [vmem:[#allocation97_spill] sm:$0xff] %v9588_v16  ;;  %v9597_v28 = vmul.f32 %v1991_v50, %v9588_v16  ;;  %v9629_v50 = vmul.f32 0.36787945, %v9440_v41 }
 0x243   : > { %v2091_v1 = vsel %vm14232_vm0, %v2074_v0, %v1162_v57  ;;  %v9607_v0 = vmul.f32 0.36787945, %v9412_v25  ;;  %v7878_v25 = vpop.eup %7877  ;;  %v14442_v57 = vld [vmem:[#allocation25_spill] sm:$0xff] }
 0x244   : > { %14439 = vst [vmem:[#allocation98_spill] sm:$0xff] %v9597_v28  ;;  %v14446_v28 = vld [vmem:[#allocation48_spill] sm:$0xff] }
 0x245   : > { %1811 = vadd.xlane.f32.xlu1 %v1774_v51  ;;  %v9617_v49 = vmul.f32 %v9607_v0, %v9420_v29  ;;  %v9632_v29 = vmul.f32 %v7878_v25, %v14442_v57  ;;  %v14444_v25 = vld [vmem:[#allocation44_spill] sm:$0xff]  ;;  %v1403_v20 = vmul.f32 0.36787945, %v9607_v0 }
 0x246   : > { %2041 = vadd.xlane.f32.xlu0 %v2025_v24  ;;  %v1228_v6 = vpop.xlane.xlu1 %1227 }
 0x247   : > { %v9599_v52 = vpop.xlane.xlu0 %1609  ;;  %v2109_v56 = vsel %vm2107_vm8, %v2092_v39, %v1228_v6  ;;  %v9620_v39 = vmul.f32 %v9609_v2, %v1774_v51  ;;  %v14443_v51 = vld [vmem:[#allocation47_spill] sm:$0xff] }
 0x249   : > { %1687 = vadd.xlane.f32.xlu1 %v9604_v14 }
 0x24a   : > { %1809 = vadd.xlane.f32.xlu0 %v14440_v17  ;;  %v1104_v43 = vpop.xlane.xlu1 %1103  ;;  %v9641_v17 = vmul.f32 %v9629_v50, %v9463_v8  ;;  %v14445_v8 = vld [vmem:[#allocation50_spill] sm:$0xff] }
 0x24b   : > { %v9613_v19 = vpop.xlane.xlu0 %1675  ;;  %v2077_v35 = vsel %vm2073_vm7, %v9442_v23, %v1104_v43  ;;  %v1851_v43 = vmul.f32 0.36787945, %v9482_v37 }
 0x24d   : > { %1421 = vadd.xlane.f32.xlu1 %v9617_v49  ;;  %v1899_v57 = vmul.f32 %v1851_v43, %v9502_v10 }
 0x24e   : > { %1875 = vadd.xlane.f32.xlu0 %v9620_v39  ;;  %v1226_v5 = vpop.xlane.xlu1 %1225 }
 0x24f   : > { %v9626_v31 = vpop.xlane.xlu0 %1059  ;;  %v2108_v24 = vsel %vm2107_vm8, %v2091_v1, %v1226_v5 }
 0x250   : > { %14441 = vst [vmem:[#allocation41_spill] sm:$0xff] %v9626_v31  ;;  %v1915_v31 = vmul.f32 0.36787945, %v1851_v43 }
 0x251   : > { %1297 = vadd.xlane.f32.xlu1 %v14443_v51 }
 0x252   : > { %1627 = vadd.xlane.f32.xlu0 %v9632_v29  ;;  %v1102_v6 = vpop.xlane.xlu1 %1101  ;;  %v1979_v0 = vmul.f32 0.36787945, %v1915_v31 }
 0x253   : > { %v9637_v23 = vpop.xlane.xlu0 %1673  ;;  %v2076_v41 = vsel %vm2073_vm7, %v9450_v36, %v1102_v6  ;;  %v14447_v6 = vld [vmem:[#allocation22_spill] sm:$0xff] }
 0x254   : > { %v1599_v16 = vmul.f32 0.00033546262, %v14447_v6 }
 0x255   : > { %1363 = vadd.xlane.f32.xlu1 %v9641_v17 }
 0x256   : > { %1237 = vadd.xlane.f32.xlu0 %v14444_v25  ;;  %v1292_v5 = vpop.xlane.xlu1 %1291  ;;  %v1963_v25 = vmul.f32 %v1915_v31, %v1899_v57  ;;  %v1663_v43 = vmul.f32 0.36787945, %v1599_v16 }
 0x257   : > { %v9648_v1 = vpop.xlane.xlu0 %1739  ;;  %v2126_v51 = vsel %vm14250_vm1, %v2109_v56, %v1292_v5  ;;  %v1647_v56 = vmul.f32 %v1599_v16, %v9540_v27  ;;  %v1916_v5 = vmul.f32 0.36787945, %v9559_v32  ;;  %v1664_v32 = vmul.f32 0.36787945, %v9591_v42  ;;  %v14451_v16 = vld [vmem:[#allocation28_spill] sm:$0xff] }
 0x259   : > { %1239 = vadd.xlane.f32.xlu1 %v14446_v28  ;;  %v14449_v28 = vld [vmem:[#allocation43_spill] sm:$0xff] }
 0x25a   : > { %1303 = vadd.xlane.f32.xlu0 %v14445_v8  ;;  %v1168_v36 = vpop.xlane.xlu1 %1167  ;;  %v14450_v8 = vld [vmem:[#allocation26_spill] sm:$0xff] }
 0x25b   : > { %v9654_v37 = vpop.xlane.xlu0 %1615  ;;  %v2094_v44 = vsel %vm14232_vm0, %v2077_v35, %v1168_v36  ;;  %v1711_v35 = vmul.f32 %v1663_v43, %v1647_v56 }
 0x25d   : > { %1933 = vadd.xlane.f32.xlu1 %v1899_v57  ;;  %v1964_v57 = vmul.f32 %v1916_v5, %v9575_v7  ;;  %v1712_v7 = vmul.f32 %v1664_v32, %v9604_v14 }
 0x25e   : > { %1997 = vadd.xlane.f32.xlu0 %v1963_v25  ;;  %v9660_v10 = vpop.xlane.xlu1 %1737 }
 0x25f   : > { %v9658_v45 = vpop.xlane.xlu0 %1057 }
 0x260   : > { %14448 = vst [vmem:[#allocation25_spill] sm:$0xff] %v9658_v45 }
 0x261   : > { %1115 = vadd.xlane.f32.xlu1 %v14450_v8 }
 0x262   : > { %1873 = vadd.xlane.f32.xlu0 %v14449_v28  ;;  %v9668_v6 = vpop.xlane.xlu1 %1613 }
 0x263   : > { %v9666_v3 = vpop.xlane.xlu0 %1803 }
 0x265   : > { %1999 = vadd.xlane.f32.xlu1 %v1964_v57 }
 0x266   : > { %1749 = vadd.xlane.f32.xlu0 %v1711_v35  ;;  %v9671_v45 = vpop.xlane.xlu1 %1679 }
 0x267   : > { %v1166_v36 = vpop.xlane.xlu0 %1165 }
 0x268   : > { %v2093_v27 = vsel %vm14232_vm0, %v2076_v41, %v1166_v36  ;;  %v1451_v36 = vmul.f32 %v1403_v20, %v9617_v49  ;;  %v2027_v49 = vmul.f32 %v1979_v0, %v1963_v25  ;;  %v1980_v25 = vmul.f32 0.36787945, %v1916_v5 }
 0x269   : > { %1685 = vadd.xlane.f32.xlu1 %v1647_v56 }
 0x26a   : > { %1625 = vadd.xlane.f32.xlu0 %v14451_v16  ;;  %v1290_v8 = vpop.xlane.xlu1 %1289  ;;  %v14453_v16 = vld [vmem:[#allocation46_spill] sm:$0xff] }
 0x26b   : > { %v1108_v28 = vpop.xlane.xlu0 %1107  ;;  %v2125_v59 = vsel %vm14250_vm1, %v2108_v24, %v1290_v8  ;;  %v14455_v8 = vld [vmem:[#allocation51_spill] sm:$0xff] }
 0x26c   : > { %v2079_v63 = vsel %vm2073_vm7, %v9475_v38, %v1108_v28  ;;  %v1342_v28 = vmul.f32 0.36787945, %v9629_v50 }
 0x26d   : > { %1751 = vadd.xlane.f32.xlu1 %v1712_v7 }
 0x26e   : > { %1425 = vadd.xlane.f32.xlu0 %v14452_v9  ;;  %v1356_v42 = vpop.xlane.xlu1 %1355  ;;  %v14454_v9 = vld [vmem:[#allocation53_spill] sm:$0xff] }
 0x26f   : > { %v9682_v41 = vpop.xlane.xlu0 %1867  ;;  %v2143_v56 = vsel %vm14249_vm15, %v2126_v51, %v1356_v42  ;;  %v1727_v51 = vmul.f32 0.36787945, %v1663_v43  ;;  %v1390_v42 = vmul.f32 %v1342_v28, %v9641_v17 }
 0x271   : > { %1469 = vadd.xlane.f32.xlu1 %v1451_v36  ;;  %v1728_v36 = vmul.f32 0.36787945, %v1664_v32  ;;  %v1775_v50 = vmul.f32 %v1727_v51, %v1711_v35  ;;  %v14458_v35 = vld [vmem:[#allocation23_spill] sm:$0xff] }
 0x272   : > { %1301 = vadd.xlane.f32.xlu0 %v14453_v16  ;;  %v1232_v24 = vpop.xlane.xlu1 %1231  ;;  %v900_v32 = vmul.f32 0.93333334, %v14458_v35 }
 0x273   : > { %v9687_v38 = vpop.xlane.xlu0 %1619  ;;  %v2111_v14 = vsel %vm2107_vm8, %v2094_v44, %v1232_v24  ;;  %v1776_v16 = vmul.f32 %v1728_v36, %v1712_v7  ;;  %v9701_v24 = vmul.f32 0.36787945, %v1728_v36 }
 0x275   : > { %1361 = vadd.xlane.f32.xlu1 %v14455_v8  ;;  %v9708_v17 = vmul.f32 %v9701_v24, %v1776_v16 }
 0x276   : > { %1177 = vadd.xlane.f32.xlu0 %v14454_v9  ;;  %v9693_v54 = vpop.xlane.xlu1 %1801  ;;  %v14456_v9 = vld [vmem:[#allocation27_spill] sm:$0xff] }
 0x277   : > { %v1230_v30 = vpop.xlane.xlu0 %1229 }
 0x278   : > { %v2110_v20 = vsel %vm2107_vm8, %v2093_v27, %v1230_v30  ;;  %v14457_v27 = vld [vmem:[#allocation55_spill] sm:$0xff] }
 0x279   : > { %1427 = vadd.xlane.f32.xlu1 %v1390_v42 }
 0x27a   : > { %2045 = vadd.xlane.f32.xlu0 %v2027_v49  ;;  %v9699_v31 = vpop.xlane.xlu1 %1677  ;;  %v9716_v49 = vmul.f32 0.36787945, %v9609_v2 }
 0x27b   : > { %v9697_v44 = vpop.xlane.xlu0 %1105 }
 0x27d   : > { %1113 = vadd.xlane.f32.xlu1 %v14456_v9  ;;  %v2028_v9 = vmul.f32 %v1980_v25, %v1964_v57  ;;  %v14461_v25 = vld [vmem:[#allocation24_spill] sm:$0xff] }
 0x27e   : > { %1813 = vadd.xlane.f32.xlu0 %v1775_v50  ;;  %v9704_v8 = vpop.xlane.xlu1 %1743 }
 0x27f   : > { %v1172_v43 = vpop.xlane.xlu0 %1171 }
 0x280   : > { %v2096_v30 = vsel %vm14232_vm0, %v2079_v63, %v1172_v43  ;;  %v14459_v63 = vld [vmem:[#allocation54_spill] sm:$0xff]  ;;  %v916_v43 = vsub.f32 0.21777777, %v900_v32 }
 0x281   : > { %1179 = vadd.xlane.f32.xlu1 %v14457_v27  ;;  %v9724_v27 = vmul.f32 %v9716_v49, %v9620_v39 }
 0x282   : > { %1879 = vadd.xlane.f32.xlu0 %v9708_v17  ;;  %v1354_v0 = vpop.xlane.xlu1 %1353 }
 0x283   : > { %v9713_v7 = vpop.xlane.xlu0 %1741  ;;  %v2142_v36 = vsel %vm14249_vm15, %v2125_v59, %v1354_v0  ;;  %v932_v59 = vmul.f32 -2.2959185, %v916_v43  ;;  %v9730_v0 = vmul.f32 0.00033546262, %v14461_v25  ;;  %v9746_v43 = vmul.f32 0.36787945, %v1727_v51 }
 0x285   : > { %2047 = vadd.xlane.f32.xlu1 %v2028_v9  ;;  %v959_v39 = vmul.f32 1.442695, %v932_v59  ;;  %v9754_v59 = vmul.f32 %v9746_v43, %v1775_v50  ;;  %v14463_v50 = vld [vmem:[#allocation33_spill] sm:$0xff] }
 0x286   : > { %1473 = vadd.xlane.f32.xlu0 %v14459_v63  ;;  %v1420_v11 = vpop.xlane.xlu1 %1419 }
 0x287   : > { %v9720_v5 = vpop.xlane.xlu0 %1617  ;;  %v2160_v35 = vsel %vm14248_vm2, %v2143_v56, %v1420_v11  ;;  %7879 = vpow2.f32 %v959_v39  ;;  %v14465_v39 = vld [vmem:[#allocation45_spill] sm:$0xff] }
 0x289   : > { %1939 = vadd.xlane.f32.xlu1 %v9724_v27 }
 0x28a   : > { %1241 = vadd.xlane.f32.xlu0 %v14460_v40  ;;  %v1296_v57 = vpop.xlane.xlu1 %1295  ;;  %v9741_v40 = vmul.f32 %v9730_v0, %v9632_v29 }
 0x28b   : > { %v1418_v2 = vpop.xlane.xlu0 %1417  ;;  %v2128_v9 = vsel %vm14250_vm1, %v2111_v14, %v1296_v57  ;;  %v901_v57 = vmul.f32 0.93333334, %v14463_v50 }
 0x28c   : > { %v9733_v32 = vsel %vm14248_vm2, %v2142_v36, %v1418_v2  ;;  %v1406_v36 = vmul.f32 0.36787945, %v1342_v28 }
 0x28d   : > { %1815 = vadd.xlane.f32.xlu1 %v1776_v16 }
 0x28e   : > { %1307 = vadd.xlane.f32.xlu0 %v9228_v33  ;;  %v9737_v56 = vpop.xlane.xlu1 %1865  ;;  %v1454_v29 = vmul.f32 %v1406_v36, %v1390_v42  ;;  %v14462_v42 = vld [vmem:[#allocation58_spill] sm:$0xff]  ;;  %v2078_v36 = vsel %vm2073_vm7, %v9497_v47, %v9697_v44 }
 0x28f   : > { %v1294_v11 = vpop.xlane.xlu0 %1293 }
 0x290   : > { %v9744_v63 = vsel %vm14250_vm1, %v2110_v20, %v1294_v11  ;;  %v917_v11 = vsub.f32 0.21777777, %v901_v57 }
 0x291   : > { %1691 = vadd.xlane.f32.xlu1 %v9741_v40 }
 0x292   : > { %2001 = vadd.xlane.f32.xlu0 %v9213_v55  ;;  %v1932_v14 = vpop.xlane.xlu1 %1931  ;;  %v933_v50 = vmul.f32 -2.2959185, %v917_v11 }
 0x293   : > { %v1360_v33 = vpop.xlane.xlu0 %1359 }
 0x294   : > { %v9751_v16 = vsel %vm14249_vm15, %v2128_v9, %v1360_v33  ;;  %v9774_v9 = vpop.eup %7879 }
 0x295   : > { %1475 = vadd.xlane.f32.xlu1 %v1454_v29  ;;  %v14466_v29 = vld [vmem:[#allocation30_spill] sm:$0xff]  ;;  %v1092_v44 = vmul.f32 0.36787945, %v9774_v9 }
 0x296   : > { %1877 = vadd.xlane.f32.xlu0 %v9754_v59  ;;  %v9757_v20 = vpop.xlane.xlu1 %1807 }
 0x297   : > { %v1236_v51 = vpop.xlane.xlu0 %1235 }
 0x298   : > { %v9760_v55 = vsel %vm2107_vm8, %v2096_v30, %v1236_v51  ;;  %v1918_v51 = vmul.f32 0.36787945, %v9716_v49 }
 0x299   : > { %1367 = vadd.xlane.f32.xlu1 %v9163_v53 }
 0x29a   : > { %1753 = vadd.xlane.f32.xlu0 %v9221_v22  ;;  %v9766_v2 = vpop.xlane.xlu1 %1683  ;;  %v1966_v49 = vmul.f32 %v1918_v51, %v9724_v27 }
 0x29b   : > { %v9764_v28 = vpop.xlane.xlu0 %1805 }
 0x29d   : > { %1243 = vadd.xlane.f32.xlu1 %v14462_v42 }
 0x29e   : > { %1429 = vadd.xlane.f32.xlu0 %v9224_v13  ;;  %v1468_v30 = vpop.xlane.xlu1 %1467 }
 0x29f   : > { %v9771_v25 = vpop.xlane.xlu0 %1871  ;;  %v2177_v22 = vsel %vm14247_vm14, %v2160_v35, %v1468_v30 }
 0x2a0   : > { %v2193_v53 = vsel %vm14464_vm10, %v2177_v22, %v9531_v18  ;;  %vm14235_vm10 = vcmask 105472  }
 0x2a1   : > { %v2210_v13 = vsel %vm14246_vm13, %v2193_v53, %v9613_v19  ;;  %1937 = vadd.xlane.f32.xlu1 %v14465_v39  ;;  %v961_v53 = vmul.f32 1.442695, %v933_v50 }
 0x2a2   : > { %1305 = vadd.xlane.f32.xlu0 %v9231_v46  ;;  %v2227_v33 = vsel %vm14245_vm12, %v2210_v13, %v9648_v1  ;;  %v1170_v18 = vpop.xlane.xlu1 %1169  ;;  %v1076_v46 = vmul.f32 %v9774_v9, %v14466_v29 }
 0x2a3   : > { %v9785_v35 = vpop.xlane.xlu0 %1623  ;;  %v2095_v19 = vsel %vm14232_vm0, %v2078_v36, %v1170_v18  ;;  %v2244_v42 = vsel %vm14238_vm11, %v2227_v33, %v9666_v3  ;;  %v1156_v36 = vmul.f32 0.36787945, %v1092_v44  ;;  %v14469_v33 = vld [vmem:[#allocation60_spill] sm:$0xff]  ;;  %v14470_v18 = vld [vmem:[#allocation29_spill] sm:$0xff]  ;;  %7881 = vpow2.f32 %v961_v53 }
 0x2a4   : > { %v2261_v47 = vsel %vm14236_vm9, %v2244_v42, %v9682_v41 }
 0x2a5   : > { %1119 = vadd.xlane.f32.xlu1 %v1076_v46  ;;  %v2278_v1 = vsel %vm14235_vm10, %v2261_v47, %v1932_v14  ;;  %v1140_v14 = vmul.f32 %v1092_v44, %v1076_v46  ;;  %v9826_v42 = vmul.f32 0.36787945, %v1156_v36  ;;  %v14471_v47 = vld [vmem:[#allocation61_spill] sm:$0xff] }
 0x2a6   : > { %1181 = vadd.xlane.f32.xlu0 %v9240_v61  ;;  %v1930_v30 = vpop.xlane.xlu1 %1929  ;;  %v14468_v61 = vld [vmem:[#allocation59_spill] sm:$0xff]  ;;  %v14472_v44 = vld [vmem:[#allocation49_spill] sm:$0xff] }
 0x2a7   : > { %v1466_v57 = vpop.xlane.xlu0 %1465  ;;  %v9821_v46 = vmul.f32 %v1156_v36, %v1140_v14 }
 0x2a8   : > { %v2176_v22 = vsel %vm14247_vm14, %v9733_v32, %v1466_v57 }
 0x2a9   : > { %v2192_v3 = vsel %vm14467_vm6, %v2176_v22, %v9599_v52  ;;  %2003 = vadd.xlane.f32.xlu1 %v1966_v49  ;;  %vm14234_vm6 = vcmask 113664  }
 0x2aa   : > { %v2209_v41 = vsel %vm14246_vm13, %v2192_v3, %v9637_v23  ;;  %2049 = vadd.xlane.f32.xlu0 %v14468_v61  ;;  %v1112_v11 = vpop.xlane.xlu1 %1111 }
 0x2ab   : > { %v1358_v13 = vpop.xlane.xlu0 %1357  ;;  %v2226_v39 = vsel %vm14245_vm12, %v2209_v41, %v9660_v10 }
 0x2ac   : > { %v9812_v27 = vsel %vm14249_vm15, %v9744_v63, %v1358_v13  ;;  %v2243_v52 = vsel %vm14238_vm11, %v2226_v39, %v9693_v54 }
 0x2ad   : > { %v2260_v23 = vsel %vm14236_vm9, %v2243_v52, %v9737_v56  ;;  %1689 = vadd.xlane.f32.xlu1 %v14470_v18  ;;  %v1855_v56 = vmul.f32 0.36787945, %v9746_v43  ;;  %v14473_v43 = vld [vmem:[#allocation31_spill] sm:$0xff] }
 0x2ae   : > { %v2277_v32 = vsel %vm14235_vm10, %v2260_v23, %v1930_v30  ;;  %1477 = vadd.xlane.f32.xlu0 %v14469_v33  ;;  %v1996_v29 = vpop.xlane.xlu1 %1995  ;;  %v902_v3 = vmul.f32 0.93333334, %v14473_v43  ;;  %v1982_v23 = vmul.f32 0.36787945, %v1918_v51 }
 0x2af   : > { %v1424_v10 = vpop.xlane.xlu0 %1423  ;;  %v2295_v54 = vsel %vm14234_vm6, %v2278_v1, %v1996_v29  ;;  %v9842_v1 = vmul.f32 %v1855_v56, %v9754_v59  ;;  %v9844_v22 = vmul.f32 0.36787945, %v1855_v56  ;;  %v14474_v59 = vld [vmem:[#allocation34_spill] sm:$0xff] }
 0x2b0   : > { %v2162_v63 = vsel %vm14248_vm2, %v9751_v16, %v1424_v10  ;;  %v9839_v16 = vmul.f32 %v9826_v42, %v9821_v46  ;;  %v918_v13 = vsub.f32 0.21777777, %v902_v3  ;;  %v14475_v10 = vld [vmem:[#allocation40_spill] sm:$0xff] }
 0x2b1   : > { %1365 = vadd.xlane.f32.xlu1 %v14472_v44  ;;  %v9854_v53 = vmul.f32 %v9844_v22, %v9842_v1  ;;  %v9874_v44 = vmul.f32 0.36787945, %v9701_v24 }
 0x2b2   : > { %1245 = vadd.xlane.f32.xlu0 %v14471_v47  ;;  %v9831_v57 = vpop.xlane.xlu1 %1681  ;;  %v2030_v47 = vmul.f32 %v1982_v23, %v1966_v49 }
 0x2b3   : > { %v1300_v50 = vpop.xlane.xlu0 %1299  ;;  %v9887_v49 = vmul.f32 %v9874_v44, %v9708_v17  ;;  %v14478_v17 = vld [vmem:[#allocation65_spill] sm:$0xff] }
 0x2b4   : > { %v9835_v30 = vsel %vm14250_vm1, %v9760_v55, %v1300_v50 }
 0x2b5   : > { %1431 = vadd.xlane.f32.xlu1 %v9273_v26  ;;  %v9860_v26 = vpop.eup %7881 }
 0x2b6   : > { %1311 = vadd.xlane.f32.xlu0 %v9839_v16  ;;  %v9849_v61 = vpop.xlane.xlu1 %1747  ;;  %v9870_v29 = vmul.f32 %v9860_v26, %v14475_v10  ;;  %v1093_v56 = vmul.f32 0.36787945, %v9860_v26  ;;  %v14480_v10 = vld [vmem:[#allocation67_spill] sm:$0xff] }
 0x2b7   : > { %v1994_v41 = vpop.xlane.xlu0 %1993 }
 0x2b8   : > { %v2294_v55 = vsel %vm14234_vm6, %v2277_v32, %v1994_v41  ;;  %v934_v32 = vmul.f32 -2.2959185, %v918_v13  ;;  %v1141_v50 = vmul.f32 %v1093_v56, %v9870_v29 }
 0x2b9   : > { %1117 = vadd.xlane.f32.xlu1 %v14474_v59  ;;  %v14479_v59 = vld [vmem:[#allocation64_spill] sm:$0xff] }
 0x2ba   : > { %2005 = vadd.xlane.f32.xlu0 %v9854_v53  ;;  %v1234_v36 = vpop.xlane.xlu1 %1233 }
 0x2bb   : > { %v9858_v39 = vpop.xlane.xlu0 %1869  ;;  %v9863_v52 = vsel %vm2107_vm8, %v2095_v19, %v1234_v36 }
 0x2bd   : > { %1183 = vadd.xlane.f32.xlu1 %v1140_v14  ;;  %v963_v14 = vmul.f32 1.442695, %v934_v32  ;;  %v1157_v32 = vmul.f32 0.36787945, %v1093_v56  ;;  %v14483_v56 = vld [vmem:[#allocation42_spill] sm:$0xff] }
 0x2be   : > { %1433 = vadd.xlane.f32.xlu0 %v9298_v21  ;;  %v1110_v18 = vpop.xlane.xlu1 %1109  ;;  %v2081_v21 = vsel %vm2073_vm7, %v9469_v15, %v1112_v11 }
 0x2bf   : > { %v9866_v33 = vpop.xlane.xlu0 %1745  ;;  %7883 = vpow2.f32 %v963_v14  ;;  %v2080_v13 = vsel %vm2073_vm7, %v9491_v34, %v1110_v18  ;;  %v14481_v34 = vld [vmem:[#allocation66_spill] sm:$0xff]  ;;  %v983_v14 = vmul.f32 -2.2959185, %v14483_v56 }
 0x2c1   : > { %2051 = vadd.xlane.f32.xlu1 %v2030_v47 }
 0x2c2   : > { %1309 = vadd.xlane.f32.xlu0 %v9285_v62  ;;  %v1176_v51 = vpop.xlane.xlu1 %1175 }
 0x2c3   : > { %v9879_v19 = vpop.xlane.xlu0 %1621  ;;  %v9883_v43 = vsel %vm14232_vm0, %v2081_v21, %v1176_v51  ;;  %v1205_v51 = vmul.f32 %v1157_v32, %v1141_v50 }
 0x2c5   : > { %1943 = vadd.xlane.f32.xlu1 %v9887_v49 }
 0x2c6   : > { %1185 = vadd.xlane.f32.xlu0 %v1141_v50  ;;  %v2044_v24 = vpop.xlane.xlu1 %2043 }
 0x2c7   : > { %v1472_v62 = vpop.xlane.xlu0 %1471  ;;  %v9892_v11 = vsel %vm14233_vm5, %v2295_v54, %v2044_v24  ;;  %v14484_v24 = vld [vmem:[#allocation69_spill] sm:$0xff] }
 0x2c8   : > { %v2179_v15 = vsel %vm14247_vm14, %v2162_v63, %v1472_v62  ;;  %14476 = vst [vmem:[#allocation47_spill] sm:$0xff] %v9892_v11 }
 0x2c9   : > { %v2195_v3 = vsel %vm14477_vm4, %v2179_v15, %v9654_v37  ;;  %1479 = vadd.xlane.f32.xlu1 %v14479_v59  ;;  %v14486_v59 = vld [vmem:[#allocation68_spill] sm:$0xff] }
 0x2ca   : > { %v2212_v41 = vsel %vm14246_vm13, %v2195_v3, %v9671_v45  ;;  %1481 = vadd.xlane.f32.xlu0 %v14478_v17  ;;  %v1936_v23 = vpop.xlane.xlu1 %1935  ;;  %v14485_v3 = vld [vmem:[#allocation37_spill] sm:$0xff]  ;;  %v1013_v17 = vmul.f32 1.442695, %v983_v14 }
 0x2cb   : > { %v1174_v36 = vpop.xlane.xlu0 %1173  ;;  %v2229_v63 = vsel %vm14245_vm12, %v2212_v41, %v9704_v8  ;;  %v1983_v41 = vmul.f32 0.36787945, %v9844_v22  ;;  %v14490_v14 = vld [vmem:[#allocation57_spill] sm:$0xff] }
 0x2cc   : > { %v2097_v54 = vsel %vm14232_vm0, %v2080_v13, %v1174_v36  ;;  %v2246_v37 = vsel %vm14238_vm11, %v2229_v63, %v9757_v20  ;;  %v9925_v62 = vpop.eup %7883  ;;  %v1221_v63 = vmul.f32 0.36787945, %v1157_v32  ;;  %7885 = vpow2.f32 %v1013_v17 }
 0x2cd   : > { %v2263_v45 = vsel %vm14236_vm9, %v2246_v37, %v9771_v25  ;;  %1371 = vadd.xlane.f32.xlu1 %v14481_v34  ;;  %v1078_v50 = vmul.f32 %v9925_v62, %v14485_v3  ;;  %v1284_v17 = vmul.f32 0.36787945, %v9826_v42 }
 0x2ce   : > { %1437 = vadd.xlane.f32.xlu0 %v14480_v10  ;;  %v9911_v47 = vsel %vm14235_vm10, %v2263_v45, %v1936_v23  ;;  %v9914_v21 = vpop.xlane.xlu1 %1811  ;;  %v9948_v10 = vmul.f32 %v1221_v63, %v1205_v51 }
 0x2cf   : > { %v2042_v18 = vpop.xlane.xlu0 %2041  ;;  %v1332_v42 = vmul.f32 %v1284_v17, %v9839_v16  ;;  %v14494_v16 = vld [vmem:[#allocation63_spill] sm:$0xff] }
 0x2d0   : > { %v9917_v8 = vsel %vm14233_vm5, %v2294_v55, %v2042_v18 }
 0x2d1   : > { %14482 = vst [vmem:[#allocation44_spill] sm:$0xff] %v9917_v8  ;;  %1247 = vadd.xlane.f32.xlu1 %v9821_v46 }
 0x2d2   : > { %1249 = vadd.xlane.f32.xlu0 %v1205_v51  ;;  %v9922_v25 = vpop.xlane.xlu1 %1687  ;;  %v14491_v51 = vld [vmem:[#allocation35_spill] sm:$0xff] }
 0x2d3   : > { %v9920_v20 = vpop.xlane.xlu0 %1809 }
 0x2d5   : > { %1941 = vadd.xlane.f32.xlu1 %v9842_v1  ;;  %v2031_v1 = vmul.f32 %v1983_v41, %v9854_v53  ;;  %v14489_v53 = vld [vmem:[#allocation70_spill] sm:$0xff] }
 0x2d6   : > { %1485 = vadd.xlane.f32.xlu0 %v14484_v24  ;;  %v1422_v55 = vpop.xlane.xlu1 %1421  ;;  %v984_v24 = vmul.f32 -2.2959185, %v14490_v14 }
 0x2d7   : > { %v9929_v15 = vpop.xlane.xlu0 %1875  ;;  %v9935_v46 = vsel %vm14248_vm2, %v9812_v27, %v1422_v55  ;;  %v14488_v27 = vld [vmem:[#allocation62_spill] sm:$0xff] }
 0x2d9   : > { %1123 = vadd.xlane.f32.xlu1 %v1078_v50 }
 0x2da   : > { %1817 = vadd.xlane.f32.xlu0 %v14486_v59  ;;  %v1298_v36 = vpop.xlane.xlu1 %1297  ;;  %v1015_v59 = vmul.f32 1.442695, %v984_v24 }
 0x2db   : > { %v9939_v13 = vpop.xlane.xlu0 %1627  ;;  %v9944_v23 = vsel %vm14250_vm1, %v9863_v52, %v1298_v36  ;;  %v1094_v52 = vmul.f32 0.36787945, %v9925_v62  ;;  %v7886_v36 = vpop.eup %7885 }
 0x2dc   : > { %14487 = vst [vmem:[#allocation50_spill] sm:$0xff] %v9939_v13  ;;  %7887 = vpow2.f32 %v1015_v59  ;;  %v14496_v59 = vld [vmem:[#allocation32_spill] sm:$0xff]  ;;  %v1285_v13 = vmul.f32 0.36787945, %v1221_v63 }
 0x2dd   : > { %1369 = vadd.xlane.f32.xlu1 %v14488_v27  ;;  %v1158_v41 = vmul.f32 0.36787945, %v1094_v52  ;;  %v1666_v27 = vmul.f32 0.36787945, %v9730_v0 }
 0x2de   : > { %2053 = vadd.xlane.f32.xlu0 %v2031_v1  ;;  %v1364_v22 = vpop.xlane.xlu1 %1363  ;;  %v14493_v1 = vld [vmem:[#allocation72_spill] sm:$0xff] }
 0x2df   : > { %v1238_v37 = vpop.xlane.xlu0 %1237  ;;  %v9952_v34 = vsel %vm14249_vm15, %v9835_v30, %v1364_v22  ;;  %v1142_v30 = vmul.f32 %v1094_v52, %v1078_v50  ;;  %v1031_v50 = vmul.f32 %v7886_v36, %v9527_v12  ;;  %v1714_v0 = vmul.f32 %v1666_v27, %v9741_v40 }
 0x2e0   : > { %v2114_v45 = vsel %vm2107_vm8, %v2097_v54, %v1238_v37  ;;  %v1730_v12 = vmul.f32 0.36787945, %v1666_v27  ;;  %v1348_v40 = vmul.f32 0.36787945, %v1284_v17  ;;  %v1920_v17 = vmul.f32 0.36787945, %v9874_v44 }
 0x2e1   : > { %1435 = vadd.xlane.f32.xlu1 %v14489_v53  ;;  %v9980_v53 = vmul.f32 0.36787945, %v1158_v41  ;;  %v1079_v11 = vmul.f32 %v9429_v60, %v1031_v50 }
 0x2e2   : > { %1313 = vadd.xlane.f32.xlu0 %v9948_v10  ;;  %v1240_v18 = vpop.xlane.xlu1 %1239 }
 0x2e3   : > { %v1304_v32 = vpop.xlane.xlu0 %1303  ;;  %v2115_v56 = vsel %vm2107_vm8, %v9883_v43, %v1240_v18  ;;  %v14492_v43 = vld [vmem:[#allocation71_spill] sm:$0xff] }
 0x2e4   : > { %v9961_v54 = vsel %vm14250_vm1, %v2115_v56, %v1304_v32 }
 0x2e5   : > { %1121 = vadd.xlane.f32.xlu1 %v9870_v29  ;;  %v9977_v29 = vmul.f32 %v1158_v41, %v1142_v30  ;;  %v10000_v41 = vmul.f32 0.36787945, %v1730_v12 }
 0x2e6   : > { %1629 = vadd.xlane.f32.xlu0 %v14491_v51  ;;  %v9967_v3 = vpop.xlane.xlu1 %1933  ;;  %v1778_v51 = vmul.f32 %v1730_v12, %v1714_v0  ;;  %v1095_v12 = vmul.f32 0.36787945, %v9429_v60 }
 0x2e7   : > { %v9965_v55 = vpop.xlane.xlu0 %1997  ;;  %v9988_v18 = vmul.f32 %v9980_v53, %v9977_v29 }
 0x2e9   : > { %1483 = vadd.xlane.f32.xlu1 %v14493_v1  ;;  %v1396_v1 = vmul.f32 %v1348_v40, %v1332_v42  ;;  %v7888_v27 = vpop.eup %7887 }
 0x2ea   : > { %1881 = vadd.xlane.f32.xlu0 %v14492_v43  ;;  %v9975_v22 = vpop.xlane.xlu1 %1115  ;;  %v10015_v8 = vmul.f32 %v7888_v27, %v9458_v48  ;;  %v1333_v27 = vmul.f32 %v1285_v13, %v9948_v10 }
 0x2eb   : > { %v9973_v37 = vpop.xlane.xlu0 %1873 }
 0x2ed   : > { %1375 = vadd.xlane.f32.xlu1 %v1332_v42 }
 0x2ee   : > { %1061 = vadd.xlane.f32.xlu0 %v1031_v50  ;;  %v2000_v32 = vpop.xlane.xlu1 %1999  ;;  %v1968_v50 = vmul.f32 %v1920_v17, %v9887_v49 }
 0x2ef   : > { %v9983_v52 = vpop.xlane.xlu0 %1749  ;;  %v9992_v56 = vsel %vm14234_vm6, %v9911_v47, %v2000_v32  ;;  %v10006_v47 = vmul.f32 %v10000_v41, %v1778_v51 }
 0x2f1   : > { %1373 = vadd.xlane.f32.xlu1 %v14494_v16 }
 0x2f2   : > { %1315 = vadd.xlane.f32.xlu0 %v9988_v18  ;;  %v9998_v24 = vpop.xlane.xlu1 %1685 }
 0x2f3   : > { %v9996_v14 = vpop.xlane.xlu0 %1625 }
 0x2f4   : > { %14495 = vst [vmem:[#allocation48_spill] sm:$0xff] %v9996_v14 }
 0x2f5   : > { %1187 = vadd.xlane.f32.xlu1 %v1142_v30 }
 0x2f6   : > { %1631 = vadd.xlane.f32.xlu0 %v14496_v59  ;;  %v10003_v43 = vpop.xlane.xlu1 %1751 }
 0x2f7   : > { %v1426_v36 = vpop.xlane.xlu0 %1425 }
 0x2f9   : > { %1439 = vadd.xlane.f32.xlu1 %v1396_v1 }
 0x2fa   : > { %1883 = vadd.xlane.f32.xlu0 %v10006_v47  ;;  %v1470_v16 = vpop.xlane.xlu1 %1469 }
 0x2fb   : > { %v1302_v32 = vpop.xlane.xlu0 %1301  ;;  %v2178_v42 = vsel %vm14247_vm14, %v9935_v46, %v1470_v16  ;;  %v1143_v46 = vmul.f32 %v1095_v12, %v1079_v11 }
 0x2fc   : > { %v10012_v30 = vsel %vm14250_vm1, %v2114_v45, %v1302_v32  ;;  %v2194_v14 = vsel %vm14477_vm4, %v2178_v42, %v9668_v6  ;;  %v1349_v32 = vmul.f32 0.36787945, %v1285_v13 }
 0x2fd   : > { %v2211_v63 = vsel %vm14246_vm13, %v2194_v14, %v9699_v31  ;;  %1755 = vadd.xlane.f32.xlu1 %v1714_v0 }
 0x2fe   : > { %1063 = vadd.xlane.f32.xlu0 %v10015_v8  ;;  %v2228_v45 = vsel %vm14245_vm12, %v2211_v63, %v9713_v7  ;;  %v1362_v48 = vpop.xlane.xlu1 %1361  ;;  %v14498_v63 = vld [vmem:[#allocation73_spill] sm:$0xff] }
 0x2ff   : > { %v1178_v44 = vpop.xlane.xlu0 %1177  ;;  %v2245_v60 = vsel %vm14238_vm11, %v2228_v45, %v9764_v28  ;;  %v2146_v6 = vsel %vm14249_vm15, %v9944_v23, %v1362_v48  ;;  %v1397_v23 = vmul.f32 %v1349_v32, %v1333_v27  ;;  %v14499_v45 = vld [vmem:[#allocation84_spill] sm:$0xff] }
 0x300   : > { %v2262_v31 = vsel %vm14236_vm9, %v2245_v60, %v9858_v39  ;;  %v2163_v0 = vsel %vm14248_vm2, %v2146_v6, %v1426_v36  ;;  %v1412_v39 = vmul.f32 0.36787945, %v1348_v40  ;;  %v1159_v60 = vmul.f32 0.36787945, %v1095_v12 }
 0x301   : > { %v2279_v7 = vsel %vm14235_vm10, %v2262_v31, %v9967_v3  ;;  %2007 = vadd.xlane.f32.xlu1 %v1968_v50  ;;  %v1984_v6 = vmul.f32 0.36787945, %v1920_v17  ;;  %v14500_v31 = vld [vmem:[#allocation75_spill] sm:$0xff] }
 0x302   : > { %1189 = vadd.xlane.f32.xlu0 %v1143_v46  ;;  %v2296_v13 = vsel %vm14234_vm6, %v2279_v7, %v9965_v55  ;;  %v1428_v28 = vpop.xlane.xlu1 %1427  ;;  %v1460_v55 = vmul.f32 %v1412_v39, %v1396_v1  ;;  %v14502_v39 = vld [vmem:[#allocation16_spill] sm:$0xff] }
 0x303   : > { %v2046_v10 = vpop.xlane.xlu0 %2045  ;;  %v2164_v49 = vsel %vm14248_vm2, %v9952_v34, %v1428_v28  ;;  %v2083_v34 = vsel %vm2073_vm7, %v14499_v45, %v9975_v22  ;;  %v2032_v22 = vmul.f32 %v1984_v6, %v1968_v50 }
 0x304   : > { %v10041_v14 = vsel %vm14233_vm5, %v2296_v13, %v2046_v10  ;;  %v1207_v13 = vmul.f32 %v1159_v60, %v1143_v46 }
 0x305   : > { %14497 = vst [vmem:[#allocation22_spill] sm:$0xff] %v10041_v14  ;;  %1251 = vadd.xlane.f32.xlu1 %v9977_v29 }
 0x306   : > { %1441 = vadd.xlane.f32.xlu0 %v1397_v23  ;;  %v1114_v3 = vpop.xlane.xlu1 %1113 }
 0x307   : > { %v10046_v36 = vpop.xlane.xlu0 %1813  ;;  %v2082_v16 = vsel %vm2073_vm7, %v9522_v4, %v1114_v3 }
 0x308   : > { %v2099_v42 = vsel %vm14232_vm0, %v2082_v16, %v1178_v44  ;;  %v1413_v44 = vmul.f32 0.36787945, %v1349_v32 }
 0x309   : > { %1487 = vadd.xlane.f32.xlu1 %v1460_v55  ;;  %v14504_v55 = vld [vmem:[#allocation36_spill] sm:$0xff] }
 0x30a   : > { %1757 = vadd.xlane.f32.xlu0 %v14498_v63  ;;  %v1180_v48 = vpop.xlane.xlu1 %1179  ;;  %v14505_v63 = vld [vmem:[#allocation78_spill] sm:$0xff] }
 0x30b   : > { %v10055_v40 = vpop.xlane.xlu0 %1879  ;;  %v2100_v29 = vsel %vm14232_vm0, %v2083_v34, %v1180_v48  ;;  %v1096_v45 = vmul.f32 0.36787945, %v14505_v63 }
 0x30d   : > { %1819 = vadd.xlane.f32.xlu1 %v1778_v51 }
 0x30e   : > { %2009 = vadd.xlane.f32.xlu0 %v14500_v31  ;;  %v2048_v1 = vpop.xlane.xlu1 %2047 }
 0x30f   : > { %v1474_v4 = vpop.xlane.xlu0 %1473  ;;  %v10062_v10 = vsel %vm14233_vm5, %v9992_v56, %v2048_v1 }
 0x310   : > { %v2180_v7 = vsel %vm14247_vm14, %v2163_v0, %v1474_v4  ;;  %14501 = vst [vmem:[#allocation43_spill] sm:$0xff] %v10062_v10  ;;  %v1461_v0 = vmul.f32 %v1413_v44, %v1397_v23  ;;  %v14503_v23 = vld [vmem:[#allocation76_spill] sm:$0xff]  ;;  %v1604_v4 = vmul.f32 0.00033546262, %v9774_v9  ;;  %v1160_v44 = vmul.f32 0.36787945, %v1096_v45 }
 0x311   : > { %v2196_v28 = vsel %vm14477_vm4, %v2180_v7, %v9720_v5  ;;  %2055 = vadd.xlane.f32.xlu1 %v2032_v22 }
 0x312   : > { %v2213_v12 = vsel %vm14246_vm13, %v2196_v28, %v9831_v57  ;;  %1253 = vadd.xlane.f32.xlu0 %v1207_v13  ;;  %v1940_v17 = vpop.xlane.xlu1 %1939  ;;  %v1652_v9 = vmul.f32 %v1604_v4, %v14496_v59  ;;  %v1668_v28 = vmul.f32 0.36787945, %v1604_v4  ;;  %v1606_v4 = vmul.f32 0.00033546262, %v9925_v62 }
 0x313   : > { %v1242_v51 = vpop.xlane.xlu0 %1241  ;;  %v2230_v32 = vsel %vm14245_vm12, %v2213_v12, %v9866_v33  ;;  %v10080_v33 = vmul.f32 0.36787945, %v1159_v60  ;;  %v14506_v60 = vld [vmem:[#allocation74_spill] sm:$0xff] }
 0x314   : > { %v2116_v46 = vsel %vm2107_vm8, %v2099_v42, %v1242_v51  ;;  %v2247_v56 = vsel %vm14238_vm11, %v2230_v32, %v9920_v20  ;;  %v1224_v51 = vmul.f32 0.36787945, %v1160_v44 }
 0x315   : > { %v2264_v50 = vsel %vm14236_vm9, %v2247_v56, %v9973_v37  ;;  %1125 = vadd.xlane.f32.xlu1 %v1079_v11  ;;  %v10087_v11 = vmul.f32 %v10080_v33, %v1207_v13  ;;  %v14507_v13 = vld [vmem:[#allocation39_spill] sm:$0xff]  ;;  %v1716_v56 = vmul.f32 %v1668_v28, %v1652_v9 }
 0x316   : > { %1489 = vadd.xlane.f32.xlu0 %v1461_v0  ;;  %v10075_v57 = vpop.xlane.xlu1 %1815 }
 0x317   : > { %v1308_v5 = vpop.xlane.xlu0 %1307 }
 0x319   : > { %1377 = vadd.xlane.f32.xlu1 %v1333_v27  ;;  %v1080_v27 = vmul.f32 %v14505_v63, %v10015_v8  ;;  %v1286_v8 = vmul.f32 0.36787945, %v9980_v53 }
 0x31a   : > { %1821 = vadd.xlane.f32.xlu0 %v14502_v39  ;;  %v10078_v16 = vpop.xlane.xlu1 %1691  ;;  %v1858_v39 = vmul.f32 0.36787945, %v10000_v41  ;;  %v14509_v41 = vld [vmem:[#allocation38_spill] sm:$0xff] }
 0x31b   : > { %v2002_v3 = vpop.xlane.xlu0 %2001  ;;  %v1144_v1 = vmul.f32 %v1096_v45, %v1080_v27 }
 0x31d   : > { %1693 = vadd.xlane.f32.xlu1 %v14504_v55  ;;  %v10117_v12 = vmul.f32 %v1160_v44, %v1144_v1  ;;  %v1732_v55 = vmul.f32 0.36787945, %v1668_v28 }
 0x31e   : > { %2057 = vadd.xlane.f32.xlu0 %v14503_v23  ;;  %v1476_v37 = vpop.xlane.xlu1 %1475 }
 0x31f   : > { %v10084_v20 = vpop.xlane.xlu0 %1877  ;;  %v2181_v42 = vsel %vm14247_vm14, %v2164_v49, %v1476_v37  ;;  %v1796_v63 = vmul.f32 0.36787945, %v1732_v55 }
 0x320   : > { %v2197_v34 = vsel %vm14477_vm4, %v2181_v42, %v9687_v38  ;;  %v10131_v42 = vmul.f32 %v1732_v55, %v1716_v56 }
 0x321   : > { %v2214_v48 = vsel %vm14246_vm13, %v2197_v34, %v9766_v2  ;;  %1945 = vadd.xlane.f32.xlu1 %v14506_v60  ;;  %v1350_v34 = vmul.f32 0.36787945, %v1286_v8  ;;  %v1288_v60 = vmul.f32 0.36787945, %v1224_v51 }
 0x322   : > { %1317 = vadd.xlane.f32.xlu0 %v10087_v11  ;;  %v2231_v49 = vsel %vm14245_vm12, %v2214_v48, %v9849_v61  ;;  %v1368_v31 = vpop.xlane.xlu1 %1367 }
 0x323   : > { %v10099_v6 = vpop.xlane.xlu0 %1753  ;;  %v10107_v38 = vsel %vm14249_vm15, %v9961_v54, %v1368_v31  ;;  %v2248_v2 = vsel %vm14238_vm11, %v2231_v49, %v9914_v21  ;;  %v1334_v21 = vmul.f32 %v1286_v8, %v9988_v18  ;;  %v1414_v55 = vmul.f32 0.36787945, %v1350_v34 }
 0x324   : > { %v2265_v7 = vsel %vm14236_vm9, %v2248_v2, %v9929_v15  ;;  %v14508_v15 = vld [vmem:[#allocation77_spill] sm:$0xff] }
 0x325   : > { %1127 = vadd.xlane.f32.xlu1 %v1080_v27  ;;  %v2282_v61 = vsel %vm14235_vm10, %v2265_v7, %v1940_v17  ;;  %v1906_v27 = vmul.f32 %v1858_v39, %v10006_v47  ;;  %v1398_v44 = vmul.f32 %v1350_v34, %v1334_v21  ;;  %v1922_v7 = vmul.f32 0.36787945, %v1858_v39 }
 0x326   : > { %1633 = vadd.xlane.f32.xlu0 %v14507_v13  ;;  %v1244_v22 = vpop.xlane.xlu1 %1243 }
 0x327   : > { %v1430_v53 = vpop.xlane.xlu0 %1429  ;;  %v2117_v54 = vsel %vm2107_vm8, %v2100_v29, %v1244_v22  ;;  %v1272_v29 = vmul.f32 %v1224_v51, %v10117_v12  ;;  %v1654_v22 = vmul.f32 %v1606_v4, %v14509_v41 }
 0x328   : > { %v10121_v32 = vsel %vm14250_vm1, %v2117_v54, %v1308_v5 }
 0x329   : > { %1379 = vadd.xlane.f32.xlu1 %v1334_v21  ;;  %v1336_v47 = vmul.f32 %v1288_v60, %v1272_v29  ;;  %v1970_v21 = vmul.f32 %v1922_v7, %v1906_v27 }
 0x32a   : > { %1885 = vadd.xlane.f32.xlu0 %v14508_v15  ;;  %v1938_v17 = vpop.xlane.xlu1 %1937 }
 0x32b   : > { %v1306_v0 = vpop.xlane.xlu0 %1305  ;;  %v2281_v23 = vsel %vm14235_vm10, %v2264_v50, %v1938_v17  ;;  %v1352_v17 = vmul.f32 0.36787945, %v1288_v60  ;;  %v1605_v60 = vmul.f32 0.00033546262, %v9860_v26 }
 0x32c   : > { %v10126_v59 = vsel %vm14250_vm1, %v2116_v46, %v1306_v0  ;;  %v2298_v18 = vsel %vm14234_vm6, %v2281_v23, %v2002_v3  ;;  %v1844_v3 = vmul.f32 %v1796_v63, %v10131_v42 }
 0x32d   : > { %1695 = vadd.xlane.f32.xlu1 %v1652_v9  ;;  %v1860_v9 = vmul.f32 0.36787945, %v1796_v63 }
 0x32e   : > { %1319 = vadd.xlane.f32.xlu0 %v1272_v29  ;;  %v1120_v37 = vpop.xlane.xlu1 %1119 }
 0x32f   : > { %v1182_v5 = vpop.xlane.xlu0 %1181  ;;  %v1908_v15 = vmul.f32 %v1860_v9, %v1844_v3 }
 0x331   : > { %1947 = vadd.xlane.f32.xlu1 %v1906_v27 }
 0x332   : > { %1635 = vadd.xlane.f32.xlu0 %v14509_v41  ;;  %v2004_v45 = vpop.xlane.xlu1 %2003 }
 0x333   : > { %v2050_v46 = vpop.xlane.xlu0 %2049  ;;  %v2299_v48 = vsel %vm14234_vm6, %v2282_v61, %v2004_v45  ;;  %v1924_v45 = vmul.f32 0.36787945, %v1860_v9 }
 0x334   : > { %v10136_v50 = vsel %vm14233_vm5, %v2298_v18, %v2050_v46 }
 0x335   : > { %14510 = vst [vmem:[#allocation26_spill] sm:$0xff] %v10136_v50  ;;  %1191 = vadd.xlane.f32.xlu1 %v1144_v1 }
 0x336   : > { %1887 = vadd.xlane.f32.xlu0 %v1844_v3  ;;  %v10140_v31 = vpop.xlane.xlu1 %1689  ;;  %v1986_v3 = vmul.f32 0.36787945, %v1922_v7 }
 0x337   : > { %v1478_v49 = vpop.xlane.xlu0 %1477 }
 0x338   : > { %v2034_v26 = vmul.f32 %v1986_v3, %v1970_v21 }
 0x339   : > { %1443 = vadd.xlane.f32.xlu1 %v1398_v44 }
 0x33a   : > { %1383 = vadd.xlane.f32.xlu0 %v1336_v47  ;;  %v1366_v2 = vpop.xlane.xlu1 %1365 }
 0x33b   : > { %v1246_v8 = vpop.xlane.xlu0 %1245  ;;  %v2148_v61 = vsel %vm14249_vm15, %v10012_v30, %v1366_v2  ;;  %v1287_v2 = vmul.f32 0.36787945, %v10080_v33 }
 0x33c   : > { %v2165_v1 = vsel %vm14248_vm2, %v2148_v61, %v1430_v53  ;;  %v1669_v61 = vmul.f32 0.36787945, %v1605_v60 }
 0x33d   : > { %v2182_v28 = vsel %vm14247_vm14, %v2165_v1, %v1478_v49  ;;  %1759 = vadd.xlane.f32.xlu1 %v1716_v56  ;;  %v1972_v49 = vmul.f32 %v1924_v45, %v1908_v15 }
 0x33e   : > { %1699 = vadd.xlane.f32.xlu0 %v1654_v22  ;;  %v2198_v62 = vsel %vm14477_vm4, %v2182_v28, %v9879_v19  ;;  %v1432_v51 = vpop.xlane.xlu1 %1431 }
 0x33f   : > { %v10148_v54 = vpop.xlane.xlu0 %1311  ;;  %v2166_v0 = vsel %vm14248_vm2, %v10107_v38, %v1432_v51  ;;  %v2215_v30 = vsel %vm14246_vm13, %v2198_v62, %v9998_v24  ;;  %v1400_v38 = vmul.f32 %v1352_v17, %v1336_v47  ;;  %v1670_v24 = vmul.f32 0.36787945, %v1606_v4 }
 0x340   : > { %v2232_v53 = vsel %vm14245_vm12, %v2215_v30, %v9983_v52  ;;  %v1416_v47 = vmul.f32 0.36787945, %v1352_v17  ;;  %v1335_v62 = vmul.f32 %v1287_v2, %v10087_v11 }
 0x341   : > { %2011 = vadd.xlane.f32.xlu1 %v1970_v21  ;;  %v2249_v56 = vsel %vm14238_vm11, %v2232_v53, %v10046_v36  ;;  %v14511_v36 = vld [vmem:[#allocation93_spill] sm:$0xff]  ;;  %v1718_v41 = vmul.f32 %v1670_v24, %v1654_v22  ;;  %v1653_v22 = vmul.f32 %v1605_v60, %v14507_v13 }
 0x342   : > { %1951 = vadd.xlane.f32.xlu0 %v1908_v15  ;;  %v1118_v19 = vpop.xlane.xlu1 %1117  ;;  %v10164_v29 = vsel %vm14236_vm9, %v2249_v56, %v10084_v20  ;;  %v2085_v63 = vsel %vm2073_vm7, %v14511_v36, %v1120_v37  ;;  %v1464_v7 = vmul.f32 %v1416_v47, %v1400_v38  ;;  %v1733_v15 = vmul.f32 0.36787945, %v1669_v61 }
 0x343   : > { %v10160_v39 = vpop.xlane.xlu0 %2005  ;;  %v2084_v23 = vsel %vm2073_vm7, %v9583_v58, %v1118_v19  ;;  %v1462_v58 = vmul.f32 %v1414_v55, %v1398_v44  ;;  %v1717_v51 = vmul.f32 %v1669_v61, %v1653_v22  ;;  %v1351_v55 = vmul.f32 0.36787945, %v1287_v2 }
 0x344   : > { %v2101_v52 = vsel %vm14232_vm0, %v2084_v23, %v1182_v5  ;;  %v1797_v56 = vmul.f32 0.36787945, %v1733_v15 }
 0x345   : > { %v2118_v18 = vsel %vm2107_vm8, %v2101_v52, %v1246_v8  ;;  %1255 = vadd.xlane.f32.xlu1 %v10117_v12  ;;  %v10186_v8 = vmul.f32 0.36787945, %v1670_v24  ;;  %v1781_v53 = vmul.f32 %v1733_v15, %v1717_v51 }
 0x346   : > { %1447 = vadd.xlane.f32.xlu0 %v1400_v38  ;;  %v1184_v20 = vpop.xlane.xlu1 %1183 }
 0x347   : > { %v10173_v27 = vpop.xlane.xlu0 %1433  ;;  %v2102_v46 = vsel %vm14232_vm0, %v2085_v63, %v1184_v20  ;;  %v10191_v9 = vmul.f32 %v10186_v8, %v1718_v41  ;;  %v1845_v24 = vmul.f32 %v1797_v56, %v1781_v53 }
 0x349   : > { %1491 = vadd.xlane.f32.xlu1 %v1462_v58 }
 0x34a   : > { %1763 = vadd.xlane.f32.xlu0 %v1718_v41  ;;  %v2052_v5 = vpop.xlane.xlu1 %2051  ;;  %v1399_v41 = vmul.f32 %v1351_v55, %v1335_v62 }
 0x34b   : > { %v1310_v34 = vpop.xlane.xlu0 %1309  ;;  %v10181_v37 = vsel %vm14233_vm5, %v2299_v48, %v2052_v5 }
 0x34c   : > { %v10178_v12 = vsel %vm14250_vm1, %v2118_v18, %v1310_v34  ;;  %14512 = vst [vmem:[#allocation28_spill] sm:$0xff] %v10181_v37  ;;  %v14515_v34 = vld [vmem:[#allocation91_spill] sm:$0xff] }
 0x34d   : > { %1823 = vadd.xlane.f32.xlu1 %v10131_v42  ;;  %v1988_v42 = vmul.f32 0.36787945, %v1924_v45 }
 0x34e   : > { %2015 = vadd.xlane.f32.xlu0 %v1972_v49  ;;  %v1944_v44 = vpop.xlane.xlu1 %1943 }
 0x34f   : > { %v10184_v4 = vpop.xlane.xlu0 %1185  ;;  %v2036_v30 = vmul.f32 %v1988_v42, %v1972_v49  ;;  %v1415_v49 = vmul.f32 0.36787945, %v1351_v55  ;;  %v14518_v42 = vld [vmem:[#allocation94_spill] sm:$0xff] }
 0x351   : > { %2059 = vadd.xlane.f32.xlu1 %v2034_v26 }
 0x352   : > { %1495 = vadd.xlane.f32.xlu0 %v1464_v7  ;;  %v1480_v1 = vpop.xlane.xlu1 %1479  ;;  %v14517_v7 = vld [vmem:[#allocation48_spill] sm:$0xff] }
 0x353   : > { %v1482_v48 = vpop.xlane.xlu0 %1481  ;;  %v2183_v28 = vsel %vm14247_vm14, %v2166_v0, %v1480_v1 }
 0x354   : > { %v2199_v33 = vsel %vm14477_vm4, %v2183_v28, %v9785_v35 }
 0x355   : > { %v2216_v13 = vsel %vm14246_vm13, %v2199_v33, %v9922_v25  ;;  %1381 = vadd.xlane.f32.xlu1 %v1335_v62  ;;  %v14519_v33 = vld [vmem:[#allocation95_spill] sm:$0xff] }
 0x356   : > { %1827 = vadd.xlane.f32.xlu0 %v10191_v9  ;;  %v2233_v17 = vsel %vm14245_vm12, %v2216_v13, %v10003_v43  ;;  %v1372_v0 = vpop.xlane.xlu1 %1371  ;;  %v14520_v13 = vld [vmem:[#allocation83_spill] sm:$0xff] }
 0x357   : > { %v10200_v21 = vpop.xlane.xlu0 %1437  ;;  %v2151_v11 = vsel %vm14249_vm15, %v10121_v32, %v1372_v0  ;;  %v2250_v35 = vsel %vm14238_vm11, %v2233_v17, %v10075_v57  ;;  %v1861_v32 = vmul.f32 0.36787945, %v1797_v56  ;;  %v14513_v57 = vld [vmem:[#allocation89_spill] sm:$0xff]  ;;  %v14522_v0 = vld [vmem:[#allocation87_spill] sm:$0xff] }
 0x358   : > { %v2267_v19 = vsel %vm14236_vm9, %v2250_v35, %v10055_v40  ;;  %v14514_v40 = vld [vmem:[#allocation80_spill] sm:$0xff] }
 0x359   : > { %1697 = vadd.xlane.f32.xlu1 %v1653_v22  ;;  %v10211_v25 = vsel %vm14235_vm10, %v2267_v19, %v1944_v44  ;;  %v1909_v63 = vmul.f32 %v1861_v32, %v1845_v24  ;;  %v1925_v58 = vmul.f32 0.36787945, %v1861_v32  ;;  %v14516_v44 = vld [vmem:[#allocation82_spill] sm:$0xff]  ;;  %v14525_v32 = vld [vmem:[#allocation79_spill] sm:$0xff] }
 0x35a   : > { %2063 = vadd.xlane.f32.xlu0 %v2036_v30  ;;  %v1248_v43 = vpop.xlane.xlu1 %1247  ;;  %v14521_v30 = vld [vmem:[#allocation86_spill] sm:$0xff] }
 0x35b   : > { %v10213_v38 = vpop.xlane.xlu0 %1249  ;;  %v2119_v23 = vsel %vm2107_vm8, %v2102_v46, %v1248_v43  ;;  %v1973_v60 = vmul.f32 %v1925_v58, %v1909_v63  ;;  %v1989_v1 = vmul.f32 0.36787945, %v1925_v58  ;;  %v1798_v43 = vmul.f32 0.36787945, %v10186_v8 }
 0x35c   : > { %v10218_v52 = vsel %vm14250_vm1, %v2119_v23, %v10148_v54  ;;  %v14524_v23 = vld [vmem:[#allocation90_spill] sm:$0xff] }
 0x35d   : > { %1949 = vadd.xlane.f32.xlu1 %v14514_v40  ;;  %v2037_v62 = vmul.f32 %v1989_v1, %v1973_v60  ;;  %v1846_v40 = vmul.f32 %v1798_v43, %v10191_v9 }
 0x35e   : > { %1701 = vadd.xlane.f32.xlu0 %v14513_v57  ;;  %v1942_v36 = vpop.xlane.xlu1 %1941 }
 0x35f   : > { %v10222_v18 = vpop.xlane.xlu0 %1485  ;;  %v2283_v20 = vsel %vm14235_vm10, %v10164_v29, %v1942_v36  ;;  %v14526_v36 = vld [vmem:[#allocation92_spill] sm:$0xff] }
 0x360   : > { %v10228_v46 = vsel %vm14234_vm6, %v2283_v20, %v10160_v39  ;;  %v1862_v20 = vmul.f32 0.36787945, %v1798_v43  ;;  %v8019_v43 = vld [vmem:[%s8364_s12 + $0x10] sm:$0xff] }
 0x361   : > { %1445 = vadd.xlane.f32.xlu1 %v1399_v41 }
 0x362   : > { %1953 = vadd.xlane.f32.xlu0 %v1909_v63  ;;  %v10232_v45 = vpop.xlane.xlu1 %1123  ;;  %v1926_v9 = vmul.f32 0.36787945, %v1862_v20 }
 0x363   : > { %v10230_v54 = vpop.xlane.xlu0 %1817 }
 0x365   : > { %1761 = vadd.xlane.f32.xlu1 %v1717_v51 }
 0x366   : > { %1765 = vadd.xlane.f32.xlu0 %v14515_v34  ;;  %v1370_v3 = vpop.xlane.xlu1 %1369  ;;  %v1910_v34 = vmul.f32 %v1862_v20, %v1846_v40  ;;  %v14533_v20 = vld [vmem:[#allocation98_spill] sm:$0xff] }
 0x367   : > { %v10235_v5 = vpop.xlane.xlu0 %2053  ;;  %v2150_v29 = vsel %vm14249_vm15, %v10126_v59, %v1370_v3 }
 0x368   : > { %v2167_v39 = vsel %vm14248_vm2, %v2150_v29, %v10173_v27  ;;  %v1463_v27 = vmul.f32 %v1415_v49, %v1399_v41  ;;  %v14527_v41 = vld [vmem:[#allocation81_spill] sm:$0xff]  ;;  %v14528_v29 = vld [vmem:[#allocation18_spill] sm:$0xff] }
 0x369   : > { %v2184_v47 = vsel %vm14247_vm14, %v2167_v39, %v1482_v48  ;;  %2013 = vadd.xlane.f32.xlu1 %v14516_v44 }
 0x36a   : > { %2017 = vadd.xlane.f32.xlu0 %v1973_v60  ;;  %v2200_v26 = vsel %vm14477_vm4, %v2184_v47, %v14517_v7  ;;  %v1436_v22 = vpop.xlane.xlu1 %1435  ;;  %v1974_v47 = vmul.f32 %v1926_v9, %v1910_v34 }
 0x36b   : > { %v10243_v2 = vpop.xlane.xlu0 %1313  ;;  %v10248_v61 = vsel %vm14248_vm2, %v2151_v11, %v1436_v22  ;;  %v10252_v59 = vsel %vm14246_vm13, %v2200_v26, %v10140_v31  ;;  %v1990_v26 = vmul.f32 0.36787945, %v1926_v9  ;;  %v14529_v22 = vld [vmem:[#allocation85_spill] sm:$0xff]  ;;  %v8020_v9 = vld [vmem:[%s8364_s12 + $0x20] sm:$0xff] }
 0x36d   : > { %1493 = vadd.xlane.f32.xlu1 %v1463_v27 }
 0x36e   : > { %1829 = vadd.xlane.f32.xlu0 %v14518_v42  ;;  %v10257_v28 = vpop.xlane.xlu1 %1121  ;;  %v14530_v42 = vld [vmem:[#allocation47_spill] sm:$0xff] }
 0x36f   : > { %v10255_v48 = vpop.xlane.xlu0 %1629 }
 0x371   : > { %1825 = vadd.xlane.f32.xlu1 %v1781_v53  ;;  %v14523_v53 = vld [vmem:[#allocation88_spill] sm:$0xff] }
 0x372   : > { %2065 = vadd.xlane.f32.xlu0 %v2037_v62  ;;  %v10261_v15 = vpop.xlane.xlu1 %1483  ;;  %v2038_v62 = vmul.f32 %v1990_v26, %v1974_v47 }
 0x373   : > { %v10259_v51 = vpop.xlane.xlu0 %1881 }
 0x375   : > { %2061 = vadd.xlane.f32.xlu1 %v14520_v13 }
 0x376   : > { %1893 = vadd.xlane.f32.xlu0 %v14519_v33  ;;  %v10267_v17 = vpop.xlane.xlu1 %1375 }
 0x377   : > { %v10265_v31 = vpop.xlane.xlu0 %1061 }
 0x379   : > { %1637 = vadd.xlane.f32.xlu1 %v14522_v0 }
 0x37a   : > { %1895 = vadd.xlane.f32.xlu0 %v14521_v30  ;;  %v10273_v56 = vpop.xlane.xlu1 %1373  ;;  %v14531_v30 = vld [vmem:[#allocation96_spill] sm:$0xff] }
 0x37b   : > { %v10271_v11 = vpop.xlane.xlu0 %1315 }
 0x37d   : > { %1889 = vadd.xlane.f32.xlu1 %v1845_v24 }
 0x37e   : > { %1959 = vadd.xlane.f32.xlu0 %v14523_v53  ;;  %v10278_v19 = vpop.xlane.xlu1 %1187 }
 0x37f   : > { %v10276_v35 = vpop.xlane.xlu0 %1631 }
 0x381   : > { %1639 = vadd.xlane.f32.xlu1 %v14525_v32 }
 0x382   : > { %2023 = vadd.xlane.f32.xlu0 %v14524_v23  ;;  %v10285_v57 = vpop.xlane.xlu1 %1439  ;;  %v14532_v23 = vld [vmem:[#allocation97_spill] sm:$0xff] }
 0x383   : > { %v10283_v55 = vpop.xlane.xlu0 %1883 }
 0x385   : > { %1891 = vadd.xlane.f32.xlu1 %v1846_v40 }
 0x386   : > { %2071 = vadd.xlane.f32.xlu0 %v14526_v36  ;;  %v10291_v63 = vpop.xlane.xlu1 %1755  ;;  %v2234_v36 = vsel %vm14245_vm12, %v10252_v59, %v10099_v6 }
 0x387   : > { %v10289_v24 = vpop.xlane.xlu0 %1063 }
 0x389   : > { %1703 = vadd.xlane.f32.xlu1 %v14527_v41 }
 0x38a   : > { %v10296_v58 = vpop.xlane.xlu1 %2007 }
 0x38b   : > { %v10294_v8 = vpop.xlane.xlu0 %1189 }
 0x38d   : > { %1955 = vadd.xlane.f32.xlu1 %v1910_v34 }
 0x38e   : > { %v10300_v60 = vpop.xlane.xlu1 %1251 }
 0x38f   : > { %v10298_v3 = vpop.xlane.xlu0 %1441 }
 0x391   : > { %1767 = vadd.xlane.f32.xlu1 %v14528_v29  ;;  %v2251_v29 = vsel %vm14238_vm11, %v2234_v36, %v10230_v54  ;;  %v304_v36 = vld [vmem:[%s14123_s4 + $0x18] sm:$0xff] }
 0x392   : > { %v10305_v39 = vpop.xlane.xlu1 %1487  ;;  %v2268_v59 = vsel %vm14236_vm9, %v2251_v29, %v10259_v51  ;;  %v305_v51 = vld [vmem:[%s14123_s4 + $0x20] sm:$0xff] }
 0x393   : > { %v10303_v49 = vpop.xlane.xlu0 %1757  ;;  %v8022_v29 = vld [vmem:[%s8364_s12 + $0x40] sm:$0xff] }
 0x395   : > { %2019 = vadd.xlane.f32.xlu1 %v1974_v47  ;;  %v10347_v47 = vsel %vm14233_vm5, %v10228_v46, %v10235_v5  ;;  %v8021_v46 = vld [vmem:[%s8364_s12 + $0x30] sm:$0xff]  ;;  %v306_v5 = vld [vmem:[%s14123_s4 + $0x28] sm:$0xff] }
 0x396   : > { %v10307_v7 = vpop.xlane.xlu1 %1819  ;;  %14535 = vst [vmem:[#allocation46_spill] sm:$0xff] %v10347_v47  ;;  %7291 = vmatprep.subr.mxu0 %v306_v5 }
 0x397   : > { %v2010_v44 = vpop.xlane.xlu0 %2009  ;;  %7292 = vmatpush3.msra.mxu0 %v306_v5  ;;  %v8023_v5 = vld [vmem:[%s8364_s12] sm:$0xff] }
 0x398   : > { %7293 = vmatprep.subr.mxu0 %v305_v51 }
 0x399   : > { %1831 = vadd.xlane.f32.xlu1 %v14529_v22  ;;  %7294 = vmatpush3.msra.mxu0 %v305_v51 }
 0x39a   : > { %v10312_v27 = vpop.xlane.xlu1 %2055  ;;  %7295 = vmatprep.subr.mxu0 %v304_v36 }
 0x39b   : > { %v10310_v1 = vpop.xlane.xlu0 %1253  ;;  %7296 = vmatpush3.msra.mxu0 %v304_v36 }
 0x39c   : > { %2490 = vrot.lane.b32.xlu0 %v14530_v42, %s8159_s16 }
 0x39d   : > { %2067 = vadd.xlane.f32.xlu1 %v2038_v62 }
 0x39e   : > { %v10318_v13 = vpop.xlane.xlu1 %1125 }
 0x39f   : > { %v10316_v33 = vpop.xlane.xlu0 %1489 }
 0x3a0   : > { %2492 = vrot.lane.b32.xlu0 %v10041_v14, %s8159_s16  ;;  %v14538_v14 = vld [vmem:[#allocation50_spill] sm:$0xff] }
 0x3a1   : > { %1957 = vadd.xlane.f32.xlu1 %v14531_v30 }
 0x3a2   : > { %v10325_v53 = vpop.xlane.xlu1 %1377 }
 0x3a3   : > { %v10323_v0 = vpop.xlane.xlu0 %1821 }
 0x3a4   : > { %2556 = vrot.lane.b32.xlu0 %v8019_v43, %s8160_s17 }
 0x3a5   : > { %2021 = vadd.xlane.f32.xlu1 %v14532_v23 }
 0x3a6   : > { %v10330_v40 = vpop.xlane.xlu1 %1693 }
 0x3a7   : > { %v2058_v32 = vpop.xlane.xlu0 %2057 }
 0x3a8   : > { %2496 = vrot.lane.b32.xlu0 %v10136_v50, %s8159_s16  ;;  %v8025_v50 = vld [vmem:[%s8364_s12 + $0x18] sm:$0xff] }
 0x3a9   : > { %2069 = vadd.xlane.f32.xlu1 %v14533_v20  ;;  %v303_v20 = vld [vmem:[%s14123_s4 + $0x10] sm:$0xff] }
 0x3aa   : > { %v1946_v34 = vpop.xlane.xlu1 %1945  ;;  %7297 = vmatprep.subr.mxu0 %v303_v20 }
 0x3ab   : > { %v10338_v41 = vpop.xlane.xlu0 %1317  ;;  %v2285_v22 = vsel %vm14235_vm10, %v2268_v59, %v1946_v34  ;;  %7298 = vmatpush3.msra.mxu0 %v303_v20  ;;  %v302_v59 = vld [vmem:[%s14123_s4 + $0x8] sm:$0xff] }
 0x3ac   : > { %14534 = vst [vmem:[#allocation52_spill] sm:$0xff] %v10338_v41  ;;  %2560 = vrot.lane.b32.xlu0 %v8020_v9, %s8160_s17  ;;  %v2302_v30 = vsel %vm14234_vm6, %v2285_v22, %v2010_v44  ;;  %v14537_v9 = vld [vmem:[#allocation44_spill] sm:$0xff]  ;;  %7299 = vmatprep.subr.mxu0 %v302_v59  ;;  %v301_v22 = vld [vmem:[%s14123_s4] sm:$0xff] }
 0x3ad   : > { %v10374_v23 = vsel %vm14233_vm5, %v2302_v30, %v2058_v32  ;;  %7300 = vmatpush3.msra.mxu0 %v302_v59  ;;  %v8024_v20 = vld [vmem:[%s8364_s12 + $0x8] sm:$0xff] }
 0x3ae   : > { %v10351_v6 = vpop.xlane.xlu1 %1127  ;;  %14536 = vst [vmem:[#allocation53_spill] sm:$0xff] %v10374_v23  ;;  %7301 = vmatprep.subr.mxu0 %v301_v22  ;;  %v8026_v41 = vld [vmem:[%s8364_s12 + $0x28] sm:$0xff] }
 0x3af   : > { %v10349_v26 = vpop.xlane.xlu0 %1633  ;;  %7302 = vmatpush3.msra.mxu0 %v301_v22 }
 0x3b0   : > { %2500 = vrot.lane.b32.xlu0 %v10347_v47, %s8159_s16 }
 0x3b2   : > { %v10360_v54 = vpop.xlane.xlu1 %1379 }
 0x3b3   : > { %v10358_v62 = vpop.xlane.xlu0 %1885 }
 0x3b4   : > { %2564 = vrot.lane.b32.xlu0 %v8021_v46, %s8160_s17 }
 0x3b6   : > { %v1696_v44 = vpop.xlane.xlu1 %1695 }
 0x3b7   : > { %v10371_v43 = vpop.xlane.xlu0 %1319 }
 0x3b8   : > { %2504 = vrot.lane.b32.xlu0 %v10374_v23, %s8159_s16 }
 0x3ba   : > { %v1948_v32 = vpop.xlane.xlu1 %1947  ;;  %2488 = vrot.lane.b32.xlu1 %v14537_v9, %s8159_s16 }
 0x3bb   : > { %v10384_v34 = vpop.xlane.xlu0 %1635 }
 0x3bc   : > { %2568 = vrot.lane.b32.xlu0 %v8022_v29, %s8160_s17 }
 0x3be   : > { %v10396_v46 = vpop.xlane.xlu1 %1191  ;;  %2552 = vrot.lane.b32.xlu1 %v8023_v5, %s8160_s17 }
 0x3bf   : > { %v1888_v30 = vpop.xlane.xlu0 %1887 }
 0x3c2   : > { %v10402_v36 = vpop.xlane.xlu1 %1443  ;;  %2554 = vrot.lane.b32.xlu1 %v8024_v20, %s8160_s17  ;;  %v2185_v20 = vsel %vm14247_vm14, %v10248_v61, %v10261_v15  ;;  %v2301_v61 = vsel %vm14234_vm6, %v10211_v25, %v10296_v58 }
 0x3c3   : > { %v10400_v51 = vpop.xlane.xlu0 %1383  ;;  %v2201_v9 = vsel %vm14477_vm4, %v2185_v20, %v14538_v14 }
 0x3c4   : > { %v2218_v14 = vsel %vm14246_vm13, %v2201_v9, %v10078_v16  ;;  %v8027_v9 = vld [vmem:[%s8364_s12 + $0x38] sm:$0xff] }
 0x3c6   : > { %v1760_v59 = vpop.xlane.xlu1 %1759  ;;  %2494 = vrot.lane.b32.xlu1 %v10062_v10, %s8159_s16 }
 0x3c7   : > { %v10406_v29 = vpop.xlane.xlu0 %1699 }
 0x3ca   : > { %v2012_v47 = vpop.xlane.xlu1 %2011  ;;  %2558 = vrot.lane.b32.xlu1 %v8025_v50, %s8160_s17  ;;  %v2153_v50 = vsel %vm14249_vm15, %v10218_v52, %v10267_v17  ;;  %v2235_v52 = vsel %vm14245_vm12, %v2218_v14, %v10291_v63 }
 0x3cb   : > { %v1952_v23 = vpop.xlane.xlu0 %1951  ;;  %v2252_v25 = vsel %vm14238_vm11, %v2235_v52, %v10307_v7 }
 0x3cc   : > { %v2269_v58 = vsel %vm14236_vm9, %v2252_v25, %v10283_v55 }
 0x3cd   : > { %v2286_v20 = vsel %vm14235_vm10, %v2269_v58, %v1948_v32 }
 0x3ce   : > { %v10414_v5 = vpop.xlane.xlu1 %1255  ;;  %2498 = vrot.lane.b32.xlu1 %v10181_v37, %s8159_s16  ;;  %v2170_v37 = vsel %vm14248_vm2, %v2153_v50, %v10285_v57 }
 0x3cf   : > { %v10412_v22 = vpop.xlane.xlu0 %1447  ;;  %v2187_v15 = vsel %vm14247_vm14, %v2170_v37, %v10305_v39 }
 0x3d0   : > { %v2203_v16 = vsel %vm14477_vm4, %v2187_v15, %v10276_v35  ;;  %v2303_v35 = vsel %vm14234_vm6, %v2286_v20, %v2012_v47  ;;  %v8028_v15 = vld [vmem:[%s8364_s12 + $0x48] sm:$0xff] }
 0x3d1   : > { %v2220_v37 = vsel %vm14246_vm13, %v2203_v16, %v1696_v44 }
 0x3d2   : > { %v10425_v42 = vpop.xlane.xlu1 %1491  ;;  %2562 = vrot.lane.b32.xlu1 %v8026_v41, %s8160_s17  ;;  %v10443_v41 = vsel %vm14233_vm5, %v2301_v61, %v10312_v27  ;;  %v2237_v39 = vsel %vm14245_vm12, %v2220_v37, %v1760_v59  ;;  %v2152_v37 = vsel %vm14249_vm15, %v10178_v12, %v10273_v56 }
 0x3d3   : > { %v10423_v10 = vpop.xlane.xlu0 %1763 }
 0x3d6   : > { %v1824_v57 = vpop.xlane.xlu1 %1823  ;;  %2502 = vrot.lane.b32.xlu1 %v10443_v41, %s8159_s16 }
 0x3d7   : > { %v2016_v17 = vpop.xlane.xlu0 %2015  ;;  %v2254_v7 = vsel %vm14238_vm11, %v2237_v39, %v1824_v57 }
 0x3d8   : > { %v2271_v55 = vsel %vm14236_vm9, %v2254_v7, %v1888_v30 }
 0x3d9   : > { %v2288_v61 = vsel %vm14235_vm10, %v2271_v55, %v1952_v23  ;;  %v8029_v23 = vld [vmem:[%s8364_s12 + $0x58] sm:$0xff] }
 0x3da   : > { %v2060_v27 = vpop.xlane.xlu1 %2059  ;;  %2566 = vrot.lane.b32.xlu1 %v8027_v9, %s8160_s17  ;;  %v2305_v47 = vsel %vm14234_vm6, %v2288_v61, %v2016_v17  ;;  %v2169_v17 = vsel %vm14248_vm2, %v2152_v37, %v10200_v21  ;;  %v14539_v9 = vld [vmem:[#allocation25_spill] sm:$0xff] }
 0x3db   : > { %v10457_v63 = vpop.xlane.xlu0 %1495  ;;  %v10465_v44 = vsel %vm14233_vm5, %v2303_v35, %v2060_v27  ;;  %v2186_v27 = vsel %vm14247_vm14, %v2169_v17, %v10222_v18  ;;  %v2086_v20 = vsel %vm2073_vm7, %v14539_v9, %v10257_v28  ;;  %v8030_v17 = vld [vmem:[%s8364_s12 + $0x50] sm:$0xff] }
 0x3dc   : > { %v2202_v35 = vsel %vm14477_vm4, %v2186_v27, %v10255_v48  ;;  %v2103_v12 = vsel %vm14232_vm0, %v2086_v20, %v10184_v4 }
 0x3dd   : > { %v2219_v21 = vsel %vm14246_vm13, %v2202_v35, %v10330_v40  ;;  %v2120_v18 = vsel %vm2107_vm8, %v2103_v12, %v10213_v38 }
 0x3de   : > { %v10470_v50 = vpop.xlane.xlu1 %1381  ;;  %2506 = vrot.lane.b32.xlu1 %v10465_v44, %s8159_s16  ;;  %v2236_v61 = vsel %vm14245_vm12, %v2219_v21, %v10303_v49  ;;  %v8031_v21 = vld [vmem:[%s8364_s12 + $0x60] sm:$0xff] }
 0x3df   : > { %v10468_v59 = vpop.xlane.xlu0 %1827  ;;  %v2253_v4 = vsel %vm14238_vm11, %v2236_v61, %v10323_v0 }
 0x3e2   : > { %v1698_v14 = vpop.xlane.xlu1 %1697  ;;  %2570 = vrot.lane.b32.xlu1 %v8028_v15, %s8160_s17  ;;  %v2270_v15 = vsel %vm14236_vm9, %v2253_v4, %v10358_v62 }
 0x3e3   : > { %v2064_v32 = vpop.xlane.xlu0 %2063 }
 0x3e4   : > { %v10479_v52 = vsel %vm14233_vm5, %v2305_v47, %v2064_v32  ;;  %v2137_v32 = vsel %vm14250_vm1, %v2120_v18, %v10243_v2  ;;  %v14540_v18 = vld [vmem:[#allocation41_spill] sm:$0xff] }
 0x3e5   : > { %v2154_v40 = vsel %vm14249_vm15, %v2137_v32, %v10325_v53  ;;  %v2087_v61 = vsel %vm2073_vm7, %v14540_v18, %v10232_v45  ;;  %v2089_v32 = vsel %vm2073_vm7, %v10289_v24, %v10351_v6  ;;  %v2088_v6 = vsel %vm2073_vm7, %v10265_v31, %v10318_v13 }
 0x3e6   : > { %v1950_v57 = vpop.xlane.xlu1 %1949  ;;  %2510 = vrot.lane.b32.xlu1 %v10479_v52, %s8159_s16  ;;  %v2171_v2 = vsel %vm14248_vm2, %v2154_v40, %v10298_v3  ;;  %v2106_v40 = vsel %vm14232_vm0, %v2089_v32, %v10396_v46 }
 0x3e7   : > { %v10481_v30 = vpop.xlane.xlu0 %1701  ;;  %v2287_v38 = vsel %vm14235_vm10, %v2270_v15, %v1950_v57  ;;  %v2188_v53 = vsel %vm14247_vm14, %v2171_v2, %v10316_v33  ;;  %v2123_v15 = vsel %vm2107_vm8, %v2106_v40, %v10414_v5  ;;  %v14541_v2 = vld [vmem:[#allocation52_spill] sm:$0xff] }
 0x3e8   : > { %v2204_v62 = vsel %vm14477_vm4, %v2188_v53, %v10349_v26  ;;  %v2140_v24 = vsel %vm14250_vm1, %v2123_v15, %v10371_v43 }
 0x3e9   : > { %v2221_v57 = vsel %vm14246_vm13, %v2204_v62, %v1698_v14 }
 0x3ea   : > { %v10485_v16 = vpop.xlane.xlu1 %1445  ;;  %2574 = vrot.lane.b32.xlu1 %v8029_v23, %s8160_s17 }
 0x3eb   : > { %v1954_v25 = vpop.xlane.xlu0 %1953 }
 0x3ee   : > { %v1762_v58 = vpop.xlane.xlu1 %1761 }
 0x3ef   : > { %v10494_v39 = vpop.xlane.xlu0 %1765  ;;  %v2238_v3 = vsel %vm14245_vm12, %v2221_v57, %v1762_v58 }
 0x3f2   : > { %v2014_v7 = vpop.xlane.xlu1 %2013 }
 0x3f3   : > { %v2018_v56 = vpop.xlane.xlu0 %2017  ;;  %v2304_v49 = vsel %vm14234_vm6, %v2287_v38, %v2014_v7 }
 0x3f6   : > { %v10507_v55 = vpop.xlane.xlu1 %1493 }
 0x3f7   : > { %v10517_v48 = vpop.xlane.xlu0 %1829 }
 0x3fa   : > { %v1826_v28 = vpop.xlane.xlu1 %1825 }
 0x3fb   : > { %v2066_v0 = vpop.xlane.xlu0 %2065  ;;  %v2255_v27 = vsel %vm14238_vm11, %v2238_v3, %v1826_v28 }
 0x3fe   : > { %v2062_v47 = vpop.xlane.xlu1 %2061 }
 0x3ff   : > { %v10528_v23 = vsel %vm14233_vm5, %v2304_v49, %v2062_v47  ;;  %v10541_v20 = vpop.xlane.xlu0 %1893 }
 0x400   : > { %2508 = vrot.lane.b32.xlu0 %v10528_v23, %s8159_s16 }
 0x402   : > { %v1638_v37 = vpop.xlane.xlu1 %1637 }
 0x403   : > { %v1896_v14 = vpop.xlane.xlu0 %1895 }
 0x404   : > { %2572 = vrot.lane.b32.xlu0 %v8030_v17, %s8160_s17 }
 0x406   : > { %v1890_v9 = vpop.xlane.xlu1 %1889 }
 0x407   : > { %v2272_v7 = vsel %vm14236_vm9, %v2255_v27, %v1890_v9  ;;  %v1960_v4 = vpop.xlane.xlu0 %1959 }
 0x408   : > { %v2289_v33 = vsel %vm14235_vm10, %v2272_v7, %v1954_v25  ;;  %v2104_v25 = vsel %vm14232_vm0, %v2087_v61, %v10278_v19 }
 0x409   : > { %v2306_v35 = vsel %vm14234_vm6, %v2289_v33, %v2018_v56  ;;  %v2121_v28 = vsel %vm2107_vm8, %v2104_v25, %v10300_v60 }
 0x40a   : > { %v1640_v26 = vpop.xlane.xlu1 %1639  ;;  %v10547_v12 = vsel %vm14233_vm5, %v2306_v35, %v2066_v0  ;;  %v2138_v45 = vsel %vm14250_vm1, %v2121_v28, %v10271_v11  ;;  %v2157_v11 = vsel %vm14249_vm15, %v2140_v24, %v10400_v51 }
 0x40b   : > { %2512 = vrot.lane.b32.xlu0 %v10547_v12, %s8159_s16  ;;  %v2155_v19 = vsel %vm14249_vm15, %v2138_v45, %v10360_v54  ;;  %v2024_v5 = vpop.xlane.xlu0 %2023  ;;  %v2105_v54 = vsel %vm14232_vm0, %v2088_v6, %v10294_v8  ;;  %v2174_v43 = vsel %vm14248_vm2, %v2157_v11, %v10412_v22  ;;  %vm14542_vm0 = vmmov %vm14477_vm4  ;;  %v14543_v45 = vld [vmem:[#allocation47_spill] sm:$0xff] }
 0x40c   : > { %v2172_v60 = vsel %vm14248_vm2, %v2155_v19, %v10402_v36  ;;  %v2122_v31 = vsel %vm2107_vm8, %v2105_v54, %v10310_v1 }
 0x40d   : > { %v2189_v46 = vsel %vm14247_vm14, %v2172_v60, %v10425_v42  ;;  %v2191_v42 = vsel %vm14247_vm14, %v2174_v43, %v10457_v63  ;;  %v2139_v8 = vsel %vm14250_vm1, %v2122_v31, %v14541_v2  ;;  %v14545_v31 = vld [vmem:[#allocation28_spill] sm:$0xff] }
 0x40e   : > { %v1892_v58 = vpop.xlane.xlu1 %1891  ;;  %v2205_v36 = vsel %vm14477_vm4, %v2189_v46, %v10384_v34  ;;  %v2207_v0 = vsel %vm14542_vm0, %v2191_v42, %v1640_v26  ;;  %v2156_v34 = vsel %vm14249_vm15, %v2139_v8, %v10470_v50  ;;  %vm14237_vm4 = vcmask 130048   ;;  %v14544_v46 = vld [vmem:[#allocation43_spill] sm:$0xff] }
 0x40f   : > { %2576 = vrot.lane.b32.xlu0 %v8031_v21, %s8160_s17  ;;  %v2222_v13 = vsel %vm14246_vm13, %v2205_v36, %v10406_v29  ;;  %v2072_v51 = vpop.xlane.xlu0 %2071  ;;  %v2173_v63 = vsel %vm14248_vm2, %v2156_v34, %v10485_v16 }
 0x410   : > { %v2239_v1 = vsel %vm14245_vm12, %v2222_v13, %v10423_v10  ;;  %v2190_v57 = vsel %vm14247_vm14, %v2173_v63, %v10507_v55 }
 0x411   : > { %v2256_v62 = vsel %vm14238_vm11, %v2239_v1, %v10468_v59  ;;  %v2206_v17 = vsel %vm14542_vm0, %v2190_v57, %v1638_v37  ;;  %vm14242_vm0 = vcmask 392192  }
 0x412   : > { %v1704_v56 = vpop.xlane.xlu1 %1703  ;;  %v2273_v3 = vsel %vm14236_vm9, %v2256_v62, %v1892_v58  ;;  %v2223_v59 = vsel %vm14246_vm13, %v2206_v17, %v10481_v30  ;;  %v8032_v58 = vld [vmem:[%s8364_s12 + $0x68] sm:$0xff] }
 0x413   : > { %v2224_v22 = vsel %vm14246_vm13, %v2207_v0, %v1704_v56  ;;  %v2491_v10 = vpop.permute.xlu0 %2490  ;;  %v2240_v33 = vsel %vm14245_vm12, %v2223_v59, %v10494_v39  ;;  %v7269_v56 = vpop.f32.mrf.mxu1 }
 0x414   : > { %v2257_v30 = vsel %vm14238_vm11, %v2240_v33, %v10517_v48  ;;  %v2602_v11 = vsel %vm14237_vm4, %v7269_v56, %v2491_v10  ;;  %v10693_v33 = vld [vmem:[%s8255_s9 + $0x88] sm:$0xff] }
 0x415   : > { %v2274_v61 = vsel %vm14236_vm9, %v2257_v30, %v10541_v20  ;;  %v2393_v20 = vpop.f32.mrf.mxu1 }
 0x416   : > { %v1956_v38 = vpop.xlane.xlu1 %1955 }
 0x417   : > { %v2290_v27 = vsel %vm14235_vm10, %v2273_v3, %v1956_v38  ;;  %v2493_v26 = vpop.permute.xlu0 %2492  ;;  %v8034_v38 = vld [vmem:[%s8364_s12 + $0x70] sm:$0xff]  ;;  %v7272_v19 = vpop.f32.mrf.mxu1 }
 0x41a   : > { %v1768_v49 = vpop.xlane.xlu1 %1767 }
 0x41b   : > { %v2241_v53 = vsel %vm14245_vm12, %v2224_v22, %v1768_v49  ;;  %v2557_v39 = vpop.permute.xlu0 %2556  ;;  %v2403_v49 = vpop.f32.mrf.mxu1 }
 0x41c   : > { %v2603_v36 = vsel %vm14237_vm4, %v2403_v49, %v2493_v26 }
 0x41d   : > { %v7275_v42 = vpop.f32.mrf.mxu1 }
 0x41e   : > { %v2020_v47 = vpop.xlane.xlu1 %2019 }
 0x41f   : > { %v2307_v16 = vsel %vm14234_vm6, %v2290_v27, %v2020_v47  ;;  %v2497_v15 = vpop.permute.xlu0 %2496  ;;  %v2413_v2 = vpop.f32.mrf.mxu1  ;;  %v10684_v27 = vld [vmem:[%s8255_s9 + $0x80] sm:$0xff] }
 0x420   : > { %v2605_v34 = vsel %vm14237_vm4, %v2413_v2, %v2497_v15 }
 0x422   : > { %v1832_v29 = vpop.xlane.xlu1 %1831 }
 0x423   : > { %v2258_v50 = vsel %vm14238_vm11, %v2241_v53, %v1832_v29 }
 0x424   : > { %v2275_v9 = vsel %vm14236_vm9, %v2258_v50, %v1896_v14 }
 0x425   : > { %v2292_v37 = vsel %vm14235_vm10, %v2275_v9, %v1960_v4  ;;  %v8033_v4 = vld [vmem:[%s8364_s12 + $0x78] sm:$0xff] }
 0x426   : > { %v2068_v7 = vpop.xlane.xlu1 %2067  ;;  %v2309_v14 = vsel %vm14234_vm6, %v2292_v37, %v2024_v5  ;;  %v2561_v5 = vpop.permute.xlu0 %2560 }
 0x427   : > { %v10618_v55 = vsel %vm14233_vm5, %v2307_v16, %v2068_v7  ;;  %v10631_v18 = vsel %vm14233_vm5, %v2309_v14, %v2072_v51 }
 0x428   : > { %2514 = vrot.lane.b32.xlu1 %v10618_v55, %s8159_s16 }
 0x42a   : > { %v1958_v35 = vpop.xlane.xlu1 %1957  ;;  %v2501_v51 = vpop.permute.xlu0 %2500 }
 0x42b   : > { %v2291_v25 = vsel %vm14235_vm10, %v2274_v61, %v1958_v35  ;;  %v10711_v61 = vld [vmem:[%s8255_s9 + $0xa0] sm:$0xff] }
 0x42c   : > { %2578 = vrot.lane.b32.xlu1 %v8032_v58, %s8160_s17  ;;  %v10700_v58 = vld [vmem:[%s8255_s9 + $0x90] sm:$0xff] }
 0x42e   : > { %v2022_v21 = vpop.xlane.xlu1 %2021  ;;  %v2565_v63 = vpop.permute.xlu0 %2564 }
 0x42f   : > { %v2308_v28 = vsel %vm14234_vm6, %v2291_v25, %v2022_v21  ;;  %v10719_v25 = vld [vmem:[%s8255_s9 + $0xb0] sm:$0xff]  ;;  %vm14546_vm6 = vcmask 64512  }
 0x430   : > { %2518 = vrot.lane.b32.xlu1 %v10631_v18, %s8159_s16  ;;  %vm14547_vm10 = vmmov %vm14546_vm6 }
 0x431   : > { %vm14549_vm9 = vmmov %vm14546_vm6 }
 0x432   : > { %v2070_v32 = vpop.xlane.xlu1 %2069  ;;  %v2505_v17 = vpop.permute.xlu0 %2504 }
 0x433   : > { %v10640_v48 = vsel %vm14233_vm5, %v2308_v28, %v2070_v32  ;;  %vm14244_vm5 = vcmask 261120   ;;  %v10723_v28 = vld [vmem:[%s8255_s9 + $0xb8] sm:$0xff] }
 0x434   : > { %2582 = vrot.lane.b32.xlu1 %v8033_v4, %s8160_s17  ;;  %2516 = vrot.lane.b32.xlu0 %v10640_v48, %s8159_s16  ;;  %v2620_v47 = vsel %vm14244_vm5, %v2603_v36, %v2557_v39  ;;  %v2622_v1 = vsel %vm14244_vm5, %v2605_v34, %v2561_v5  ;;  %v10715_v39 = vld [vmem:[%s8255_s9 + $0xa8] sm:$0xff]  ;;  %v3717_v4 = vmul.f32 %v10684_v27, %v10684_v27  ;;  %v10749_v36 = vld [vmem:[%s8255_s9 + $0xd0] sm:$0xff] }
 0x435   : > { %v10739_v5 = vld [vmem:[%s8255_s9 + $0xc8] sm:$0xff]  ;;  %v3721_v34 = vmul.f32 %v10711_v61, %v10711_v61 }
 0x436   : > { %v2489_v40 = vpop.permute.xlu1 %2488  ;;  %v2569_v16 = vpop.permute.xlu0 %2568 }
 0x437   : > { %v2601_v60 = vsel %vm14237_vm4, %v2393_v20, %v2489_v40  ;;  %v10729_v40 = vld [vmem:[%s8255_s9 + $0xc0] sm:$0xff] }
 0x438   : > { %2995 = vrot.lane.b32.xlu1 %v14543_v45, %s8160_s17  ;;  %2580 = vrot.lane.b32.xlu0 %v8034_v38, %s8160_s17  ;;  %v3733_v38 = vsel %vm14546_vm6, %v3717_v4, 0.0 }
 0x43a   : > { %v2553_v24 = vpop.permute.xlu1 %2552 }
 0x43b   : > { %v2618_v6 = vsel %vm14244_vm5, %v2601_v60, %v2553_v24 }
 0x43c   : > { %2999 = vrot.lane.b32.xlu1 %v14544_v46, %s8160_s17  ;;  %7303 = vmatprep.mubr.msk.f32.mxu0 %vm14242_vm0, %v2618_v6 }
 0x43e   : > { %v2555_v54 = vpop.permute.xlu1 %2554 }
 0x43f   : > { %v2619_v43 = vsel %vm14244_vm5, %v2602_v11, %v2555_v54  ;;  %v3719_v54 = vmul.f32 %v10700_v58, %v10700_v58 }
 0x440   : > { %3003 = vrot.lane.b32.xlu1 %v14545_v31, %s8160_s17  ;;  %7304 = vmatmul.mubr.msk.f32.vlgmr.msra.gmra.mxu0 %vm14242_vm0, %v2619_v43 }
 0x441   : > { %7306 = vmatprep.mubr.msk.f32.mxu0 %vm14242_vm0, %v2620_v47  ;;  %v3739_v31 = vsel %vm14547_vm10, %v3719_v54, 0.0  ;;  %vm14548_vm10 = vmmov %vm14546_vm6 }
 0x442   : > { %v2495_v13 = vpop.permute.xlu1 %2494 }
 0x443   : > { %v2604_v8 = vsel %vm14237_vm4, %v7272_v19, %v2495_v13  ;;  %v3718_v19 = vmul.f32 %v10693_v33, %v10693_v33  ;;  %v10756_v13 = vld [vmem:[%s8255_s9 + $0xd8] sm:$0xff] }
 0x444   : > { %3007 = vrot.lane.b32.xlu1 %v10443_v41, %s8160_s17  ;;  %v7278_v41 = vpop.f32.mrf.mxu1 }
 0x445   : > { %v3736_v11 = vsel %vm14546_vm6, %v3718_v19, 0.0 }
 0x446   : > { %v2559_v0 = vpop.permute.xlu1 %2558  ;;  %v2423_v29 = vpop.f32.mrf.mxu1 }
 0x447   : > { %v2621_v22 = vsel %vm14244_vm5, %v2604_v8, %v2559_v0  ;;  %v2607_v50 = vsel %vm14237_vm4, %v2423_v29, %v2501_v51 }
 0x448   : > { %3011 = vrot.lane.b32.xlu1 %v10465_v44, %s8160_s17  ;;  %7307 = vmatmul.mubr.msk.f32.gmra.mxu0 %vm14242_vm0, %v2621_v22  ;;  %v2624_v3 = vsel %vm14244_vm5, %v2607_v50, %v2565_v63  ;;  %v3745_v63 = vsel %vm14548_vm10, %v3721_v34, 0.0  ;;  %vm14550_vm10 = vmmov %vm14546_vm6  ;;  %v14559_v34 = vld [vmem:[#allocation53_spill] sm:$0xff] }
 0x449   : > { %7309 = vmatprep.mubr.msk.f32.mxu0 %vm14242_vm0, %v2622_v1  ;;  %v10766_v1 = vld [vmem:[%s8255_s9 + $0xe0] sm:$0xff] }
 0x44a   : > { %v2499_v53 = vpop.permute.xlu1 %2498 }
 0x44b   : > { %v2606_v62 = vsel %vm14237_vm4, %v7275_v42, %v2499_v53  ;;  %v10773_v53 = vld [vmem:[%s8255_s9 + $0xe8] sm:$0xff] }
 0x44c   : > { %3015 = vrot.lane.b32.xlu1 %v10479_v52, %s8160_s17  ;;  %v7281_v52 = vpop.f32.mrf.mxu1 }
 0x44e   : > { %v2563_v57 = vpop.permute.xlu1 %2562  ;;  %v2433_v9 = vpop.f32.mrf.mxu1 }
 0x44f   : > { %v2623_v44 = vsel %vm14244_vm5, %v2606_v62, %v2563_v57  ;;  %v3723_v62 = vmul.f32 %v10719_v25, %v10719_v25  ;;  %v10780_v57 = vld [vmem:[%s8255_s9 + $0xf0] sm:$0xff] }
 0x450   : > { %3019 = vrot.lane.b32.xlu1 %v10618_v55, %s8160_s17  ;;  %7310 = vmatmul.mubr.msk.f32.gmra.mxu0 %vm14242_vm0, %v2623_v44  ;;  %v2609_v55 = vsel %vm14237_vm4, %v2433_v9, %v2505_v17  ;;  %v7284_v32 = vpop.f32.mrf.mxu1  ;;  %v3724_v17 = vmul.f32 %v10723_v28, %v10723_v28  ;;  %v10787_v44 = vld [vmem:[%s8255_s9 + $0xf8] sm:$0xff] }
 0x451   : > { %7312 = vmatprep.mubr.msk.f32.mxu0 %vm14242_vm0, %v2624_v3  ;;  %v2626_v35 = vsel %vm14244_vm5, %v2609_v55, %v2569_v16  ;;  %v3751_v50 = vsel %vm14549_vm9, %v3723_v62, 0.0  ;;  %v3726_v16 = vmul.f32 %v10739_v5, %v10739_v5  ;;  %vm14551_vm9 = vmmov %vm14546_vm6 }
 0x452   : > { %v2503_v10 = vpop.permute.xlu1 %2502  ;;  %v2443_v15 = vpop.f32.mrf.mxu1  ;;  %v3754_v3 = vsel %vm14550_vm10, %v3724_v17, 0.0  ;;  %vm14552_vm10 = vmmov %vm14546_vm6 }
 0x453   : > { %v2608_v7 = vsel %vm14237_vm4, %v7278_v41, %v2503_v10  ;;  %v3722_v41 = vmul.f32 %v10715_v39, %v10715_v39  ;;  %v3760_v9 = vsel %vm14551_vm9, %v3726_v16, 0.0  ;;  %vm14553_vm9 = vmmov %vm14546_vm6 }
 0x454   : > { %3023 = vrot.lane.b32.xlu1 %v10631_v18, %s8160_s17  ;;  %v10706_v18 = vld [vmem:[%s8255_s9 + $0x98] sm:$0xff]  ;;  %v7287_v43 = vpop.f32.mrf.mxu1  ;;  %s6652_s9 = sshll.u32 %s270_s25, 3 }
 0x455   : > { %v3720_v42 = vmul.f32 %v10706_v18, %v10706_v18  ;;  %v3748_v29 = vsel %vm14546_vm6, %v3722_v41, 0.0  ;;  %s12435_s26 = scalar_lea.vmem [#allocation2], %s6652_s9 }
 0x456   : > { %3492 = vxpose.xlu0.b32.start [1/16] (narrow) %v10684_v27, 8  ;;  %v2567_v59 = vpop.permute.xlu1 %2566  ;;  %v2453_v51 = vpop.f32.mrf.mxu1 }
 0x457   : > { %v2625_v37 = vsel %vm14244_vm5, %v2608_v7, %v2567_v59  ;;  %v3742_v0 = vsel %vm14546_vm6, %v3720_v42, 0.0  ;;  %v3727_v7 = vmul.f32 %v10749_v36, %v10749_v36  ;;  %v6779_v42 = vld [vmem:[%s8364_s12 + $0x88] sm:$0xff] }
 0x458   : > { %7313 = vmatmul.mubr.msk.f32.gmra.mxu0 %vm14242_vm0, %v2625_v37  ;;  %v3728_v37 = vmul.f32 %v10756_v13, %v10756_v13 }
 0x459   : > { %7315 = vmatprep.mubr.msk.f32.mxu0 %vm14242_vm0, %v2626_v35  ;;  %v3763_v55 = vsel %vm14552_vm10, %v3727_v7, 0.0  ;;  %vm14554_vm10 = vmmov %vm14546_vm6 }
 0x45a   : > { %3493 = vxpose.xlu0.b32.cont [2/16] (narrow) %v10693_v33, 8  ;;  %v2507_v26 = vpop.permute.xlu1 %2506 }
 0x45b   : > { %v2610_v14 = vsel %vm14237_vm4, %v7281_v52, %v2507_v26  ;;  %v3725_v52 = vmul.f32 %v10729_v40, %v10729_v40 }
 0x45d   : > { %v3757_v10 = vsel %vm14546_vm6, %v3725_v52, 0.0 }
 0x45e   : > { %3494 = vxpose.xlu0.b32.cont [3/16] (narrow) %v10700_v58, 8  ;;  %v2571_v30 = vpop.permute.xlu1 %2570 }
 0x45f   : > { %v2627_v21 = vsel %vm14244_vm5, %v2610_v14, %v2571_v30  ;;  %v3766_v30 = vsel %vm14546_vm6, %v3728_v37, 0.0 }
 0x460   : > { %7316 = vmatmul.mubr.msk.f32.gmra.mxu0 %vm14242_vm0, %v2627_v21  ;;  %v3729_v21 = vmul.f32 %v10766_v1, %v10766_v1 }
 0x462   : > { %3495 = vxpose.xlu0.b32.cont [4/16] (narrow) %v10706_v18, 8  ;;  %v2511_v56 = vpop.permute.xlu1 %2510  ;;  %v3769_v4 = vsel %vm14553_vm9, %v3729_v21, 0.0  ;;  %vm14560_vm9 = vmmov %vm14546_vm6 }
 0x463   : > { %v2612_v6 = vsel %vm14237_vm4, %v7284_v32, %v2511_v56  ;;  %v7290_v32 = vpop.f32.mrf.mxu1 }
 0x466   : > { %3496 = vxpose.xlu0.b32.cont [5/16] (narrow) %v10711_v61, 8  ;;  %v2575_v45 = vpop.permute.xlu1 %2574 }
 0x467   : > { %v2629_v49 = vsel %vm14244_vm5, %v2612_v6, %v2575_v45  ;;  %v2463_v45 = vpop.f32.mrf.mxu1 }
 0x46a   : > { %3497 = vxpose.xlu0.b32.cont [6/16] (narrow) %v10715_v39, 8 }
 0x46e   : > { %3498 = vxpose.xlu0.b32.cont [7/16] (narrow) %v10719_v25, 8 }
 0x472   : > { %v2509_v20 = vpop.permute.xlu0 %2508  ;;  %3499 = vxpose.xlu0.b32.cont [8/16] (narrow) %v10723_v28, 8 }
 0x473   : > { %v2611_v60 = vsel %vm14237_vm4, %v2443_v15, %v2509_v20  ;;  %v3730_v20 = vmul.f32 %v10773_v53, %v10773_v53 }
 0x475   : > { %v3772_v19 = vsel %vm14554_vm10, %v3730_v20, 0.0 }
 0x476   : > { %v2573_v24 = vpop.permute.xlu0 %2572  ;;  %3500 = vxpose.xlu0.b32.cont [9/16] (narrow) %v10729_v40, 8 }
 0x477   : > { %v2628_v46 = vsel %vm14244_vm5, %v2611_v60, %v2573_v24  ;;  %v3732_v60 = vmul.f32 %v10787_v44, %v10787_v44 }
 0x478   : > { %7318 = vmatprep.mubr.msk.f32.mxu0 %vm14242_vm0, %v2628_v46  ;;  %3734 = vadd.xlane.f32.xlu1 %v3733_v38 }
 0x479   : > { %7319 = vmatmul.mubr.msk.f32.gmra.mxu0 %vm14242_vm0, %v2629_v49  ;;  %v3778_v54 = vsel %vm14546_vm6, %v3732_v60, 0.0 }
 0x47a   : > { %3501 = vxpose.xlu0.b32.cont [10/16] (narrow) %v10739_v5, 8 }
 0x47c   : > { %3737 = vadd.xlane.f32.xlu1 %v3736_v11 }
 0x47d   : > { %v2513_v47 = vpop.permute.xlu0 %2512 }
 0x47e   : > { %3502 = vxpose.xlu0.b32.cont [11/16] (narrow) %v10749_v36, 8  ;;  %v2613_v2 = vsel %vm14237_vm4, %v2453_v51, %v2513_v47  ;;  %v6778_v47 = vld [vmem:[%s8364_s12 + $0x80] sm:$0xff]  ;;  %v14557_v51 = vld [vmem:[#allocation26_spill] sm:$0xff] }
 0x480   : > { %3740 = vadd.xlane.f32.xlu1 %v3739_v31  ;;  %v14556_v31 = vld [vmem:[#allocation22_spill] sm:$0xff] }
 0x481   : > { %v2577_v8 = vpop.permute.xlu0 %2576 }
 0x482   : > { %v2630_v22 = vsel %vm14244_vm5, %v2613_v2, %v2577_v8  ;;  %3503 = vxpose.xlu0.b32.cont [12/16] (narrow) %v10756_v13, 8  ;;  %v6781_v2 = vld [vmem:[%s8364_s12 + $0x98] sm:$0xff] }
 0x483   : > { %7321 = vmatprep.mubr.msk.f32.mxu0 %vm14242_vm0, %v2630_v22  ;;  %v14558_v8 = vld [vmem:[#allocation46_spill] sm:$0xff] }
 0x484   : > { %3743 = vadd.xlane.f32.xlu1 %v3742_v0  ;;  %v6783_v0 = vld [vmem:[%s8364_s12 + $0xa8] sm:$0xff]  ;;  %v6785_v22 = vld [vmem:[%s8364_s12 + $0xb8] sm:$0xff] }
 0x486   : > { %3504 = vxpose.xlu0.b32.cont [13/16] (narrow) %v10766_v1, 8 }
 0x488   : > { %3746 = vadd.xlane.f32.xlu1 %v3745_v63  ;;  %v3731_v63 = vmul.f32 %v10780_v57, %v10780_v57 }
 0x48a   : > { %3505 = vxpose.xlu0.b32.cont [14/16] (narrow) %v10773_v53, 8  ;;  %v3775_v41 = vsel %vm14560_vm9, %v3731_v63, 0.0  ;;  %v10932_v63 = vld [vmem:[%s14123_s4 + $0x80] sm:$0xff] }
 0x48b   : > { %7383 = vmatprep.subr.mxu0 %v10932_v63 }
 0x48c   : > { %3749 = vadd.xlane.f32.xlu1 %v3748_v29  ;;  %7384 = vmatpush3.msra.mxu0 %v10932_v63 }
 0x48e   : > { %3506 = vxpose.xlu0.b32.cont [15/16] (narrow) %v10780_v57, 8 }
 0x490   : > { %3752 = vadd.xlane.f32.xlu1 %v3751_v50 }
 0x492   : > { %3507 = vxpose.xlu0.b32.end [16/16] (narrow) %v10787_v44, 8 }
 0x494   : > { %3755 = vadd.xlane.f32.xlu1 %v3754_v3  ;;  %v6780_v3 = vld [vmem:[%s8364_s12 + $0x90] sm:$0xff] }
 0x498   : > { %3758 = vadd.xlane.f32.xlu1 %v3757_v10  ;;  %v6782_v10 = vld [vmem:[%s8364_s12 + $0xa0] sm:$0xff] }
 0x49a   : > { %v2515_v59 = vpop.permute.xlu1 %2514 }
 0x49b   : > { %v2614_v35 = vsel %vm14237_vm4, %v7287_v43, %v2515_v59  ;;  %v14555_v43 = vld [vmem:[#allocation44_spill] sm:$0xff]  ;;  %v6784_v59 = vld [vmem:[%s8364_s12 + $0xb0] sm:$0xff] }
 0x49c   : > { %3761 = vadd.xlane.f32.xlu1 %v3760_v9 }
 0x49e   : > { %v2579_v26 = vpop.permute.xlu1 %2578 }
 0x49f   : > { %v2631_v14 = vsel %vm14244_vm5, %v2614_v35, %v2579_v26 }
 0x4a0   : > { %7322 = vmatmul.mubr.msk.f32.gmra.mxu0 %vm14242_vm0, %v2631_v14  ;;  %3764 = vadd.xlane.f32.xlu1 %v3763_v55 }
 0x4a2   : > { %v2519_v56 = vpop.permute.xlu1 %2518 }
 0x4a3   : > { %v2616_v46 = vsel %vm14237_vm4, %v7290_v32, %v2519_v56 }
 0x4a4   : > { %3767 = vadd.xlane.f32.xlu1 %v3766_v30 }
 0x4a6   : > { %v2517_v15 = vpop.permute.xlu0 %2516  ;;  %v2583_v38 = vpop.permute.xlu1 %2582 }
 0x4a7   : > { %v2615_v24 = vsel %vm14237_vm4, %v2463_v45, %v2517_v15  ;;  %v2633_v11 = vsel %vm14244_vm5, %v2616_v46, %v2583_v38 }
 0x4a8   : > { %3770 = vadd.xlane.f32.xlu1 %v3769_v4 }
 0x4aa   : > { %v2581_v6 = vpop.permute.xlu0 %2580 }
 0x4ab   : > { %v2632_v49 = vsel %vm14244_vm5, %v2615_v24, %v2581_v6 }
 0x4ac   : > { %7324 = vmatprep.mubr.msk.f32.mxu0 %vm14242_vm0, %v2632_v49  ;;  %3773 = vadd.xlane.f32.xlu1 %v3772_v19 }
 0x4ad   : > { %7325 = vmatmul.mubr.msk.f32.gmra.mxu0 %vm14242_vm0, %v2633_v11 }
 0x4b0   : > { %3779 = vadd.xlane.f32.xlu1 %v3778_v54 }
 0x4bb   : > { %2993 = vrot.lane.b32.xlu0 %v14555_v43, %s8160_s17 }
 0x4bf   : > { %2997 = vrot.lane.b32.xlu0 %v14556_v31, %s8160_s17 }
 0x4c1   : > { %5661 = vrot.lane.b32.xlu1 %v6778_v47, %s8160_s17 }
 0x4c3   : > { %3001 = vrot.lane.b32.xlu0 %v14557_v51, %s8160_s17 }
 0x4c5   : > { %5663 = vrot.lane.b32.xlu1 %v6779_v42, %s8160_s17 }
 0x4c7   : > { %3005 = vrot.lane.b32.xlu0 %v14558_v8, %s8160_s17 }
 0x4c9   : > { %5667 = vrot.lane.b32.xlu1 %v6781_v2, %s8160_s17 }
 0x4cb   : > { %3009 = vrot.lane.b32.xlu0 %v14559_v34, %s8160_s17 }
 0x4cd   : > { %5671 = vrot.lane.b32.xlu1 %v6783_v0, %s8160_s17 }
 0x4cf   : > { %3013 = vrot.lane.b32.xlu0 %v10528_v23, %s8160_s17  ;;  %v10853_v23 = vld [vmem:[%s14123_s4 + $0x30] ss:$0 sm:$0xff] }
 0x4d1   : > { %5675 = vrot.lane.b32.xlu1 %v6785_v22, %s8160_s17 }
 0x4d3   : > { %3017 = vrot.lane.b32.xlu0 %v10547_v12, %s8160_s17 }
 0x4d7   : > { %3021 = vrot.lane.b32.xlu0 %v10640_v48, %s8160_s17 }
 0x4f6   : > { %3776 = vadd.xlane.f32.xlu0 %v3775_v41  ;;  %v316_v41 = vld [vmem:[%s14123_s4 + $0x78] sm:$0xff] }
 0x4f7   : > { %7385 = vmatprep.subr.mxu0 %v316_v41 }
 0x4f8   : > { %7386 = vmatpush3.msra.mxu0 %v316_v41  ;;  %v14578_v41 = vld [vmem:[#allocation12_spill] sm:$0xff] }
 0x500   : > { %v7305_v29 = vpop.f32.mrf.mxu0 }
 0x501   : > { %v2759_v62 = vadd.f32 %v7305_v29, %v10853_v23  ;;  %v315_v29 = vld [vmem:[%s14123_s4 + $0x70] sm:$0xff] }
 0x502   : > { %v2753_v48 = vpop.f32.mrf.mxu0  ;;  %7387 = vmatprep.subr.mxu0 %v315_v29 }
 0x503   : > { %v10856_v12 = vmax.f32 %v2759_v62, 0.0  ;;  %v2754_v55 = vadd.f32 %v10853_v23, %v2753_v48  ;;  %v314_v62 = vld [vmem:[%s14123_s4 + $0x68] sm:$0xff]  ;;  %7388 = vmatpush3.msra.mxu0 %v315_v29  ;;  %v313_v48 = vld [vmem:[%s14123_s4 + $0x60] sm:$0xff]  ;;  %v8044_v29 = vld [vmem:[%s8434_s15 + $0x50] sm:$0xff] }
 0x504   : > { %7389 = vmatprep.subr.mxu0 %v314_v62 }
 0x505   : > { %14561 = vst [vmem:[#allocation51_spill] sm:$0xff] %v10856_v12  ;;  %3059 = vrot.lane.b32.xlu1 %v10856_v12, %s8161_s6  ;;  %v10877_v35 = vmax.f32 %v2754_v55, 0.0  ;;  %7390 = vmatpush3.msra.mxu0 %v314_v62  ;;  %v309_v55 = vld [vmem:[%s14123_s4 + $0x40] sm:$0xff] }
 0x506   : > { %7391 = vmatprep.subr.mxu0 %v313_v48  ;;  %v14580_v62 = vld [vmem:[#allocation15_spill] sm:$0xff] }
 0x507   : > { %14562 = vst [vmem:[#allocation27_spill] sm:$0xff] %v10877_v35  ;;  %7392 = vmatpush3.msra.mxu0 %v313_v48  ;;  %v8045_v48 = vld [vmem:[%s8434_s15 + $0x58] sm:$0xff] }
 0x508   : > { %v7308_v50 = vpop.f32.mrf.mxu0 }
 0x509   : > { %v2769_v17 = vadd.f32 %v7308_v50, %v10853_v23 }
 0x50a   : > { %v2763_v16 = vpop.f32.mrf.mxu0 }
 0x50b   : > { %v10862_v52 = vmax.f32 %v2769_v17, 0.0  ;;  %v2764_v26 = vadd.f32 %v10853_v23, %v2763_v16 }
 0x50c   : > { %5665 = vrot.lane.b32.xlu0 %v6780_v3, %s8160_s17  ;;  %v312_v3 = vld [vmem:[%s14123_s4 + $0x58] sm:$0xff] }
 0x50d   : > { %3063 = vrot.lane.b32.xlu1 %v10862_v52, %s8161_s6  ;;  %v10883_v56 = vmax.f32 %v2764_v26, 0.0  ;;  %7393 = vmatprep.subr.mxu0 %v312_v3  ;;  %v308_v26 = vld [vmem:[%s14123_s4 + $0x38] sm:$0xff] }
 0x50e   : > { %7394 = vmatpush3.msra.mxu0 %v312_v3  ;;  %v14584_v3 = vld [vmem:[#allocation17_spill] sm:$0xff] }
 0x50f   : > { %vm14585_vm11 = vcmp.le.f32.partialorder %v14584_v3, 49.0 }
 0x510   : > { %5669 = vrot.lane.b32.xlu0 %v6782_v10, %s8160_s17  ;;  %v7311_v9 = vpop.f32.mrf.mxu0 }
 0x511   : > { %v2779_v7 = vadd.f32 %v7311_v9, %v10853_v23 }
 0x512   : > { %v2773_v14 = vpop.f32.mrf.mxu0 }
 0x513   : > { %v10872_v37 = vmax.f32 %v2779_v7, 0.0  ;;  %v2774_v32 = vadd.f32 %v10853_v23, %v2773_v14  ;;  %v10985_v14 = vpop.trf.xlu0 }
 0x514   : > { %5673 = vrot.lane.b32.xlu0 %v6784_v59, %s8160_s17  ;;  %v311_v59 = vld [vmem:[%s14123_s4 + $0x50] sm:$0xff] }
 0x515   : > { %3067 = vrot.lane.b32.xlu1 %v10872_v37, %s8161_s6  ;;  %v10892_v15 = vmax.f32 %v2774_v32, 0.0  ;;  %7395 = vmatprep.subr.mxu0 %v311_v59  ;;  %v8036_v32 = vld [vmem:[%s8434_s15 + $0x10] sm:$0xff] }
 0x516   : > { %7396 = vmatpush3.msra.mxu0 %v311_v59  ;;  %v8048_v59 = vld [vmem:[%s8434_s15 + $0x70] sm:$0xff] }
 0x518   : > { %3057 = vrot.lane.b32.xlu0 %v10877_v35, %s8161_s6  ;;  %v7314_v30 = vpop.f32.mrf.mxu0 }
 0x519   : > { %v2789_v21 = vadd.f32 %v7314_v30, %v10853_v23  ;;  %v8035_v30 = vld [vmem:[%s8434_s15 + $0x8] sm:$0xff] }
 0x51a   : > { %v2783_v20 = vpop.f32.mrf.mxu0 }
 0x51b   : > { %v10886_v4 = vmax.f32 %v2789_v21, 0.0  ;;  %v2784_v45 = vadd.f32 %v10853_v23, %v2783_v20  ;;  %v14563_v21 = vld [vmem:[#allocation5_spill] sm:$0xff] }
 0x51c   : > { %3061 = vrot.lane.b32.xlu0 %v10883_v56, %s8161_s6  ;;  %vm14564_vm10 = vcmp.le.f32.partialorder %v14563_v21, 49.0 }
 0x51d   : > { %3071 = vrot.lane.b32.xlu1 %v10886_v4, %s8161_s6  ;;  %v10898_v60 = vmax.f32 %v2784_v45, 0.0  ;;  %v8037_v45 = vld [vmem:[%s8434_s15 + $0x18] sm:$0xff] }
 0x520   : > { %3065 = vrot.lane.b32.xlu0 %v10892_v15, %s8161_s6  ;;  %v7317_v38 = vpop.f32.mrf.mxu0 }
 0x521   : > { %v2799_v19 = vadd.f32 %v7317_v38, %v10853_v23  ;;  %v14566_v38 = vld [vmem:[#allocation7_spill] sm:$0xff] }
 0x522   : > { %v2793_v24 = vpop.f32.mrf.mxu0  ;;  %vm14567_vm6 = vcmp.le.f32.partialorder %v14566_v38, 49.0 }
 0x523   : > { %v10900_v6 = vmax.f32 %v2799_v19, 0.0  ;;  %v2794_v46 = vadd.f32 %v10853_v23, %v2793_v24  ;;  %v8038_v19 = vld [vmem:[%s8434_s15 + $0x20] sm:$0xff]  ;;  %v14568_v24 = vld [vmem:[#allocation8_spill] sm:$0xff] }
 0x524   : > { %3069 = vrot.lane.b32.xlu0 %v10898_v60, %s8161_s6  ;;  %vm14569_vm9 = vcmp.le.f32.partialorder %v14568_v24, 49.0 }
 0x525   : > { %v10905_v49 = vmax.f32 %v2794_v46, 0.0  ;;  %3075 = vrot.lane.b32.xlu1 %v10900_v6, %s8161_s6  ;;  %v8039_v46 = vld [vmem:[%s8434_s15 + $0x28] sm:$0xff] }
 0x528   : > { %3073 = vrot.lane.b32.xlu0 %v10905_v49, %s8161_s6 }
 0x539   : > { %v7320_v11 = vpop.f32.mrf.mxu0 }
 0x53a   : > { %v2809_v54 = vadd.f32 %v7320_v11, %v10853_v23  ;;  %v14570_v11 = vld [vmem:[#allocation9_spill] sm:$0xff] }
 0x53b   : > { %v2803_v43 = vpop.f32.mrf.mxu0  ;;  %vm14571_vm4 = vcmp.le.f32.partialorder %v14570_v11, 49.0 }
 0x53c   : > { %v10912_v47 = vmax.f32 %v2809_v54, 0.0  ;;  %v2804_v31 = vadd.f32 %v10853_v23, %v2803_v43  ;;  %v8040_v54 = vld [vmem:[%s8434_s15 + $0x30] sm:$0xff]  ;;  %v14572_v43 = vld [vmem:[#allocation11_spill] sm:$0xff] }
 0x53e   : > { %v10915_v42 = vmax.f32 %v2804_v31, 0.0  ;;  %3079 = vrot.lane.b32.xlu1 %v10912_v47, %s8161_s6  ;;  %v8041_v31 = vld [vmem:[%s8434_s15 + $0x38] sm:$0xff] }
 0x540   : > { %3077 = vrot.lane.b32.xlu0 %v10915_v42, %s8161_s6 }
 0x560   : > { %v7323_v51 = vpop.f32.mrf.mxu0 }
 0x561   : > { %v2819_v2 = vadd.f32 %v7323_v51, %v10853_v23  ;;  %v14574_v51 = vld [vmem:[#allocation10_spill] sm:$0xff] }
 0x562   : > { %v2813_v8 = vpop.f32.mrf.mxu0 }
 0x563   : > { %v10922_v0 = vmax.f32 %v2819_v2, 0.0  ;;  %v2814_v34 = vadd.f32 %v10853_v23, %v2813_v8  ;;  %v8042_v2 = vld [vmem:[%s8434_s15 + $0x40] sm:$0xff]  ;;  %v14576_v8 = vld [vmem:[#allocation13_spill] sm:$0xff] }
 0x565   : > { %v10925_v22 = vmax.f32 %v2814_v34, 0.0  ;;  %3083 = vrot.lane.b32.xlu1 %v10922_v0, %s8161_s6  ;;  %v8043_v34 = vld [vmem:[%s8434_s15 + $0x48] sm:$0xff] }
 0x567   : > { %3081 = vrot.lane.b32.xlu0 %v10925_v22, %s8161_s6 }
 0x56d   : > { %v7326_v50 = vpop.f32.mrf.mxu0 }
 0x56e   : > { %v2829_v17 = vadd.f32 %v7326_v50, %v10853_v23  ;;  %v14582_v50 = vld [vmem:[#allocation14_spill] sm:$0xff] }
 0x56f   : > { %v2823_v10 = vpop.f32.mrf.mxu0 }
 0x570   : > { %v10954_v16 = vmax.f32 %v2829_v17, 0.0  ;;  %v2824_v9 = vadd.f32 %v10853_v23, %v2823_v10  ;;  %v310_v23 = vld [vmem:[%s14123_s4 + $0x48] sm:$0xff]  ;;  %v8046_v17 = vld [vmem:[%s8434_s15 + $0x60] sm:$0xff] }
 0x571   : > { %7397 = vmatprep.subr.mxu0 %v310_v23  ;;  %v8047_v10 = vld [vmem:[%s8434_s15 + $0x68] sm:$0xff] }
 0x572   : > { %v10957_v7 = vmax.f32 %v2824_v9, 0.0  ;;  %3087 = vrot.lane.b32.xlu1 %v10954_v16, %s8161_s6  ;;  %7327 = vmatprep.subr.mxu1 %v10954_v16  ;;  %v14586_v9 = vld [vmem:[#allocation19_spill] sm:$0xff] }
 0x573   : > { %7328 = vmatpush3.msra.mxu1 %v10954_v16  ;;  %7398 = vmatpush3.msra.mxu0 %v310_v23  ;;  %v14588_v23 = vld [vmem:[#allocation20_spill] sm:$0xff] }
 0x574   : > { %3085 = vrot.lane.b32.xlu0 %v10957_v7, %s8161_s6  ;;  %7329 = vmatprep.subr.mxu1 %v10957_v7 }
 0x575   : > { %7330 = vmatpush3.msra.mxu1 %v10957_v7  ;;  %7399 = vmatprep.subr.mxu0 %v309_v55 }
 0x576   : > { %7331 = vmatprep.subr.mxu1 %v10922_v0  ;;  %7400 = vmatpush3.msra.mxu0 %v309_v55  ;;  %v8049_v55 = vld [vmem:[%s8434_s15 + $0x78] sm:$0xff] }
 0x577   : > { %7332 = vmatpush3.msra.mxu1 %v10922_v0  ;;  %7401 = vmatprep.subr.mxu0 %v308_v26 }
 0x578   : > { %7333 = vmatprep.subr.mxu1 %v10925_v22  ;;  %7402 = vmatpush3.msra.mxu0 %v308_v26  ;;  %v14590_v26 = vld [vmem:[#allocation21_spill] sm:$0xff] }
 0x579   : > { %7334 = vmatpush3.msra.mxu1 %v10925_v22  ;;  %7462 = vmatprep.subr.mxu0 %v10985_v14 }
 0x57a   : > { %7335 = vmatprep.subr.mxu1 %v10912_v47 }
 0x57b   : > { %7336 = vmatpush3.msra.mxu1 %v10912_v47 }
 0x57c   : > { %7337 = vmatprep.subr.mxu1 %v10915_v42 }
 0x57d   : > { %7338 = vmatpush3.msra.mxu1 %v10915_v42 }
 0x57e   : > { %7339 = vmatprep.subr.mxu1 %v10900_v6 }
 0x57f   : > { %7340 = vmatpush3.msra.mxu1 %v10900_v6 }
 0x580   : > { %7341 = vmatprep.subr.mxu1 %v10905_v49 }
 0x581   : > { %7342 = vmatpush3.msra.mxu1 %v10905_v49 }
 0x582   : > { %7343 = vmatprep.subr.mxu1 %v10886_v4 }
 0x583   : > { %7344 = vmatpush3.msra.mxu1 %v10886_v4 }
 0x584   : > { %7345 = vmatprep.subr.mxu1 %v10898_v60 }
 0x585   : > { %7346 = vmatpush3.msra.mxu1 %v10898_v60 }
 0x586   : > { %7347 = vmatprep.subr.mxu1 %v10872_v37 }
 0x587   : > { %7348 = vmatpush3.msra.mxu1 %v10872_v37 }
 0x588   : > { %7349 = vmatprep.subr.mxu1 %v10892_v15 }
 0x589   : > { %7350 = vmatpush3.msra.mxu1 %v10892_v15 }
 0x58a   : > { %7351 = vmatprep.subr.mxu1 %v10862_v52 }
 0x58b   : > { %7352 = vmatpush3.msra.mxu1 %v10862_v52 }
 0x58c   : > { %7353 = vmatprep.subr.mxu1 %v10883_v56 }
 0x58d   : > { %7354 = vmatpush3.msra.mxu1 %v10883_v56 }
 0x58e   : > { %7355 = vmatprep.subr.mxu1 %v10856_v12 }
 0x58f   : > { %7356 = vmatpush3.msra.mxu1 %v10856_v12 }
 0x590   : > { %7357 = vmatprep.subr.mxu1 %v10877_v35 }
 0x591   : > { %7358 = vmatpush3.msra.mxu1 %v10877_v35 }
 0x592   : > { %7360 = vmatmul.mubr.msk.f32.vlgmr.msra.gmra.mxu1 %vm14564_vm10, %v8035_v30  ;;  %vm14573_vm10 = vcmp.le.f32.partialorder %v14572_v43, 49.0  ;;  %v2996_v30 = vpop.permute.xlu1 %2995 }
 0x593   : > { %7362 = vmatprep.mubr.msk.f32.mxu1 %vm731_vm3, %v8036_v32  ;;  %vm14575_vm3 = vcmp.le.f32.partialorder %v14574_v51, 49.0 }
 0x596   : > { %7363 = vmatmul.mubr.msk.f32.gmra.mxu1 %vm14567_vm6, %v8037_v45  ;;  %vm14577_vm6 = vcmp.le.f32.partialorder %v14576_v8, 49.0  ;;  %v3000_v21 = vpop.permute.xlu1 %2999  ;;  %v2994_v8 = vpop.permute.xlu0 %2993 }
 0x597   : > { %7365 = vmatprep.mubr.msk.f32.mxu1 %vm14569_vm9, %v8038_v19  ;;  %vm14579_vm9 = vcmp.le.f32.partialorder %v14578_v41, 49.0 }
 0x59a   : > { %7366 = vmatmul.mubr.msk.f32.gmra.mxu1 %vm14571_vm4, %v8039_v46  ;;  %vm14581_vm4 = vcmp.le.f32.partialorder %v14580_v62, 49.0  ;;  %v11055_v32 = vpop.permute.xlu1 %3003  ;;  %v2998_v41 = vpop.permute.xlu0 %2997 }
 0x59b   : > { %7368 = vmatprep.mubr.msk.f32.mxu1 %vm14573_vm10, %v8040_v54  ;;  %vm14583_vm10 = vcmp.le.f32.partialorder %v14582_v50, 49.0 }
 0x59e   : > { %7369 = vmatmul.mubr.msk.f32.gmra.mxu1 %vm14575_vm3, %v8041_v31  ;;  %vm14587_vm3 = vcmp.le.f32.partialorder %v14586_v9, 49.0  ;;  %v11057_v20 = vpop.permute.xlu1 %3007  ;;  %v3002_v62 = vpop.permute.xlu0 %3001 }
 0x59f   : > { %7371 = vmatprep.mubr.msk.f32.mxu1 %vm14577_vm6, %v8042_v2  ;;  %vm14589_vm6 = vcmp.le.f32.partialorder %v14588_v23, 49.0 }
 0x5a2   : > { %7372 = vmatmul.mubr.msk.f32.gmra.mxu1 %vm14579_vm9, %v8043_v34  ;;  %vm14591_vm9 = vcmp.le.f32.partialorder %v14590_v26, 49.0  ;;  %v11059_v45 = vpop.permute.xlu1 %3011  ;;  %v3006_v50 = vpop.permute.xlu0 %3005 }
 0x5a3   : > { %7374 = vmatprep.mubr.msk.f32.mxu1 %vm14581_vm4, %v8044_v29  ;;  %vm14613_vm4 = vcmask 64512  }
 0x5a6   : > { %7375 = vmatmul.mubr.msk.f32.gmra.mxu1 %vm14583_vm10, %v8045_v48  ;;  %v11061_v38 = vpop.permute.xlu1 %3015  ;;  %v11089_v3 = vpop.permute.xlu0 %3009  ;;  %vm14614_vm10 = vmmov %vm14613_vm4 }
 0x5a7   : > { %7377 = vmatprep.mubr.msk.f32.mxu1 %vm14585_vm11, %v8046_v17  ;;  %vm14241_vm11 = vcmask 654336  }
 0x5aa   : > { %7378 = vmatmul.mubr.msk.f32.gmra.mxu1 %vm14587_vm3, %v8047_v10  ;;  %v11063_v19 = vpop.permute.xlu1 %3019  ;;  %v11093_v9 = vpop.permute.xlu0 %3013  ;;  %vm14615_vm3 = vmmov %vm14613_vm4 }
 0x5ab   : > { %7380 = vmatprep.mubr.msk.f32.mxu1 %vm14589_vm6, %v8048_v59  ;;  %vm14616_vm6 = vmmov %vm14615_vm3 }
 0x5ae   : > { %7381 = vmatmul.mubr.msk.f32.gmra.mxu1 %vm14591_vm9, %v8049_v55  ;;  %v11065_v24 = vpop.permute.xlu1 %3023  ;;  %v11097_v23 = vpop.permute.xlu0 %3017  ;;  %vm14617_vm9 = vmmov %vm14615_vm3 }
 0x5b2   : > { %v11067_v46 = vpop.xlane.xlu1 %3734  ;;  %v11101_v26 = vpop.permute.xlu0 %3021 }
 0x5b6   : > { %v11069_v11 = vpop.xlane.xlu1 %3737 }
 0x5ba   : > { %v11071_v54 = vpop.xlane.xlu1 %3740 }
 0x5bb   : > { %14592 = vst [vmem:[#allocation55_spill] sm:$0xff] %v11071_v54 }
 0x5be   : > { %v11073_v43 = vpop.xlane.xlu1 %3743 }
 0x5bf   : > { %14593 = vst [vmem:[#allocation23_spill] sm:$0xff] %v11073_v43 }
 0x5c2   : > { %v11075_v31 = vpop.xlane.xlu1 %3746 }
 0x5c6   : > { %v11077_v51 = vpop.xlane.xlu1 %3749 }
 0x5c7   : > { %14594 = vst [vmem:[#allocation54_spill] sm:$0xff] %v11077_v51 }
 0x5ca   : > { %v11079_v2 = vpop.xlane.xlu1 %3752 }
 0x5cb   : > { %14595 = vst [vmem:[#allocation56_spill] sm:$0xff] %v11079_v2 }
 0x5ce   : > { %v11081_v34 = vpop.xlane.xlu1 %3755 }
 0x5cf   : > { %14596 = vst [vmem:[#allocation24_spill] sm:$0xff] %v11081_v34 }
 0x5d2   : > { %v11083_v29 = vpop.xlane.xlu1 %3758 }
 0x5d3   : > { %14597 = vst [vmem:[#allocation58_spill] sm:$0xff] %v11083_v29 }
 0x5d6   : > { %v11085_v48 = vpop.xlane.xlu1 %3761 }
 0x5d7   : > { %14598 = vst [vmem:[#allocation33_spill] sm:$0xff] %v11085_v48  ;;  %v11105_v48 = vpop.xlane.xlu0 %3776 }
 0x5d8   : > { %14604 = vst [vmem:[#allocation61_spill] sm:$0xff] %v11105_v48 }
 0x5da   : > { %v11087_v17 = vpop.xlane.xlu1 %3764 }
 0x5db   : > { %14599 = vst [vmem:[#allocation45_spill] sm:$0xff] %v11087_v17  ;;  %v11109_v17 = vpop.permute.xlu0 %5665 }
 0x5dc   : > { %14606 = vst [vmem:[#allocation31_spill] sm:$0xff] %v11109_v17 }
 0x5de   : > { %v11091_v10 = vpop.xlane.xlu1 %3767 }
 0x5df   : > { %14600 = vst [vmem:[#allocation30_spill] sm:$0xff] %v11091_v10  ;;  %v11113_v10 = vpop.permute.xlu0 %5669 }
 0x5e0   : > { %14608 = vst [vmem:[#allocation40_spill] sm:$0xff] %v11113_v10 }
 0x5e2   : > { %v11095_v59 = vpop.xlane.xlu1 %3770 }
 0x5e3   : > { %14601 = vst [vmem:[#allocation59_spill] sm:$0xff] %v11095_v59  ;;  %v11117_v59 = vpop.permute.xlu0 %5673 }
 0x5e4   : > { %14610 = vst [vmem:[#allocation64_spill] sm:$0xff] %v11117_v59 }
 0x5e6   : > { %v11099_v55 = vpop.xlane.xlu1 %3773 }
 0x5e7   : > { %14602 = vst [vmem:[#allocation60_spill] sm:$0xff] %v11099_v55  ;;  %v3058_v55 = vpop.permute.xlu0 %3057 }
 0x5ea   : > { %v11103_v29 = vpop.xlane.xlu1 %3779 }
 0x5eb   : > { %14603 = vst [vmem:[#allocation29_spill] sm:$0xff] %v11103_v29  ;;  %v3062_v12 = vpop.permute.xlu0 %3061 }
 0x5ee   : > { %v11107_v51 = vpop.permute.xlu1 %5661 }
 0x5ef   : > { %14605 = vst [vmem:[#allocation49_spill] sm:$0xff] %v11107_v51 }
 0x5f2   : > { %v11111_v2 = vpop.permute.xlu1 %5663 }
 0x5f3   : > { %14607 = vst [vmem:[#allocation34_spill] sm:$0xff] %v11111_v2 }
 0x5f6   : > { %v11115_v54 = vpop.permute.xlu1 %5667 }
 0x5f7   : > { %14609 = vst [vmem:[#allocation65_spill] sm:$0xff] %v11115_v54 }
 0x5fa   : > { %v11119_v43 = vpop.permute.xlu1 %5671 }
 0x5fb   : > { %14611 = vst [vmem:[#allocation67_spill] sm:$0xff] %v11119_v43 }
 0x5fe   : > { %v11121_v35 = vpop.permute.xlu1 %5675 }
 0x5ff   : > { %14612 = vst [vmem:[#allocation66_spill] sm:$0xff] %v11121_v35  ;;  %v3066_v35 = vpop.permute.xlu0 %3065 }
 0x602   : > { %v3060_v2 = vpop.permute.xlu1 %3059 }
 0x652   : > { %v7361_v29 = vpop.f32.mrf.mxu1 }
 0x653   : > { %v3106_v48 = vsel %vm14244_vm5, %v7361_v29, %v2996_v30  ;;  %v3064_v29 = vpop.permute.xlu1 %3063 }
 0x654   : > { %v2914_v51 = vpop.f32.mrf.mxu1  ;;  %v3122_v54 = vsel %vm14242_vm0, %v3106_v48, %v3060_v2  ;;  %v11136_v2 = vld [vmem:[%s14123_s4 + $0x28] sm:$0xff] }
 0x655   : > { %v3105_v17 = vsel %vm14244_vm5, %v2914_v51, %v2994_v8 }
 0x656   : > { %v7364_v34 = vpop.f32.mrf.mxu1  ;;  %v3121_v10 = vsel %vm14242_vm0, %v3105_v17, %v3058_v55  ;;  %v3070_v17 = vpop.permute.xlu0 %3069 }
 0x657   : > { %7403 = vmatprep.mubr.msk.f32.mxu0 %vm14241_vm11, %v3121_v10  ;;  %v3108_v59 = vsel %vm14244_vm5, %v7364_v34, %v3000_v21 }
 0x658   : > { %v2924_v43 = vpop.f32.mrf.mxu1  ;;  %7404 = vmatmul.mubr.msk.f32.vlgmr.msra.gmra.mxu0 %vm14241_vm11, %v3122_v54  ;;  %v3124_v21 = vsel %vm14242_vm0, %v3108_v59, %v3064_v29 }
 0x659   : > { %v3107_v30 = vsel %vm14244_vm5, %v2924_v43, %v2998_v41  ;;  %7463 = vmatpush3.msra.mxu0 %v10985_v14 }
 0x65a   : > { %v7367_v51 = vpop.f32.mrf.mxu1  ;;  %v3123_v8 = vsel %vm14242_vm0, %v3107_v30, %v3062_v12  ;;  %7544 = vmatprep.subr.mxu0 %v11136_v2  ;;  %v3068_v12 = vpop.permute.xlu1 %3067 }
 0x65b   : > { %7406 = vmatprep.mubr.msk.f32.mxu0 %vm14241_vm11, %v3123_v8  ;;  %v3110_v54 = vsel %vm14244_vm5, %v7367_v51, %v11055_v32 }
 0x65c   : > { %v2934_v43 = vpop.f32.mrf.mxu1  ;;  %7407 = vmatmul.mubr.msk.f32.gmra.mxu0 %vm14241_vm11, %v3124_v21  ;;  %v3126_v10 = vsel %vm14242_vm0, %v3110_v54, %v3068_v12 }
 0x65d   : > { %v3109_v34 = vsel %vm14244_vm5, %v2934_v43, %v3002_v62 }
 0x65e   : > { %v7370_v41 = vpop.f32.mrf.mxu1  ;;  %v3125_v48 = vsel %vm14242_vm0, %v3109_v34, %v3066_v35  ;;  %v3072_v30 = vpop.permute.xlu1 %3071 }
 0x65f   : > { %7409 = vmatprep.mubr.msk.f32.mxu0 %vm14241_vm11, %v3125_v48  ;;  %v3112_v59 = vsel %vm14244_vm5, %v7370_v41, %v11057_v20  ;;  %v3074_v20 = vpop.permute.xlu0 %3073 }
 0x660   : > { %v2944_v55 = vpop.f32.mrf.mxu1  ;;  %7410 = vmatmul.mubr.msk.f32.gmra.mxu0 %vm14241_vm11, %v3126_v10  ;;  %v3128_v35 = vsel %vm14242_vm0, %v3112_v59, %v3072_v30 }
 0x661   : > { %v3111_v32 = vsel %vm14244_vm5, %v2944_v55, %v3006_v50 }
 0x662   : > { %v7373_v29 = vpop.f32.mrf.mxu1  ;;  %v3127_v62 = vsel %vm14242_vm0, %v3111_v32, %v3070_v17  ;;  %v3076_v54 = vpop.permute.xlu1 %3075 }
 0x663   : > { %7412 = vmatprep.mubr.msk.f32.mxu0 %vm14241_vm11, %v3127_v62  ;;  %v3114_v51 = vsel %vm14244_vm5, %v7373_v29, %v11059_v45  ;;  %v3078_v45 = vpop.permute.xlu0 %3077 }
 0x664   : > { %v2954_v8 = vpop.f32.mrf.mxu1  ;;  %7413 = vmatmul.mubr.msk.f32.gmra.mxu0 %vm14241_vm11, %v3128_v35  ;;  %v3130_v34 = vsel %vm14242_vm0, %v3114_v51, %v3076_v54 }
 0x665   : > { %v3113_v21 = vsel %vm14244_vm5, %v2954_v8, %v11089_v3 }
 0x666   : > { %v7376_v50 = vpop.f32.mrf.mxu1  ;;  %v3129_v43 = vsel %vm14242_vm0, %v3113_v21, %v3074_v20  ;;  %v3080_v17 = vpop.permute.xlu1 %3079 }
 0x667   : > { %7415 = vmatprep.mubr.msk.f32.mxu0 %vm14241_vm11, %v3129_v43  ;;  %v3116_v12 = vsel %vm14244_vm5, %v7376_v50, %v11061_v38  ;;  %v3082_v38 = vpop.permute.xlu0 %3081 }
 0x668   : > { %v2964_v41 = vpop.f32.mrf.mxu1  ;;  %7416 = vmatmul.mubr.msk.f32.gmra.mxu0 %vm14241_vm11, %v3130_v34  ;;  %v3132_v59 = vsel %vm14242_vm0, %v3116_v12, %v3080_v17 }
 0x669   : > { %v3115_v48 = vsel %vm14244_vm5, %v2964_v41, %v11093_v9 }
 0x66a   : > { %v7379_v3 = vpop.f32.mrf.mxu1  ;;  %v3131_v10 = vsel %vm14242_vm0, %v3115_v48, %v3078_v45  ;;  %v3084_v29 = vpop.permute.xlu1 %3083  ;;  %v11265_v48 = vld [vmem:[%s14123_s4 + $0x88] ss:$0 sm:$0xff] }
 0x66b   : > { %7418 = vmatprep.mubr.msk.f32.mxu0 %vm14241_vm11, %v3131_v10  ;;  %v3118_v55 = vsel %vm14244_vm5, %v7379_v3, %v11063_v19  ;;  %v3086_v19 = vpop.permute.xlu0 %3085 }
 0x66c   : > { %v2974_v32 = vpop.f32.mrf.mxu1  ;;  %7419 = vmatmul.mubr.msk.f32.gmra.mxu0 %vm14241_vm11, %v3132_v59  ;;  %v3134_v35 = vsel %vm14242_vm0, %v3118_v55, %v3084_v29 }
 0x66d   : > { %v3117_v30 = vsel %vm14244_vm5, %v2974_v32, %v11097_v23 }
 0x66e   : > { %v7382_v9 = vpop.f32.mrf.mxu1  ;;  %v3133_v62 = vsel %vm14242_vm0, %v3117_v30, %v3082_v38  ;;  %v3088_v21 = vpop.permute.xlu1 %3087 }
 0x66f   : > { %7421 = vmatprep.mubr.msk.f32.mxu0 %vm14241_vm11, %v3133_v62  ;;  %v3120_v51 = vsel %vm14244_vm5, %v7382_v9, %v11065_v24  ;;  %v8051_v24 = vld [vmem:[%s14123_s4 + $0x20] sm:$0xff] }
 0x670   : > { %v2984_v8 = vpop.f32.mrf.mxu1  ;;  %7422 = vmatmul.mubr.msk.f32.gmra.mxu0 %vm14241_vm11, %v3134_v35  ;;  %v3136_v54 = vsel %vm14242_vm0, %v3120_v51, %v3088_v21 }
 0x671   : > { %v3119_v20 = vsel %vm14244_vm5, %v2984_v8, %v11101_v26 }
 0x672   : > { %v3135_v23 = vsel %vm14242_vm0, %v3119_v20, %v3086_v19  ;;  %vm14625_vm0 = vmmov %vm14615_vm3 }
 0x673   : > { %7424 = vmatprep.mubr.msk.f32.mxu0 %vm14241_vm11, %v3135_v23 }
 0x674   : > { %7425 = vmatmul.mubr.msk.f32.gmra.mxu0 %vm14241_vm11, %v3136_v54  ;;  %vm14624_vm11 = vmmov %vm14615_vm3 }
 0x675   : > { %7464 = vmatprep.mubr.msk.f32.mxu0 %vm14613_vm4, %v10684_v27  ;;  %v8052_v27 = vld [vmem:[%s14123_s4 + $0x18] sm:$0xff]  ;;  %vm14618_vm4 = vmmov %vm14615_vm3 }
 0x678   : > { %7465 = vmatmul.mubr.msk.f32.vlgmr.msra.gmra.mxu0 %vm14614_vm10, %v10693_v33  ;;  %v8053_v33 = vld [vmem:[%s14123_s4 + $0x10] sm:$0xff]  ;;  %vm14619_vm10 = vmmov %vm14615_vm3 }
 0x679   : > { %7467 = vmatprep.mubr.msk.f32.mxu0 %vm14615_vm3, %v10700_v58  ;;  %7545 = vmatpush3.msra.mxu0 %v11136_v2  ;;  %v8054_v58 = vld [vmem:[%s14123_s4 + $0x8] sm:$0xff] }
 0x67a   : > { %7546 = vmatprep.subr.mxu0 %v8051_v24 }
 0x67b   : > { %7547 = vmatpush3.msra.mxu0 %v8051_v24 }
 0x67c   : > { %7468 = vmatmul.mubr.msk.f32.gmra.mxu0 %vm14616_vm6, %v10706_v18  ;;  %7548 = vmatprep.subr.mxu0 %v8052_v27  ;;  %v8055_v18 = vld [vmem:[%s14123_s4] sm:$0xff]  ;;  %vm14620_vm6 = vmmov %vm14615_vm3 }
 0x67d   : > { %7470 = vmatprep.mubr.msk.f32.mxu0 %vm14617_vm9, %v10711_v61  ;;  %7549 = vmatpush3.msra.mxu0 %v8052_v27  ;;  %vm14621_vm9 = vmmov %vm14615_vm3  ;;  %v11238_v61 = vld [vmem:[%s8364_s12 + $0xc8] sm:$0xff] }
 0x67e   : > { %7550 = vmatprep.subr.mxu0 %v8053_v33  ;;  %5679 = vrot.lane.b32.xlu1 %v11238_v61, %s8160_s17 }
 0x67f   : > { %7551 = vmatpush3.msra.mxu0 %v8053_v33 }
 0x680   : > { %7471 = vmatmul.mubr.msk.f32.gmra.mxu0 %vm14618_vm4, %v10715_v39  ;;  %7552 = vmatprep.subr.mxu0 %v8054_v58  ;;  %vm14622_vm4 = vmmov %vm14615_vm3  ;;  %v11243_v39 = vld [vmem:[%s8364_s12 + $0xc0] sm:$0xff] }
 0x681   : > { %7473 = vmatprep.mubr.msk.f32.mxu0 %vm14619_vm10, %v10719_v25  ;;  %7553 = vmatpush3.msra.mxu0 %v8054_v58  ;;  %vm14623_vm10 = vmmov %vm14615_vm3  ;;  %v14251_v25 = vmov 0.0  }
 0x682   : > { %7554 = vmatprep.subr.mxu0 %v8055_v18  ;;  %5677 = vrot.lane.b32.xlu0 %v11243_v39, %s8160_s17 }
 0x683   : > { %7555 = vmatpush3.msra.mxu0 %v8055_v18  ;;  %7427 = vmatprep.subr.mxu1 %v14251_v25 }
 0x684   : > { %7474 = vmatmul.mubr.msk.f32.gmra.mxu0 %vm14615_vm3, %v10723_v28  ;;  %7636 = vmatprep.subr.mxu0 %v10932_v63  ;;  %vm14626_vm3 = vmmov %vm14625_vm0 }
 0x685   : > { %7476 = vmatprep.mubr.msk.f32.mxu0 %vm14620_vm6, %v10729_v40  ;;  %vm14627_vm6 = vmmov %vm14625_vm0 }
 0x688   : > { %7477 = vmatmul.mubr.msk.f32.gmra.mxu0 %vm14621_vm9, %v10739_v5 }
 0x689   : > { %7479 = vmatprep.mubr.msk.f32.mxu0 %vm14622_vm4, %v10749_v36 }
 0x68c   : > { %7480 = vmatmul.mubr.msk.f32.gmra.mxu0 %vm14623_vm10, %v10756_v13 }
 0x68d   : > { %7482 = vmatprep.mubr.msk.f32.mxu0 %vm14624_vm11, %v10766_v1 }
 0x690   : > { %7483 = vmatmul.mubr.msk.f32.gmra.mxu0 %vm14625_vm0, %v10773_v53  ;;  %vm14243_vm0 = vmmov 0  }
 0x691   : > { %7485 = vmatprep.mubr.msk.f32.mxu0 %vm14626_vm3, %v10780_v57  ;;  %7459 = vmatprep.mubr.msk.f32.mxu1 %vm14243_vm0, %v14251_v25  ;;  %v3781_v57 = vmul.f32 %v10985_v14, %v10985_v14 }
 0x693   : > { %v3782_v26 = vrot.slane %v3781_v57, 4 }
 0x694   : > { %7486 = vmatmul.mubr.msk.f32.gmra.mxu0 %vm14627_vm6, %v10787_v44 }
 0x695   : > { %v3783_v43 = vadd.f32 %v3782_v26, %v3781_v57 }
 0x697   : > { %v3784_v41 = vrot.slane %v3783_v43, 2 }
 0x699   : > { %v3785_v10 = vadd.f32 %v3784_v41, %v3783_v43 }
 0x69b   : > { %v3786_v51 = vrot.slane %v3785_v10, 1 }
 0x718   : > { %v11250_v28 = vpop.f32.mrf.mxu0 }
 0x71a   : > { %v11252_v40 = vpop.f32.mrf.mxu0 }
 0x71c   : > { %v11254_v5 = vpop.f32.mrf.mxu0 }
 0x71e   : > { %v11256_v36 = vpop.f32.mrf.mxu0 }
 0x720   : > { %v7411_v13 = vpop.f32.mrf.mxu0 }
 0x722   : > { %v11258_v1 = vpop.f32.mrf.mxu0 }
 0x724   : > { %v7414_v53 = vpop.f32.mrf.mxu0 }
 0x726   : > { %v3286_v44 = vpop.f32.mrf.mxu0 }
 0x728   : > { %v7417_v63 = vpop.f32.mrf.mxu0 }
 0x729   : > { %v3302_v54 = vadd.f32 %v7417_v63, %v11265_v48 }
 0x72a   : > { %v3296_v2 = vpop.f32.mrf.mxu0 }
 0x72b   : > { %v3297_v58 = vadd.f32 %v11265_v48, %v3296_v2  ;;  %v3344_v26 = vmax.f32 %v3302_v54, 0.0  ;;  %v3287_v2 = vadd.f32 %v11265_v48, %v3286_v44  ;;  %v3277_v44 = vadd.f32 %v11265_v48, %v11258_v1 }
 0x72c   : > { %v7420_v50 = vpop.f32.mrf.mxu0 }
 0x72d   : > { %v3312_v29 = vadd.f32 %v7420_v50, %v11265_v48  ;;  %v3360_v41 = vadd.f32 %v3344_v26, %v10900_v6  ;;  %v3272_v6 = vadd.f32 %v11254_v5, %v11265_v48 }
 0x72e   : > { %v3306_v34 = vpop.f32.mrf.mxu0 }
 0x72f   : > { %v3307_v19 = vadd.f32 %v11265_v48, %v3306_v34  ;;  %v3346_v24 = vmax.f32 %v3312_v29, 0.0 }
 0x730   : > { %v7423_v12 = vpop.f32.mrf.mxu0 }
 0x731   : > { %v3322_v3 = vadd.f32 %v7423_v12, %v11265_v48  ;;  %v3345_v18 = vmax.f32 %v3307_v19, 0.0  ;;  %v3362_v50 = vadd.f32 %v3346_v24, %v10912_v47  ;;  %v14630_v19 = vld [vmem:[#allocation24_spill] sm:$0xff] }
 0x732   : > { %v3316_v45 = vpop.f32.mrf.mxu0 }
 0x733   : > { %v3317_v55 = vadd.f32 %v11265_v48, %v3316_v45  ;;  %v3348_v9 = vmax.f32 %v3322_v3, 0.0  ;;  %v3361_v34 = vadd.f32 %v3345_v18, %v10915_v42  ;;  %v3341_v42 = vmax.f32 %v3287_v2, 0.0  ;;  %v367_v18 = vld [vmem:[%s11349_s23] sm:$0xf] }
 0x734   : > { %v7426_v17 = vpop.f32.mrf.mxu0 }
 0x735   : > { %v3332_v14 = vadd.f32 %v7426_v17, %v11265_v48  ;;  %v3347_v20 = vmax.f32 %v3317_v55, 0.0  ;;  %v3364_v27 = vadd.f32 %v3348_v9, %v10922_v0  ;;  %v3292_v0 = vadd.f32 %v7414_v53, %v11265_v48 }
 0x736   : > { %v3326_v59 = vpop.f32.mrf.mxu0 }
 0x737   : > { %v3350_v32 = vmax.f32 %v3332_v14, 0.0  ;;  %v3327_v38 = vadd.f32 %v11265_v48, %v3326_v59  ;;  %v3342_v53 = vmax.f32 %v3292_v0, 0.0  ;;  %v14633_v0 = vld [vmem:[#allocation23_spill] sm:$0xff] }
 0x738   : > { %v7466_v30 = vpop.f32.mrf.mxu0 }
 0x739   : > { %v3366_v62 = vadd.f32 %v3350_v32, %v10954_v16  ;;  %v3349_v35 = vmax.f32 %v3327_v38, 0.0  ;;  %v11280_v16 = vadd.f32 %v3786_v51, %v3785_v10  ;;  %v3805_v33 = vmul.f32 2.0, %v7466_v30 }
 0x73a   : > { %v3638_v8 = vpop.f32.mrf.mxu0  ;;  %v3358_v10 = vadd.f32 %v3342_v53, %v10886_v4  ;;  %v3357_v32 = vadd.f32 %v3341_v42, %v10898_v60  ;;  %v3262_v4 = vadd.f32 %v11250_v28, %v11265_v48  ;;  %v3338_v38 = vmax.f32 %v3272_v6, 0.0 }
 0x73b   : > { %v3365_v21 = vadd.f32 %v3349_v35, %v10957_v7  ;;  %7428 = vmatpush3.msra.mxu1 %v3366_v62  ;;  %v3363_v7 = vadd.f32 %v3347_v20, %v10925_v22  ;;  %v3789_v63 = vadd.f32 %v11280_v16, %v11069_v11  ;;  %v3343_v22 = vmax.f32 %v3297_v58, 0.0 }
 0x73c   : > { %7429 = vmatprep.subr.mxu1 %v14251_v25  ;;  %v11276_v23 = vpop.f32.mrf.mxu0  ;;  %v3282_v11 = vadd.f32 %v7411_v13, %v11265_v48  ;;  %v3804_v45 = vmul.f32 2.0, %v3638_v8  ;;  %v3788_v13 = vadd.f32 %v11280_v16, %v11067_v46  ;;  %v3339_v46 = vmax.f32 %v3277_v44, 0.0 }
 0x73d   : > { %7430 = vmatpush3.msra.mxu1 %v3365_v21  ;;  %v3821_v43 = vsub.f32 %v3789_v63, %v3805_v33  ;;  %v3359_v17 = vadd.f32 %v3343_v22, %v10905_v49  ;;  %v3267_v49 = vadd.f32 %v11265_v48, %v11256_v36  ;;  %v3792_v5 = vadd.f32 %v11280_v16, %v11075_v31  ;;  %v14631_v21 = vld [vmem:[#allocation51_spill] sm:$0xff] }
 0x73e   : > { %7431 = vmatprep.subr.mxu1 %v14251_v25  ;;  %v11285_v57 = vpop.f32.mrf.mxu0  ;;  %v3340_v14 = vmax.f32 %v3282_v11, 0.0  ;;  %v3820_v1 = vsub.f32 %v3788_v13, %v3804_v45  ;;  %v3257_v60 = vadd.f32 %v11265_v48, %v11252_v40  ;;  %v3355_v9 = vadd.f32 %v3339_v46, %v10892_v15  ;;  %v14635_v11 = vld [vmem:[#allocation55_spill] sm:$0xff]  ;;  %v14638_v46 = vld [vmem:[#allocation58_spill] sm:$0xff] }
 0x73f   : > { %7432 = vmatpush3.msra.mxu1 %v3364_v27  ;;  %v11300_v47 = vmax.f32 %v3821_v43, 0.0  ;;  %v3337_v31 = vmax.f32 %v3267_v49, 0.0  ;;  %v3336_v28 = vmax.f32 %v3262_v4, 0.0  ;;  %v3354_v35 = vadd.f32 %v3338_v38, %v10862_v52  ;;  %v14632_v27 = vld [vmem:[#allocation27_spill] sm:$0xff]  ;;  %v6792_v43 = vld [vmem:[%s8364_s12 + $0xf0] sm:$0xff] }
 0x740   : > { %7433 = vmatprep.subr.mxu1 %v14251_v25  ;;  %v11295_v12 = vpop.f32.mrf.mxu0  ;;  %v3356_v30 = vadd.f32 %v3340_v14, %v10872_v37  ;;  %v11326_v36 = vmax.f32 %v3820_v1, 0.0  ;;  %v3335_v15 = vmax.f32 %v3257_v60, 0.0  ;;  %v3795_v20 = vadd.f32 %v11280_v16, %v14630_v19  ;;  %v6789_v1 = vld [vmem:[%s8364_s12 + $0xd8] sm:$0xff]  ;;  %v14640_v4 = vld [vmem:[#allocation33_spill] sm:$0xff] }
 0x741   : > { %7434 = vmatpush3.msra.mxu1 %v3363_v7  ;;  %14628 = vst [vmem:[#allocation42_spill] sm:$0xff] %v11300_v47  ;;  %v11313_v59 = vmin.f32 %v11300_v47, 49.0  ;;  %v3353_v48 = vadd.f32 %v3337_v31, %v10883_v56  ;;  %v3352_v54 = vadd.f32 %v3336_v28, %v14631_v21  ;;  %v6793_v7 = vld [vmem:[%s8364_s12 + $0xf8] sm:$0xff]  ;;  %v3807_v63 = vmul.f32 2.0, %v11276_v23  ;;  %v11371_v23 = vld [vmem:[%s8434_s15 + $0x80] sm:$0xff]  ;;  %v6788_v31 = vld [vmem:[%s8364_s12 + $0xd0] sm:$0xff] }
 0x742   : > { %7435 = vmatprep.subr.mxu1 %v14251_v25  ;;  %v3658_v3 = vpop.f32.mrf.mxu0  ;;  %v11337_v51 = vmin.f32 %v11326_v36, 49.0  ;;  %v3351_v33 = vadd.f32 %v3335_v15, %v14632_v27  ;;  %v3791_v26 = vadd.f32 %v11280_v16, %v14633_v0  ;;  %vm3852_vm11 = vcmp.le.f32.partialorder %v11326_v36, 49.0  ;;  %v14645_v15 = vld [vmem:[#allocation59_spill] sm:$0xff] }
 0x743   : > { %7436 = vmatpush3.msra.mxu1 %v3362_v50  ;;  %v3808_v55 = vmul.f32 2.0, %v3658_v3  ;;  %7889 = vrsqrt.f32 %v11313_v59  ;;  %v4093_v37 = vmul.f32 -2.2959185, %v11313_v59  ;;  %v3806_v50 = vmul.f32 2.0, %v11285_v57  ;;  %v6791_v57 = vld [vmem:[%s8364_s12 + $0xe8] sm:$0xff]  ;;  %v6790_v3 = vld [vmem:[%s8364_s12 + $0xe0] sm:$0xff] }
 0x744   : > { %7437 = vmatprep.subr.mxu1 %v14251_v25  ;;  %v7475_v62 = vpop.f32.mrf.mxu0  ;;  %7891 = vrsqrt.f32 %v11337_v51  ;;  %v3790_v53 = vadd.f32 %v11280_v16, %v14635_v11  ;;  %v3823_v44 = vsub.f32 %v3791_v26, %v3807_v63  ;;  %v11398_v38 = vadd.f32 %v11280_v16, %v14640_v4 }
 0x745   : > { %7438 = vmatpush3.msra.mxu1 %v3361_v34  ;;  %v3824_v29 = vsub.f32 %v3792_v5, %v3808_v55  ;;  %v3811_v40 = vmul.f32 2.0, %v7475_v62  ;;  %v4110_v52 = vmul.f32 1.442695, %v4093_v37  ;;  %v14637_v55 = vld [vmem:[#allocation54_spill] sm:$0xff]  ;;  %vm3909_vm9 = vcmp.eq.f32.partialorder %v11313_v59, inf  ;;  %v11414_v37 = vld [vmem:[%s8434_s15 + $0x88] sm:$0xff] }
 0x746   : > { %7439 = vmatprep.subr.mxu1 %v14251_v25  ;;  %v3668_v58 = vpop.f32.mrf.mxu0  ;;  %v3822_v42 = vsub.f32 %v3790_v53, %v3806_v50  ;;  %v3793_v49 = vadd.f32 %v11280_v16, %v14637_v55  ;;  %v11394_v5 = vmax.f32 %v3823_v44, 0.0  ;;  %vm3853_vm4 = vcmp.le.f32.partialorder %v11300_v47, 49.0 }
 0x747   : > { %7440 = vmatpush3.msra.mxu1 %v3360_v41  ;;  %v11339_v8 = vmax.f32 %v3824_v29, 0.0  ;;  %v3827_v24 = vsub.f32 %v3795_v20, %v3811_v40  ;;  %7893 = vpow2.f32 %v4110_v52  ;;  %v3810_v22 = vmul.f32 2.0, %v3668_v58  ;;  %v14636_v41 = vld [vmem:[#allocation56_spill] sm:$0xff] }
 0x748   : > { %7441 = vmatprep.subr.mxu1 %v14251_v25  ;;  %v3794_v45 = vadd.f32 %v11280_v16, %v14636_v41  ;;  %14639 = vst [vmem:[#allocation68_spill] sm:$0xff] %v11394_v5  ;;  %v11405_v29 = vmax.f32 %v3822_v42, 0.0  ;;  %v3912_v19 = vand.u32 2147483648, %v11313_v59  ;;  %v14646_v52 = vld [vmem:[#allocation60_spill] sm:$0xff]  ;;  %vm3911_vm10 = vcmp.eq.f32.partialorder %v11313_v59, 0.0 }
 0x749   : > { %7442 = vmatpush3.msra.mxu1 %v3359_v17  ;;  %14629 = vst [vmem:[#allocation69_spill] sm:$0xff] %v11339_v8  ;;  %v11354_v56 = vmin.f32 %v11339_v8, 49.0  ;;  %v11368_v2 = vmax.f32 %v3827_v24, 0.0  ;;  %v7478_v17 = vpop.f32.mrf.mxu0  ;;  %v11427_v21 = vadd.f32 %v11280_v16, %v14646_v52  ;;  %v11454_v50 = vsel %vm3852_vm11, %v11371_v23, 0.0 }
 0x74a   : > { %7443 = vmatprep.subr.mxu1 %v14251_v25  ;;  %v3826_v14 = vsub.f32 %v3794_v45, %v3810_v22  ;;  %14642 = vst [vmem:[#allocation62_spill] sm:$0xff] %v11405_v29  ;;  %v3813_v24 = vmul.f32 2.0, %v7478_v17  ;;  %vm3902_vm3 = vcmp.eq.f32.partialorder %v11337_v51, inf  ;;  %vm3904_vm6 = vcmp.eq.f32.partialorder %v11337_v51, 0.0 }
 0x74b   : > { %7444 = vmatpush3.msra.mxu1 %v3358_v10  ;;  %7895 = vrsqrt.f32 %v11354_v56  ;;  %14634 = vst [vmem:[#allocation37_spill] sm:$0xff] %v11368_v2  ;;  %v11384_v6 = vmin.f32 %v11368_v2, 49.0  ;;  %v3809_v10 = vmul.f32 2.0, %v11295_v12  ;;  %v3678_v60 = vpop.f32.mrf.mxu0  ;;  %v3905_v45 = vand.u32 2147483648, %v11337_v51 }
 0x74c   : > { %7445 = vmatprep.subr.mxu1 %v14251_v25  ;;  %v11411_v62 = vmax.f32 %v3826_v14, 0.0  ;;  %v3812_v11 = vmul.f32 2.0, %v3678_v60  ;;  %v8056_v14 = vld [vmem:[%s8364_s12 + $0xb8] sm:$0xff]  ;;  %vm3856_vm5 = vcmp.le.f32.partialorder %v11339_v8, 49.0  ;;  %vm14334_vm13 = vcmp.le.f32.partialorder %v11368_v2, 49.0 }
 0x74d   : > { %7446 = vmatpush3.msra.mxu1 %v3357_v32  ;;  %v11392_v32 = vadd.f32 %v11280_v16, %v14638_v46  ;;  %7897 = vrsqrt.f32 %v11384_v6  ;;  %v3825_v20 = vsub.f32 %v3793_v49, %v3809_v10  ;;  %v7481_v63 = vpop.f32.mrf.mxu0 }
 0x74e   : > { %7447 = vmatprep.subr.mxu1 %v14251_v25  ;;  %14643 = vst [vmem:[#allocation70_spill] sm:$0xff] %v11411_v62  ;;  %v11449_v26 = vmin.f32 %v11411_v62, 49.0  ;;  %v3815_v42 = vmul.f32 2.0, %v7481_v63  ;;  %vm14335_vm1 = vcmp.le.f32.partialorder %v11411_v62, 49.0 }
 0x74f   : > { %7448 = vmatpush3.msra.mxu1 %v3356_v30  ;;  %v14641_v30 = vld [vmem:[#allocation45_spill] sm:$0xff] }
 0x750   : > { %7449 = vmatprep.subr.mxu1 %v14251_v25  ;;  %v7890_v34 = vpop.eup %7889  ;;  %v11402_v12 = vadd.f32 %v11280_v16, %v14641_v30  ;;  %v8057_v30 = vld [vmem:[%s8364_s12 + $0xb0] sm:$0xff]  ;;  %vm3944_vm2 = vcmp.eq.f32.partialorder %v11449_v26, inf  ;;  %vm3946_vm15 = vcmp.eq.f32.partialorder %v11449_v26, 0.0 }
 0x751   : > { %7450 = vmatpush3.msra.mxu1 %v3355_v9  ;;  %v3908_v13 = vmul.f32 %v7890_v34, %v11313_v59  ;;  %v7892_v28 = vpop.eup %7891  ;;  %v11460_v34 = vmax.f32 %v3825_v20, 0.0 }
 0x752   : > { %7451 = vmatprep.subr.mxu1 %v14251_v25  ;;  %v3901_v0 = vmul.f32 %v7892_v28, %v11337_v51 }
 0x753   : > { %7452 = vmatpush3.msra.mxu1 %v3354_v35  ;;  %v3910_v9 = vsel %vm3909_vm9, %v11313_v59, %v3908_v13  ;;  %v14644_v35 = vld [vmem:[#allocation30_spill] sm:$0xff]  ;;  %v11445_v59 = vsel %vm3853_vm4, %v11414_v37, 0.0  ;;  %14648 = vst [vmem:[#allocation57_spill] sm:$0xff] %v11460_v34  ;;  %vm3930_vm9 = vcmp.eq.f32.partialorder %v11354_v56, inf  ;;  %vm3857_vm12 = vcmp.le.f32.partialorder %v11460_v34, 49.0 }
 0x754   : > { %7453 = vmatprep.subr.mxu1 %v14251_v25  ;;  %v11418_v40 = vadd.f32 %v11280_v16, %v14644_v35  ;;  %v7894_v27 = vpop.eup %7893  ;;  %v3903_v17 = vsel %vm3902_vm3, %v11337_v51, %v3901_v0  ;;  %v8058_v35 = vld [vmem:[%s8364_s12 + $0xa8] sm:$0xff]  ;;  %vm3951_vm3 = vcmp.eq.f32.partialorder %v11384_v6, inf }
 0x755   : > { %7454 = vmatpush3.msra.mxu1 %v3353_v48  ;;  %v11422_v48 = vadd.f32 %v11280_v16, %v14645_v15  ;;  %v11467_v41 = vmul.f32 %v7894_v27, %v11445_v59  ;;  %v11495_v60 = vsel %vm3904_vm6, %v3905_v45, %v3903_v17  ;;  %vm3953_vm6 = vcmp.eq.f32.partialorder %v11384_v6, 0.0 }
 0x756   : > { %7455 = vmatprep.subr.mxu1 %v14251_v25 }
 0x757   : > { %7456 = vmatpush3.msra.mxu1 %v3352_v54  ;;  %v11431_v54 = vmin.f32 %v11394_v5, 49.0  ;;  %4158 = vadd.xlane.f32.xlu1 %v11467_v41 }
 0x758   : > { %7457 = vmatprep.subr.mxu1 %v14251_v25  ;;  %v7896_v22 = vpop.eup %7895 }
 0x759   : > { %7458 = vmatpush3.msra.mxu1 %v3351_v33  ;;  %v14647_v33 = vld [vmem:[#allocation61_spill] sm:$0xff]  ;;  %7899 = vrsqrt.f32 %v11431_v54  ;;  %v3926_v44 = vand.u32 2147483648, %v11431_v54  ;;  %v4095_v55 = vmul.f32 -2.2959185, %v11431_v54  ;;  %vm3923_vm0 = vcmp.eq.f32.partialorder %v11431_v54, inf }
 0x75a   : > { %7460 = vmatmul.mubr.f32.vlgmr.msra.gmra.mxu1 %v367_v18  ;;  %7488 = vmatprep.subr.mxu1 %v6793_v7  ;;  %v11435_v58 = vadd.f32 %v11280_v16, %v14647_v33  ;;  %v11437_v18 = vsel %vm3911_vm10, %v3912_v19, %v3910_v9  ;;  %vm3932_vm10 = vcmp.eq.f32.partialorder %v11354_v56, 0.0  ;;  %v3831_v9 = vsub.f32 %v11418_v40, %v3815_v42  ;;  %v7898_v15 = vpop.eup %7897  ;;  %v8059_v33 = vld [vmem:[%s8364_s12 + $0xa0] sm:$0xff] }
 0x75b   : > { %7489 = vmatpush3.msra.mxu1 %v6793_v7  ;;  %7520 = vmatprep.mubr.msk.f32.mxu1 %vm3852_vm11, %v11371_v23  ;;  %v11440_v7 = vmin.f32 %v11405_v29, 49.0  ;;  %v4013_v53 = vmul.f32 0.93333334, %v11437_v18  ;;  %v4114_v28 = vmul.f32 1.442695, %v4095_v55 }
 0x75c   : > { %7490 = vmatprep.subr.mxu1 %v6792_v43 }
 0x75d   : > { %7491 = vmatpush3.msra.mxu1 %v6792_v43  ;;  %v4092_v43 = vmul.f32 -2.2959185, %v11337_v51  ;;  %7901 = vrsqrt.f32 %v11440_v7  ;;  %v3919_v10 = vand.u32 2147483648, %v11440_v7  ;;  %v4029_v49 = vsub.f32 0.21777777, %v4013_v53  ;;  %v8060_v53 = vld [vmem:[%s8364_s12 + $0x98] sm:$0xff] }
 0x75e   : > { %7492 = vmatprep.subr.mxu1 %v6791_v57  ;;  %7903 = vrsqrt.f32 %v11449_v26  ;;  %vm3916_vm14 = vcmp.eq.f32.partialorder %v11440_v7, inf }
 0x75f   : > { %7493 = vmatpush3.msra.mxu1 %v6791_v57  ;;  %v3829_v57 = vsub.f32 %v11398_v38, %v3813_v24  ;;  %v4108_v13 = vmul.f32 1.442695, %v4092_v43  ;;  %v4094_v38 = vmul.f32 -2.2959185, %v11440_v7  ;;  %v4045_v52 = vmul.f32 -2.2959185, %v4029_v49 }
 0x760   : > { %7494 = vmatprep.subr.mxu1 %v6790_v3  ;;  %v4012_v24 = vmul.f32 0.93333334, %v11495_v60  ;;  %v4099_v43 = vmul.f32 -2.2959185, %v11384_v6  ;;  %v6828_v49 = vadd.f32 -3.7333333, %v11437_v18 }
 0x761   : > { %7495 = vmatpush3.msra.mxu1 %v6790_v3  ;;  %v3929_v3 = vmul.f32 %v7896_v22, %v11354_v56  ;;  %v11487_v46 = vmax.f32 %v3829_v57, 0.0  ;;  %7905 = vpow2.f32 %v4108_v13  ;;  %v4112_v19 = vmul.f32 1.442695, %v4094_v38  ;;  %v8061_v13 = vld [vmem:[%s8364_s12 + $0x90] sm:$0xff] }
 0x762   : > { %7496 = vmatprep.subr.mxu1 %v6789_v1  ;;  %7907 = vpow2.f32 %v4114_v28  ;;  %v3950_v22 = vmul.f32 %v7898_v15, %v11384_v6  ;;  %v3954_v57 = vand.u32 2147483648, %v11384_v6  ;;  %v4122_v42 = vmul.f32 1.442695, %v4099_v43  ;;  %v8062_v28 = vld [vmem:[%s8364_s12 + $0x88] sm:$0xff] }
 0x763   : > { %7497 = vmatpush3.msra.mxu1 %v6789_v1  ;;  %v11483_v1 = vmin.f32 %v11460_v34, 49.0  ;;  %14649 = vst [vmem:[#allocation35_spill] sm:$0xff] %v11487_v46  ;;  %v11510_v40 = vmin.f32 %v11487_v46, 49.0  ;;  %7909 = vpow2.f32 %v4112_v19  ;;  %v4062_v38 = vmul.f32 1.442695, %v4045_v52 }
 0x764   : > { %7498 = vmatprep.subr.mxu1 %v6788_v31  ;;  %v4637_v19 = vmul.f32 -2.2959185, %v6828_v49 }
 0x765   : > { %7499 = vmatpush3.msra.mxu1 %v6788_v31  ;;  %v3931_v31 = vsel %vm3930_vm9, %v11354_v56, %v3929_v3  ;;  %v4097_v20 = vmul.f32 -2.2959185, %v11483_v1  ;;  %vm3854_vm9 = vcmp.le.f32.partialorder %v11405_v29, 49.0 }
 0x766   : > { %7500 = vmatprep.subr.mxu1 %v11238_v61  ;;  %v4653_v43 = vmul.f32 %v6828_v49, %v4637_v19 }
 0x767   : > { %7501 = vmatpush3.msra.mxu1 %v11238_v61  ;;  %v3688_v61 = vpop.f32.mrf.mxu0  ;;  %v4118_v0 = vmul.f32 1.442695, %v4097_v20 }
 0x768   : > { %7502 = vmatprep.subr.mxu1 %v11243_v39  ;;  %v11489_v4 = vmul.f32 2.0, %v3688_v61  ;;  %v4098_v61 = vmul.f32 -2.2959185, %v11449_v26 }
 0x769   : > { %7503 = vmatpush3.msra.mxu1 %v11243_v39  ;;  %v3828_v39 = vsub.f32 %v11392_v32, %v3812_v11  ;;  %v3933_v32 = vand.u32 2147483648, %v11354_v56  ;;  %v11522_v11 = vmax.f32 %v3831_v9, 0.0  ;;  %7911 = vpow2.f32 %v4118_v0  ;;  %v7484_v9 = vpop.f32.mrf.mxu0 }
 0x76a   : > { %7504 = vmatprep.subr.mxu1 %v8056_v14  ;;  %v3830_v27 = vsub.f32 %v11402_v12, %v11489_v4  ;;  %v4096_v12 = vmul.f32 -2.2959185, %v11354_v56  ;;  %v4101_v56 = vmul.f32 -2.2959185, %v11510_v40  ;;  %7913 = vpow2.f32 %v4122_v42 }
 0x76b   : > { %7505 = vmatpush3.msra.mxu1 %v8056_v14  ;;  %v11504_v51 = vmax.f32 %v3828_v39, 0.0  ;;  %v11517_v63 = vsel %vm3932_vm10, %v3933_v32, %v3931_v31  ;;  %14651 = vst [vmem:[#allocation72_spill] sm:$0xff] %v11522_v11  ;;  %vm3855_vm10 = vcmp.le.f32.partialorder %v11394_v5, 49.0  ;;  %v7900_v14 = vpop.eup %7899  ;;  %v4028_v39 = vsub.f32 0.21777777, %v4012_v24  ;;  %v8063_v24 = vld [vmem:[%s8364_s12 + $0x80] sm:$0xff] }
 0x76c   : > { %7506 = vmatprep.subr.mxu1 %v8057_v30  ;;  %v4016_v17 = vmul.f32 0.93333334, %v11517_v63  ;;  %v4116_v3 = vmul.f32 1.442695, %v4096_v12  ;;  %v4120_v55 = vmul.f32 1.442695, %v4098_v61  ;;  %v7902_v4 = vpop.eup %7901  ;;  %v3922_v20 = vmul.f32 %v7900_v14, %v11431_v54  ;;  %v3698_v61 = vpop.f32.mrf.mxu0 }
 0x76d   : > { %7507 = vmatpush3.msra.mxu1 %v8057_v30  ;;  %14650 = vst [vmem:[#allocation71_spill] sm:$0xff] %v11504_v51  ;;  %v11529_v45 = vmin.f32 %v11504_v51, 49.0  ;;  %v3952_v30 = vsel %vm3951_vm3, %v11384_v6, %v3950_v22  ;;  %v11542_v32 = vmin.f32 %v11522_v11, 49.0  ;;  %v11544_v31 = vmax.f32 %v3830_v27, 0.0 }
 0x76e   : > { %7508 = vmatprep.subr.mxu1 %v8058_v35  ;;  %7915 = vpow2.f32 %v4120_v55  ;;  %v4126_v18 = vmul.f32 1.442695, %v4101_v56  ;;  %vm3925_vm3 = vcmp.eq.f32.partialorder %v11431_v54, 0.0  ;;  %v4032_v52 = vsub.f32 0.21777777, %v4016_v17  ;;  %v6797_v17 = vld [vmem:[%s8434_s15 + $0x98] sm:$0xff] }
 0x76f   : > { %7509 = vmatpush3.msra.mxu1 %v8058_v35  ;;  %14652 = vst [vmem:[#allocation63_spill] sm:$0xff] %v11544_v31  ;;  %v7904_v35 = vpop.eup %7903  ;;  %v4100_v15 = vmul.f32 -2.2959185, %v11529_v45  ;;  %7917 = vpow2.f32 %v4116_v3  ;;  %v4044_v27 = vmul.f32 -2.2959185, %v4028_v39  ;;  %v3817_v0 = vmul.f32 2.0, %v7484_v9 }
 0x770   : > { %7510 = vmatprep.subr.mxu1 %v8059_v33  ;;  %7919 = vpow2.f32 %v4062_v38  ;;  %v3943_v22 = vmul.f32 %v7904_v35, %v11449_v26  ;;  %v3947_v12 = vand.u32 2147483648, %v11449_v26  ;;  %v4103_v42 = vmul.f32 -2.2959185, %v11542_v32  ;;  %v7906_v6 = vpop.eup %7905 }
 0x771   : > { %7511 = vmatpush3.msra.mxu1 %v8059_v33  ;;  %v11557_v33 = vsel %vm3953_vm6, %v3954_v57, %v3952_v30  ;;  %v11569_v57 = vmin.f32 %v11544_v31, 49.0  ;;  %7921 = vpow2.f32 %v4126_v18  ;;  %v4124_v3 = vmul.f32 1.442695, %v4100_v15  ;;  %v7908_v30 = vpop.eup %7907  ;;  %v6798_v18 = vld [vmem:[%s8434_s15 + $0xa0] sm:$0xff] }
 0x772   : > { %7512 = vmatprep.subr.mxu1 %v8060_v53  ;;  %v6827_v56 = vadd.f32 -3.7333333, %v11495_v60  ;;  %vm3918_vm6 = vcmp.eq.f32.partialorder %v11440_v7, 0.0  ;;  %v4019_v14 = vmul.f32 0.93333334, %v11557_v33  ;;  %v3924_v60 = vsel %vm3923_vm0, %v11431_v54, %v3922_v20  ;;  %v6799_v20 = vld [vmem:[%s8434_s15 + $0xa8] sm:$0xff] }
 0x773   : > { %7513 = vmatpush3.msra.mxu1 %v8060_v53  ;;  %v6796_v53 = vld [vmem:[%s8434_s15 + $0x90] sm:$0xff]  ;;  %14653 = vst [vmem:[#allocation32_spill] sm:$0xff] %v11569_v57  ;;  %v4670_v39 = vmul.f32 1.442695, %v4653_v43  ;;  %v4060_v55 = vmul.f32 1.442695, %v4044_v27  ;;  %v3915_v49 = vmul.f32 %v7902_v4, %v11440_v7  ;;  %v3833_v38 = vsub.f32 %v11427_v21, %v3817_v0  ;;  %v7910_v21 = vpop.eup %7909  ;;  %v11600_v4 = vpop.f32.mrf.mxu0 }
 0x774   : > { %7514 = vmatprep.subr.mxu1 %v8061_v13  ;;  %v3945_v9 = vsel %vm3944_vm2, %v11449_v26, %v3943_v22  ;;  %v11595_v35 = vsel %vm3854_vm9, %v6796_v53, 0.0  ;;  %v4130_v15 = vmul.f32 1.442695, %v4103_v42  ;;  %7923 = vpow2.f32 %v4124_v3 }
 0x775   : > { %7515 = vmatpush3.msra.mxu1 %v8061_v13  ;;  %v4048_v13 = vmul.f32 -2.2959185, %v4032_v52  ;;  %v6801_v52 = vld [vmem:[%s8434_s15 + $0xb8] sm:$0xff]  ;;  %v4636_v27 = vmul.f32 -2.2959185, %v6827_v56  ;;  %v11611_v22 = vmul.f32 %v7910_v21, %v11595_v35  ;;  %7925 = vpow2.f32 %v4670_v39  ;;  %v3708_v39 = vpop.f32.mrf.mxu0 }
 0x776   : > { %7516 = vmatprep.subr.mxu1 %v8062_v28  ;;  %v4035_v43 = vsub.f32 0.21777777, %v4019_v14  ;;  %7927 = vpow2.f32 %v4060_v55  ;;  %v11617_v42 = vsel %vm3925_vm3, %v3926_v44, %v3924_v60  ;;  %v11627_v14 = vmax.f32 %v3833_v38, 0.0 }
 0x777   : > { %7517 = vmatpush3.msra.mxu1 %v8062_v28  ;;  %v11591_v28 = vsel %vm3855_vm10, %v6797_v17, 0.0  ;;  %v4068_v0 = vmul.f32 1.442695, %v4048_v13  ;;  %v11625_v13 = vsel %vm3946_vm15, %v3947_v12, %v3945_v9  ;;  %v11632_v54 = vsel %vm3857_vm12, %v6799_v20, 0.0 }
 0x778   : > { %7518 = vmatprep.subr.mxu1 %v8063_v24  ;;  %v11603_v19 = vmul.f32 %v7908_v30, %v11591_v28  ;;  %14654 = vst [vmem:[#allocation73_spill] sm:$0xff] %v11627_v14  ;;  %v11636_v44 = vsel %vm14334_vm13, %v6801_v52, 0.0  ;;  %7929 = vpow2.f32 %v4130_v15  ;;  %v4652_v55 = vmul.f32 %v6827_v56, %v4636_v27 }
 0x779   : > { %7519 = vmatpush3.msra.mxu1 %v8063_v24  ;;  %v4102_v24 = vmul.f32 -2.2959185, %v11569_v57  ;;  %7931 = vpow2.f32 %v4068_v0  ;;  %v4051_v38 = vmul.f32 -2.2959185, %v4035_v43  ;;  %vm14329_vm15 = vcmp.le.f32.partialorder %v11504_v51, 49.0  ;;  %v6803_v43 = vld [vmem:[%s8434_s15 + $0xc8] sm:$0xff] }
 0x77a   : > { %7521 = vmatmul.mubr.msk.f32.vlgmr.msra.gmra.mxu1 %vm3853_vm4, %v11414_v37  ;;  %v11578_v37 = vmul.f32 %v7906_v6, %v11454_v50  ;;  %v3917_v6 = vsel %vm3916_vm14, %v11440_v7, %v3915_v49  ;;  %4162 = vadd.xlane.f32.xlu0 %v11603_v19  ;;  %v4015_v49 = vmul.f32 0.93333334, %v11617_v42  ;;  %vm14256_vm14 = vcmp.le.f32.partialorder %v11487_v46, 49.0 }
 0x77b   : > { %7523 = vmatprep.mubr.msk.f32.mxu1 %vm3854_vm9, %v6796_v53  ;;  %v7912_v53 = vpop.eup %7911  ;;  %v4128_v12 = vmul.f32 1.442695, %v4102_v24  ;;  %v11654_v15 = vsel %vm3918_vm6, %v3919_v10, %v3917_v6  ;;  %v4018_v21 = vmul.f32 0.93333334, %v11625_v13  ;;  %v3818_v24 = vmul.f32 2.0, %v3708_v39  ;;  %v6802_v10 = vld [vmem:[%s8434_s15 + $0xc0] sm:$0xff] }
 0x77c   : > { %4156 = vadd.xlane.f32.xlu1 %v11578_v37  ;;  %v7914_v3 = vpop.eup %7913  ;;  %v11648_v30 = vmul.f32 %v7912_v53, %v11632_v54  ;;  %v4668_v53 = vmul.f32 1.442695, %v4652_v55  ;;  %vm14328_vm2 = vcmp.le.f32.partialorder %v11544_v31, 49.0  ;;  %v3819_v39 = vmul.f32 2.0, %v11600_v4  ;;  %v14658_v4 = vld [vmem:[#allocation29_spill] sm:$0xff] }
 0x77d   : > { %v11642_v26 = vmul.f32 %v7914_v3, %v11636_v44  ;;  %v7916_v60 = vpop.eup %7915  ;;  %7933 = vpow2.f32 %v4128_v12  ;;  %v4034_v12 = vsub.f32 0.21777777, %v4018_v21  ;;  %v3834_v55 = vsub.f32 %v11435_v58, %v3818_v24 }
 0x77e   : > { %7524 = vmatmul.mubr.msk.f32.gmra.mxu1 %vm3855_vm10, %v6797_v17  ;;  %v3816_v17 = vmul.f32 2.0, %v3698_v61  ;;  %v6800_v61 = vld [vmem:[%s8434_s15 + $0xb0] sm:$0xff]  ;;  %v7918_v9 = vpop.eup %7917  ;;  %7935 = vrsqrt.f32 %v11483_v1  ;;  %vm14258_vm0 = vcmp.le.f32.partialorder %v11522_v11, 49.0  ;;  %vm14299_vm6 = vcmp.le.f32.partialorder %v11627_v14, 49.0 }
 0x77f   : > { %7526 = vmatprep.mubr.msk.f32.mxu1 %vm3856_vm5, %v6798_v18  ;;  %4170 = vadd.xlane.f32.xlu0 %v11642_v26  ;;  %v11667_v7 = vsel %vm14335_vm1, %v6800_v61, 0.0  ;;  %v11672_v27 = vpop.eup %7919  ;;  %7937 = vpow2.f32 %v4668_v53  ;;  %v4050_v53 = vmul.f32 -2.2959185, %v4034_v12  ;;  %v6830_v12 = vadd.f32 -3.7333333, %v11617_v42 }
 0x780   : > { %4160 = vadd.xlane.f32.xlu1 %v11611_v22  ;;  %v3832_v56 = vsub.f32 %v11422_v48, %v3816_v17  ;;  %v11676_v48 = vsel %vm3856_vm5, %v6798_v18, 0.0  ;;  %v11679_v0 = vmul.f32 %v7916_v60, %v11667_v7  ;;  %v7922_v6 = vpop.eup %7921  ;;  %v4031_v17 = vsub.f32 0.21777777, %v4015_v49 }
 0x781   : > { %v4144_v3 = vmul.f32 %v7918_v9, %v11676_v48  ;;  %v4014_v18 = vmul.f32 0.93333334, %v11654_v15  ;;  %v11695_v60 = vsel %vm14256_vm14, %v6803_v43, 0.0  ;;  %v11699_v49 = vmul.f32 %v11672_v27, %v11467_v41  ;;  %v7924_v41 = vpop.eup %7923 }
 0x782   : > { %7527 = vmatmul.mubr.msk.f32.gmra.mxu1 %vm3857_vm12, %v6799_v20  ;;  %v11662_v20 = vmin.f32 %v11627_v14, 49.0  ;;  %14657 = vst [vmem:[#allocation16_spill] sm:$0xff] %v11695_v60  ;;  %v3803_v9 = vadd.f32 %v11280_v16, %v14658_v4  ;;  %v4047_v21 = vmul.f32 -2.2959185, %v4031_v17  ;;  %v7926_v24 = vpop.eup %7925  ;;  %v6805_v16 = vld [vmem:[%s8434_s15 + $0xd8] sm:$0xff]  ;;  %v11717_v4 = vmax.f32 %v3834_v55, 0.0 }
 0x783   : > { %7529 = vmatprep.mubr.msk.f32.mxu1 %vm14335_vm1, %v6800_v61  ;;  %v11688_v61 = vmax.f32 %v3832_v56, 0.0  ;;  %4168 = vadd.xlane.f32.xlu0 %v11679_v0  ;;  %v11707_v56 = vmul.f32 %v7922_v6, %v11695_v60  ;;  %v4030_v25 = vsub.f32 0.21777777, %v4014_v18  ;;  %v11715_v6 = vpop.eup %7927  ;;  %v11722_v17 = vsel %vm14329_vm15, %v6802_v10, 0.0 }
 0x784   : > { %14655 = vst [vmem:[#allocation84_spill] sm:$0xff] %v11662_v20  ;;  %4166 = vadd.xlane.f32.xlu1 %v11648_v30  ;;  %v4105_v58 = vmul.f32 -2.2959185, %v11662_v20  ;;  %14660 = vst [vmem:[#allocation36_spill] sm:$0xff] %v11717_v4  ;;  %v11731_v18 = vmul.f32 %v7924_v41, %v11722_v17  ;;  %v4066_v55 = vmul.f32 1.442695, %v4047_v21 }
 0x785   : > { %14656 = vst [vmem:[#allocation75_spill] sm:$0xff] %v11688_v61  ;;  %14659 = vst [vmem:[#allocation76_spill] sm:$0xff] %v11707_v56  ;;  %vm14327_vm3 = vcmp.le.f32.partialorder %v11688_v61, 49.0  ;;  %v11745_v41 = vld [vmem:[%s8434_s15 + $0xe8] sm:$0xff]  ;;  %v4046_v42 = vmul.f32 -2.2959185, %v4030_v25 }
 0x786   : > { %7530 = vmatmul.mubr.msk.f32.gmra.mxu1 %vm14334_vm13, %v6801_v52  ;;  %v4074_v52 = vmul.f32 1.442695, %v4051_v38  ;;  %v6804_v38 = vld [vmem:[%s8434_s15 + $0xd0] sm:$0xff]  ;;  %14661 = vst [vmem:[#allocation78_spill] sm:$0xff] %v11722_v17  ;;  %14662 = vst [vmem:[#allocation74_spill] sm:$0xff] %v11731_v18  ;;  %v11752_v21 = vsel %vm14258_vm0, %v6805_v16, 0.0 }
 0x787   : > { %7532 = vmatprep.mubr.msk.f32.mxu1 %vm14329_vm15, %v6802_v10  ;;  %4174 = vadd.xlane.f32.xlu0 %v11707_v56  ;;  %v7930_v10 = vpop.eup %7929  ;;  %v4072_v2 = vmul.f32 1.442695, %v4050_v53  ;;  %14664 = vst [vmem:[#allocation77_spill] sm:$0xff] %v11752_v21  ;;  %v6829_v31 = vadd.f32 -3.7333333, %v11654_v15  ;;  %vm14939_vm15 = vcmask 80896  }
 0x788   : > { %4164 = vadd.xlane.f32.xlu1 %v4144_v3  ;;  %7939 = vpow2.f32 %v4074_v52  ;;  %v11727_v52 = vld [vmem:[%s8434_s15 + $0xe0] sm:$0xff]  ;;  %v11738_v46 = vpop.eup %7931  ;;  %v6831_v8 = vadd.f32 -3.7333333, %v11517_v63  ;;  %v4717_v36 = vmul.f32 0.00033546262, %v11672_v27  ;;  %vm14971_vm13 = vcmask 48128  }
 0x789   : > { %v11768_v53 = vmul.f32 %v11738_v46, %v4144_v3  ;;  %v4638_v29 = vmul.f32 -2.2959185, %v6829_v31  ;;  %v6833_v14 = vadd.f32 -3.7333333, %v11625_v13  ;;  %vm14974_vm1 = vcmask 56320  }
 0x78a   : > { %7533 = vmatmul.mubr.msk.f32.gmra.mxu1 %vm14256_vm14, %v6803_v43  ;;  %v3835_v43 = vsub.f32 %v3803_v9, %v3819_v39  ;;  %v4134_v39 = vmul.f32 1.442695, %v4105_v58  ;;  %v4701_v9 = vmul.f32 %v7926_v24, %v11445_v59  ;;  %v11748_v58 = vld [vmem:[%s8434_s15 + $0xf0] sm:$0xff]  ;;  %vm14326_vm14 = vcmp.le.f32.partialorder %v11717_v4, 49.0  ;;  %v7934_v25 = vpop.eup %7933 }
 0x78b   : > { %7535 = vmatprep.mubr.msk.f32.mxu1 %vm14328_vm2, %v6804_v38  ;;  %4172 = vadd.xlane.f32.xlu0 %v11731_v18  ;;  %v11759_v59 = vmul.f32 %v7930_v10, %v11752_v21  ;;  %v4639_v24 = vmul.f32 -2.2959185, %v6830_v12  ;;  %v7936_v11 = vpop.eup %7935  ;;  %v11772_v10 = vld [vmem:[%s8434_s15 + $0xf8] sm:$0xff] }
 0x78c   : > { %4222 = vadd.xlane.f32.xlu1 %v11699_v49  ;;  %v11741_v51 = vmax.f32 %v3835_v43, 0.0  ;;  %7941 = vpow2.f32 %v4134_v39  ;;  %v4188_v43 = vmul.f32 %v11715_v6, %v11578_v37  ;;  %v4064_v39 = vmul.f32 1.442695, %v4046_v42 }
 0x78d   : > { %7943 = vpow2.f32 %v4066_v55  ;;  %v11777_v55 = vsel %vm14328_vm2, %v6804_v38, 0.0  ;;  %v11783_v37 = vmin.f32 %v11688_v61, 49.0  ;;  %v4655_v62 = vmul.f32 %v6830_v12, %v4639_v24 }
 0x78e   : > { %7536 = vmatmul.mubr.msk.f32.gmra.mxu1 %vm14258_vm0, %v6805_v16  ;;  %14663 = vst [vmem:[#allocation39_spill] sm:$0xff] %v11741_v51  ;;  %v4205_v16 = vmul.f32 0.36787945, %v11672_v27  ;;  %vm14291_vm0 = vcmp.le.f32.partialorder %v11741_v51, 49.0  ;;  %7945 = vpow2.f32 %v4072_v2  ;;  %14665 = vst [vmem:[#allocation38_spill] sm:$0xff] %v11777_v55  ;;  %v11786_v3 = vmul.f32 %v7934_v25, %v11777_v55  ;;  %v7938_v2 = vpop.eup %7937 }
 0x78f   : > { %7538 = vmatprep.mubr.msk.f32.mxu1 %vm14327_vm3, %v11727_v52  ;;  %4178 = vadd.xlane.f32.xlu0 %v11759_v59  ;;  %14666 = vst [vmem:[#allocation93_spill] sm:$0xff] %v11783_v37  ;;  %v4204_v38 = vmul.f32 0.36787945, %v11715_v6  ;;  %7947 = vpow2.f32 %v4064_v39  ;;  %v3936_v12 = vmul.f32 %v7936_v11, %v11483_v1  ;;  %v4674_v24 = vmul.f32 1.442695, %v4655_v62 }
 0x790   : > { %4734 = vadd.xlane.f32.xlu1 %v4701_v9  ;;  %14667 = vst [vmem:[#allocation89_spill] sm:$0xff] %v11786_v3  ;;  %v4253_v42 = vmul.f32 %v4205_v16, %v11699_v49  ;;  %v4104_v49 = vmul.f32 -2.2959185, %v11783_v37  ;;  %v4640_v25 = vmul.f32 -2.2959185, %v6831_v8  ;;  %v3940_v39 = vand.u32 2147483648, %v11483_v1 }
 0x791   : > { %v4252_v5 = vmul.f32 %v4204_v38, %v4188_v43  ;;  %v11802_v15 = vmul.f32 0.36787945, %v4205_v16  ;;  %v4208_v62 = vmul.f32 0.36787945, %v11738_v46  ;;  %7949 = vpow2.f32 %v4674_v24 }
 0x792   : > { %7539 = vmatmul.mubr.msk.f32.gmra.mxu1 %vm14299_vm6, %v11745_v41  ;;  %v4656_v63 = vmul.f32 %v6831_v8, %v4640_v25  ;;  %v4132_v27 = vmul.f32 1.442695, %v4104_v49  ;;  %v11823_v24 = vmin.f32 %v11741_v51, 49.0  ;;  %v11839_v25 = vmul.f32 0.36787945, %v4204_v38 }
 0x793   : > { %7541 = vmatprep.mubr.msk.f32.mxu1 %vm14326_vm14, %v11748_v58  ;;  %4176 = vadd.xlane.f32.xlu0 %v11786_v3  ;;  %v11816_v3 = vmul.f32 %v4208_v62, %v11768_v53  ;;  %vm14938_vm2 = vcmask 72704  }
 0x794   : > { %4220 = vadd.xlane.f32.xlu1 %v4188_v43  ;;  %v4676_v43 = vmul.f32 1.442695, %v4656_v63 }
 0x795   : > { %v11794_v34 = vpop.eup %7939 }
 0x796   : > { %7542 = vmatmul.mubr.msk.f32.gmra.mxu1 %vm14291_vm0, %v11772_v10  ;;  %v11806_v47 = vmul.f32 %v11794_v34, %v11642_v26  ;;  %v4654_v26 = vmul.f32 %v6829_v31, %v4638_v29  ;;  %7951 = vpow2.f32 %v4676_v43  ;;  %v11829_v29 = vsel %vm14299_vm6, %v11745_v41, 0.0 }
 0x797   : > { %7612 = vmatprep.mubr.msk.f32.mxu1 %vm3852_vm11, %v11371_v23  ;;  %v4700_v23 = vmul.f32 %v7938_v2, %v11454_v50  ;;  %vm3937_vm11 = vcmp.eq.f32.partialorder %v11483_v1, inf  ;;  %v4765_v50 = vmul.f32 %v4717_v36, %v4701_v9  ;;  %v11813_v2 = vmul.f32 %v11802_v15, %v4253_v42  ;;  %14668 = vst [vmem:[#allocation80_spill] sm:$0xff] %v11829_v29 }
 0x798   : > { %4286 = vadd.xlane.f32.xlu1 %v4253_v42  ;;  %v3938_v11 = vsel %vm3937_vm11, %v11483_v1, %v3936_v12  ;;  %vm3939_vm11 = vcmp.eq.f32.partialorder %v11483_v1, 0.0  ;;  %v6834_v9 = vadd.f32 -3.7333333, %v11557_v33  ;;  %v4716_v1 = vmul.f32 0.00033546262, %v11715_v6 }
 0x799   : > { %4732 = vadd.xlane.f32.xlu0 %v4700_v23  ;;  %v7942_v16 = vpop.eup %7941  ;;  %v3941_v12 = vsel %vm3939_vm11, %v3940_v39, %v3938_v11  ;;  %7953 = vpow2.f32 %v4132_v27  ;;  %v4672_v63 = vmul.f32 1.442695, %v4654_v26  ;;  %v4272_v41 = vmul.f32 0.36787945, %v4208_v62 }
 0x79a   : > { %v11818_v8 = vpop.eup %7943  ;;  %v11834_v42 = vmul.f32 %v7942_v16, %v11829_v29  ;;  %v4643_v33 = vmul.f32 -2.2959185, %v6834_v9  ;;  %v4017_v43 = vmul.f32 0.93333334, %v3941_v12  ;;  %v11842_v39 = vmul.f32 0.36787945, %v4717_v36 }
 0x79b   : > { %v11831_v31 = vpop.eup %7945  ;;  %v4191_v49 = vmul.f32 %v11818_v8, %v11603_v19  ;;  %v4107_v16 = vmul.f32 -2.2959185, %v11823_v24  ;;  %v4764_v19 = vmul.f32 %v4716_v1, %v4700_v23  ;;  %v11852_v26 = vmul.f32 %v4272_v41, %v11816_v3 }
 0x79c   : > { %4284 = vadd.xlane.f32.xlu1 %v4252_v5  ;;  %14669 = vst [vmem:[#allocation91_spill] sm:$0xff] %v11834_v42  ;;  %v4659_v11 = vmul.f32 %v6834_v9, %v4643_v33  ;;  %v11847_v6 = vmul.f32 %v11831_v31, %v11679_v0  ;;  %v11849_v27 = vpop.eup %7947  ;;  %v4211_v9 = vmul.f32 0.36787945, %v11794_v34  ;;  %v11856_v62 = vmul.f32 %v11839_v25, %v4252_v5 }
 0x79d   : > { %4798 = vadd.xlane.f32.xlu0 %v4765_v50  ;;  %7955 = vpow2.f32 %v4672_v63  ;;  %v4720_v36 = vmul.f32 0.00033546262, %v11738_v46  ;;  %v4033_v33 = vsub.f32 0.21777777, %v4017_v43  ;;  %v11864_v23 = vmul.f32 %v11842_v39, %v4765_v50 }
 0x79e   : > { %v4682_v38 = vmul.f32 1.442695, %v4659_v11  ;;  %v11860_v0 = vmul.f32 %v4211_v9, %v11806_v47  ;;  %v4138_v11 = vmul.f32 1.442695, %v4107_v16  ;;  %v11869_v5 = vmul.f32 %v11849_v27, %v11611_v22 }
 0x79f   : > { %v11872_v63 = vmul.f32 0.36787945, %v11818_v8  ;;  %v4210_v46 = vmul.f32 0.36787945, %v11831_v31  ;;  %v4784_v43 = vmul.f32 0.36787945, %v4720_v36 }
 0x7a0   : > { %4350 = vadd.xlane.f32.xlu1 %v11813_v2  ;;  %7957 = vpow2.f32 %v4682_v38  ;;  %v4642_v50 = vmul.f32 -2.2959185, %v6833_v14  ;;  %v4049_v16 = vmul.f32 -2.2959185, %v4033_v33  ;;  %v6832_v13 = vadd.f32 -3.7333333, %v3941_v12 }
 0x7a1   : > { %4182 = vadd.xlane.f32.xlu0 %v11834_v42  ;;  %v7950_v42 = vpop.eup %7949  ;;  %7959 = vrsqrt.f32 %v11542_v32  ;;  %v11879_v29 = vmul.f32 %v4210_v46, %v11847_v6  ;;  %v4336_v22 = vmul.f32 0.36787945, %v4272_v41  ;;  %v11886_v18 = vmul.f32 %v11872_v63, %v4191_v49 }
 0x7a2   : > { %v4703_v55 = vmul.f32 %v7950_v42, %v11591_v28  ;;  %7961 = vpow2.f32 %v4138_v11  ;;  %v4658_v21 = vmul.f32 %v6833_v14, %v4642_v50  ;;  %v11888_v17 = vmul.f32 0.36787945, %v4716_v1 }
 0x7a3   : > { %v7952_v38 = vpop.eup %7951  ;;  %v11891_v33 = vmul.f32 %v4336_v22, %v11852_v26  ;;  %v4275_v12 = vmul.f32 0.36787945, %v4211_v9  ;;  %v4848_v42 = vmul.f32 0.36787945, %v4784_v43  ;;  %v4070_v11 = vmul.f32 1.442695, %v4049_v16 }
 0x7a4   : > { %4226 = vadd.xlane.f32.xlu1 %v4191_v49  ;;  %v11883_v37 = vmul.f32 %v7952_v38, %v11676_v48  ;;  %v4680_v28 = vmul.f32 1.442695, %v4658_v21  ;;  %v11900_v14 = vsel %vm14327_vm3, %v11727_v52, 0.0  ;;  %v4641_v48 = vmul.f32 -2.2959185, %v6832_v13 }
 0x7a5   : > { %4796 = vadd.xlane.f32.xlu0 %v4764_v19  ;;  %14670 = vst [vmem:[#allocation82_spill] sm:$0xff] %v11891_v33  ;;  %14671 = vst [vmem:[#allocation48_spill] sm:$0xff] %v11900_v14  ;;  %v11903_v1 = vmul.f32 %v4275_v12, %v11860_v0  ;;  %v4333_v9 = vmul.f32 0.36787945, %v11802_v15  ;;  %v4274_v50 = vmul.f32 0.36787945, %v4210_v46 }
 0x7a6   : > { %v7954_v20 = vpop.eup %7953  ;;  %v11894_v41 = vmul.f32 %v4720_v36, %v11883_v37  ;;  %7963 = vpow2.f32 %v4680_v28  ;;  %v11913_v36 = vmul.f32 %v11888_v17, %v4764_v19  ;;  %v11915_v38 = vmul.f32 0.36787945, %v4275_v12 }
 0x7a7   : > { %14672 = vst [vmem:[#allocation94_spill] sm:$0xff] %v11903_v1  ;;  %v11906_v49 = vmul.f32 %v7954_v20, %v11900_v14  ;;  %7965 = vrsqrt.f32 %v11823_v24  ;;  %v4723_v20 = vmul.f32 0.00033546262, %v11794_v34  ;;  %v4657_v19 = vmul.f32 %v6832_v13, %v4641_v48 }
 0x7a8   : > { %4348 = vadd.xlane.f32.xlu1 %v11856_v62  ;;  %v11910_v21 = vmul.f32 %v4784_v43, %v11894_v41  ;;  %v11924_v43 = vmin.f32 %v11717_v4, 49.0  ;;  %v11928_v46 = vmul.f32 %v4274_v50, %v11879_v29  ;;  %v11932_v12 = vmul.f32 %v11915_v38, %v11903_v1 }
 0x7a9   : > { %4862 = vadd.xlane.f32.xlu0 %v11864_v23  ;;  %14673 = vst [vmem:[#allocation95_spill] sm:$0xff] %v11906_v49  ;;  %7967 = vpow2.f32 %v4070_v11  ;;  %v4381_v34 = vmul.f32 %v4333_v9, %v11813_v2  ;;  %v11936_v28 = vmul.f32 0.36787945, %v11842_v39  ;;  %v11945_v13 = vmul.f32 0.00033546262, %v11818_v8 }
 0x7aa   : > { %v7956_v52 = vpop.eup %7955  ;;  %v11921_v16 = vmul.f32 %v4848_v42, %v11910_v21  ;;  %14675 = vst [vmem:[#allocation86_spill] sm:$0xff] %v11928_v46  ;;  %v11947_v48 = vmul.f32 0.36787945, %v4848_v42  ;;  %v4787_v11 = vmul.f32 0.36787945, %v4723_v20  ;;  %7969 = vrsqrt.f32 %v11924_v43 }
 0x7ab   : > { %v4678_v39 = vmul.f32 1.442695, %v4657_v19  ;;  %v11960_v8 = vmul.f32 %v11936_v28, %v11864_v23  ;;  %v4722_v42 = vmul.f32 0.00033546262, %v11831_v31  ;;  %v11970_v19 = vmul.f32 0.36787945, %v11839_v25 }
 0x7ac   : > { %4224 = vadd.xlane.f32.xlu1 %v11869_v5  ;;  %14674 = vst [vmem:[#allocation83_spill] sm:$0xff] %v11921_v16  ;;  %v4400_v57 = vmul.f32 0.36787945, %v4336_v22  ;;  %v11974_v56 = vmul.f32 0.36787945, %v4274_v50  ;;  %v11980_v31 = vsel %vm14291_vm0, %v11772_v10, 0.0 }
 0x7ad   : > { %4738 = vadd.xlane.f32.xlu0 %v4703_v55  ;;  %v7958_v15 = vpop.eup %7957  ;;  %14678 = vst [vmem:[#allocation90_spill] sm:$0xff] %v11980_v31  ;;  %7971 = vpow2.f32 %v4678_v39  ;;  %v4786_v60 = vmul.f32 0.36787945, %v4722_v42  ;;  %v11994_v51 = vmul.f32 %v11970_v19, %v11856_v62  ;;  %v11996_v10 = vmul.f32 0.36787945, %v4333_v9 }
 0x7ae   : > { %v11939_v61 = vmul.f32 %v7958_v15, %v11636_v44  ;;  %v7960_v2 = vpop.eup %7959  ;;  %v4106_v44 = vmul.f32 -2.2959185, %v11924_v43  ;;  %v11967_v15 = vmul.f32 %v11945_v13, %v4703_v55  ;;  %v11983_v55 = vmul.f32 0.36787945, %v11849_v27 }
 0x7af   : > { %v11989_v22 = vmul.f32 %v4400_v57, %v11891_v33  ;;  %v3978_v50 = vmul.f32 %v7960_v2, %v11542_v32  ;;  %v12000_v39 = vmul.f32 %v11974_v56, %v11928_v46  ;;  %v4851_v9 = vmul.f32 0.36787945, %v4787_v11 }
 0x7b0   : > { %4290 = vadd.xlane.f32.xlu1 %v11886_v18  ;;  %v11950_v14 = vmul.f32 %v4723_v20, %v11939_v61  ;;  %v7962_v20 = vpop.eup %7961  ;;  %v4136_v25 = vmul.f32 1.442695, %v4106_v44  ;;  %v12004_v44 = vmul.f32 0.36787945, %v11872_v63  ;;  %v12012_v62 = vmul.f32 %v11983_v55, %v11869_v5 }
 0x7b1   : > { %4180 = vadd.xlane.f32.xlu0 %v11906_v49  ;;  %v11942_v49 = vmul.f32 %v7956_v52, %v11595_v35  ;;  %v11956_v35 = vmul.f32 %v11947_v48, %v11921_v16  ;;  %v11986_v23 = vmul.f32 %v7962_v20, %v11980_v31  ;;  %14679 = vst [vmem:[#allocation79_spill] sm:$0xff] %v11989_v22  ;;  %v4464_v16 = vmul.f32 0.36787945, %v4400_v57 }
 0x7b2   : > { %v11964_v52 = vmul.f32 %v4787_v11, %v11950_v14  ;;  %vm3979_vm11 = vcmp.eq.f32.partialorder %v11542_v32, inf  ;;  %7973 = vpow2.f32 %v4136_v25  ;;  %v4850_v31 = vmul.f32 0.36787945, %v4786_v60 }
 0x7b3   : > { %14676 = vst [vmem:[#allocation87_spill] sm:$0xff] %v11956_v35  ;;  %v7964_v1 = vpop.eup %7963  ;;  %v12015_v57 = vmul.f32 %v4464_v16, %v11989_v22  ;;  %v12025_v46 = vmul.f32 %v11996_v10, %v4381_v34  ;;  %v12030_v22 = vmul.f32 0.36787945, %v4851_v9  ;;  %v3982_v11 = vand.u32 2147483648, %v11542_v32 }
 0x7b4   : > { %4860 = vadd.xlane.f32.xlu1 %v11913_v36  ;;  %14677 = vst [vmem:[#allocation88_spill] sm:$0xff] %v11964_v52  ;;  %v12007_v20 = vmul.f32 %v7964_v1, %v11667_v7  ;;  %v7966_v2 = vpop.eup %7965  ;;  %v3980_v7 = vsel %vm3979_vm11, %v11542_v32, %v3978_v50  ;;  %v12028_v5 = vmul.f32 %v4851_v9, %v11964_v52  ;;  %vm3981_vm0 = vcmp.eq.f32.partialorder %v11542_v32, 0.0 }
 0x7b5   : > { %4414 = vadd.xlane.f32.xlu0 %v4381_v34  ;;  %14680 = vst [vmem:[#allocation92_spill] sm:$0xff] %v12015_v57  ;;  %v4528_v25 = vmul.f32 0.36787945, %v4464_v16  ;;  %v4006_v50 = vmul.f32 %v7966_v2, %v11823_v24  ;;  %v12044_v9 = vsel %vm3981_vm0, %v3982_v11, %v3980_v7  ;;  %v4403_v52 = vmul.f32 0.36787945, %v11915_v38 }
 0x7b6   : > { %v12019_v63 = vmul.f32 %v4722_v42, %v12007_v20  ;;  %v12022_v1 = vpop.eup %7967  ;;  %14681 = vst [vmem:[#allocation81_spill] sm:$0xff] %v12028_v5  ;;  %v12042_v34 = vmul.f32 %v12030_v22, %v12028_v5  ;;  %14683 = vst [vmem:[#allocation85_spill] sm:$0xff] %v12044_v9  ;;  %v4023_v16 = vmul.f32 0.93333334, %v12044_v9  ;;  %v12060_v2 = vmul.f32 %v12004_v44, %v11886_v18 }
 0x7b7   : > { %v12049_v33 = vmul.f32 %v12022_v1, %v11648_v30  ;;  %v12063_v7 = vmul.f32 0.36787945, %v11888_v17  ;;  %v12066_v38 = vmul.f32 %v4528_v25, %v12015_v57  ;;  %v12069_v30 = vmul.f32 %v4403_v52, %v11932_v12  ;;  %v7970_v5 = vpop.eup %7969 }
 0x7b8   : > { %4736 = vadd.xlane.f32.xlu1 %v11942_v49  ;;  %v12035_v42 = vmul.f32 %v4786_v60, %v12019_v63  ;;  %v12052_v60 = vmul.f32 0.36787945, %v11936_v28  ;;  %v4039_v28 = vsub.f32 0.21777777, %v4023_v16  ;;  %v4976_v11 = vmul.f32 0.36787945, %v11947_v48 }
 0x7b9   : > { %4926 = vadd.xlane.f32.xlu0 %v11960_v8  ;;  %14685 = vst [vmem:[#allocation97_spill] sm:$0xff] %v12066_v38  ;;  %vm4007_vm0 = vcmp.eq.f32.partialorder %v11823_v24, inf  ;;  %v12075_v18 = vmul.f32 0.36787945, %v4850_v31  ;;  %v12087_v48 = vmul.f32 %v12063_v7, %v11913_v36  ;;  %v4718_v57 = vmul.f32 0.00033546262, %v11849_v27 }
 0x7ba   : > { %14682 = vst [vmem:[#allocation18_spill] sm:$0xff] %v12035_v42  ;;  %v12055_v32 = vmul.f32 %v4850_v31, %v12035_v42  ;;  %v7972_v17 = vpop.eup %7971  ;;  %v4008_v42 = vsel %vm4007_vm0, %v11823_v24, %v4006_v50  ;;  %v12080_v25 = vmul.f32 %v12052_v60, %v11960_v8  ;;  %v12083_v38 = vmul.f32 %v4976_v11, %v11956_v35 }
 0x7bb   : > { %v5040_v16 = vmul.f32 0.36787945, %v4976_v11  ;;  %v4055_v9 = vmul.f32 -2.2959185, %v4039_v28  ;;  %v4010_v50 = vand.u32 2147483648, %v11823_v24  ;;  %v3999_v8 = vmul.f32 %v7970_v5, %v11924_v43 }
 0x7bc   : > { %4802 = vadd.xlane.f32.xlu1 %v11967_v15  ;;  %14684 = vst [vmem:[#allocation96_spill] sm:$0xff] %v12055_v32  ;;  %14686 = vst [vmem:[#allocation98_spill] sm:$0xff] %v12083_v38  ;;  %v12092_v31 = vmul.f32 %v12075_v18, %v12055_v32  ;;  %vm4009_vm11 = vcmp.eq.f32.partialorder %v11823_v24, 0.0  ;;  %vm4000_vm0 = vcmp.eq.f32.partialorder %v11924_v43, inf  ;;  %v12106_v27 = vmul.f32 %v7972_v17, %v11632_v54 }
 0x7bd   : > { %4186 = vadd.xlane.f32.xlu0 %v11986_v23  ;;  %v12098_v35 = vmul.f32 %v5040_v16, %v12083_v38  ;;  %v12102_v36 = vsel %vm4009_vm11, %v4010_v50, %v4008_v42  ;;  %v4402_v28 = vmul.f32 0.36787945, %v11974_v56  ;;  %vm4002_vm6 = vcmp.eq.f32.partialorder %v11924_v43, 0.0 }
 0x7be   : > { %14687 = vst [vmem:[#allocation50_spill] sm:$0xff] %v12102_v36  ;;  %v4766_v5 = vmul.f32 %v4718_v57, %v11942_v49  ;;  %v12112_v38 = vmul.f32 0.36787945, %v11945_v13  ;;  %v4082_v24 = vmul.f32 1.442695, %v4055_v9  ;;  %v4001_v32 = vsel %vm4000_vm0, %v11924_v43, %v3999_v8 }
 0x7bf   : > { %v7974_v11 = vpop.eup %7973  ;;  %v12117_v42 = vmul.f32 %v4402_v28, %v12000_v39  ;;  %v4466_v54 = vmul.f32 0.36787945, %v4402_v28  ;;  %v4467_v17 = vmul.f32 0.36787945, %v4403_v52  ;;  %v4027_v56 = vmul.f32 0.93333334, %v12102_v36 }
 0x7c0   : > { %4412 = vadd.xlane.f32.xlu1 %v11994_v51  ;;  %v4003_v50 = vand.u32 2147483648, %v11924_v43  ;;  %v12124_v49 = vsel %vm14326_vm14, %v11748_v58, 0.0  ;;  %v12127_v13 = vmul.f32 0.36787945, %v11983_v55  ;;  %v5104_v28 = vmul.f32 0.36787945, %v5040_v16 }
 0x7c1   : > { %4288 = vadd.xlane.f32.xlu0 %v12012_v62  ;;  %14688 = vst [vmem:[#allocation25_spill] sm:$0xff] %v12124_v49  ;;  %v12130_v9 = vmul.f32 %v7974_v11, %v12124_v49  ;;  %v12133_v8 = vmul.f32 %v4466_v54, %v12117_v42  ;;  %v12136_v52 = vmul.f32 %v4467_v17, %v12069_v30  ;;  %v4396_v55 = vmul.f32 0.36787945, %v11970_v19 }
 0x7c2   : > { %v12140_v36 = vsel %vm4002_vm6, %v4003_v50, %v4001_v32  ;;  %v4831_v58 = vmul.f32 %v12112_v38, %v11967_v15  ;;  %7975 = vpow2.f32 %v4082_v24  ;;  %v12147_v11 = vmul.f32 %v5104_v28, %v12098_v35 }
 0x7c3   : > { %14689 = vst [vmem:[#allocation41_spill] sm:$0xff] %v12140_v36  ;;  %v4043_v4 = vsub.f32 0.21777777, %v4027_v56  ;;  %v4026_v49 = vmul.f32 0.93333334, %v12140_v36  ;;  %v4318_v43 = vmul.f32 %v12127_v13, %v12012_v62  ;;  %v4444_v32 = vmul.f32 %v4396_v55, %v11994_v51 }
 0x7c4   : > { %4478 = vadd.xlane.f32.xlu1 %v12025_v46  ;;  %v12154_v16 = vmul.f32 0.36787945, %v11996_v10  ;;  %v12157_v24 = vmul.f32 0.36787945, %v12022_v1  ;;  %v4335_v50 = vmul.f32 0.36787945, %v12004_v44 }
 0x7c5   : > { %4230 = vadd.xlane.f32.xlu0 %v12049_v33  ;;  %v4059_v15 = vmul.f32 -2.2959185, %v4043_v4  ;;  %v4042_v19 = vsub.f32 0.21777777, %v4026_v49  ;;  %v4979_v62 = vmul.f32 0.36787945, %v12030_v22 }
 0x7c6   : > { %v12161_v56 = vmul.f32 %v12154_v16, %v12025_v46  ;;  %v4530_v28 = vmul.f32 0.36787945, %v4466_v54  ;;  %v4257_v46 = vmul.f32 %v12157_v24, %v12049_v33  ;;  %v4782_v36 = vmul.f32 0.36787945, %v4718_v57 }
 0x7c7   : > { %v4090_v51 = vmul.f32 1.442695, %v4059_v15  ;;  %v12168_v4 = vmul.f32 %v4979_v62, %v12042_v34  ;;  %v4058_v49 = vmul.f32 -2.2959185, %v4042_v19  ;;  %v4383_v44 = vmul.f32 %v4335_v50, %v12060_v2 }
 0x7c8   : > { %4354 = vadd.xlane.f32.xlu1 %v12060_v2  ;;  %v12171_v10 = vmul.f32 %v4530_v28, %v12133_v8  ;;  %v4908_v22 = vmul.f32 0.36787945, %v12063_v7  ;;  %v4531_v54 = vmul.f32 0.36787945, %v4467_v17  ;;  %v12187_v2 = vmul.f32 0.36787945, %v12052_v60 }
 0x7c9   : > { %4990 = vadd.xlane.f32.xlu0 %v12080_v25  ;;  %7977 = vpow2.f32 %v4090_v51  ;;  %v4088_v57 = vmul.f32 1.442695, %v4058_v49  ;;  %v12198_v49 = vmul.f32 0.36787945, %v4396_v55  ;;  %v4847_v60 = vmul.f32 0.36787945, %v12112_v38 }
 0x7ca   : > { %14690 = vst [vmem:[#allocation52_spill] sm:$0xff] %v12171_v10  ;;  %v12181_v28 = vmul.f32 %v4531_v54, %v12136_v52  ;;  %v4830_v10 = vmul.f32 %v4782_v36, %v4766_v5  ;;  %v4956_v7 = vmul.f32 %v4908_v22, %v12087_v48  ;;  %v5043_v54 = vmul.f32 0.36787945, %v4979_v62 }
 0x7cb   : > { %7979 = vpow2.f32 %v4088_v57  ;;  %v12214_v55 = vmul.f32 %v12198_v49, %v4444_v32  ;;  %v4334_v38 = vmul.f32 0.36787945, %v12127_v13  ;;  %v4895_v62 = vmul.f32 %v4847_v60, %v4831_v58 }
 0x7cc   : > { %4924 = vadd.xlane.f32.xlu1 %v12087_v48  ;;  %14691 = vst [vmem:[#allocation47_spill] sm:$0xff] %v12181_v28  ;;  %v12203_v48 = vmul.f32 %v12187_v2, %v12080_v25  ;;  %v12218_v25 = vmul.f32 0.00033546262, %v12022_v1  ;;  %v12231_v28 = vmul.f32 0.36787945, %v4335_v50  ;;  %7981 = vrsqrt.f32 %v11510_v40 }
 0x7cd   : > { %4742 = vadd.xlane.f32.xlu0 %v12106_v27  ;;  %v5107_v13 = vmul.f32 0.36787945, %v5043_v54  ;;  %vm3965_vm6 = vcmp.eq.f32.partialorder %v11510_v40, inf  ;;  %vm3967_vm11 = vcmp.eq.f32.partialorder %v11510_v40, 0.0  ;;  %vm14323_vm0 = vcmask 257024  }
 0x7ce   : > { %v12235_v1 = vmul.f32 %v12218_v25, %v12106_v27  ;;  %v12251_v27 = vmul.f32 %v12231_v28, %v4383_v44  ;;  %7983 = vrsqrt.f32 %v11529_v45  ;;  %vm14751_vm14 = vcmask 48128  }
 0x7cf   : > { %v12178_v15 = vpop.eup %7975  ;;  %vm14765_vm3 = vcmask 72704  }
 0x7d0   : > { %4800 = vadd.xlane.f32.xlu1 %v4766_v5  ;;  %v4215_v17 = vmul.f32 0.36787945, %v12178_v15 }
 0x7d1   : > { %4184 = vadd.xlane.f32.xlu0 %v12130_v9 }
 0x7d2   : > { %v4279_v5 = vmul.f32 0.36787945, %v4215_v17 }
 0x7d4   : > { %4866 = vadd.xlane.f32.xlu1 %v4831_v58  ;;  %v4525_v58 = vmul.f32 0.36787945, %v12154_v16  ;;  %v12254_v16 = vmul.f32 0.36787945, %v12157_v24 }
 0x7d5   : > { %4352 = vadd.xlane.f32.xlu0 %v4318_v43 }
 0x7d8   : > { %4476 = vadd.xlane.f32.xlu1 %v4444_v32  ;;  %v12229_v32 = vmul.f32 %v4334_v38, %v4318_v43 }
 0x7d9   : > { %4228 = vadd.xlane.f32.xlu0 %v11768_v53  ;;  %v4978_v53 = vmul.f32 0.36787945, %v12075_v18  ;;  %v12192_v18 = vmul.f32 %v12178_v15, %v11759_v59 }
 0x7db   : > { %v12184_v19 = vmul.f32 %v4978_v53, %v12092_v31  ;;  %v5042_v33 = vmul.f32 0.36787945, %v4978_v53  ;;  %v12206_v59 = vmul.f32 %v4215_v17, %v12192_v18  ;;  %v12227_v17 = vpop.eup %7977 }
 0x7dc   : > { %4542 = vadd.xlane.f32.xlu1 %v12161_v56  ;;  %14696 = vst [vmem:[#allocation26_spill] sm:$0xff] %v12227_v17  ;;  %v12248_v50 = vmul.f32 %v12227_v17, %v11986_v23  ;;  %v12266_v23 = vmul.f32 0.36787945, %v4782_v36  ;;  %v12283_v36 = vmul.f32 0.36787945, %v4847_v60 }
 0x7dd   : > { %4294 = vadd.xlane.f32.xlu0 %v4257_v46  ;;  %14692 = vst [vmem:[#allocation43_spill] sm:$0xff] %v12184_v19  ;;  %v12196_v51 = vmul.f32 %v5042_v33, %v12184_v19  ;;  %v5106_v53 = vmul.f32 0.36787945, %v5042_v33  ;;  %v12210_v19 = vmul.f32 %v5043_v54, %v12168_v4  ;;  %v12221_v57 = vmul.f32 %v4279_v5, %v12206_v59  ;;  %v12256_v54 = vpop.eup %7979 }
 0x7de   : > { %v4343_v33 = vmul.f32 0.36787945, %v4279_v5  ;;  %14698 = vst [vmem:[#allocation53_spill] sm:$0xff] %v12248_v50  ;;  %14699 = vst [vmem:[#allocation5_spill] sm:$0xff] %v12256_v54  ;;  %v12272_v24 = vmul.f32 %v12256_v54, %v12130_v9  ;;  %v12288_v9 = vpop.permute.xlu1 %5679 }
 0x7df   : > { %14693 = vst [vmem:[#allocation28_spill] sm:$0xff] %v12210_v19  ;;  %14694 = vst [vmem:[#allocation44_spill] sm:$0xff] %v12221_v57 }
 0x7e0   : > { %4418 = vadd.xlane.f32.xlu1 %v4383_v44  ;;  %v12239_v5 = vmul.f32 %v4343_v33, %v12221_v57  ;;  %v4407_v43 = vmul.f32 0.36787945, %v4343_v33  ;;  %v12264_v33 = vmul.f32 %v12254_v16, %v4257_v46  ;;  %v12268_v44 = vmul.f32 0.36787945, %v4908_v22  ;;  %14701 = vst [vmem:[#allocation7_spill] sm:$0xff] %v12272_v24  ;;  %14703 = vst [vmem:[#allocation9_spill] sm:$0xff] %v12288_v9 }
 0x7e1   : > { %4864 = vadd.xlane.f32.xlu0 %v4830_v10  ;;  %v12281_v46 = vmul.f32 %v12266_v23, %v4830_v10  ;;  %v12300_v10 = vmul.f32 0.36787945, %v12187_v2 }
 0x7e2   : > { %v4471_v22 = vmul.f32 0.36787945, %v4407_v43 }
 0x7e3   : > { %v12316_v2 = vmul.f32 %v12300_v10, %v12203_v48 }
 0x7e4   : > { %4988 = vadd.xlane.f32.xlu1 %v4956_v7 }
 0x7e5   : > { %4740 = vadd.xlane.f32.xlu0 %v11883_v37  ;;  %v12224_v37 = vmul.f32 %v5106_v53, %v12196_v51  ;;  %v12243_v53 = vmul.f32 %v5107_v13, %v12210_v19  ;;  %v12260_v13 = vmul.f32 %v4407_v43, %v12239_v5  ;;  %v12304_v43 = vpop.xlane.xlu1 %4158 }
 0x7e7   : > { %14695 = vst [vmem:[#allocation22_spill] sm:$0xff] %v12224_v37  ;;  %14697 = vst [vmem:[#allocation46_spill] sm:$0xff] %v12243_v53  ;;  %v4573_v37 = vmul.f32 %v4525_v58, %v12161_v56  ;;  %v4218_v53 = vmul.f32 0.36787945, %v12256_v54  ;;  %v12296_v58 = vmul.f32 %v12283_v36, %v4895_v62 }
 0x7e8   : > { %5054 = vadd.xlane.f32.xlu1 %v12203_v48  ;;  %14700 = vst [vmem:[#allocation6_spill] sm:$0xff] %v12260_v13  ;;  %v4535_v48 = vmul.f32 0.36787945, %v4471_v22 }
 0x7e9   : > { %4540 = vadd.xlane.f32.xlu0 %v12214_v55  ;;  %v12278_v56 = vmul.f32 %v4218_v53, %v12272_v24  ;;  %v4282_v60 = vmul.f32 0.36787945, %v4218_v53  ;;  %v4524_v24 = vmul.f32 0.36787945, %v12198_v49 }
 0x7eb   : > { %14702 = vst [vmem:[#allocation8_spill] sm:$0xff] %v12278_v56  ;;  %v4572_v49 = vmul.f32 %v4524_v24, %v12214_v55 }
 0x7ec   : > { %4930 = vadd.xlane.f32.xlu1 %v4895_v62  ;;  %v12311_v62 = vmul.f32 %v4282_v60, %v12278_v56 }
 0x7ed   : > { %4416 = vadd.xlane.f32.xlu0 %v12229_v32 }
 0x7ee   : > { %14706 = vst [vmem:[#allocation13_spill] sm:$0xff] %v12311_v62 }
 0x7f0   : > { %4806 = vadd.xlane.f32.xlu1 %v12235_v1 }
 0x7f1   : > { %4482 = vadd.xlane.f32.xlu0 %v12251_v27 }
 0x7f4   : > { %4590 = vadd.xlane.f32.xlu1 %v4573_v37  ;;  %v12286_v37 = vmul.f32 %v12268_v44, %v4956_v7  ;;  %v4219_v7 = vmul.f32 0.36787945, %v12227_v17 }
 0x7f5   : > { %4358 = vadd.xlane.f32.xlu0 %v12264_v33 }
 0x7f6   : > { %v12308_v9 = vmul.f32 %v4219_v7, %v12248_v50  ;;  %v4283_v54 = vmul.f32 0.36787945, %v4219_v7  ;;  %v12325_v50 = vmul.f32 0.36787945, %v4334_v38 }
 0x7f8   : > { %4292 = vadd.xlane.f32.xlu1 %v11816_v3  ;;  %v12293_v3 = vmul.f32 %v4471_v22, %v12260_v13  ;;  %14705 = vst [vmem:[#allocation10_spill] sm:$0xff] %v12308_v9  ;;  %v12320_v53 = vmul.f32 %v4283_v54, %v12308_v9  ;;  %v4347_v17 = vmul.f32 0.36787945, %v4283_v54  ;;  %v4346_v13 = vmul.f32 0.36787945, %v4282_v60 }
 0x7f9   : > { %4928 = vadd.xlane.f32.xlu0 %v12281_v46 }
 0x7fa   : > { %14704 = vst [vmem:[#allocation11_spill] sm:$0xff] %v12293_v3  ;;  %14707 = vst [vmem:[#allocation12_spill] sm:$0xff] %v12320_v53  ;;  %v12331_v7 = vmul.f32 %v4347_v17, %v12320_v53  ;;  %v4411_v9 = vmul.f32 0.36787945, %v4347_v17  ;;  %v12337_v54 = vmul.f32 %v4535_v48, %v12293_v3  ;;  %v12340_v38 = vmul.f32 %v4346_v13, %v12311_v62 }
 0x7fb   : > { %v12355_v17 = vmul.f32 0.36787945, %v12231_v28 }
 0x7fc   : > { %5052 = vadd.xlane.f32.xlu1 %v12286_v37  ;;  %14709 = vst [vmem:[#allocation14_spill] sm:$0xff] %v12331_v7  ;;  %14710 = vst [vmem:[#allocation17_spill] sm:$0xff] %v12337_v54  ;;  %v12346_v55 = vmul.f32 %v4411_v9, %v12331_v7  ;;  %v4475_v60 = vmul.f32 0.36787945, %v4411_v9 }
 0x7fd   : > { %4994 = vadd.xlane.f32.xlu0 %v12296_v58  ;;  %14711 = vst [vmem:[#allocation19_spill] sm:$0xff] %v12340_v38  ;;  %v12372_v28 = vmul.f32 %v12355_v17, %v12251_v27 }
 0x7fe   : > { %14712 = vst [vmem:[#allocation20_spill] sm:$0xff] %v12346_v55  ;;  %v12366_v48 = vmul.f32 %v4475_v60, %v12346_v55  ;;  %v4539_v9 = vmul.f32 0.36787945, %v4475_v60 }
 0x800   : > { %4234 = vadd.xlane.f32.xlu1 %v11806_v47  ;;  %v12322_v47 = vpop.permute.xlu0 %5677  ;;  %14713 = vst [vmem:[#allocation21_spill] sm:$0xff] %v12366_v48  ;;  %v12380_v54 = vmul.f32 %v4539_v9, %v12366_v48  ;;  %v3968_v9 = vand.u32 2147483648, %v11510_v40  ;;  %v5101_v48 = vmul.f32 0.36787945, %v12300_v10 }
 0x801   : > { %4746 = vadd.xlane.f32.xlu0 %v11939_v61  ;;  %14708 = vst [vmem:[#allocation15_spill] sm:$0xff] %v12322_v47  ;;  %v12334_v61 = vmul.f32 0.36787945, %v12218_v25  ;;  %v12352_v25 = vmul.f32 %v12325_v50, %v12229_v32 }
 0x802   : > { %14714 = vst [vmem:[#allocation24_spill] sm:$0xff] %v12380_v54 }
 0x803   : > { %v12359_v22 = vmul.f32 %v12334_v61, %v12235_v1  ;;  %v12375_v1 = vmul.f32 0.36787945, %v12254_v16  ;;  %v12393_v16 = vmul.f32 0.36787945, %v12268_v44 }
 0x804   : > { %5118 = vadd.xlane.f32.xlu1 %v12316_v2  ;;  %v12342_v47 = vpop.xlane.xlu0 %4162 }
 0x805   : > { %v12327_v56 = vpop.xlane.xlu1 %4156  ;;  %4588 = vadd.xlane.f32.xlu0 %v4572_v49  ;;  %v7982_v49 = vpop.eup %7981  ;;  %v12390_v27 = vmul.f32 %v12375_v1, %v12264_v33 }
 0x806   : > { %v3964_v53 = vmul.f32 %v7982_v49, %v11510_v40  ;;  %v4410_v49 = vmul.f32 0.36787945, %v4346_v13  ;;  %v12410_v13 = vmul.f32 %v12393_v16, %v12286_v37 }
 0x808   : > { %4804 = vadd.xlane.f32.xlu1 %v11894_v41  ;;  %v12362_v41 = vpop.xlane.xlu0 %4170  ;;  %v3966_v60 = vsel %vm3965_vm6, %v11510_v40, %v3964_v53  ;;  %v12406_v33 = vmul.f32 %v4410_v49, %v12340_v38  ;;  %v4474_v44 = vmul.f32 0.36787945, %v4410_v49  ;;  %v12413_v53 = vmul.f32 0.36787945, %v12266_v23 }
 0x809   : > { %v12348_v24 = vpop.xlane.xlu1 %4160  ;;  %4480 = vadd.xlane.f32.xlu0 %v12352_v25  ;;  %v3969_v62 = vsel %vm3967_vm11, %v3968_v9, %v3966_v60  ;;  %v5149_v49 = vmul.f32 %v5101_v48, %v12316_v2  ;;  %v4849_v2 = vmul.f32 0.36787945, %v12334_v61  ;;  %vm14722_vm6 = vcmask 15360  }
 0x80a   : > { %14716 = vst [vmem:[#allocation27_spill] sm:$0xff] %v12406_v33  ;;  %v12419_v40 = vmul.f32 %v4474_v44, %v12406_v33  ;;  %v4538_v38 = vmul.f32 0.36787945, %v4474_v44  ;;  %v4021_v48 = vmul.f32 0.93333334, %v3969_v62  ;;  %vm14723_vm11 = vmmov %vm14722_vm6 }
 0x80c   : > { %4870 = vadd.xlane.f32.xlu1 %v12359_v22  ;;  %v12382_v55 = vpop.xlane.xlu0 %4168  ;;  %14717 = vst [vmem:[#allocation23_spill] sm:$0xff] %v12419_v40  ;;  %v12427_v10 = vmul.f32 %v4538_v38, %v12419_v40 }
 0x80d   : > { %v12368_v32 = vpop.xlane.xlu1 %4166  ;;  %4546 = vadd.xlane.f32.xlu0 %v12372_v28 }
 0x80e   : > { %14719 = vst [vmem:[#allocation56_spill] sm:$0xff] %v12427_v10 }
 0x810   : > { %4356 = vadd.xlane.f32.xlu1 %v11852_v26  ;;  %v12401_v26 = vpop.xlane.xlu0 %4174 }
 0x811   : > { %v12386_v7 = vpop.xlane.xlu1 %4164  ;;  %4422 = vadd.xlane.f32.xlu0 %v12390_v27  ;;  %14715 = vst [vmem:[#allocation51_spill] sm:$0xff] %v12401_v26 }
 0x814   : > { %4232 = vadd.xlane.f32.xlu1 %v11847_v6  ;;  %v12423_v37 = vpop.xlane.xlu0 %4172 }
 0x815   : > { %v4223_v54 = vpop.xlane.xlu1 %4222  ;;  %5116 = vadd.xlane.f32.xlu0 %v12410_v13  ;;  %14718 = vst [vmem:[#allocation55_spill] sm:$0xff] %v12423_v37 }
 0x816   : > { %v5197_v6 = vsel %vm2073_vm7, %v12304_v43, %v4223_v54  ;;  %v12433_v43 = vmul.f32 %v12413_v53, %v12281_v46  ;;  %v6836_v54 = vadd.f32 -3.7333333, %v3969_v62 }
 0x818   : > { %4298 = vadd.xlane.f32.xlu1 %v11860_v0  ;;  %v12441_v0 = vmul.f32 0.36787945, %v12283_v36  ;;  %v12444_v38 = vpop.xlane.xlu0 %4178  ;;  %v4645_v46 = vmul.f32 -2.2959185, %v6836_v54 }
 0x819   : > { %v12429_v60 = vpop.xlane.xlu1 %4734  ;;  %4992 = vadd.xlane.f32.xlu0 %v12433_v43  ;;  %14720 = vst [vmem:[#allocation54_spill] sm:$0xff] %v12444_v38 }
 0x81a   : > { %v3433_v23 = vpop.f32.mrf.mxu1  ;;  %v12450_v40 = vmul.f32 %v12441_v0, %v12296_v58  ;;  %v7984_v58 = vpop.eup %7983 }
 0x81b   : > { %3438 = vst.msk [vmem:[%s12435_s26] sm:$0xf] %vm14323_vm0, %v3433_v23  ;;  %vm14741_vm0 = vcmask 39936  }
 0x81c   : > { %v7461_v9 = vpop.f32.mrf.mxu1  ;;  %5166 = vadd.xlane.f32.xlu1 %v5149_v49  ;;  %v12454_v36 = vpop.xlane.xlu0 %4176  ;;  %v4527_v49 = vmul.f32 0.36787945, %v12355_v17  ;;  %v12466_v17 = vmul.f32 0.36787945, %v12325_v50 }
 0x81d   : > { %v4221_v44 = vpop.xlane.xlu1 %4220  ;;  %4868 = vadd.xlane.f32.xlu0 %v11910_v21  ;;  %14721 = vst [vmem:[#allocation58_spill] sm:$0xff] %v12454_v36  ;;  %v4661_v9 = vmul.f32 %v6836_v54, %v4645_v46  ;;  %v5100_v46 = vmul.f32 0.36787945, %v12393_v16 }
 0x81e   : > { %v5196_v10 = vsel %vm2073_vm7, %v12327_v56, %v4221_v44  ;;  %v4897_v56 = vmul.f32 %v4849_v2, %v12359_v22  ;;  %v4037_v44 = vsub.f32 0.21777777, %v4021_v48  ;;  %v4575_v62 = vmul.f32 %v4527_v49, %v12372_v28 }
 0x81f   : > { %v4686_v38 = vmul.f32 1.442695, %v4661_v9  ;;  %v3957_v22 = vmul.f32 %v7984_v58, %v11529_v45  ;;  %v14725_v9 = vld [vmem:[#allocation82_spill] sm:$0xff]  ;;  %v12495_v58 = vmul.f32 0.36787945, %v4849_v2 }
 0x820   : > { %5058 = vadd.xlane.f32.xlu1 %v12450_v40  ;;  %v4053_v54 = vmul.f32 -2.2959185, %v4037_v44 }
 0x821   : > { %v4287_v23 = vpop.xlane.xlu1 %4286  ;;  %4744 = vadd.xlane.f32.xlu0 %v12007_v20  ;;  %7985 = vpow2.f32 %v4686_v38  ;;  %v12490_v38 = vmul.f32 0.36787945, %v12375_v1 }
 0x822   : > { %v5213_v33 = vsel %vm14722_vm6, %v5197_v6, %v4287_v23  ;;  %v12461_v61 = vpop.xlane.xlu0 %4732  ;;  %v4078_v50 = vmul.f32 1.442695, %v4053_v54  ;;  %vm3958_vm6 = vcmp.eq.f32.partialorder %v11529_v45, inf  ;;  %v12507_v54 = vmul.f32 %v12495_v58, %v4897_v56 }
 0x823   : > { %v3959_v48 = vsel %vm3958_vm6, %v11529_v45, %v3957_v22  ;;  %vm14729_vm6 = vcmask 15360  }
 0x824   : > { %4934 = vadd.xlane.f32.xlu1 %v4897_v56  ;;  %7987 = vpow2.f32 %v4078_v50 }
 0x825   : > { %v4285_v21 = vpop.xlane.xlu1 %4284  ;;  %4594 = vadd.xlane.f32.xlu0 %v4575_v62 }
 0x826   : > { %v5212_v36 = vsel %vm14723_vm11, %v5196_v10, %v4285_v21  ;;  %v12469_v6 = vpop.xlane.xlu0 %4798  ;;  %v12476_v10 = vmul.f32 %v12466_v17, %v12352_v25  ;;  %vm3960_vm11 = vcmp.eq.f32.partialorder %v11529_v45, 0.0 }
 0x828   : > { %4810 = vadd.xlane.f32.xlu1 %v11950_v14  ;;  %v3961_v14 = vand.u32 2147483648, %v11529_v45  ;;  %v12500_v45 = vmul.f32 %v12490_v38, %v12390_v27 }
 0x829   : > { %v4351_v20 = vpop.xlane.xlu1 %4350  ;;  %4296 = vadd.xlane.f32.xlu0 %v11879_v29 }
 0x82a   : > { %v5229_v28 = vsel %vm2107_vm8, %v5213_v33, %v4351_v20  ;;  %v12481_v23 = vpop.xlane.xlu0 %4182  ;;  %v5148_v33 = vmul.f32 %v5100_v46, %v12410_v13  ;;  %v3962_v29 = vsel %vm3960_vm11, %v3961_v14, %v3959_v48  ;;  %v14727_v46 = vld [vmem:[#allocation94_spill] sm:$0xff]  ;;  %v14728_v48 = vld [vmem:[#allocation16_spill] sm:$0xff]  ;;  %vm14733_vm11 = vcmask 31744  }
 0x82b   : > { %14724 = vst [vmem:[#allocation33_spill] sm:$0xff] %v12481_v23  ;;  %v6835_v21 = vadd.f32 -3.7333333, %v3962_v29 }
 0x82c   : > { %4544 = vadd.xlane.f32.xlu1 %v12476_v10 }
 0x82d   : > { %v4227_v16 = vpop.xlane.xlu1 %4226  ;;  %5164 = vadd.xlane.f32.xlu0 %v5148_v33  ;;  %v4644_v22 = vmul.f32 -2.2959185, %v6835_v21 }
 0x82e   : > { %v5199_v25 = vsel %vm2073_vm7, %v12342_v47, %v4227_v16  ;;  %v12492_v49 = vpop.xlane.xlu0 %4796  ;;  %v14726_v47 = vld [vmem:[#allocation83_spill] sm:$0xff]  ;;  %v7986_v2 = vpop.eup %7985  ;;  %v4020_v16 = vmul.f32 0.93333334, %v3962_v29  ;;  %v12533_v29 = vmul.f32 0.36787945, %v12441_v0 }
 0x82f   : > { %v12517_v14 = vmul.f32 %v7986_v2, %v14728_v48  ;;  %v4660_v56 = vmul.f32 %v6835_v21, %v4644_v22 }
 0x830   : > { %4420 = vadd.xlane.f32.xlu1 %v14725_v9 }
 0x831   : > { %v4349_v44 = vpop.xlane.xlu1 %4348  ;;  %4932 = vadd.xlane.f32.xlu0 %v14726_v47  ;;  %v4036_v47 = vsub.f32 0.21777777, %v4020_v16  ;;  %v12542_v16 = vmul.f32 %v12533_v29, %v12450_v40 }
 0x832   : > { %v5228_v13 = vsel %vm2107_vm8, %v5212_v36, %v4349_v44  ;;  %v12503_v1 = vpop.xlane.xlu0 %4862  ;;  %v4974_v36 = vmul.f32 0.36787945, %v12413_v53  ;;  %v12521_v44 = vpop.eup %7987 }
 0x833   : > { %v4052_v48 = vmul.f32 -2.2959185, %v4036_v47  ;;  %v4526_v47 = vmul.f32 0.36787945, %v12466_v17 }
 0x834   : > { %4486 = vadd.xlane.f32.xlu1 %v12500_v45  ;;  %v5022_v9 = vmul.f32 %v4974_v36, %v12433_v43 }
 0x835   : > { %v4225_v62 = vpop.xlane.xlu1 %4224  ;;  %4998 = vadd.xlane.f32.xlu0 %v12507_v54 }
 0x836   : > { %v5198_v20 = vsel %vm2073_vm7, %v12348_v24, %v4225_v62  ;;  %v12513_v27 = vpop.xlane.xlu0 %4738  ;;  %v4684_v62 = vmul.f32 1.442695, %v4660_v56 }
 0x838   : > { %4362 = vadd.xlane.f32.xlu1 %v14727_v46  ;;  %v14731_v46 = vld [vmem:[#allocation76_spill] sm:$0xff]  ;;  %7989 = vpow2.f32 %v4684_v62 }
 0x839   : > { %v4291_v50 = vpop.xlane.xlu1 %4290  ;;  %4750 = vadd.xlane.f32.xlu0 %v12517_v14  ;;  %v12530_v2 = vmul.f32 %v12521_v44, %v14731_v46 }
 0x83a   : > { %v5215_v33 = vsel %vm14729_vm6, %v5199_v25, %v4291_v50  ;;  %v12524_v24 = vpop.xlane.xlu0 %4180  ;;  %v14732_v25 = vld [vmem:[#allocation86_spill] sm:$0xff]  ;;  %v5038_v50 = vmul.f32 0.36787945, %v4974_v36  ;;  %vm14736_vm6 = vmmov %vm14733_vm11 }
 0x83b   : > { %14730 = vst [vmem:[#allocation45_spill] sm:$0xff] %v12524_v24 }
 0x83c   : > { %5056 = vadd.xlane.f32.xlu1 %v5022_v9  ;;  %v5086_v46 = vmul.f32 %v5038_v50, %v5022_v9  ;;  %v5102_v26 = vmul.f32 0.36787945, %v5038_v50  ;;  %v12606_v50 = vmul.f32 0.36787945, %v12495_v58 }
 0x83d   : > { %v12526_v53 = vpop.xlane.xlu1 %4860  ;;  %4360 = vadd.xlane.f32.xlu0 %v14732_v25  ;;  %v4076_v25 = vmul.f32 1.442695, %v4052_v48  ;;  %v14740_v48 = vld [vmem:[#allocation85_spill] sm:$0xff] }
 0x83e   : > { %v4415_v43 = vpop.xlane.xlu0 %4414  ;;  %v6838_v24 = vadd.f32 -3.7333333, %v14740_v48  ;;  %v5150_v19 = vmul.f32 %v5102_v26, %v5086_v46 }
 0x83f   : > { %v5245_v21 = vsel %vm14733_vm11, %v5229_v28, %v4415_v43  ;;  %7991 = vpow2.f32 %v4076_v25  ;;  %v14738_v43 = vld [vmem:[#allocation88_spill] sm:$0xff]  ;;  %vm14739_vm11 = vcmask 15360  }
 0x840   : > { %4238 = vadd.xlane.f32.xlu1 %v12530_v2  ;;  %v14742_v25 = vld [vmem:[#allocation32_spill] sm:$0xff] }
 0x841   : > { %v12538_v22 = vpop.xlane.xlu1 %4736  ;;  %4426 = vadd.xlane.f32.xlu0 %v11932_v12  ;;  %v14737_v12 = vld [vmem:[#allocation87_spill] sm:$0xff]  ;;  %7993 = vrsqrt.f32 %v14742_v25 }
 0x842   : > { %14734 = vst [vmem:[#allocation30_spill] sm:$0xff] %v12538_v22  ;;  %v12545_v0 = vpop.xlane.xlu0 %4926 }
 0x844   : > { %5122 = vadd.xlane.f32.xlu1 %v12542_v16 }
 0x845   : > { %v12548_v56 = vpop.xlane.xlu1 %4802  ;;  %5120 = vadd.xlane.f32.xlu0 %v5086_v46  ;;  %v7990_v3 = vpop.eup %7989 }
 0x846   : > { %v12550_v28 = vpop.xlane.xlu0 %4186 }
 0x847   : > { %14735 = vst [vmem:[#allocation59_spill] sm:$0xff] %v12550_v28 }
 0x848   : > { %4808 = vadd.xlane.f32.xlu1 %v12019_v63  ;;  %v4574_v63 = vmul.f32 %v4526_v47, %v12476_v10  ;;  %v14745_v47 = vld [vmem:[#allocation79_spill] sm:$0xff] }
 0x849   : > { %v4413_v36 = vpop.xlane.xlu1 %4412  ;;  %4996 = vadd.xlane.f32.xlu0 %v14737_v12 }
 0x84a   : > { %v5244_v40 = vsel %vm14736_vm6, %v5228_v13, %v4413_v36  ;;  %v4289_v62 = vpop.xlane.xlu0 %4288  ;;  %v14743_v13 = vld [vmem:[#allocation18_spill] sm:$0xff]  ;;  %vm3972_vm6 = vcmp.eq.f32.partialorder %v14742_v25, inf }
 0x84b   : > { %v5214_v23 = vsel %vm14739_vm11, %v5198_v20, %v4289_v62  ;;  %v4647_v62 = vmul.f32 -2.2959185, %v6838_v24  ;;  %vm3974_vm11 = vcmp.eq.f32.partialorder %v14742_v25, 0.0 }
 0x84c   : > { %4874 = vadd.xlane.f32.xlu1 %v14738_v43  ;;  %v14744_v43 = vld [vmem:[#allocation78_spill] sm:$0xff] }
 0x84d   : > { %v4479_v9 = vpop.xlane.xlu1 %4478  ;;  %4872 = vadd.xlane.f32.xlu0 %v14743_v13  ;;  %v12566_v20 = vmul.f32 %v7990_v3, %v14744_v43  ;;  %v14746_v13 = vld [vmem:[#allocation92_spill] sm:$0xff] }
 0x84e   : > { %v5261_v28 = vsel %vm14741_vm0, %v5245_v21, %v4479_v9  ;;  %v4231_v17 = vpop.xlane.xlu0 %4230  ;;  %v12570_v21 = vmul.f32 0.36787945, %v12490_v38 }
 0x84f   : > { %v5201_v36 = vsel %vm2073_vm7, %v12368_v32, %v4231_v17  ;;  %v12578_v32 = vpop.eup %7991  ;;  %v14749_v17 = vld [vmem:[#allocation74_spill] sm:$0xff] }
 0x850   : > { %4592 = vadd.xlane.f32.xlu1 %v4574_v63  ;;  %v4663_v63 = vmul.f32 %v6838_v24, %v4647_v62  ;;  %v12582_v3 = vmul.f32 %v12570_v21, %v12500_v45  ;;  %v4212_v43 = vmul.f32 0.36787945, %v12578_v32  ;;  %v4213_v62 = vmul.f32 0.36787945, %v12521_v44  ;;  %v7994_v45 = vpop.eup %7993 }
 0x851   : > { %v4355_v12 = vpop.xlane.xlu1 %4354  ;;  %4748 = vadd.xlane.f32.xlu0 %v12566_v20 }
 0x852   : > { %v5231_v48 = vsel %vm2107_vm8, %v5215_v33, %v4355_v12  ;;  %v12573_v10 = vpop.xlane.xlu0 %4990  ;;  %v4196_v12 = vmul.f32 %v12578_v32, %v14749_v17  ;;  %v4690_v24 = vmul.f32 1.442695, %v4663_v63  ;;  %v4261_v37 = vmul.f32 %v4213_v62, %v12530_v2 }
 0x853   : > { %v5103_v17 = vmul.f32 0.36787945, %v12533_v29  ;;  %v3971_v63 = vmul.f32 %v7994_v45, %v14742_v25  ;;  %v14757_v45 = vld [vmem:[#allocation81_spill] sm:$0xff] }
 0x854   : > { %4484 = vadd.xlane.f32.xlu1 %v14745_v47  ;;  %7995 = vpow2.f32 %v4690_v24  ;;  %v14755_v24 = vld [vmem:[#allocation84_spill] sm:$0xff] }
 0x855   : > { %v12576_v9 = vpop.xlane.xlu1 %4924  ;;  %4548 = vadd.xlane.f32.xlu0 %v14746_v13  ;;  %v5151_v57 = vmul.f32 %v5103_v17, %v12542_v16  ;;  %v3973_v2 = vsel %vm3972_vm6, %v14742_v25, %v3971_v63  ;;  %v14752_v16 = vld [vmem:[#allocation96_spill] sm:$0xff]  ;;  %vm14754_vm6 = vcmask 31744   ;;  %7997 = vrsqrt.f32 %v14755_v24 }
 0x856   : > { %v12585_v33 = vpop.xlane.xlu0 %4742 }
 0x857   : > { %14747 = vst [vmem:[#allocation60_spill] sm:$0xff] %v12585_v33  ;;  %v4260_v33 = vmul.f32 %v4212_v43, %v4196_v12 }
 0x858   : > { %4550 = vadd.xlane.f32.xlu1 %v12582_v3 }
 0x859   : > { %v12588_v38 = vpop.xlane.xlu1 %4800  ;;  %4424 = vadd.xlane.f32.xlu0 %v12000_v39 }
 0x85a   : > { %14748 = vst [vmem:[#allocation61_spill] sm:$0xff] %v12588_v38  ;;  %v12595_v47 = vpop.xlane.xlu0 %4184 }
 0x85b   : > { %14750 = vst [vmem:[#allocation29_spill] sm:$0xff] %v12595_v47 }
 0x85c   : > { %4236 = vadd.xlane.f32.xlu1 %v4196_v12  ;;  %v3975_v12 = vand.u32 2147483648, %v14742_v25 }
 0x85d   : > { %v12597_v13 = vpop.xlane.xlu1 %4866  ;;  %4300 = vadd.xlane.f32.xlu0 %v4260_v33 }
 0x85e   : > { %v4353_v38 = vpop.xlane.xlu0 %4352  ;;  %v3976_v58 = vsel %vm3974_vm11, %v3975_v12, %v3973_v2  ;;  %vm14761_vm11 = vmmov %vm14754_vm6 }
 0x85f   : > { %v5230_v39 = vsel %vm2107_vm8, %v5214_v23, %v4353_v38 }
 0x860   : > { %4302 = vadd.xlane.f32.xlu1 %v4261_v37 }
 0x861   : > { %v4477_v22 = vpop.xlane.xlu1 %4476  ;;  %5168 = vadd.xlane.f32.xlu0 %v5150_v19  ;;  %v7996_v38 = vpop.eup %7995 }
 0x862   : > { %v5260_v47 = vsel %vm14741_vm0, %v5244_v40, %v4477_v22  ;;  %v12610_v29 = vpop.xlane.xlu0 %4228  ;;  %v12617_v22 = vmul.f32 %v12606_v50, %v12507_v54  ;;  %vm14753_vm0 = vcmask 15360   ;;  %v6837_v40 = vadd.f32 -3.7333333, %v3976_v58 }
 0x864   : > { %5170 = vadd.xlane.f32.xlu1 %v5151_v57  ;;  %v4646_v2 = vmul.f32 -2.2959185, %v6837_v40 }
 0x865   : > { %v4543_v23 = vpop.xlane.xlu1 %4542  ;;  %4936 = vadd.xlane.f32.xlu0 %v14752_v16 }
 0x866   : > { %v5277_v26 = vsel %vm14751_vm14, %v5261_v28, %v4543_v23  ;;  %v4295_v19 = vpop.xlane.xlu0 %4294  ;;  %v12626_v28 = vmul.f32 0.00033546262, %v12521_v44  ;;  %v4529_v44 = vmul.f32 0.36787945, %v12570_v21  ;;  %v4022_v23 = vmul.f32 0.93333334, %v3976_v58 }
 0x867   : > { %v12622_v46 = vsel %vm14753_vm0, %v5201_v36, %v4295_v19  ;;  %v14758_v36 = vld [vmem:[#allocation77_spill] sm:$0xff]  ;;  %v12647_v19 = vmul.f32 0.36787945, %v4212_v43  ;;  %vm14762_vm0 = vcmask 39936  }
 0x868   : > { %5062 = vadd.xlane.f32.xlu1 %v12617_v22  ;;  %v12636_v63 = vmul.f32 %v7996_v38, %v14758_v36  ;;  %v4577_v38 = vmul.f32 %v4529_v44, %v12582_v3  ;;  %v4038_v21 = vsub.f32 0.21777777, %v4022_v23  ;;  %v7998_v3 = vpop.eup %7997 }
 0x869   : > { %v4419_v57 = vpop.xlane.xlu1 %4418  ;;  %5002 = vadd.xlane.f32.xlu0 %v12042_v34  ;;  %v4277_v34 = vmul.f32 0.36787945, %v4213_v62  ;;  %v12657_v62 = vmul.f32 %v12647_v19, %v4260_v33  ;;  %v4724_v33 = vmul.f32 0.00033546262, %v12578_v32 }
 0x86a   : > { %v5247_v25 = vsel %vm14754_vm6, %v5231_v48, %v4419_v57  ;;  %v12630_v54 = vpop.xlane.xlu0 %4864  ;;  %v12640_v48 = vmul.f32 %v12626_v28, %v12517_v14  ;;  %v4662_v57 = vmul.f32 %v6837_v40, %v4646_v2  ;;  %v4054_v2 = vmul.f32 -2.2959185, %v4038_v21 }
 0x86b   : > { %14756 = vst [vmem:[#allocation82_spill] sm:$0xff] %v12630_v54  ;;  %v4325_v36 = vmul.f32 %v4277_v34, %v4261_v37  ;;  %v12659_v58 = vmul.f32 0.36787945, %v4277_v34  ;;  %v3992_v34 = vmul.f32 %v7998_v3, %v14755_v24  ;;  %vm14763_vm6 = vcmask 56320  }
 0x86c   : > { %4938 = vadd.xlane.f32.xlu1 %v14757_v45  ;;  %v14760_v45 = vld [vmem:[#allocation97_spill] sm:$0xff]  ;;  %v4688_v43 = vmul.f32 1.442695, %v4662_v57  ;;  %v4080_v57 = vmul.f32 1.442695, %v4054_v2 }
 0x86d   : > { %v12633_v17 = vpop.xlane.xlu1 %4988  ;;  %4754 = vadd.xlane.f32.xlu0 %v12636_v63  ;;  %v12669_v44 = vmul.f32 %v12659_v58, %v4325_v36 }
 0x86e   : > { %v12644_v12 = vpop.xlane.xlu0 %4740  ;;  %7999 = vpow2.f32 %v4688_v43  ;;  %v4772_v43 = vmul.f32 %v4724_v33, %v12566_v20  ;;  %v12704_v20 = vmul.f32 0.36787945, %v12606_v50 }
 0x86f   : > { %14759 = vst [vmem:[#allocation83_spill] sm:$0xff] %v12644_v12  ;;  %8001 = vpow2.f32 %v4080_v57 }
 0x870   : > { %4814 = vadd.xlane.f32.xlu1 %v12640_v48 }
 0x871   : > { %v5055_v16 = vpop.xlane.xlu1 %5054  ;;  %4596 = vadd.xlane.f32.xlu0 %v14760_v45 }
 0x872   : > { %v4541_v14 = vpop.xlane.xlu0 %4540 }
 0x873   : > { %v12652_v54 = vsel %vm14751_vm14, %v5260_v47, %v4541_v14  ;;  %vm3993_vm14 = vcmp.eq.f32.partialorder %v14755_v24, inf  ;;  %v12682_v14 = vmul.f32 0.36787945, %v4724_v33 }
 0x874   : > { %4598 = vadd.xlane.f32.xlu1 %v4577_v38  ;;  %v3994_v32 = vsel %vm3993_vm14, %v14755_v24, %v3992_v34  ;;  %vm14769_vm14 = vcmask 89088  }
 0x875   : > { %v12654_v12 = vpop.xlane.xlu1 %4930  ;;  %4364 = vadd.xlane.f32.xlu0 %v12657_v62  ;;  %v4836_v50 = vmul.f32 %v12682_v14, %v4772_v43 }
 0x876   : > { %v4417_v40 = vpop.xlane.xlu0 %4416 }
 0x877   : > { %v12664_v37 = vsel %vm14761_vm11, %v5230_v39, %v4417_v40  ;;  %vm14764_vm11 = vcmask 64512  }
 0x878   : > { %4490 = vadd.xlane.f32.xlu1 %v12069_v30 }
 0x879   : > { %v12666_v47 = vpop.xlane.xlu1 %4806  ;;  %4430 = vadd.xlane.f32.xlu0 %v12669_v44 }
 0x87a   : > { %v4483_v23 = vpop.xlane.xlu0 %4482 }
 0x87b   : > { %v12675_v30 = vsel %vm14762_vm0, %v5247_v25, %v4483_v23  ;;  %v14766_v25 = vld [vmem:[#allocation98_spill] sm:$0xff]  ;;  %vm14767_vm0 = vcmask 80896   ;;  %v8000_v34 = vpop.eup %7999 }
 0x87c   : > { %4366 = vadd.xlane.f32.xlu1 %v4325_v36 }
 0x87d   : > { %v4591_v39 = vpop.xlane.xlu1 %4590  ;;  %5124 = vadd.xlane.f32.xlu0 %v12098_v35 }
 0x87e   : > { %v5293_v38 = vsel %vm14763_vm6, %v5277_v26, %v4591_v39  ;;  %v4359_v21 = vpop.xlane.xlu0 %4358  ;;  %v3996_v26 = vand.u32 2147483648, %v14755_v24  ;;  %vm14768_vm6 = vcmask 15360   ;;  %v4789_v39 = vmul.f32 0.36787945, %v12626_v28 }
 0x87f   : > { %v5309_v45 = vsel %vm14764_vm11, %v5293_v38, %v12429_v60  ;;  %v5200_v60 = vsel %vm2073_vm7, %v12386_v7, %v12610_v29  ;;  %v12697_v3 = vsel %vm2107_vm8, %v12622_v46, %v4359_v21  ;;  %vm14770_vm11 = vcmask 97280  }
 0x880   : > { %v5325_v36 = vsel %vm14765_vm3, %v5309_v45, %v12469_v6  ;;  %5060 = vadd.xlane.f32.xlu1 %v14766_v25  ;;  %vm3995_vm3 = vcmp.eq.f32.partialorder %v14755_v24, 0.0  ;;  %v12739_v45 = vpop.eup %8001  ;;  %v4837_v25 = vmul.f32 %v4789_v39, %v12640_v48 }
 0x881   : > { %v5341_v35 = vsel %vm14767_vm0, %v5325_v36, %v12503_v1  ;;  %v4293_v6 = vpop.xlane.xlu1 %4292  ;;  %v12708_v7 = vsel %vm3995_vm3, %v3996_v26, %v3994_v32  ;;  %5000 = vadd.xlane.f32.xlu0 %v12092_v31  ;;  %vm14771_vm0 = vcmask 105472   ;;  %v14772_v31 = vld [vmem:[#allocation93_spill] sm:$0xff]  ;;  %vm14774_vm3 = vcmask 113664  }
 0x882   : > { %v12701_v40 = vsel %vm14768_vm6, %v5200_v60, %v4293_v6  ;;  %v5357_v2 = vsel %vm14769_vm14, %v5341_v35, %v12545_v0  ;;  %v12713_v29 = vpop.xlane.xlu0 %4928  ;;  %v6840_v33 = vadd.f32 -3.7333333, %v12708_v7  ;;  %v12721_v0 = vmul.f32 %v12704_v20, %v12617_v22  ;;  %v14776_v60 = vld [vmem:[#allocation89_spill] sm:$0xff] }
 0x883   : > { %v5373_v1 = vsel %vm14770_vm11, %v5357_v2, %v12573_v10  ;;  %8003 = vrsqrt.f32 %v14772_v31  ;;  %v12737_v22 = vmul.f32 0.36787945, %v12647_v19  ;;  %vm14775_vm6 = vcmask 56320  }
 0x884   : > { %4242 = vadd.xlane.f32.xlu1 %v12192_v18  ;;  %v5389_v46 = vsel %vm14771_vm0, %v5373_v1, %v5055_v16  ;;  %v14773_v16 = vld [vmem:[#allocation38_spill] sm:$0xff]  ;;  %v4649_v57 = vmul.f32 -2.2959185, %v6840_v33  ;;  %v4198_v35 = vmul.f32 %v12739_v45, %v14776_v60  ;;  %v12757_v6 = vmul.f32 0.36787945, %v12739_v45 }
 0x885   : > { %v5053_v24 = vpop.xlane.xlu1 %5052  ;;  %4876 = vadd.xlane.f32.xlu0 %v4836_v50  ;;  %v12730_v23 = vmul.f32 %v8000_v34, %v14773_v16  ;;  %v12748_v26 = vmul.f32 %v12737_v22, %v12657_v62  ;;  %vm14777_vm14 = vcmask 64512   ;;  %vm14778_vm11 = vcmask 72704  }
 0x886   : > { %v12724_v10 = vpop.xlane.xlu0 %4994  ;;  %v4665_v36 = vmul.f32 %v6840_v33, %v4649_v57  ;;  %vm14779_vm0 = vcmask 80896   ;;  %v4025_v60 = vmul.f32 0.93333334, %v12708_v7 }
 0x888   : > { %5126 = vadd.xlane.f32.xlu1 %v12721_v0  ;;  %v4694_v48 = vmul.f32 1.442695, %v4665_v36  ;;  %v12784_v36 = vmul.f32 0.36787945, %v12682_v14 }
 0x889   : > { %v12727_v18 = vpop.xlane.xlu1 %4234  ;;  %4752 = vadd.xlane.f32.xlu0 %v12730_v23 }
 0x88a   : > { %v12734_v38 = vpop.xlane.xlu0 %4746  ;;  %8005 = vpow2.f32 %v4694_v48 }
 0x88c   : > { %4812 = vadd.xlane.f32.xlu1 %v4772_v43 }
 0x88d   : > { %v5119_v32 = vpop.xlane.xlu1 %5118  ;;  %4552 = vadd.xlane.f32.xlu0 %v12133_v8 }
 0x88e   : > { %v12742_v21 = vsel %vm14774_vm3, %v5389_v46, %v5119_v32  ;;  %v4589_v28 = vpop.xlane.xlu0 %4588  ;;  %vm14780_vm3 = vcmask 39936  }
 0x88f   : > { %v5292_v19 = vsel %vm14775_vm6, %v12652_v54, %v4589_v28  ;;  %vm14781_vm6 = vcmask 89088   ;;  %v12799_v28 = vmul.f32 %v12784_v36, %v4836_v50 }
 0x890   : > { %4878 = vadd.xlane.f32.xlu1 %v4837_v25  ;;  %v5308_v8 = vsel %vm14777_vm14, %v5292_v19, %v12461_v61  ;;  %v8004_v62 = vpop.eup %8003  ;;  %v4262_v61 = vmul.f32 %v12757_v6, %v4198_v35  ;;  %vm14782_vm14 = vcmask 97280  }
 0x891   : > { %v12752_v43 = vpop.xlane.xlu1 %4804  ;;  %v5324_v2 = vsel %vm14778_vm11, %v5308_v8, %v12492_v49  ;;  %4428 = vadd.xlane.f32.xlu0 %v12748_v26  ;;  %vm14783_vm11 = vcmask 105472  }
 0x892   : > { %v5340_v54 = vsel %vm14779_vm0, %v5324_v2, %v12526_v53  ;;  %v4481_v1 = vpop.xlane.xlu0 %4480  ;;  %vm14784_vm0 = vcmask 48128   ;;  %v14788_v2 = vld [vmem:[#allocation80_spill] sm:$0xff] }
 0x893   : > { %v12769_v46 = vsel %vm14780_vm3, %v12664_v37, %v4481_v1  ;;  %v5356_v49 = vsel %vm14781_vm6, %v5340_v54, %v12576_v9  ;;  %v4853_v37 = vmul.f32 0.36787945, %v4789_v39  ;;  %vm3986_vm3 = vcmp.eq.f32.partialorder %v14772_v31, inf }
 0x894   : > { %4488 = vadd.xlane.f32.xlu1 %v12117_v42  ;;  %v5372_v34 = vsel %vm14782_vm14, %v5356_v49, %v12633_v17  ;;  %v3985_v42 = vmul.f32 %v8004_v62, %v14772_v31  ;;  %v3989_v39 = vand.u32 2147483648, %v14772_v31  ;;  %vm14785_vm6 = vcmask 31744  }
 0x895   : > { %v12771_v33 = vpop.xlane.xlu1 %4870  ;;  %4304 = vadd.xlane.f32.xlu0 %v4262_v61  ;;  %v5388_v53 = vsel %vm14783_vm11, %v5372_v34, %v5053_v24  ;;  %vm3988_vm14 = vcmp.eq.f32.partialorder %v14772_v31, 0.0  ;;  %vm14786_vm11 = vcmask 113664  }
 0x896   : > { %v4547_v16 = vpop.xlane.xlu0 %4546  ;;  %v3987_v17 = vsel %vm3986_vm3, %v14772_v31, %v3985_v42  ;;  %vm14789_vm3 = vcmask 121856  }
 0x897   : > { %v5279_v57 = vsel %vm14784_vm0, %v12675_v30, %v4547_v16  ;;  %v3990_v19 = vsel %vm3988_vm14, %v3989_v39, %v3987_v17  ;;  %v8006_v48 = vpop.eup %8005  ;;  %vm14787_vm0 = vcmask 15360   ;;  %v12839_v16 = vmul.f32 0.00033546262, %v12178_v15 }
 0x898   : > { %4554 = vadd.xlane.f32.xlu1 %v12136_v52  ;;  %v4901_v52 = vmul.f32 %v4853_v37, %v4837_v25  ;;  %v12825_v62 = vmul.f32 %v8006_v48, %v14788_v2  ;;  %vm14792_vm14 = vcmask 64512   ;;  %v4726_v48 = vmul.f32 0.00033546262, %v12739_v45  ;;  %v14803_v2 = vld [vmem:[#allocation44_spill] sm:$0xff] }
 0x899   : > { %v4357_v32 = vpop.xlane.xlu1 %4356  ;;  %5172 = vadd.xlane.f32.xlu0 %v12147_v11  ;;  %v5105_v11 = vmul.f32 0.36787945, %v12704_v20  ;;  %v6839_v20 = vadd.f32 -3.7333333, %v3990_v19 }
 0x89a   : > { %v12788_v9 = vsel %vm2107_vm8, %v12701_v40, %v4357_v32  ;;  %v4423_v24 = vpop.xlane.xlu0 %4422  ;;  %v12801_v40 = vmul.f32 0.36787945, %v4853_v37  ;;  %v14790_v37 = vld [vmem:[#allocation52_spill] sm:$0xff] }
 0x89b   : > { %v12796_v30 = vsel %vm14785_vm6, %v12697_v3, %v4423_v24  ;;  %v5203_v3 = vsel %vm2073_vm7, %v12362_v41, %v12727_v18  ;;  %v4041_v41 = vsub.f32 0.21777777, %v4025_v60  ;;  %v4648_v54 = vmul.f32 -2.2959185, %v6839_v20 }
 0x89c   : > { %4240 = vadd.xlane.f32.xlu1 %v4198_v35  ;;  %v12815_v31 = vmul.f32 %v12801_v40, %v4901_v52  ;;  %vm14791_vm6 = vcmask 56320  }
 0x89d   : > { %v4233_v14 = vpop.xlane.xlu1 %4232  ;;  %4940 = vadd.xlane.f32.xlu0 %v12799_v28  ;;  %v4057_v49 = vmul.f32 -2.2959185, %v4041_v41  ;;  %v4664_v42 = vmul.f32 %v6839_v20, %v4648_v54  ;;  %v12872_v20 = vmul.f32 0.36787945, %v12784_v36  ;;  %v4790_v41 = vmul.f32 0.36787945, %v4726_v48 }
 0x89e   : > { %v5117_v25 = vpop.xlane.xlu0 %5116  ;;  %v5202_v60 = vsel %vm2073_vm7, %v12382_v55, %v4233_v14 }
 0x89f   : > { %v12812_v50 = vsel %vm14786_vm11, %v5388_v53, %v5117_v25  ;;  %v12836_v53 = vmul.f32 0.36787945, %v12757_v6  ;;  %v4086_v32 = vmul.f32 1.442695, %v4057_v49  ;;  %v4692_v39 = vmul.f32 1.442695, %v4664_v42 }
 0x8a0   : > { %4306 = vadd.xlane.f32.xlu1 %v12206_v59  ;;  %v5153_v59 = vmul.f32 %v5105_v11, %v12721_v0  ;;  %v12851_v6 = vmul.f32 %v12839_v16, %v12636_v63  ;;  %vm14793_vm11 = vcmask 72704  }
 0x8a1   : > { %v4299_v35 = vpop.xlane.xlu1 %4298  ;;  %5006 = vadd.xlane.f32.xlu0 %v12815_v31  ;;  %v12847_v24 = vmul.f32 %v12836_v53, %v4262_v61  ;;  %8007 = vpow2.f32 %v4086_v32 }
 0x8a2   : > { %v12818_v8 = vsel %vm14787_vm0, %v5203_v3, %v4299_v35  ;;  %v12822_v7 = vpop.xlane.xlu0 %4992  ;;  %8009 = vpow2.f32 %v4692_v39  ;;  %vm14794_vm0 = vcmask 80896   ;;  %v14795_v35 = vld [vmem:[#allocation47_spill] sm:$0xff]  ;;  %v4404_v39 = vmul.f32 0.36787945, %v12737_v22 }
 0x8a4   : > { %5174 = vadd.xlane.f32.xlu1 %v5153_v59  ;;  %v4774_v59 = vmul.f32 %v4726_v48, %v12730_v23  ;;  %v12943_v48 = vmul.f32 0.36787945, %v12836_v53 }
 0x8a5   : > { %v5167_v18 = vpop.xlane.xlu1 %5166  ;;  %4758 = vadd.xlane.f32.xlu0 %v12825_v62 }
 0x8a6   : > { %v12829_v1 = vsel %vm14789_vm3, %v12742_v21, %v5167_v18  ;;  %v12832_v34 = vpop.xlane.xlu0 %4868  ;;  %vm14796_vm3 = vcmask 15360  }
 0x8a8   : > { %5066 = vadd.xlane.f32.xlu1 %v12168_v4  ;;  %v4024_v4 = vmul.f32 0.93333334, %v3990_v19  ;;  %v12861_v19 = vmul.f32 0.36787945, %v12659_v58 }
 0x8a9   : > { %v5059_v0 = vpop.xlane.xlu1 %5058  ;;  %4600 = vadd.xlane.f32.xlu0 %v14790_v37  ;;  %v14806_v37 = vld [vmem:[#allocation48_spill] sm:$0xff] }
 0x8aa   : > { %v12842_v21 = vpop.xlane.xlu0 %4744  ;;  %v4040_v25 = vsub.f32 0.21777777, %v4024_v4 }
 0x8ac   : > { %4942 = vadd.xlane.f32.xlu1 %v4901_v52 }
 0x8ad   : > { %v12844_v17 = vpop.xlane.xlu1 %4934  ;;  %4368 = vadd.xlane.f32.xlu0 %v12847_v24 }
 0x8ae   : > { %v4595_v15 = vpop.xlane.xlu0 %4594 }
 0x8af   : > { %v5295_v11 = vsel %vm14791_vm6, %v5279_v57, %v4595_v15  ;;  %vm14797_vm6 = vcmask 89088  }
 0x8b0   : > { %4818 = vadd.xlane.f32.xlu1 %v12851_v6  ;;  %v5311_v61 = vsel %vm14792_vm14, %v5295_v11, %v12513_v27  ;;  %vm14798_vm14 = vcmask 48128   ;;  %v14807_v11 = vld [vmem:[#allocation91_spill] sm:$0xff] }
 0x8b1   : > { %v12856_v52 = vpop.xlane.xlu1 %4810  ;;  %v5327_v63 = vsel %vm14793_vm11, %v5311_v61, %v12548_v56  ;;  %4434 = vadd.xlane.f32.xlu0 %v12239_v5  ;;  %v4056_v56 = vmul.f32 -2.2959185, %v4040_v25  ;;  %vm14799_vm11 = vcmask 97280  }
 0x8b2   : > { %v5343_v57 = vsel %vm14794_vm0, %v5327_v63, %v12597_v13  ;;  %v4297_v3 = vpop.xlane.xlu0 %4296  ;;  %v12884_v13 = vmul.f32 %v12861_v19, %v12669_v44  ;;  %vm14800_vm0 = vcmask 105472  }
 0x8b3   : > { %v5218_v27 = vsel %vm14796_vm3, %v5202_v60, %v4297_v3  ;;  %v5359_v5 = vsel %vm14797_vm6, %v5343_v57, %v12654_v12  ;;  %v12893_v12 = vmul.f32 %v12872_v20, %v12799_v28  ;;  %vm14801_vm3 = vcmask 121856   ;;  %v12908_v28 = vpop.eup %8007  ;;  %v14808_v3 = vld [vmem:[#allocation28_spill] sm:$0xff] }
 0x8b4   : > { %4602 = vadd.xlane.f32.xlu1 %v14795_v35  ;;  %v5375_v36 = vsel %vm14799_vm11, %v5359_v5, %v12724_v10  ;;  %v4084_v10 = vmul.f32 1.442695, %v4056_v56  ;;  %vm14802_vm6 = vcmask 31744   ;;  %v8010_v49 = vpop.eup %8009  ;;  %v4729_v4 = vmul.f32 0.00033546262, %v12908_v28 }
 0x8b5   : > { %v4545_v58 = vpop.xlane.xlu1 %4544  ;;  %5128 = vadd.xlane.f32.xlu0 %v12196_v51  ;;  %v5391_v14 = vsel %vm14800_vm0, %v5375_v36, %v5059_v0  ;;  %v12918_v32 = vmul.f32 %v8010_v49, %v14806_v37  ;;  %v4452_v60 = vmul.f32 %v4404_v39, %v12748_v26  ;;  %v4468_v57 = vmul.f32 0.36787945, %v4404_v39  ;;  %vm14809_vm11 = vmmov %vm14802_vm6  ;;  %v14812_v37 = vld [vmem:[#allocation22_spill] sm:$0xff] }
 0x8b6   : > { %v12880_v55 = vsel %vm14798_vm14, %v12769_v46, %v4545_v58  ;;  %v5165_v45 = vpop.xlane.xlu0 %5164  ;;  %8011 = vpow2.f32 %v4084_v10  ;;  %vm14804_vm14 = vcmask 39936   ;;  %v12930_v63 = vmul.f32 %v4729_v4, %v12825_v62 }
 0x8b7   : > { %v12897_v46 = vsel %vm14801_vm3, %v12812_v50, %v5165_v45  ;;  %v4838_v50 = vmul.f32 %v4790_v41, %v4774_v59  ;;  %v12940_v58 = vmul.f32 %v4468_v57, %v4452_v60  ;;  %v4791_v26 = vmul.f32 0.36787945, %v12839_v16  ;;  %v14810_v45 = vld [vmem:[#allocation95_spill] sm:$0xff] }
 0x8b8   : > { %4494 = vadd.xlane.f32.xlu1 %v12884_v13  ;;  %v12954_v36 = vmul.f32 %v12943_v48, %v12847_v24  ;;  %vm14811_vm0 = vcmask 113664   ;;  %v12967_v24 = vmul.f32 0.36787945, %v12861_v19  ;;  %vm14813_vm3 = vcmask 56320  }
 0x8b9   : > { %v4421_v44 = vpop.xlane.xlu1 %4420  ;;  %5004 = vadd.xlane.f32.xlu0 %v12893_v12  ;;  %v4839_v16 = vmul.f32 %v4791_v26, %v12851_v6 }
 0x8ba   : > { %v12902_v51 = vsel %vm14802_vm6, %v12788_v9, %v4421_v44  ;;  %v12905_v18 = vpop.xlane.xlu0 %4932  ;;  %v14805_v9 = vld [vmem:[#allocation43_spill] sm:$0xff]  ;;  %v12977_v6 = vmul.f32 %v12967_v24, %v12884_v13  ;;  %v14814_v13 = vld [vmem:[#allocation30_spill] sm:$0xff]  ;;  %vm14815_vm6 = vcmask 64512  }
 0x8bc   : > { %4370 = vadd.xlane.f32.xlu1 %v14803_v2 }
 0x8bd   : > { %v4487_v54 = vpop.xlane.xlu1 %4486  ;;  %4880 = vadd.xlane.f32.xlu0 %v4838_v50 }
 0x8be   : > { %v12912_v23 = vsel %vm14804_vm14, %v12796_v30, %v4487_v54  ;;  %v12914_v0 = vpop.xlane.xlu0 %4998  ;;  %v4201_v30 = vmul.f32 %v12908_v28, %v14807_v11  ;;  %vm14817_vm14 = vcmask 72704  }
 0x8c0   : > { %5064 = vadd.xlane.f32.xlu1 %v14805_v9 }
 0x8c1   : > { %v4363_v42 = vpop.xlane.xlu1 %4362  ;;  %4756 = vadd.xlane.f32.xlu0 %v12918_v32 }
 0x8c2   : > { %v5235_v15 = vsel %vm2107_vm8, %v12818_v8, %v4363_v42  ;;  %v12927_v25 = vpop.xlane.xlu0 %4750  ;;  %v4855_v42 = vmul.f32 0.36787945, %v4791_v26  ;;  %v14816_v26 = vld [vmem:[#allocation61_spill] sm:$0xff] }
 0x8c3   : > { %v12945_v62 = vpop.eup %8011 }
 0x8c4   : > { %4246 = vadd.xlane.f32.xlu1 %v4201_v30  ;;  %v4200_v53 = vmul.f32 %v12945_v62, %v14810_v45  ;;  %v4216_v44 = vmul.f32 0.36787945, %v12945_v62  ;;  %v4903_v11 = vmul.f32 %v4855_v42, %v4839_v16 }
 0x8c5   : > { %v5057_v61 = vpop.xlane.xlu1 %5056  ;;  %4822 = vadd.xlane.f32.xlu0 %v12930_v63 }
 0x8c6   : > { %v4361_v22 = vpop.xlane.xlu0 %4360  ;;  %v4264_v54 = vmul.f32 %v4216_v44, %v4200_v53 }
 0x8c7   : > { %v12936_v8 = vsel %vm2107_vm8, %v5218_v27, %v4361_v22  ;;  %v4217_v22 = vmul.f32 0.36787945, %v12908_v28 }
 0x8c8   : > { %5130 = vadd.xlane.f32.xlu1 %v14808_v3 }
 0x8c9   : > { %v12938_v35 = vpop.xlane.xlu1 %4238  ;;  %4556 = vadd.xlane.f32.xlu0 %v12940_v58 }
 0x8ca   : > { %v4427_v56 = vpop.xlane.xlu0 %4426 }
 0x8cb   : > { %v12950_v5 = vsel %vm14809_vm11, %v5235_v15, %v4427_v56  ;;  %vm14819_vm11 = vcmask 80896  }
 0x8cc   : > { %4816 = vadd.xlane.f32.xlu1 %v4774_v59 }
 0x8cd   : > { %v5123_v27 = vpop.xlane.xlu1 %5122  ;;  %4432 = vadd.xlane.f32.xlu0 %v12954_v36 }
 0x8ce   : > { %v12960_v10 = vsel %vm14811_vm0, %v5391_v14, %v5123_v27  ;;  %v5121_v59 = vpop.xlane.xlu0 %5120  ;;  %v12973_v14 = vmul.f32 0.36787945, %v4790_v41  ;;  %vm14820_vm0 = vcmask 39936  }
 0x8d0   : > { %4882 = vadd.xlane.f32.xlu1 %v4839_v16  ;;  %v12984_v15 = vmul.f32 %v12973_v14, %v4838_v50  ;;  %v14818_v50 = vld [vmem:[#allocation82_spill] sm:$0xff] }
 0x8d1   : > { %v12964_v2 = vpop.xlane.xlu1 %4808  ;;  %4308 = vadd.xlane.f32.xlu0 %v4264_v54 }
 0x8d2   : > { %v12969_v49 = vpop.xlane.xlu0 %4996 }
 0x8d4   : > { %4492 = vadd.xlane.f32.xlu1 %v4452_v60  ;;  %v12986_v60 = vmul.f32 0.36787945, %v4855_v42 }
 0x8d5   : > { %v12971_v9 = vpop.xlane.xlu1 %4874  ;;  %5176 = vadd.xlane.f32.xlu0 %v14812_v37  ;;  %v4265_v37 = vmul.f32 %v4217_v22, %v4201_v30  ;;  %v4532_v30 = vmul.f32 0.36787945, %v4468_v57 }
 0x8d6   : > { %v12980_v39 = vpop.xlane.xlu0 %4872  ;;  %v13001_v42 = vmul.f32 %v12986_v60, %v4903_v11 }
 0x8d8   : > { %4558 = vadd.xlane.f32.xlu1 %v12977_v6 }
 0x8d9   : > { %v4593_v19 = vpop.xlane.xlu1 %4592  ;;  %4944 = vadd.xlane.f32.xlu0 %v12984_v15 }
 0x8da   : > { %v5294_v41 = vsel %vm14813_vm3, %v12880_v55, %v4593_v19  ;;  %v12996_v27 = vpop.xlane.xlu0 %4748  ;;  %v13003_v55 = vmul.f32 0.36787945, %v4729_v4  ;;  %vm14821_vm3 = vcmask 89088  }
 0x8db   : > { %v5310_v3 = vsel %vm14815_vm6, %v5294_v41, %v14814_v13  ;;  %vm14822_vm6 = vcmask 97280  }
 0x8dc   : > { %v5326_v56 = vsel %vm14817_vm14, %v5310_v3, %v14816_v26  ;;  %4244 = vadd.xlane.f32.xlu1 %v4200_v53  ;;  %vm14823_vm14 = vcmask 105472  }
 0x8dd   : > { %v5342_v45 = vsel %vm14819_vm11, %v5326_v56, %v14818_v50  ;;  %v4485_v16 = vpop.xlane.xlu1 %4484  ;;  %5010 = vadd.xlane.f32.xlu0 %v13001_v42  ;;  %vm14824_vm11 = vcmask 48128   ;;  %v14827_v56 = vld [vmem:[#allocation46_spill] sm:$0xff]  ;;  %v4281_v50 = vmul.f32 0.36787945, %v4217_v22 }
 0x8de   : > { %v5264_v28 = vsel %vm14820_vm0, %v12902_v51, %v4485_v16  ;;  %v5358_v19 = vsel %vm14821_vm3, %v5342_v45, %v12713_v29  ;;  %v4549_v41 = vpop.xlane.xlu0 %4548  ;;  %v13018_v51 = vmul.f32 %v13003_v55, %v12930_v63  ;;  %vm14825_vm0 = vcmask 113664   ;;  %vm14826_vm3 = vmmov %vm14824_vm11 }
 0x8df   : > { %v5374_v53 = vsel %vm14822_vm6, %v5358_v19, %v12822_v7  ;;  %v13014_v3 = vsel %vm14824_vm11, %v5264_v28, %v4549_v41  ;;  %v13026_v7 = vmul.f32 0.36787945, %v12801_v40  ;;  %vm14828_vm6 = vcmask 31744   ;;  %v14830_v19 = vld [vmem:[#allocation51_spill] sm:$0xff] }
 0x8e0   : > { %4310 = vadd.xlane.f32.xlu1 %v4265_v37  ;;  %v5390_v13 = vsel %vm14823_vm14, %v5374_v53, %v5057_v61  ;;  %v13035_v45 = vmul.f32 0.36787945, %v4216_v44  ;;  %v4329_v22 = vmul.f32 %v4281_v50, %v4265_v37  ;;  %vm14831_vm14 = vcmask 15360  }
 0x8e1   : > { %v4551_v4 = vpop.xlane.xlu1 %4550  ;;  %v5406_v29 = vsel %vm14825_vm0, %v5390_v13, %v5121_v59  ;;  %4886 = vadd.xlane.f32.xlu0 %v13018_v51  ;;  %v4580_v59 = vmul.f32 %v4532_v30, %v12940_v58  ;;  %v13041_v40 = vmul.f32 %v13026_v7, %v12815_v31  ;;  %v5205_v58 = vsel %vm2073_vm7, %v14830_v19, %v12938_v35  ;;  %vm14832_vm11 = vmmov %vm14831_vm14 }
 0x8e2   : > { %v13023_v26 = vsel %vm14826_vm3, %v12912_v23, %v4551_v4  ;;  %v4425_v61 = vpop.xlane.xlu0 %4424  ;;  %v14829_v23 = vld [vmem:[#allocation55_spill] sm:$0xff]  ;;  %v13052_v41 = vmul.f32 %v13035_v45, %v4264_v54  ;;  %v13054_v31 = vmul.f32 0.36787945, %v4281_v50  ;;  %v4533_v37 = vmul.f32 0.36787945, %v12967_v24  ;;  %v14833_v4 = vld [vmem:[#allocation50_spill] sm:$0xff] }
 0x8e3   : > { %v13032_v63 = vsel %vm14828_vm6, %v12936_v8, %v4425_v61  ;;  %v4980_v8 = vmul.f32 0.36787945, %v12872_v20  ;;  %v6842_v20 = vadd.f32 -3.7333333, %v14833_v4  ;;  %vm14834_vm0 = vcmask 121856  }
 0x8e4   : > { %5178 = vadd.xlane.f32.xlu1 %v14827_v56  ;;  %v13066_v54 = vmul.f32 %v13054_v31, %v4329_v22  ;;  %vm14836_vm3 = vmmov %vm14834_vm0  ;;  %v4406_v4 = vmul.f32 0.36787945, %v12943_v48  ;;  %vm14839_vm6 = vcmask 56320  }
 0x8e5   : > { %v4237_v57 = vpop.xlane.xlu1 %4236  ;;  %4604 = vadd.xlane.f32.xlu0 %v4580_v59  ;;  %v5028_v56 = vmul.f32 %v4980_v8, %v12893_v12  ;;  %v13069_v50 = vmul.f32 0.36787945, %v4980_v8  ;;  %v4651_v59 = vmul.f32 -2.2959185, %v6842_v20  ;;  %v13083_v12 = vmul.f32 0.36787945, %v12973_v14 }
 0x8e6   : > { %v5204_v16 = vsel %vm2073_vm7, %v14829_v23, %v4237_v57  ;;  %v4301_v28 = vpop.xlane.xlu0 %4300  ;;  %v4581_v57 = vmul.f32 %v4533_v37, %v12977_v6  ;;  %v14838_v6 = vld [vmem:[#allocation6_spill] sm:$0xff] }
 0x8e7   : > { %v13049_v44 = vsel %vm14831_vm14, %v5204_v16, %v4301_v28  ;;  %v13080_v23 = vmul.f32 %v13069_v50, %v5028_v56  ;;  %v14837_v16 = vld [vmem:[#allocation41_spill] sm:$0xff]  ;;  %v4667_v8 = vmul.f32 %v6842_v20, %v4651_v59  ;;  %v13114_v59 = vmul.f32 0.36787945, %v4406_v4 }
 0x8e8   : > { %5070 = vadd.xlane.f32.xlu1 %v13041_v40  ;;  %v6841_v28 = vadd.f32 -3.7333333, %v14837_v16  ;;  %vm14841_vm14 = vcmask 64512  }
 0x8e9   : > { %v4303_v53 = vpop.xlane.xlu1 %4302  ;;  %4372 = vadd.xlane.f32.xlu0 %v13052_v41  ;;  %v4698_v37 = vmul.f32 1.442695, %v4667_v8  ;;  %v14840_v8 = vld [vmem:[#allocation83_spill] sm:$0xff] }
 0x8ea   : > { %v13057_v13 = vsel %vm14832_vm11, %v5205_v58, %v4303_v53  ;;  %v5169_v30 = vpop.xlane.xlu0 %5168  ;;  %v13094_v58 = vmul.f32 %v13083_v12, %v12984_v15  ;;  %v13097_v53 = vmul.f32 0.36787945, %v12986_v60  ;;  %v4650_v14 = vmul.f32 -2.2959185, %v6841_v28  ;;  %vm14842_vm11 = vmmov %vm14839_vm6 }
 0x8eb   : > { %v13063_v35 = vsel %vm14834_vm0, %v5406_v29, %v5169_v30  ;;  %v13110_v15 = vmul.f32 0.36787945, %v13003_v55  ;;  %8013 = vpow2.f32 %v4698_v37  ;;  %vm14843_vm0 = vcmask 72704  }
 0x8ec   : > { %4946 = vadd.xlane.f32.xlu1 %v4903_v11  ;;  %14835 = vst [vmem:[#allocation94_spill] sm:$0xff] %v13063_v35  ;;  %v4666_v60 = vmul.f32 %v6841_v28, %v4650_v14 }
 0x8ed   : > { %v5171_v61 = vpop.xlane.xlu1 %5170  ;;  %4438 = vadd.xlane.f32.xlu0 %v13066_v54  ;;  %v13123_v55 = vmul.f32 %v13110_v15, %v13018_v51 }
 0x8ee   : > { %v13073_v24 = vsel %vm14836_vm3, %v12960_v10, %v5171_v61  ;;  %v13077_v11 = vpop.xlane.xlu0 %4936  ;;  %v13107_v61 = vmul.f32 %v13097_v53, %v13001_v42  ;;  %v4696_v28 = vmul.f32 1.442695, %v4666_v60  ;;  %vm14845_vm3 = vmmov %vm14841_vm14 }
 0x8f0   : > { %4606 = vadd.xlane.f32.xlu1 %v4581_v57  ;;  %v4454_v57 = vmul.f32 %v4406_v4, %v12954_v36  ;;  %v14847_v4 = vld [vmem:[#allocation53_spill] sm:$0xff]  ;;  %8015 = vpow2.f32 %v4696_v28 }
 0x8f1   : > { %v5063_v29 = vpop.xlane.xlu1 %5062  ;;  %5132 = vadd.xlane.f32.xlu0 %v13080_v23 }
 0x8f2   : > { %v13087_v10 = vpop.xlane.xlu0 %5002 }
 0x8f4   : > { %4498 = vadd.xlane.f32.xlu1 %v14838_v6 }
 0x8f5   : > { %v13090_v19 = vpop.xlane.xlu1 %4938  ;;  %5008 = vadd.xlane.f32.xlu0 %v13094_v58 }
 0x8f6   : > { %v13101_v20 = vpop.xlane.xlu0 %4754 }
 0x8f8   : > { %4374 = vadd.xlane.f32.xlu1 %v4329_v22  ;;  %v13117_v22 = vmul.f32 0.36787945, %v13026_v7  ;;  %v14844_v7 = vld [vmem:[#allocation60_spill] sm:$0xff] }
 0x8f9   : > { %v13103_v30 = vpop.xlane.xlu1 %4814  ;;  %5074 = vadd.xlane.f32.xlu0 %v13107_v61 }
 0x8fa   : > { %v4597_v48 = vpop.xlane.xlu0 %4596  ;;  %v13140_v60 = vmul.f32 %v13117_v22, %v13041_v40 }
 0x8fb   : > { %v5296_v42 = vsel %vm14839_vm6, %v13014_v3, %v4597_v48  ;;  %v4518_v3 = vmul.f32 %v13114_v59, %v4454_v57  ;;  %vm14846_vm6 = vmmov %vm14843_vm0 }
 0x8fc   : > { %5068 = vadd.xlane.f32.xlu1 %v5028_v56  ;;  %v5312_v6 = vsel %vm14841_vm14, %v5296_v42, %v14840_v8  ;;  %vm14848_vm14 = vcmask 80896  }
 0x8fd   : > { %v4599_v16 = vpop.xlane.xlu1 %4598  ;;  %v5328_v56 = vsel %vm14843_vm0, %v5312_v6, %v12752_v43  ;;  %4950 = vadd.xlane.f32.xlu0 %v13123_v55  ;;  %vm14850_vm0 = vcmask 89088  }
 0x8fe   : > { %v5297_v36 = vsel %vm14842_vm11, %v13023_v26, %v4599_v16  ;;  %v4365_v37 = vpop.xlane.xlu0 %4364  ;;  %v13143_v26 = vmul.f32 0.36787945, %v13035_v45  ;;  %v5344_v43 = vsel %vm14848_vm14, %v5328_v56, %v12832_v34  ;;  %vm14849_vm11 = vmmov %vm14848_vm14  ;;  %v4728_v45 = vmul.f32 0.00033546262, %v12945_v62 }
 0x8ff   : > { %v5313_v14 = vsel %vm14845_vm3, %v5297_v36, %v14844_v7  ;;  %v5236_v42 = vsel %vm2107_vm8, %v13049_v44, %v4365_v37  ;;  %v5360_v16 = vsel %vm14850_vm0, %v5344_v43, %v12905_v18  ;;  %vm14851_vm3 = vcmask 39936   ;;  %vm14853_vm14 = vmmov %vm14850_vm0 }
 0x900   : > { %v5329_v51 = vsel %vm14846_vm6, %v5313_v14, %v12666_v47  ;;  %4250 = vadd.xlane.f32.xlu1 %v14847_v4  ;;  %vm14852_vm6 = vcmask 97280   ;;  %vm14855_vm0 = vcmask 105472   ;;  %v14859_v14 = vld [vmem:[#allocation8_spill] sm:$0xff]  ;;  %v5047_v4 = vmul.f32 0.36787945, %v13097_v53 }
 0x901   : > { %v5345_v48 = vsel %vm14849_vm11, %v5329_v51, %v12771_v33  ;;  %v4491_v47 = vpop.xlane.xlu1 %4490  ;;  %v5376_v34 = vsel %vm14852_vm6, %v5360_v16, %v12969_v49  ;;  %4560 = vadd.xlane.f32.xlu0 %v4518_v3  ;;  %vm14854_vm11 = vmmov %vm14852_vm6  ;;  %v4776_v49 = vmul.f32 %v4728_v45, %v12918_v32  ;;  %v14861_v16 = vld [vmem:[#allocation25_spill] sm:$0xff] }
 0x902   : > { %v13155_v40 = vsel %vm14851_vm3, %v12950_v5, %v4491_v47  ;;  %v5361_v33 = vsel %vm14853_vm14, %v5345_v48, %v12844_v17  ;;  %v4431_v8 = vpop.xlane.xlu0 %4430  ;;  %v13168_v5 = vmul.f32 %v13143_v26, %v13052_v41  ;;  %v8014_v17 = vpop.eup %8013  ;;  %vm14856_vm3 = vcmask 31744   ;;  %vm14857_vm6 = vmmov %vm14855_vm0  ;;  %v14858_v41 = vld [vmem:[#allocation90_spill] sm:$0xff] }
 0x903   : > { %v5377_v44 = vsel %vm14854_vm11, %v5361_v33, %v12914_v0  ;;  %v13180_v7 = vmul.f32 %v8014_v17, %v14858_v41  ;;  %vm14860_vm14 = vcmask 113664   ;;  %v8016_v43 = vpop.eup %8015  ;;  %v5095_v47 = vmul.f32 %v5047_v4, %v13107_v61  ;;  %v14862_v33 = vld [vmem:[#allocation5_spill] sm:$0xff] }
 0x904   : > { %5134 = vadd.xlane.f32.xlu1 %v13140_v60  ;;  %v5393_v18 = vsel %vm14855_vm0, %v5377_v44, %v5063_v29  ;;  %v5108_v29 = vmul.f32 0.36787945, %v13069_v50  ;;  %v4730_v44 = vmul.f32 0.00033546262, %v14862_v33  ;;  %vm14863_vm11 = vmmov %vm14860_vm14  ;;  %v4534_v17 = vmul.f32 0.36787945, %v13114_v59 }
 0x905   : > { %v4367_v28 = vpop.xlane.xlu1 %4366  ;;  %4436 = vadd.xlane.f32.xlu0 %v13168_v5  ;;  %vm14867_vm0 = vmmov %vm14856_vm3  ;;  %v5111_v33 = vmul.f32 0.36787945, %v5047_v4 }
 0x906   : > { %v5237_v62 = vsel %vm2107_vm8, %v13057_v13, %v4367_v28  ;;  %v5125_v6 = vpop.xlane.xlu0 %5124  ;;  %v5156_v37 = vmul.f32 %v5108_v29, %v13080_v23  ;;  %v14864_v23 = vld [vmem:[#allocation11_spill] sm:$0xff]  ;;  %v5109_v29 = vmul.f32 0.36787945, %v13117_v22 }
 0x907   : > { %v13175_v0 = vsel %vm14856_vm3, %v5237_v62, %v4431_v8  ;;  %vm14868_vm3 = vcmask 39936  }
 0x908   : > { %4820 = vadd.xlane.f32.xlu1 %v4776_v49 }
 0x909   : > { %v5061_v36 = vpop.xlane.xlu1 %5060  ;;  %4312 = vadd.xlane.f32.xlu0 %v14859_v14 }
 0x90a   : > { %v5392_v56 = vsel %vm14857_vm6, %v5376_v34, %v5061_v36  ;;  %v13184_v13 = vpop.xlane.xlu0 %5000  ;;  %v4714_v34 = vmul.f32 %v8016_v43, %v14861_v16  ;;  %v4582_v36 = vmul.f32 %v4534_v17, %v4518_v3  ;;  %v4792_v43 = vmul.f32 0.36787945, %v4728_v45  ;;  %v14872_v17 = vld [vmem:[#allocation14_spill] sm:$0xff] }
 0x90b   : > { %v5408_v32 = vsel %vm14860_vm14, %v5392_v56, %v5125_v6  ;;  %v14865_v6 = vld [vmem:[#allocation7_spill] sm:$0xff]  ;;  %v14866_v56 = vld [vmem:[#allocation10_spill] sm:$0xff]  ;;  %vm14870_vm6 = vcmask 48128   ;;  %v5159_v45 = vmul.f32 %v5111_v33, %v5095_v47 }
 0x90c   : > { %4762 = vadd.xlane.f32.xlu1 %v13180_v7  ;;  %v4778_v62 = vmul.f32 %v4730_v44, %v4714_v34  ;;  %vm14871_vm14 = vmmov %vm14870_vm6 }
 0x90d   : > { %v4243_v51 = vpop.xlane.xlu1 %4242  ;;  %5180 = vadd.xlane.f32.xlu0 %v5156_v37  ;;  %v5157_v37 = vmul.f32 %v5109_v29, %v13140_v60  ;;  %v14875_v29 = vld [vmem:[#allocation58_spill] sm:$0xff] }
 0x90e   : > { %v13189_v50 = vpop.xlane.xlu0 %4876 }
 0x910   : > { %4496 = vadd.xlane.f32.xlu1 %v4454_v57 }
 0x911   : > { %v5127_v48 = vpop.xlane.xlu1 %5126  ;;  %5138 = vadd.xlane.f32.xlu0 %v5095_v47 }
 0x912   : > { %v5409_v8 = vsel %vm14863_vm11, %v5393_v18, %v5127_v48  ;;  %v13195_v28 = vpop.xlane.xlu0 %4752  ;;  %v14869_v48 = vld [vmem:[#allocation13_spill] sm:$0xff]  ;;  %vm14873_vm11 = vcmask 121856  }
 0x914   : > { %4562 = vadd.xlane.f32.xlu1 %v14864_v23 }
 0x915   : > { %v13198_v53 = vpop.xlane.xlu1 %4812  ;;  %4824 = vadd.xlane.f32.xlu0 %v4778_v62 }
 0x916   : > { %v4553_v57 = vpop.xlane.xlu0 %4552 }
 0x918   : > { %4248 = vadd.xlane.f32.xlu1 %v14865_v6 }
 0x919   : > { %v13202_v61 = vpop.xlane.xlu1 %4878  ;;  %4608 = vadd.xlane.f32.xlu0 %v4582_v36  ;;  %v4794_v36 = vmul.f32 0.36787945, %v4730_v44 }
 0x91a   : > { %v4429_v18 = vpop.xlane.xlu0 %4428 }
 0x91b   : > { %v13207_v41 = vsel %vm14867_vm0, %v5236_v42, %v4429_v18  ;;  %v4840_v42 = vmul.f32 %v4792_v43, %v4776_v49  ;;  %v14876_v18 = vld [vmem:[#allocation26_spill] sm:$0xff]  ;;  %vm14877_vm0 = vcmask 15360   ;;  %v4842_v47 = vmul.f32 %v4794_v36, %v4778_v62 }
 0x91c   : > { %4314 = vadd.xlane.f32.xlu1 %v14866_v56  ;;  %v4731_v56 = vmul.f32 0.00033546262, %v14876_v18 }
 0x91d   : > { %v4489_v14 = vpop.xlane.xlu1 %4488  ;;  %4376 = vadd.xlane.f32.xlu0 %v14869_v48 }
 0x91e   : > { %v5266_v59 = vsel %vm14868_vm3, %v13032_v63, %v4489_v14  ;;  %v4305_v16 = vpop.xlane.xlu0 %4304  ;;  %v14878_v14 = vld [vmem:[#allocation54_spill] sm:$0xff]  ;;  %vm14879_vm3 = vmmov %vm14877_vm0  ;;  %v4779_v48 = vmul.f32 %v4731_v56, %v13180_v7 }
 0x91f   : > { %v5282_v3 = vsel %vm14870_vm6, %v5266_v59, %v4553_v57  ;;  %v4408_v57 = vmul.f32 0.36787945, %v13143_v26  ;;  %vm14880_vm6 = vmmov %vm14873_vm11 }
 0x920   : > { %5182 = vadd.xlane.f32.xlu1 %v5157_v37 }
 0x921   : > { %v4555_v22 = vpop.xlane.xlu1 %4554  ;;  %4442 = vadd.xlane.f32.xlu0 %v14872_v17  ;;  %v13234_v44 = vmul.f32 %v4408_v57, %v13168_v5  ;;  %v4472_v26 = vmul.f32 0.36787945, %v4408_v57  ;;  %v13247_v5 = vmul.f32 0.36787945, %v13054_v31  ;;  %v14882_v17 = vld [vmem:[#allocation17_spill] sm:$0xff] }
 0x922   : > { %v13216_v23 = vsel %vm14871_vm14, %v13155_v40, %v4555_v22  ;;  %v5173_v6 = vpop.xlane.xlu0 %5172  ;;  %v4856_v22 = vmul.f32 0.36787945, %v4792_v43  ;;  %vm14884_vm14 = vcmask 56320  }
 0x923   : > { %v13220_v63 = vsel %vm14873_vm11, %v5408_v32, %v5173_v6  ;;  %v5207_v32 = vsel %vm2073_vm7, %v14878_v14, %v4243_v51  ;;  %v4520_v33 = vmul.f32 %v4472_v26, %v13234_v44  ;;  %v13254_v43 = vmul.f32 %v13247_v5, %v13066_v54 }
 0x924   : > { %4884 = vadd.xlane.f32.xlu1 %v4840_v42  ;;  %14874 = vst [vmem:[#allocation16_spill] sm:$0xff] %v13220_v63  ;;  %v4904_v7 = vmul.f32 %v4856_v22, %v4840_v42  ;;  %vm14885_vm11 = vcmask 64512   ;;  %v4982_v14 = vmul.f32 0.36787945, %v13083_v12 }
 0x925   : > { %v4241_v60 = vpop.xlane.xlu1 %4240  ;;  %5186 = vadd.xlane.f32.xlu0 %v5159_v45  ;;  %v14883_v45 = vld [vmem:[#allocation19_spill] sm:$0xff] }
 0x926   : > { %v5206_v4 = vsel %vm2073_vm7, %v14875_v29, %v4241_v60  ;;  %v13229_v49 = vpop.xlane.xlu0 %4940  ;;  %v4920_v60 = vmul.f32 0.36787945, %v4856_v22 }
 0x927   : > { %v13227_v40 = vsel %vm14877_vm0, %v5206_v4, %v4305_v16  ;;  %vm14886_vm0 = vcmask 72704  }
 0x928   : > { %4760 = vadd.xlane.f32.xlu1 %v4714_v34  ;;  %v13261_v4 = vmul.f32 %v4920_v60, %v4904_v7  ;;  %v4984_v18 = vmul.f32 0.36787945, %v4920_v60 }
 0x929   : > { %v4307_v59 = vpop.xlane.xlu1 %4306  ;;  %4888 = vadd.xlane.f32.xlu0 %v4842_v47 }
 0x92a   : > { %v13237_v37 = vsel %vm14879_vm3, %v5207_v32, %v4307_v59  ;;  %v13240_v16 = vpop.xlane.xlu0 %5006  ;;  %v14887_v32 = vld [vmem:[#allocation20_spill] sm:$0xff]  ;;  %vm14889_vm3 = vcmask 80896  }
 0x92c   : > { %4826 = vadd.xlane.f32.xlu1 %v4779_v48 }
 0x92d   : > { %v5175_v34 = vpop.xlane.xlu1 %5174  ;;  %4564 = vadd.xlane.f32.xlu0 %v4520_v33 }
 0x92e   : > { %v13244_v51 = vsel %vm14880_vm6, %v5409_v8, %v5175_v34  ;;  %v13249_v62 = vpop.xlane.xlu0 %4758  ;;  %v4795_v8 = vmul.f32 0.36787945, %v4731_v56  ;;  %v14888_v56 = vld [vmem:[#allocation12_spill] sm:$0xff]  ;;  %vm14890_vm6 = vcmask 89088  }
 0x92f   : > { %14881 = vst [vmem:[#allocation76_spill] sm:$0xff] %v13249_v62 }
 0x930   : > { %4610 = vadd.xlane.f32.xlu1 %v14882_v17  ;;  %v4843_v34 = vmul.f32 %v4795_v8, %v4779_v48  ;;  %v4859_v60 = vmul.f32 0.36787945, %v4795_v8 }
 0x931   : > { %v5067_v6 = vpop.xlane.xlu1 %5066  ;;  %4440 = vadd.xlane.f32.xlu0 %v14883_v45 }
 0x932   : > { %v4601_v57 = vpop.xlane.xlu0 %4600  ;;  %v13284_v48 = vmul.f32 %v4859_v60, %v4843_v34 }
 0x933   : > { %v5298_v31 = vsel %vm14884_vm14, %v5282_v3, %v4601_v57  ;;  %v4858_v3 = vmul.f32 0.36787945, %v4794_v36  ;;  %vm14891_vm14 = vcmask 97280  }
 0x934   : > { %4502 = vadd.xlane.f32.xlu1 %v13254_v43  ;;  %v5314_v42 = vsel %vm14885_vm11, %v5298_v31, %v12842_v21  ;;  %v5032_v21 = vmul.f32 %v4984_v18, %v13261_v4  ;;  %v4923_v31 = vmul.f32 0.36787945, %v4859_v60  ;;  %vm14892_vm11 = vcmask 56320  }
 0x935   : > { %v13259_v29 = vpop.xlane.xlu1 %4942  ;;  %v5330_v54 = vsel %vm14886_vm0, %v5314_v42, %v12964_v2  ;;  %4506 = vadd.xlane.f32.xlu0 %v14887_v32  ;;  %v5030_v2 = vmul.f32 %v4982_v14, %v13094_v58  ;;  %v4921_v42 = vmul.f32 0.36787945, %v13110_v15  ;;  %vm14893_vm0 = vcmask 64512  }
 0x936   : > { %v13269_v59 = vpop.xlane.xlu0 %4368  ;;  %v5346_v22 = vsel %vm14889_vm3, %v5330_v54, %v12980_v39  ;;  %v4906_v39 = vmul.f32 %v4858_v3, %v4842_v47  ;;  %vm14894_vm3 = vcmask 72704   ;;  %v4971_v32 = vmul.f32 %v4923_v31, %v13284_v48 }
 0x937   : > { %v5362_v12 = vsel %vm14890_vm6, %v5346_v22, %v13077_v11  ;;  %vm14895_vm6 = vcmask 80896   ;;  %v5048_v60 = vmul.f32 0.36787945, %v4984_v18 }
 0x938   : > { %4378 = vadd.xlane.f32.xlu1 %v14888_v56  ;;  %v5378_v45 = vsel %vm14891_vm14, %v5362_v12, %v13184_v13  ;;  %v4536_v56 = vmul.f32 0.36787945, %v4472_v26  ;;  %vm14896_vm14 = vcmask 39936   ;;  %v4473_v12 = vmul.f32 0.36787945, %v13247_v5 }
 0x939   : > { %v13274_v17 = vpop.xlane.xlu1 %4818  ;;  %5076 = vadd.xlane.f32.xlu0 %v5032_v21 }
 0x93a   : > { %v13282_v57 = vpop.xlane.xlu0 %4434  ;;  %v4584_v22 = vmul.f32 %v4536_v56, %v4520_v33  ;;  %v5112_v56 = vmul.f32 0.36787945, %v5048_v60 }
 0x93c   : > { %5072 = vadd.xlane.f32.xlu1 %v5030_v2 }
 0x93d   : > { %v4603_v36 = vpop.xlane.xlu1 %4602  ;;  %4952 = vadd.xlane.f32.xlu0 %v4906_v39 }
 0x93e   : > { %v5299_v8 = vsel %vm14892_vm11, %v13216_v23, %v4603_v36  ;;  %v13293_v13 = vpop.xlane.xlu0 %5128  ;;  %vm14897_vm11 = vcmask 89088   ;;  %v14901_v36 = vld [vmem:[#allocation21_spill] sm:$0xff] }
 0x93f   : > { %v5315_v11 = vsel %vm14893_vm0, %v5299_v8, %v12734_v38  ;;  %v4969_v38 = vmul.f32 %v4921_v42, %v13123_v55  ;;  %vm14898_vm0 = vcmask 97280   ;;  %v4922_v8 = vmul.f32 0.36787945, %v4858_v3 }
 0x940   : > { %v5331_v58 = vsel %vm14894_vm3, %v5315_v11, %v12856_v52  ;;  %4948 = vadd.xlane.f32.xlu1 %v4904_v7  ;;  %vm14899_vm3 = vcmask 105472   ;;  %v4521_v11 = vmul.f32 %v4473_v12, %v13254_v43  ;;  %v4985_v3 = vmul.f32 0.36787945, %v4921_v42 }
 0x941   : > { %v5347_v47 = vsel %vm14895_vm6, %v5331_v58, %v12971_v9  ;;  %v4495_v54 = vpop.xlane.xlu1 %4494  ;;  %5018 = vadd.xlane.f32.xlu0 %v4971_v32  ;;  %vm14900_vm6 = vmmov %vm14899_vm3  ;;  %v4970_v5 = vmul.f32 %v4922_v8, %v4906_v39  ;;  %v4987_v58 = vmul.f32 0.36787945, %v4923_v31  ;;  %v14903_v39 = vld [vmem:[#allocation24_spill] sm:$0xff] }
 0x942   : > { %v13300_v15 = vsel %vm14896_vm14, %v13175_v0, %v4495_v54  ;;  %v5363_v23 = vsel %vm14897_vm11, %v5347_v47, %v13090_v19  ;;  %v13307_v7 = vpop.xlane.xlu0 %5004  ;;  %vm14909_vm11 = vcmask 48128  }
 0x943   : > { %v5379_v52 = vsel %vm14898_vm0, %v5363_v23, %v13087_v10  ;;  %v5033_v23 = vmul.f32 %v4985_v3, %v4969_v38  ;;  %vm14910_vm0 = vcmask 56320  }
 0x944   : > { %5014 = vadd.xlane.f32.xlu1 %v4969_v38  ;;  %v13310_v9 = vsel %vm14899_vm3, %v5379_v52, %v5067_v6  ;;  %vm14911_vm3 = vcmask 64512  }
 0x945   : > { %v4371_v26 = vpop.xlane.xlu1 %4370  ;;  %4612 = vadd.xlane.f32.xlu0 %v4584_v22  ;;  %v4537_v22 = vmul.f32 0.36787945, %v4473_v12  ;;  %v5049_v12 = vmul.f32 0.36787945, %v4985_v3 }
 0x946   : > { %v13314_v0 = vsel %vm2107_vm8, %v13237_v37, %v4371_v26  ;;  %v13316_v55 = vpop.xlane.xlu0 %4880  ;;  %v5096_v37 = vmul.f32 %v5048_v60, %v5032_v21  ;;  %v5035_v21 = vmul.f32 %v4987_v58, %v4971_v32  ;;  %v5051_v26 = vmul.f32 0.36787945, %v4987_v58 }
 0x947   : > { %v4585_v60 = vmul.f32 %v4537_v22, %v4521_v11  ;;  %v14906_v22 = vld [vmem:[#allocation27_spill] sm:$0xff] }
 0x948   : > { %4890 = vadd.xlane.f32.xlu1 %v4843_v34  ;;  %v5046_v34 = vmul.f32 0.36787945, %v4982_v14  ;;  %v5160_v52 = vmul.f32 %v5112_v56, %v5096_v37 }
 0x949   : > { %v5065_v19 = vpop.xlane.xlu1 %5064  ;;  %4570 = vadd.xlane.f32.xlu0 %v14901_v36 }
 0x94a   : > { %v13319_v10 = vsel %vm14900_vm6, %v5378_v45, %v5065_v19  ;;  %v13323_v6 = vpop.xlane.xlu0 %4756  ;;  %v5094_v47 = vmul.f32 %v5046_v34, %v5030_v2  ;;  %v5115_v19 = vmul.f32 0.36787945, %v5051_v26  ;;  %v5110_v38 = vmul.f32 0.36787945, %v5046_v34 }
 0x94b   : > { %v5113_v34 = vmul.f32 0.36787945, %v5049_v12  ;;  %vm14912_vm6 = vcmask 72704  }
 0x94c   : > { %4500 = vadd.xlane.f32.xlu1 %v13234_v44  ;;  %v5158_v58 = vmul.f32 %v5110_v38, %v5094_v47  ;;  %v14907_v38 = vld [vmem:[#allocation23_spill] sm:$0xff] }
 0x94d   : > { %v13326_v33 = vpop.xlane.xlu1 %4246  ;;  %5140 = vadd.xlane.f32.xlu0 %v5096_v37 }
 0x94e   : > { %v13329_v18 = vpop.xlane.xlu0 %4822 }
 0x94f   : > { %14902 = vst [vmem:[#allocation86_spill] sm:$0xff] %v13329_v18  ;;  %v8065_v18 = vld [vmem:[%s8364_s12 + $0xe0] sm:$0xff] }
 0x950   : > { %4566 = vadd.xlane.f32.xlu1 %v4521_v11 }
 0x951   : > { %v13331_v45 = vpop.xlane.xlu1 %5130  ;;  %5016 = vadd.xlane.f32.xlu0 %v4970_v5 }
 0x952   : > { %v13333_v54 = vpop.xlane.xlu0 %4556 }
 0x954   : > { %5136 = vadd.xlane.f32.xlu1 %v5094_v47 }
 0x955   : > { %v13335_v44 = vpop.xlane.xlu1 %4816  ;;  %5082 = vadd.xlane.f32.xlu0 %v5035_v21 }
 0x956   : > { %v13337_v43 = vpop.xlane.xlu0 %4432 }
 0x958   : > { %5012 = vadd.xlane.f32.xlu1 %v13261_v4  ;;  %v5099_v4 = vmul.f32 %v5051_v26, %v5035_v21 }
 0x959   : > { %v13340_v14 = vpop.xlane.xlu1 %4882  ;;  %4618 = vadd.xlane.f32.xlu0 %v14903_v39 }
 0x95a   : > { %v13343_v2 = vpop.xlane.xlu0 %4308  ;;  %v5163_v37 = vmul.f32 %v5115_v19, %v5099_v4 }
 0x95c   : > { %5078 = vadd.xlane.f32.xlu1 %v5033_v23 }
 0x95d   : > { %v4493_v31 = vpop.xlane.xlu1 %4492  ;;  %5188 = vadd.xlane.f32.xlu0 %v5160_v52  ;;  %v5097_v52 = vmul.f32 %v5049_v12, %v5033_v23  ;;  %v4986_v23 = vmul.f32 0.36787945, %v4922_v8 }
 0x95e   : > { %v13345_v42 = vpop.xlane.xlu0 %5176  ;;  %v5268_v8 = vsel %vm14896_vm14, %v13207_v41, %v4493_v31  ;;  %vm14913_vm14 = vcmask 80896  }
 0x95f   : > { %v5161_v47 = vmul.f32 %v5113_v34, %v5097_v52 }
 0x960   : > { %4954 = vadd.xlane.f32.xlu1 %v13284_v48 }
 0x961   : > { %v13348_v32 = vpop.xlane.xlu1 %4558  ;;  %5146 = vadd.xlane.f32.xlu0 %v5099_v4 }
 0x962   : > { %v13350_v36 = vpop.xlane.xlu0 %4944 }
 0x963   : > { %14904 = vst [vmem:[#allocation87_spill] sm:$0xff] %v13350_v36 }
 0x964   : > { %4614 = vadd.xlane.f32.xlu1 %v4585_v60 }
 0x965   : > { %v13352_v39 = vpop.xlane.xlu1 %4244  ;;  %5194 = vadd.xlane.f32.xlu0 %v5163_v37 }
 0x966   : > { %v13354_v56 = vpop.xlane.xlu0 %5010 }
 0x968   : > { %5184 = vadd.xlane.f32.xlu1 %v5158_v58  ;;  %v5034_v58 = vmul.f32 %v4986_v23, %v4970_v5 }
 0x969   : > { %v13356_v48 = vpop.xlane.xlu1 %4310 }
 0x96a   : > { %v13358_v21 = vpop.xlane.xlu0 %4886 }
 0x96b   : > { %14905 = vst [vmem:[#allocation88_spill] sm:$0xff] %v13358_v21  ;;  %v8064_v21 = vld [vmem:[%s8364_s12 + $0xd0] sm:$0xff] }
 0x96c   : > { %5142 = vadd.xlane.f32.xlu1 %v5097_v52  ;;  %v5050_v52 = vmul.f32 0.36787945, %v4986_v23 }
 0x96d   : > { %v13360_v11 = vpop.xlane.xlu1 %5178 }
 0x96e   : > { %v4605_v26 = vpop.xlane.xlu0 %4604  ;;  %v5098_v5 = vmul.f32 %v5050_v52, %v5034_v58  ;;  %v5114_v62 = vmul.f32 0.36787945, %v5050_v52 }
 0x970   : > { %4504 = vadd.xlane.f32.xlu1 %v14906_v22  ;;  %v5162_v41 = vmul.f32 %v5114_v62, %v5098_v5 }
 0x971   : > { %v13363_v4 = vpop.xlane.xlu1 %5070 }
 0x972   : > { %v13365_v3 = vpop.xlane.xlu0 %4372 }
 0x974   : > { %5190 = vadd.xlane.f32.xlu1 %v5161_v47  ;;  %v14908_v47 = vld [vmem:[#allocation56_spill] sm:$0xff] }
 0x975   : > { %v13367_v19 = vpop.xlane.xlu1 %4946 }
 0x976   : > { %v13369_v60 = vpop.xlane.xlu0 %4438 }
 0x978   : > { %4568 = vadd.xlane.f32.xlu1 %v14907_v38 }
 0x979   : > { %v4607_v37 = vpop.xlane.xlu1 %4606 }
 0x97a   : > { %v5133_v12 = vpop.xlane.xlu0 %5132 }
 0x97b   : > { %5681 = vrot.lane.b32.xlu0 %v8064_v21, %s8160_s17  ;;  %v5284_v21 = vsel %vm14909_vm11, %v5268_v8, %v13333_v54  ;;  %vm14914_vm11 = vcmask 113664  }
 0x97c   : > { %5080 = vadd.xlane.f32.xlu1 %v5034_v58  ;;  %v5300_v23 = vsel %vm14910_vm0, %v5284_v21, %v4605_v26  ;;  %v5410_v52 = vsel %vm14914_vm11, %v13319_v10, %v13293_v13  ;;  %vm14915_vm0 = vcmask 121856  }
 0x97d   : > { %v13374_v22 = vpop.xlane.xlu1 %4498  ;;  %v13413_v8 = vsel %vm14915_vm0, %v5410_v52, %v13345_v42  ;;  %v8067_v52 = vld [vmem:[%s8364_s12 + $0xe8] sm:$0xff] }
 0x97e   : > { %v13376_v34 = vpop.xlane.xlu0 %5008  ;;  %14916 = vst [vmem:[#allocation85_spill] sm:$0xff] %v13413_v8 }
 0x97f   : > { %5685 = vrot.lane.b32.xlu0 %v8065_v18, %s8160_s17  ;;  %v5316_v18 = vsel %vm14911_vm3, %v5300_v23, %v12996_v27  ;;  %vm14917_vm3 = vcmask 89088  }
 0x980   : > { %4616 = vadd.xlane.f32.xlu1 %v14908_v47  ;;  %v5332_v58 = vsel %vm14912_vm6, %v5316_v18, %v13198_v53  ;;  %vm14918_vm6 = vcmask 97280   ;;  %v8066_v18 = vld [vmem:[%s8364_s12 + $0xd8] sm:$0xff] }
 0x981   : > { %v13383_v38 = vpop.xlane.xlu1 %4374  ;;  %v5348_v27 = vsel %vm14913_vm14, %v5332_v58, %v13189_v50  ;;  %vm14919_vm14 = vcmask 105472  }
 0x982   : > { %v13387_v36 = vpop.xlane.xlu0 %5074  ;;  %v5364_v53 = vsel %vm14917_vm3, %v5348_v27, %v13229_v49  ;;  %vm14921_vm3 = vcmask 48128  }
 0x983   : > { %5599 = vrot.lane.b32.xlu0 %v12829_v1, %s8159_s16  ;;  %v5380_v50 = vsel %vm14918_vm6, %v5364_v53, %v13307_v7  ;;  %v5285_v7 = vsel %vm14921_vm3, %v13300_v15, %v13348_v32  ;;  %vm14922_vm6 = vcmask 56320   ;;  %vm14926_vm3 = vcmask 89088  }
 0x984   : > { %5144 = vadd.xlane.f32.xlu1 %v5098_v5 }
 0x985   : > { %v5069_v47 = vpop.xlane.xlu1 %5068 }
 0x986   : > { %v13394_v31 = vpop.xlane.xlu0 %4950  ;;  %v5396_v13 = vsel %vm14919_vm14, %v5380_v50, %v5069_v47  ;;  %v5301_v47 = vsel %vm14922_vm6, %v5285_v7, %v4607_v37  ;;  %vm14923_vm14 = vcmask 64512   ;;  %vm14927_vm6 = vcmask 113664  }
 0x987   : > { %5601 = vrot.lane.b32.xlu0 %v13063_v35, %s8159_s16  ;;  %v5317_v53 = vsel %vm14923_vm14, %v5301_v47, %v12927_v25  ;;  %vm14928_vm14 = vcmask 97280  }
 0x988   : > { %5192 = vadd.xlane.f32.xlu1 %v5162_v41  ;;  %v5412_v41 = vsel %vm14914_vm11, %v5396_v13, %v5133_v12  ;;  %vm14924_vm11 = vcmask 72704  }
 0x989   : > { %v13398_v54 = vpop.xlane.xlu1 %4250  ;;  %v5333_v15 = vsel %vm14924_vm11, %v5317_v53, %v13103_v30  ;;  %v5411_v30 = vsel %vm14927_vm6, %v13310_v9, %v13331_v45  ;;  %vm14929_vm11 = vcmask 121856  }
 0x98a   : > { %v13402_v26 = vpop.xlane.xlu0 %4560  ;;  %v13477_v7 = vsel %vm14929_vm11, %v5411_v30, %v13360_v11 }
 0x98b   : > { %5605 = vrot.lane.b32.xlu0 %v13220_v63, %s8159_s16 }
 0x98d   : > { %v5135_v62 = vpop.xlane.xlu1 %5134 }
 0x98e   : > { %v13415_v5 = vpop.xlane.xlu0 %4436 }
 0x98f   : > { %5609 = vrot.lane.b32.xlu0 %v13413_v8, %s8159_s16 }
 0x991   : > { %v13421_v21 = vpop.xlane.xlu1 %4820 }
 0x992   : > { %v13425_v23 = vpop.xlane.xlu0 %4312 }
 0x995   : > { %v13428_v10 = vpop.xlane.xlu1 %4762 }
 0x996   : > { %v5181_v42 = vpop.xlane.xlu0 %5180 }
 0x997   : > { %v13432_v49 = vsel %vm14915_vm0, %v5412_v41, %v5181_v42  ;;  %vm14925_vm0 = vcmask 80896  }
 0x998   : > { %14920 = vst [vmem:[#allocation32_spill] sm:$0xff] %v13432_v49  ;;  %5613 = vrot.lane.b32.xlu0 %v13432_v49, %s8159_s16  ;;  %v5349_v37 = vsel %vm14925_vm0, %v5333_v15, %v13202_v61  ;;  %vm14930_vm0 = vcmask 105472   ;;  %v5238_v49 = vsel %vm2107_vm8, %v13227_v40, %v13269_v59 }
 0x999   : > { %5683 = vrot.lane.b32.xlu1 %v8066_v18, %s8160_s17  ;;  %v13436_v58 = vpop.xlane.xlu1 %4496  ;;  %v5365_v25 = vsel %vm14926_vm3, %v5349_v37, %v13259_v29  ;;  %vm14931_vm3 = vmmov %vm14927_vm6 }
 0x99a   : > { %v5139_v27 = vpop.xlane.xlu0 %5138  ;;  %v5381_v61 = vsel %vm14928_vm14, %v5365_v25, %v13240_v16  ;;  %vm14932_vm6 = vmmov %vm14929_vm11  ;;  %vm14933_vm14 = vcmask 31744   ;;  %vm14934_vm11 = vcmask 39936  }
 0x99b   : > { %v5255_v37 = vsel %vm14933_vm14, %v13314_v0, %v13282_v57  ;;  %vm14940_vm14 = vcmask 89088  }
 0x99d   : > { %5687 = vrot.lane.b32.xlu1 %v8067_v52, %s8160_s17  ;;  %v4563_v12 = vpop.xlane.xlu1 %4562  ;;  %v5397_v52 = vsel %vm14930_vm0, %v5381_v61, %v13363_v4  ;;  %v5271_v4 = vsel %vm14934_vm11, %v5255_v37, %v13374_v22  ;;  %vm14935_vm0 = vcmask 48128   ;;  %vm14941_vm11 = vcmask 97280  }
 0x99e   : > { %v13448_v50 = vpop.xlane.xlu0 %4824  ;;  %v5413_v53 = vsel %vm14931_vm3, %v5397_v52, %v5135_v62  ;;  %v5287_v25 = vsel %vm14935_vm0, %v5271_v4, %v4563_v12  ;;  %vm14936_vm3 = vcmask 56320   ;;  %vm14942_vm0 = vcmask 105472  }
 0x9a1   : > { %5597 = vrot.lane.b32.xlu1 %v12897_v46, %s8159_s16  ;;  %v13452_v13 = vpop.xlane.xlu1 %4248 }
 0x9a2   : > { %v13456_v32 = vpop.xlane.xlu0 %4608 }
 0x9a5   : > { %5603 = vrot.lane.b32.xlu1 %v13073_v24, %s8159_s16  ;;  %v13462_v42 = vpop.xlane.xlu1 %4314 }
 0x9a6   : > { %v13466_v41 = vpop.xlane.xlu0 %4376 }
 0x9a9   : > { %5607 = vrot.lane.b32.xlu1 %v13244_v51, %s8159_s16  ;;  %v5183_v18 = vpop.xlane.xlu1 %5182 }
 0x9aa   : > { %v13479_v47 = vpop.xlane.xlu0 %4442  ;;  %v13489_v9 = vsel %vm14932_vm6, %v5413_v53, %v5183_v18  ;;  %vm14937_vm6 = vcmask 64512  }
 0x9ad   : > { %5611 = vrot.lane.b32.xlu1 %v13477_v7, %s8159_s16  ;;  %v13483_v29 = vpop.xlane.xlu1 %4884 }
 0x9ae   : > { %v5187_v16 = vpop.xlane.xlu0 %5186 }
 0x9b1   : > { %5615 = vrot.lane.b32.xlu1 %v13489_v9, %s8159_s16  ;;  %v13493_v45 = vpop.xlane.xlu1 %4760 }
 0x9b2   : > { %v13495_v11 = vpop.xlane.xlu0 %4888 }
 0x9b5   : > { %v13497_v15 = vpop.xlane.xlu1 %4826 }
 0x9b6   : > { %v4565_v62 = vpop.xlane.xlu0 %4564 }
 0x9b9   : > { %v4611_v18 = vpop.xlane.xlu1 %4610 }
 0x9ba   : > { %v5303_v30 = vsel %vm14936_vm3, %v5287_v25, %v4611_v18  ;;  %v13510_v53 = vpop.xlane.xlu0 %4440  ;;  %vm14943_vm3 = vcmask 113664  }
 0x9bb   : > { %v5319_v61 = vsel %vm14937_vm6, %v5303_v30, %v13101_v20  ;;  %vm14947_vm6 = vcmask 31744  }
 0x9bc   : > { %v5335_v52 = vsel %vm14938_vm2, %v5319_v61, %v13274_v17  ;;  %vm14944_vm2 = vcmask 121856   ;;  %v5254_v63 = vsel %vm14947_vm6, %v5238_v49, %v13337_v43 }
 0x9bd   : > { %v5351_v57 = vsel %vm14939_vm15, %v5335_v52, %v13340_v14  ;;  %v4503_v0 = vpop.xlane.xlu1 %4502  ;;  %vm14946_vm15 = vcmask 15360  }
 0x9be   : > { %v5367_v22 = vsel %vm14940_vm14, %v5351_v57, %v13367_v19  ;;  %v4507_v37 = vpop.xlane.xlu0 %4506  ;;  %vm14948_vm14 = vmmov %vm14947_vm6 }
 0x9bf   : > { %v5383_v12 = vsel %vm14941_vm11, %v5367_v22, %v13354_v56  ;;  %vm14949_vm11 = vcmask 39936  }
 0x9c0   : > { %v5399_v4 = vsel %vm14942_vm0, %v5383_v12, %v13387_v36  ;;  %vm14950_vm0 = vmmov %vm14949_vm11 }
 0x9c1   : > { %v4379_v20 = vpop.xlane.xlu1 %4378  ;;  %v5415_v25 = vsel %vm14943_vm3, %v5399_v4, %v5139_v27  ;;  %vm14951_vm3 = vcmask 48128  }
 0x9c2   : > { %v13522_v17 = vsel %vm14944_vm2, %v5415_v25, %v5187_v16  ;;  %v13526_v14 = vpop.xlane.xlu0 %5076  ;;  %v14945_v16 = vld [vmem:[#allocation45_spill] sm:$0xff]  ;;  %vm14952_vm2 = vmmov %vm14951_vm3 }
 0x9c3   : > { %5619 = vrot.lane.b32.xlu1 %v13522_v17, %s8159_s16  ;;  %v5208_v22 = vsel %vm2073_vm7, %v14945_v16, %v13352_v39  ;;  %v5270_v39 = vsel %vm14949_vm11, %v5254_v63, %v13436_v58  ;;  %v14956_v63 = vld [vmem:[#allocation59_spill] sm:$0xff]  ;;  %vm14957_vm11 = vcmask 15360  }
 0x9c4   : > { %v5224_v12 = vsel %vm14946_vm15, %v5208_v22, %v13343_v2  ;;  %v5286_v22 = vsel %vm14951_vm3, %v5270_v39, %v13402_v26  ;;  %vm14953_vm15 = vcmask 56320   ;;  %vm14960_vm3 = vcmask 72704  }
 0x9c5   : > { %v5073_v18 = vpop.xlane.xlu1 %5072  ;;  %v5240_v8 = vsel %vm2107_vm8, %v5224_v12, %v13365_v3  ;;  %v5302_v3 = vsel %vm14953_vm15, %v5286_v22, %v13456_v32  ;;  %vm14954_vm6 = vmmov %vm14953_vm15  ;;  %v14959_v32 = vld [vmem:[#allocation33_spill] sm:$0xff] }
 0x9c6   : > { %v13528_v19 = vpop.xlane.xlu0 %4952  ;;  %v5256_v35 = vsel %vm14948_vm14, %v5240_v8, %v13415_v5  ;;  %vm14955_vm14 = vcmask 64512   ;;  %vm14962_vm15 = vmmov %vm14960_vm3 }
 0x9c7   : > { %v5318_v8 = vsel %vm14955_vm14, %v5302_v3, %v13195_v28 }
 0x9c9   : > { %v4949_v30 = vpop.xlane.xlu1 %4948 }
 0x9ca   : > { %v13530_v56 = vpop.xlane.xlu0 %5018 }
 0x9cd   : > { %v13532_v61 = vpop.xlane.xlu1 %5014 }
 0x9ce   : > { %v4613_v36 = vpop.xlane.xlu0 %4612 }
 0x9d1   : > { %v13534_v52 = vpop.xlane.xlu1 %4890 }
 0x9d2   : > { %v4571_v27 = vpop.xlane.xlu0 %4570 }
 0x9d5   : > { %v4501_v57 = vpop.xlane.xlu1 %4500 }
 0x9d6   : > { %v5141_v4 = vpop.xlane.xlu0 %5140  ;;  %v5272_v2 = vsel %vm14950_vm0, %v5256_v35, %v4501_v57  ;;  %v5211_v35 = vsel %vm2073_vm7, %v14956_v63, %v13398_v54  ;;  %vm14958_vm0 = vmmov %vm14955_vm14  ;;  %v5209_v57 = vsel %vm2073_vm7, %v14959_v32, %v13326_v33  ;;  %vm14964_vm14 = vcmask 80896  }
 0x9d7   : > { %v5288_v40 = vsel %vm14952_vm2, %v5272_v2, %v4565_v62  ;;  %v5227_v26 = vsel %vm14957_vm11, %v5211_v35, %v13462_v42  ;;  %vm14961_vm2 = vmmov %vm14957_vm11 }
 0x9d8   : > { %v5304_v49 = vsel %vm14954_vm6, %v5288_v40, %v4613_v36  ;;  %v5334_v36 = vsel %vm14960_vm3, %v5318_v8, %v13335_v44  ;;  %v5243_v28 = vsel %vm2107_vm8, %v5227_v26, %v4379_v20  ;;  %v5225_v54 = vsel %vm14961_vm2, %v5209_v57, %v13356_v48  ;;  %v14978_v8 = vld [vmem:[#allocation76_spill] sm:$0xff] }
 0x9d9   : > { %v4567_v25 = vpop.xlane.xlu1 %4566  ;;  %v5320_v5 = vsel %vm14958_vm0, %v5304_v49, %v13323_v6  ;;  %v5241_v42 = vsel %vm2107_vm8, %v5225_v54, %v13383_v38  ;;  %vm14963_vm6 = vcmask 31744   ;;  %v5350_v33 = vsel %vm14964_vm14, %v5334_v36, %v13316_v55  ;;  %vm14966_vm0 = vmmov %vm14964_vm14  ;;  %v14968_v38 = vld [vmem:[#allocation87_spill] sm:$0xff] }
 0x9da   : > { %v13556_v59 = vpop.xlane.xlu0 %5016  ;;  %v5336_v6 = vsel %vm14962_vm15, %v5320_v5, %v13421_v21  ;;  %v5259_v12 = vsel %vm14963_vm6, %v5243_v28, %v13479_v47  ;;  %vm14965_vm11 = vmmov %vm14963_vm6  ;;  %vm14967_vm3 = vcmask 39936   ;;  %vm14969_vm2 = vcmask 89088   ;;  %v14985_v5 = vld [vmem:[#allocation88_spill] sm:$0xff] }
 0x9db   : > { %v5257_v44 = vsel %vm14965_vm11, %v5241_v42, %v13369_v60  ;;  %v5352_v20 = vsel %vm14966_vm0, %v5336_v6, %v13483_v29  ;;  %v5366_v22 = vsel %vm14969_vm2, %v5350_v33, %v14968_v38  ;;  %vm14970_vm15 = vmmov %vm14967_vm3  ;;  %vm14976_vm0 = vcmask 97280  }
 0x9dc   : > { %v5273_v2 = vsel %vm14967_vm3, %v5257_v44, %v4503_v0  ;;  %v5275_v21 = vsel %vm14970_vm15, %v5259_v12, %v4507_v37  ;;  %vm14972_vm6 = vmmov %vm14971_vm13  ;;  %v5382_v29 = vsel %vm14976_vm0, %v5366_v22, %v13376_v34  ;;  %vm14980_vm15 = vcmask 105472  }
 0x9dd   : > { %v5137_v16 = vpop.xlane.xlu1 %5136  ;;  %v5291_v47 = vsel %vm14971_vm13, %v5275_v21, %v4571_v27  ;;  %v5289_v40 = vsel %vm14972_vm6, %v5273_v2, %v4567_v25  ;;  %vm14973_vm14 = vmmov %vm14969_vm2  ;;  %vm14979_vm2 = vcmask 64512   ;;  %v5398_v37 = vsel %vm14980_vm15, %v5382_v29, %v5073_v18  ;;  %v14981_v27 = vld [vmem:[#allocation86_spill] sm:$0xff] }
 0x9de   : > { %v5083_v58 = vpop.xlane.xlu0 %5082  ;;  %v5368_v3 = vsel %vm14973_vm14, %v5352_v20, %v4949_v30  ;;  %vm14975_vm11 = vmmov %vm14974_vm1  ;;  %vm14982_vm13 = vcmask 72704   ;;  %vm14983_vm6 = vcmask 113664  }
 0x9df   : > { %vm14977_vm3 = vmmov %vm14976_vm0  ;;  %v5414_v35 = vsel %vm14983_vm6, %v5398_v37, %v5137_v16  ;;  %vm14988_vm0 = vcmask 121856  }
 0x9e0   : > { %vm14984_vm14 = vmmov %vm14979_vm2 }
 0x9e1   : > { %v5013_v43 = vpop.xlane.xlu1 %5012 }
 0x9e2   : > { %v4619_v48 = vpop.xlane.xlu0 %4618  ;;  %v5384_v0 = vsel %vm14977_vm3, %v5368_v3, %v5013_v43  ;;  %vm14989_vm3 = vmmov %vm14982_vm13 }
 0x9e3   : > { %v5307_v60 = vsel %vm14974_vm1, %v5291_v47, %v4619_v48  ;;  %vm14986_vm1 = vcmask 80896  }
 0x9e4   : > { %v5323_v30 = vsel %vm14984_vm14, %v5307_v60, %v13428_v10  ;;  %vm14994_vm14 = vcmask 97280  }
 0x9e5   : > { %v5079_v62 = vpop.xlane.xlu1 %5078  ;;  %v5339_v18 = vsel %vm14989_vm3, %v5323_v30, %v13497_v15 }
 0x9e6   : > { %v5189_v26 = vpop.xlane.xlu0 %5188 }
 0x9e9   : > { %v4955_v39 = vpop.xlane.xlu1 %4954 }
 0x9ea   : > { %v5147_v54 = vpop.xlane.xlu0 %5146 }
 0x9ed   : > { %v4615_v55 = vpop.xlane.xlu1 %4614 }
 0x9ee   : > { %v5305_v49 = vsel %vm14975_vm11, %v5289_v40, %v4615_v55  ;;  %vm14987_vm11 = vmmov %vm14980_vm15  ;;  %v5195_v12 = vpop.xlane.xlu0 %5194 }
 0x9ef   : > { %v5321_v63 = vsel %vm14979_vm2, %v5305_v49, %v14978_v8  ;;  %v5400_v43 = vsel %vm14987_vm11, %v5384_v0, %v13526_v14  ;;  %vm14990_vm2 = vcmask 89088   ;;  %vm14991_vm15 = vmmov %vm14983_vm6 }
 0x9f0   : > { %v5337_v25 = vsel %vm14982_vm13, %v5321_v63, %v14981_v27  ;;  %v5416_v16 = vsel %vm14991_vm15, %v5400_v43, %v5141_v4  ;;  %vm14992_vm13 = vmmov %vm14988_vm0 }
 0x9f1   : > { %v5353_v32 = vsel %vm14986_vm1, %v5337_v25, %v14985_v5  ;;  %v5185_v34 = vpop.xlane.xlu1 %5184  ;;  %v13625_v28 = vsel %vm14992_vm13, %v5416_v16, %v5189_v26  ;;  %vm14993_vm6 = vmmov %vm14986_vm1 }
 0x9f2   : > { %v13615_v57 = vsel %vm14988_vm0, %v5414_v35, %v5185_v34  ;;  %v5369_v10 = vsel %vm14990_vm2, %v5353_v32, %v13394_v31  ;;  %v5355_v14 = vsel %vm14993_vm6, %v5339_v18, %v13534_v52  ;;  %vm14995_vm1 = vmmov %vm14990_vm2  ;;  %v13651_v2 = vpop.permute.xlu0 %5681  ;;  %v15019_v18 = vld [vmem:[#allocation94_spill] sm:$0xff] }
 0x9f3   : > { %5617 = vrot.lane.b32.xlu0 %v13615_v57, %s8159_s16  ;;  %v5385_v42 = vsel %vm14994_vm14, %v5369_v10, %v13532_v61  ;;  %v5371_v15 = vsel %vm14995_vm1, %v5355_v14, %v4955_v39  ;;  %vm14996_vm0 = vmmov %vm14994_vm14  ;;  %vm15003_vm14 = vcmask 15360   ;;  %vm15004_vm1 = vcmask 31744   ;;  %v15020_v10 = vld [vmem:[#allocation49_spill] sm:$0xff] }
 0x9f4   : > { %v5401_v31 = vsel %vm14987_vm11, %v5385_v42, %v5079_v62  ;;  %v5387_v4 = vsel %vm14996_vm0, %v5371_v15, %v13530_v56  ;;  %vm14997_vm3 = vmmov %vm14991_vm15  ;;  %v15001_v62 = vld [vmem:[#allocation29_spill] sm:$0xff]  ;;  %vm15007_vm0 = vcmask 56320   ;;  %v15026_v42 = vld [vmem:[#allocation31_spill] sm:$0xff] }
 0x9f5   : > { %v5143_v36 = vpop.xlane.xlu1 %5142  ;;  %vm14998_vm2 = vmmov %vm14987_vm11  ;;  %v5210_v56 = vsel %vm2073_vm7, %v15001_v62, %v13452_v13  ;;  %v8068_v13 = vld [vmem:[%s8364_s12 + $0xf8] sm:$0xff]  ;;  %vm15005_vm7 = vcmask 39936   ;;  %vm15006_vm11 = vcmask 48128  }
 0x9f6   : > { %v5417_v33 = vsel %vm14997_vm3, %v5401_v31, %v5143_v36  ;;  %v5403_v44 = vsel %vm14998_vm2, %v5387_v4, %v5083_v58  ;;  %vm14999_vm15 = vmmov %vm14992_vm13  ;;  %v7522_v58 = vpop.f32.mrf.mxu1  ;;  %v5226_v38 = vsel %vm15003_vm14, %v5210_v56, %v13425_v23  ;;  %v13664_v3 = vpop.permute.xlu0 %5685  ;;  %vm15010_vm2 = vcmask 80896   ;;  %v15022_v36 = vld [vmem:[#allocation34_spill] sm:$0xff]  ;;  %v8070_v31 = vld [vmem:[%s14123_s4 + $0x80] sm:$0xff] }
 0x9f7   : > { %5621 = vrot.lane.b32.xlu0 %v13625_v28, %s8159_s16  ;;  %vm15000_vm13 = vmmov %vm14997_vm3  ;;  %v5242_v21 = vsel %vm2107_vm8, %v5226_v38, %v13466_v41  ;;  %vm15008_vm3 = vcmask 64512   ;;  %vm15009_vm8 = vcmask 72704   ;;  %vm15014_vm14 = vcmask 113664   ;;  %v15031_v4 = vld [vmem:[#allocation16_spill] sm:$0xff]  ;;  %v15040_v38 = vld [vmem:[#allocation85_spill] sm:$0xff] }
 0x9f8   : > { %v5419_v39 = vsel %vm15000_vm13, %v5403_v44, %v5147_v54  ;;  %vm15002_vm6 = vmmov %vm14999_vm15  ;;  %v5258_v47 = vsel %vm15004_vm1, %v5242_v21, %v13510_v53  ;;  %v5502_v40 = vpop.f32.mrf.mxu1  ;;  %vm15012_vm13 = vcmask 97280   ;;  %vm15015_vm1 = vcmask 121856  }
 0x9f9   : > { %v4505_v6 = vpop.xlane.xlu1 %4504  ;;  %v13649_v48 = vsel %vm15002_vm6, %v5419_v39, %v5195_v12  ;;  %vm15013_vm6 = vcmask 105472   ;;  %v15032_v12 = vld [vmem:[#allocation65_spill] sm:$0xff] }
 0x9fa   : > { %v5274_v55 = vsel %vm15005_vm7, %v5258_v47, %v4505_v6  ;;  %v7525_v41 = vpop.f32.mrf.mxu1  ;;  %v5600_v37 = vpop.permute.xlu0 %5599  ;;  %vm15016_vm7 = vcmask 130048   ;;  %v8072_v47 = vld [vmem:[%s14123_s4 + $0x70] sm:$0xff] }
 0x9fb   : > { %v5710_v32 = vsel %vm15016_vm7, %v7522_v58, %v5600_v37  ;;  %v8074_v37 = vld [vmem:[%s14123_s4 + $0x60] sm:$0xff] }
 0x9fd   : > { %v5191_v52 = vpop.xlane.xlu1 %5190 }
 0x9fe   : > { %v13640_v61 = vsel %vm14999_vm15, %v5417_v33, %v5191_v52  ;;  %vm15011_vm15 = vcmask 89088   ;;  %v8071_v52 = vld [vmem:[%s14123_s4 + $0x78] sm:$0xff] }
 0x9ff   : > { %5623 = vrot.lane.b32.xlu1 %v13640_v61, %s8159_s16 }
 0xa01   : > { %v4569_v20 = vpop.xlane.xlu1 %4568 }
 0xa02   : > { %v5290_v60 = vsel %vm15006_vm11, %v5274_v55, %v4569_v20  ;;  %vm15017_vm11 = vmmov %vm15016_vm7  ;;  %v15035_v20 = vld [vmem:[#allocation40_spill] sm:$0xff] }
 0xa03   : > { %5627 = vrot.lane.b32.xlu1 %v13649_v48, %s8159_s16  ;;  %v15044_v55 = vld [vmem:[#allocation64_spill] sm:$0xff] }
 0xa05   : > { %v5081_v22 = vpop.xlane.xlu1 %5080 }
 0xa07   : > { %5691 = vrot.lane.b32.xlu1 %v8068_v13, %s8160_s17 }
 0xa09   : > { %v4617_v49 = vpop.xlane.xlu1 %4616 }
 0xa0a   : > { %v5306_v23 = vsel %vm15007_vm0, %v5290_v60, %v4617_v49  ;;  %vm15018_vm0 = vmmov %vm15016_vm7 }
 0xa0b   : > { %v5322_v29 = vsel %vm15008_vm3, %v5306_v23, %v13493_v45  ;;  %6097 = vrot.lane.b32.xlu1 %v12829_v1, %s8160_s17  ;;  %v5512_v1 = vpop.f32.mrf.mxu1  ;;  %vm15021_vm3 = vcmask 261120   ;;  %v15049_v23 = vld [vmem:[#allocation32_spill] sm:$0xff] }
 0xa0c   : > { %v5338_v53 = vsel %vm15009_vm8, %v5322_v29, %v13448_v50  ;;  %vm15023_vm8 = vmmov %vm15021_vm3  ;;  %v15050_v29 = vld [vmem:[#allocation66_spill] sm:$0xff] }
 0xa0d   : > { %v5354_v0 = vsel %vm15010_vm2, %v5338_v53, %v13495_v11  ;;  %v5145_v8 = vpop.xlane.xlu1 %5144  ;;  %vm15024_vm2 = vcmask 392192   ;;  %vm15033_vm7 = vmmov %vm15021_vm3  ;;  %v8073_v53 = vld [vmem:[%s14123_s4 + $0x68] sm:$0xff] }
 0xa0e   : > { %v5370_v63 = vsel %vm15011_vm15, %v5354_v0, %v13528_v19  ;;  %v7528_v19 = vpop.f32.mrf.mxu1  ;;  %vm15025_vm15 = vmmov %vm15024_vm2 }
 0xa0f   : > { %v5386_v27 = vsel %vm15012_vm13, %v5370_v63, %v13556_v59  ;;  %6101 = vrot.lane.b32.xlu1 %v13073_v24, %s8160_s17  ;;  %v5602_v59 = vpop.permute.xlu0 %5601  ;;  %v8069_v24 = vld [vmem:[%s8364_s12 + $0xf0] sm:$0xff]  ;;  %vm15027_vm13 = vmmov %vm15021_vm3 }
 0xa10   : > { %v5402_v45 = vsel %vm15013_vm6, %v5386_v27, %v5081_v22  ;;  %v5522_v30 = vpop.f32.mrf.mxu1  ;;  %v5711_v43 = vsel %vm15017_vm11, %v5512_v1, %v5602_v59  ;;  %vm15028_vm6 = vmmov %vm15018_vm0  ;;  %v15041_v22 = vld [vmem:[#allocation67_spill] sm:$0xff]  ;;  %v15057_v1 = vld [vmem:[#allocation9_spill] sm:$0xff] }
 0xa11   : > { %v5418_v50 = vsel %vm15014_vm14, %v5402_v45, %v5145_v8  ;;  %v5193_v25 = vpop.xlane.xlu1 %5192  ;;  %v5727_v15 = vsel %vm15027_vm13, %v5711_v43, %v15026_v42  ;;  %vm15029_vm14 = vmmov %vm15018_vm0  ;;  %v15053_v8 = vld [vmem:[#allocation15_spill] sm:$0xff]  ;;  %v8079_v59 = vld [vmem:[%s14123_s4 + $0x38] sm:$0xff] }
 0xa12   : > { %v13685_v11 = vsel %vm15015_vm1, %v5418_v50, %v5193_v25  ;;  %vm15030_vm1 = vmmov %vm15024_vm2  ;;  %v8075_v50 = vld [vmem:[%s14123_s4 + $0x58] sm:$0xff]  ;;  %v8076_v25 = vld [vmem:[%s14123_s4 + $0x50] sm:$0xff] }
 0xa13   : > { %6105 = vrot.lane.b32.xlu1 %v13244_v51, %s8160_s17  ;;  %5625 = vrot.lane.b32.xlu0 %v13685_v11, %s8159_s16  ;;  %v5606_v5 = vpop.permute.xlu0 %5605  ;;  %v7531_v51 = vpop.f32.mrf.mxu1  ;;  %vm15034_vm11 = vmmov %vm15030_vm1  ;;  %s6550_s16 = sshll.u32 %s12435_s26, 4  ;;  %s14068_s16 = int_to_ptr.vmem [resolvable:$true] %s6550_s16 }
 0xa14   : > { %vm15043_vm13 = vmmov %vm15030_vm1  ;;  %s8097_s13 = scalar_lea.vmem %s14068_s16, 128  ;;  %p8104_p0 = scmp.lt.s32.totalorder %s14068_s16, %s8102_s30 }
 0xa15   : > { %v13691_v35 = vpop.permute.xlu1 %5683  ;;  %v5532_v16 = vpop.f32.mrf.mxu1  ;;  %p8098_p11 = scmp.ne.s32.totalorder %s14068_s16, %s8097_s13  ;;  %p8105_p1 = scmp.lt.s32.totalorder %s8103_s14, %s8097_s13 }
 0xa17   : > { %6109 = vrot.lane.b32.xlu1 %v13477_v7, %s8160_s17  ;;  %5689 = vrot.lane.b32.xlu0 %v8069_v24, %s8160_s17  ;;  %v5610_v14 = vpop.permute.xlu0 %5609  ;;  %v7534_v44 = vpop.f32.mrf.mxu1  ;;  %p8099_p12 = pnand %p8098_p11, %p8235_p5  ;;  %p8106_p2 = por %p8105_p1, %p8104_p0 }
 0xa19   : > { %v13697_v26 = vpop.permute.xlu1 %5687  ;;  %v5542_v13 = vpop.f32.mrf.mxu1  ;;  %p8100_p13 = pneg %p8099_p12 }
 0xa1b   : > { %6113 = vrot.lane.b32.xlu1 %v13489_v9, %s8160_s17  ;;  %6095 = vrot.lane.b32.xlu0 %v12897_v46, %s8160_s17  ;;  %v5726_v46 = vsel %vm15023_vm8, %v5710_v32, %v15022_v36  ;;  %v5614_v58 = vpop.permute.xlu0 %5613  ;;  %p8107_p3 = pnand %p8106_p2, %p8100_p13 }
 0xa1d   : > { %v5598_v34 = vpop.permute.xlu1 %5597 }
 0xa1e   : > { %v5709_v7 = vsel %vm15018_vm0, %v5502_v40, %v5598_v34  ;;  %vm15036_vm0 = vmmov %vm15021_vm3 }
 0xa1f   : > { %6117 = vrot.lane.b32.xlu1 %v13522_v17, %s8160_s17  ;;  %6099 = vrot.lane.b32.xlu0 %v15019_v18, %s8160_s17  ;;  %v5725_v9 = vsel %vm15021_vm3, %v5709_v7, %v15020_v10  ;;  %v5713_v17 = vsel %vm15028_vm6, %v5522_v30, %v5606_v5  ;;  %vm15037_vm3 = vmmov %vm15028_vm6 }
 0xa20   : > { %7556 = vmatprep.mubr.msk.f32.mxu0 %vm15024_vm2, %v5725_v9  ;;  %v5729_v62 = vsel %vm15036_vm0, %v5713_v17, %v15035_v20  ;;  %vm15038_vm8 = vmmov %vm15037_vm3 }
 0xa21   : > { %7557 = vmatmul.mubr.msk.f32.vlgmr.msra.gmra.mxu0 %vm15025_vm15, %v5726_v46  ;;  %v5604_v54 = vpop.permute.xlu1 %5603  ;;  %vm15039_vm2 = vmmov %vm15030_vm1 }
 0xa22   : > { %v5712_v6 = vsel %vm15029_vm14, %v7525_v41, %v5604_v54  ;;  %7559 = vmatprep.mubr.msk.f32.mxu0 %vm15030_vm1, %v5727_v15  ;;  %7637 = vmatpush3.msra.mxu0 %v8070_v31  ;;  %vm15042_vm15 = vmmov %vm15036_vm0 }
 0xa23   : > { %6121 = vrot.lane.b32.xlu1 %v13640_v61, %s8160_s17  ;;  %6103 = vrot.lane.b32.xlu0 %v15031_v4, %s8160_s17  ;;  %v5728_v33 = vsel %vm15033_vm7, %v5712_v6, %v15032_v12  ;;  %v5715_v61 = vsel %vm15037_vm3, %v5532_v16, %v5610_v14  ;;  %vm15045_vm6 = vmmov %vm15036_vm0  ;;  %v8080_v4 = vld [vmem:[%s14123_s4 + $0x30] ss:$0 sm:$0xff] }
 0xa24   : > { %7638 = vmatprep.subr.mxu0 %v8071_v52  ;;  %v5731_v60 = vsel %vm15045_vm6, %v5715_v61, %v15044_v55  ;;  %vm15046_vm14 = vmmov %vm15037_vm3 }
 0xa25   : > { %7560 = vmatmul.mubr.msk.f32.gmra.mxu0 %vm15034_vm11, %v5728_v33  ;;  %v5608_v39 = vpop.permute.xlu1 %5607  ;;  %vm15047_vm1 = vmmov %vm15037_vm3 }
 0xa26   : > { %v5714_v56 = vsel %vm15038_vm8, %v7528_v19, %v5608_v39  ;;  %7562 = vmatprep.mubr.msk.f32.mxu0 %vm15039_vm2, %v5729_v62  ;;  %7639 = vmatpush3.msra.mxu0 %v8071_v52  ;;  %vm15048_vm7 = vmmov %vm15039_vm2  ;;  %v8078_v19 = vld [vmem:[%s14123_s4 + $0x40] sm:$0xff] }
 0xa27   : > { %6125 = vrot.lane.b32.xlu1 %v13649_v48, %s8160_s17  ;;  %6107 = vrot.lane.b32.xlu0 %v15040_v38, %s8160_s17  ;;  %v5730_v21 = vsel %vm15042_vm15, %v5714_v56, %v15041_v22  ;;  %v5717_v48 = vsel %vm15046_vm14, %v5542_v13, %v5614_v58  ;;  %vm15051_vm11 = vmmov %vm15036_vm0 }
 0xa28   : > { %7640 = vmatprep.subr.mxu0 %v8072_v47  ;;  %vm15052_vm0 = vmmov %vm15039_vm2 }
 0xa29   : > { %7563 = vmatmul.mubr.msk.f32.gmra.mxu0 %vm15043_vm13, %v5730_v21  ;;  %v5612_v40 = vpop.permute.xlu1 %5611  ;;  %vm15054_vm3 = vmmov %vm15045_vm6 }
 0xa2a   : > { %v5716_v49 = vsel %vm15047_vm1, %v7531_v51, %v5612_v40  ;;  %7565 = vmatprep.mubr.msk.f32.mxu0 %vm15048_vm7, %v5731_v60  ;;  %7641 = vmatpush3.msra.mxu0 %v8072_v47  ;;  %v5733_v63 = vsel %vm15054_vm3, %v5717_v48, %v15053_v8  ;;  %vm15055_vm8 = vmmov %vm15047_vm1 }
 0xa2b   : > { %6111 = vrot.lane.b32.xlu0 %v15049_v23, %s8160_s17  ;;  %v5732_v41 = vsel %vm15051_vm11, %v5716_v49, %v15050_v29  ;;  %7642 = vmatprep.subr.mxu0 %v8073_v53  ;;  %vm15056_vm2 = vmmov %vm15052_vm0 }
 0xa2c   : > { %7643 = vmatpush3.msra.mxu0 %v8073_v53  ;;  %vm15058_vm15 = vmmov %vm15054_vm3 }
 0xa2d   : > { %7566 = vmatmul.mubr.msk.f32.gmra.mxu0 %vm15052_vm0, %v5732_v41  ;;  %v5616_v0 = vpop.permute.xlu1 %5615  ;;  %7644 = vmatprep.subr.mxu0 %v8074_v37  ;;  %vm15059_vm13 = vmmov %vm15052_vm0 }
 0xa2e   : > { %v5718_v27 = vsel %vm15055_vm8, %v7534_v44, %v5616_v0  ;;  %7568 = vmatprep.mubr.msk.f32.mxu0 %vm15056_vm2, %v5733_v63  ;;  %7645 = vmatpush3.msra.mxu0 %v8074_v37  ;;  %vm15060_vm6 = vmmov %vm15047_vm1 }
 0xa2f   : > { %6115 = vrot.lane.b32.xlu0 %v13615_v57, %s8160_s17  ;;  %v5734_v45 = vsel %vm15058_vm15, %v5718_v27, %v15057_v1  ;;  %7646 = vmatprep.subr.mxu0 %v8075_v50  ;;  %v8077_v57 = vld [vmem:[%s14123_s4 + $0x48] sm:$0xff]  ;;  %vm15061_vm14 = vmmov %vm15047_vm1 }
 0xa30   : > { %7647 = vmatpush3.msra.mxu0 %v8075_v50  ;;  %vm15062_vm1 = vmmov %vm15054_vm3 }
 0xa31   : > { %7569 = vmatmul.mubr.msk.f32.gmra.mxu0 %vm15059_vm13, %v5734_v45  ;;  %7648 = vmatprep.subr.mxu0 %v8076_v25  ;;  %vm15063_vm7 = vmmov %vm15052_vm0 }
 0xa32   : > { %7649 = vmatpush3.msra.mxu0 %v8076_v25  ;;  %vm15064_vm11 = vmmov %vm15062_vm1 }
 0xa33   : > { %6119 = vrot.lane.b32.xlu0 %v13625_v28, %s8160_s17  ;;  %7650 = vmatprep.subr.mxu0 %v8077_v57  ;;  %v7537_v28 = vpop.f32.mrf.mxu1  ;;  %vm15065_vm3 = vmmov %vm15060_vm6 }
 0xa34   : > { %7651 = vmatpush3.msra.mxu0 %v8077_v57  ;;  %vm15066_vm8 = vmmov %vm15062_vm1 }
 0xa35   : > { %7652 = vmatprep.subr.mxu0 %v8078_v19  ;;  %v5552_v24 = vpop.f32.mrf.mxu1  ;;  %v5620_v30 = vpop.permute.xlu1 %5619  ;;  %vm15067_vm2 = vmmov %vm15052_vm0 }
 0xa36   : > { %7653 = vmatpush3.msra.mxu0 %v8078_v19  ;;  %v5720_v51 = vsel %vm15060_vm6, %v7537_v28, %v5620_v30  ;;  %vm15068_vm15 = vmmov %vm15065_vm3 }
 0xa37   : > { %6123 = vrot.lane.b32.xlu0 %v13685_v11, %s8160_s17  ;;  %7654 = vmatprep.subr.mxu0 %v8079_v59  ;;  %v7540_v5 = vpop.f32.mrf.mxu1  ;;  %v5736_v11 = vsel %vm15064_vm11, %v5720_v51, %v13691_v35  ;;  %vm15069_vm13 = vmmov %vm15062_vm1 }
 0xa38   : > { %7655 = vmatpush3.msra.mxu0 %v8079_v59  ;;  %vm15070_vm6 = vmmov %vm15052_vm0 }
 0xa39   : > { %v5562_v7 = vpop.f32.mrf.mxu1 }
 0xa3b   : > { %v7543_v46 = vpop.f32.mrf.mxu1 }
 0xa3d   : > { %v5572_v54 = vpop.f32.mrf.mxu1 }
 0xa65   : > { %v5618_v32 = vpop.permute.xlu0 %5617 }
 0xa66   : > { %v5719_v34 = vsel %vm15061_vm14, %v5552_v24, %v5618_v32  ;;  %vm15071_vm14 = vmmov %vm15065_vm3 }
 0xa67   : > { %v5735_v43 = vsel %vm15062_vm1, %v5719_v34, %v13651_v2  ;;  %vm15072_vm1 = vmmov %vm15065_vm3 }
 0xa68   : > { %7571 = vmatprep.mubr.msk.f32.mxu0 %vm15063_vm7, %v5735_v43  ;;  %vm15073_vm7 = vmmov %vm15066_vm8 }
 0xa69   : > { %v5622_v18 = vpop.permute.xlu0 %5621  ;;  %7572 = vmatmul.mubr.msk.f32.gmra.mxu0 %vm15052_vm0, %v5736_v11  ;;  %vm15074_vm11 = vmmov %vm15073_vm7 }
 0xa6a   : > { %v5721_v10 = vsel %vm15065_vm3, %v5562_v7, %v5622_v18  ;;  %vm15075_vm3 = vmmov %vm15052_vm0 }
 0xa6b   : > { %v5737_v9 = vsel %vm15066_vm8, %v5721_v10, %v13664_v3  ;;  %v8081_v10 = vld [vmem:[%s8434_s15 + $0x88] sm:$0xff] }
 0xa6c   : > { %7574 = vmatprep.mubr.msk.f32.mxu0 %vm15067_vm2, %v5737_v9 }
 0xa71   : > { %v5624_v16 = vpop.permute.xlu1 %5623 }
 0xa72   : > { %v5722_v36 = vsel %vm15068_vm15, %v7540_v5, %v5624_v16  ;;  %v15077_v16 = vmov 0.0  }
 0xa73   : > { %v5738_v2 = vsel %vm15069_vm13, %v5722_v36, %v13697_v26  ;;  %v8082_v36 = vld [vmem:[%s8434_s15 + $0x90] sm:$0xff] }
 0xa74   : > { %7575 = vmatmul.mubr.msk.f32.gmra.mxu0 %vm15070_vm6, %v5738_v2 }
 0xa75   : > { %v5628_v35 = vpop.permute.xlu1 %5627 }
 0xa76   : > { %v5724_v3 = vsel %vm15072_vm1, %v7543_v46, %v5628_v35  ;;  %v8083_v35 = vld [vmem:[%s8434_s15 + $0x98] sm:$0xff]  ;;  %vm15103_vm1 = vmmov %vm15073_vm7 }
 0xa79   : > { %v5692_v42 = vpop.permute.xlu1 %5691 }
 0xa7a   : > { %v5740_v31 = vsel %vm15074_vm11, %v5724_v3, %v5692_v42  ;;  %v8085_v42 = vld [vmem:[%s8434_s15 + $0xa8] sm:$0xff]  ;;  %v15082_v3 = vld [vmem:[#allocation70_spill] sm:$0xff]  ;;  %vm15105_vm11 = vmmov %vm15052_vm0 }
 0xa85   : > { %v5626_v14 = vpop.permute.xlu0 %5625 }
 0xa86   : > { %v5723_v15 = vsel %vm15071_vm14, %v5572_v54, %v5626_v14  ;;  %v8084_v14 = vld [vmem:[%s8434_s15 + $0xa0] sm:$0xff]  ;;  %vm15102_vm14 = vmmov 0  }
 0xa89   : > { %v5690_v17 = vpop.permute.xlu0 %5689 }
 0xa8a   : > { %v5739_v6 = vsel %vm15073_vm7, %v5723_v15, %v5690_v17  ;;  %v8086_v17 = vld [vmem:[%s8434_s15 + $0xb0] sm:$0xff]  ;;  %vm15104_vm7 = vmmov %vm15103_vm1 }
 0xa8b   : > { %7577 = vmatprep.mubr.msk.f32.mxu0 %vm15052_vm0, %v5739_v6  ;;  %v8087_v6 = vld [vmem:[%s8434_s15 + $0xb8] sm:$0xff] }
 0xa8c   : > { %7578 = vmatmul.mubr.msk.f32.gmra.mxu0 %vm15075_vm3, %v5740_v31  ;;  %v15084_v31 = vld [vmem:[#allocation37_spill] sm:$0xff]  ;;  %vm15106_vm3 = vcmask 654336  }
 0xae1   : > { %v7558_v26 = vpop.f32.mrf.mxu0 }
 0xae2   : > { %v5861_v12 = vadd.f32 %v8080_v4, %v7558_v26  ;;  %v8088_v26 = vld [vmem:[%s8434_s15 + $0xc0] sm:$0xff] }
 0xae3   : > { %v5855_v33 = vpop.f32.mrf.mxu0 }
 0xae4   : > { %v13818_v52 = vmax.f32 %v5861_v12, 0.0  ;;  %v5856_v44 = vadd.f32 %v8080_v4, %v5855_v33  ;;  %v8089_v12 = vld [vmem:[%s8434_s15 + $0xc8] sm:$0xff]  ;;  %v15088_v33 = vld [vmem:[#allocation35_spill] sm:$0xff] }
 0xae5   : > { %v7561_v39 = vpop.f32.mrf.mxu0 }
 0xae6   : > { %v13820_v20 = vmax.f32 %v5856_v44, 0.0  ;;  %v5871_v62 = vadd.f32 %v8080_v4, %v7561_v39  ;;  %6161 = vrot.lane.b32.xlu1 %v13818_v52, %s8161_s6  ;;  %v8090_v44 = vld [vmem:[%s8434_s15 + $0xd0] sm:$0xff]  ;;  %v15090_v39 = vld [vmem:[#allocation63_spill] sm:$0xff] }
 0xae7   : > { %v5865_v61 = vpop.f32.mrf.mxu0 }
 0xae8   : > { %v13824_v56 = vmax.f32 %v5871_v62, 0.0  ;;  %v5866_v58 = vadd.f32 %v8080_v4, %v5865_v61  ;;  %6159 = vrot.lane.b32.xlu0 %v13820_v20, %s8161_s6  ;;  %v8091_v62 = vld [vmem:[%s8434_s15 + $0xd8] sm:$0xff]  ;;  %v15092_v61 = vld [vmem:[#allocation72_spill] sm:$0xff] }
 0xae9   : > { %v7564_v38 = vpop.f32.mrf.mxu0  ;;  %vm15093_vm8 = vcmp.le.f32.partialorder %v15092_v61, 49.0 }
 0xaea   : > { %v13828_v22 = vmax.f32 %v5866_v58, 0.0  ;;  %v5881_v21 = vadd.f32 %v8080_v4, %v7564_v38  ;;  %6165 = vrot.lane.b32.xlu1 %v13824_v56, %s8161_s6  ;;  %v8092_v58 = vld [vmem:[%s8434_s15 + $0xe0] sm:$0xff] }
 0xaeb   : > { %v5875_v47 = vpop.f32.mrf.mxu0  ;;  %v15094_v38 = vld [vmem:[#allocation75_spill] sm:$0xff] }
 0xaec   : > { %v13832_v13 = vmax.f32 %v5881_v21, 0.0  ;;  %v5876_v40 = vadd.f32 %v8080_v4, %v5875_v47  ;;  %6163 = vrot.lane.b32.xlu0 %v13828_v22, %s8161_s6  ;;  %vm15095_vm2 = vcmp.le.f32.partialorder %v15094_v38, 49.0  ;;  %v8093_v21 = vld [vmem:[%s8434_s15 + $0xe8] sm:$0xff]  ;;  %v15096_v47 = vld [vmem:[#allocation73_spill] sm:$0xff] }
 0xaed   : > { %v7567_v55 = vpop.f32.mrf.mxu0  ;;  %vm15097_vm15 = vcmp.le.f32.partialorder %v15096_v47, 49.0 }
 0xaee   : > { %v13836_v60 = vmax.f32 %v5876_v40, 0.0  ;;  %v5891_v48 = vadd.f32 %v8080_v4, %v7567_v55  ;;  %6169 = vrot.lane.b32.xlu1 %v13832_v13, %s8161_s6  ;;  %v8094_v40 = vld [vmem:[%s8434_s15 + $0xf0] sm:$0xff]  ;;  %v15098_v55 = vld [vmem:[#allocation36_spill] sm:$0xff] }
 0xaef   : > { %v5885_v49 = vpop.f32.mrf.mxu0  ;;  %vm15099_vm13 = vcmp.le.f32.partialorder %v15098_v55, 49.0 }
 0xaf0   : > { %v13840_v23 = vmax.f32 %v5891_v48, 0.0  ;;  %v5886_v29 = vadd.f32 %v8080_v4, %v5885_v49  ;;  %6167 = vrot.lane.b32.xlu0 %v13836_v60, %s8161_s6  ;;  %v8095_v48 = vld [vmem:[%s8434_s15 + $0xf8] sm:$0xff]  ;;  %v15100_v49 = vld [vmem:[#allocation39_spill] sm:$0xff] }
 0xaf1   : > { %v7570_v41 = vpop.f32.mrf.mxu0  ;;  %vm15101_vm6 = vcmp.le.f32.partialorder %v15100_v49, 49.0 }
 0xaf2   : > { %v13844_v53 = vmax.f32 %v5886_v29, 0.0  ;;  %v5901_v0 = vadd.f32 %v8080_v4, %v7570_v41  ;;  %6173 = vrot.lane.b32.xlu1 %v13840_v23, %s8161_s6  ;;  %v6096_v29 = vpop.permute.xlu0 %6095  ;;  %v6098_v41 = vpop.permute.xlu1 %6097 }
 0xaf3   : > { %v5895_v8 = vpop.f32.mrf.mxu0 }
 0xaf4   : > { %v13848_v63 = vmax.f32 %v5901_v0, 0.0  ;;  %v5896_v37 = vadd.f32 %v8080_v4, %v5895_v8  ;;  %6171 = vrot.lane.b32.xlu0 %v13844_v53, %s8161_s6 }
 0xaf6   : > { %v13852_v27 = vmax.f32 %v5896_v37, 0.0  ;;  %6177 = vrot.lane.b32.xlu1 %v13848_v63, %s8161_s6  ;;  %v6100_v0 = vpop.permute.xlu0 %6099  ;;  %v6102_v8 = vpop.permute.xlu1 %6101 }
 0xaf8   : > { %6175 = vrot.lane.b32.xlu0 %v13852_v27, %s8161_s6 }
 0xafa   : > { %v6104_v37 = vpop.permute.xlu0 %6103 }
 0xb29   : > { %v7573_v1 = vpop.f32.mrf.mxu0 }
 0xb2a   : > { %v5911_v45 = vadd.f32 %v8080_v4, %v7573_v1  ;;  %v6106_v1 = vpop.permute.xlu1 %6105 }
 0xb2b   : > { %v5905_v50 = vpop.f32.mrf.mxu0 }
 0xb2c   : > { %v13858_v25 = vmax.f32 %v5911_v45, 0.0  ;;  %v5906_v57 = vadd.f32 %v8080_v4, %v5905_v50  ;;  %v6108_v45 = vpop.permute.xlu0 %6107 }
 0xb2e   : > { %v13860_v19 = vmax.f32 %v5906_v57, 0.0  ;;  %6181 = vrot.lane.b32.xlu1 %v13858_v25, %s8161_s6  ;;  %v6110_v50 = vpop.permute.xlu1 %6109 }
 0xb30   : > { %6179 = vrot.lane.b32.xlu0 %v13860_v19, %s8161_s6  ;;  %v6112_v57 = vpop.permute.xlu0 %6111 }
 0xb34   : > { %v7576_v59 = vpop.f32.mrf.mxu0 }
 0xb35   : > { %v5921_v28 = vadd.f32 %v8080_v4, %v7576_v59  ;;  %v6114_v59 = vpop.permute.xlu1 %6113 }
 0xb36   : > { %v5915_v24 = vpop.f32.mrf.mxu0 }
 0xb37   : > { %v13866_v30 = vmax.f32 %v5921_v28, 0.0  ;;  %v5916_v5 = vadd.f32 %v8080_v4, %v5915_v24  ;;  %v6116_v28 = vpop.permute.xlu0 %6115 }
 0xb39   : > { %v13868_v51 = vmax.f32 %v5916_v5, 0.0  ;;  %6185 = vrot.lane.b32.xlu1 %v13866_v30, %s8161_s6  ;;  %v6118_v24 = vpop.permute.xlu1 %6117 }
 0xb3b   : > { %6183 = vrot.lane.b32.xlu0 %v13868_v51, %s8161_s6  ;;  %v13962_v5 = vpop.permute.xlu0 %6119 }
 0xb4c   : > { %v7579_v32 = vpop.f32.mrf.mxu0 }
 0xb4d   : > { %v5931_v34 = vadd.f32 %v8080_v4, %v7579_v32  ;;  %v13964_v32 = vpop.permute.xlu1 %6121 }
 0xb4e   : > { %v5925_v43 = vpop.f32.mrf.mxu0 }
 0xb4f   : > { %v13874_v11 = vmax.f32 %v5931_v34, 0.0  ;;  %v5926_v7 = vadd.f32 %v8080_v4, %v5925_v43  ;;  %v15086_v4 = vld [vmem:[#allocation71_spill] sm:$0xff]  ;;  %v13966_v34 = vpop.permute.xlu0 %6123 }
 0xb51   : > { %v13876_v18 = vmax.f32 %v5926_v7, 0.0  ;;  %6189 = vrot.lane.b32.xlu1 %v13874_v11, %s8161_s6  ;;  %7580 = vmatprep.subr.mxu1 %v13874_v11  ;;  %v13968_v43 = vpop.permute.xlu1 %6125 }
 0xb52   : > { %7581 = vmatpush3.msra.mxu1 %v13874_v11 }
 0xb53   : > { %6187 = vrot.lane.b32.xlu0 %v13876_v18, %s8161_s6  ;;  %7582 = vmatprep.subr.mxu1 %v13876_v18 }
 0xb54   : > { %7583 = vmatpush3.msra.mxu1 %v13876_v18 }
 0xb55   : > { %7584 = vmatprep.subr.mxu1 %v13866_v30 }
 0xb56   : > { %7585 = vmatpush3.msra.mxu1 %v13866_v30 }
 0xb57   : > { %7586 = vmatprep.subr.mxu1 %v13868_v51 }
 0xb58   : > { %7587 = vmatpush3.msra.mxu1 %v13868_v51 }
 0xb59   : > { %7588 = vmatprep.subr.mxu1 %v13858_v25 }
 0xb5a   : > { %7589 = vmatpush3.msra.mxu1 %v13858_v25  ;;  %v6160_v7 = vpop.permute.xlu0 %6159 }
 0xb5b   : > { %7590 = vmatprep.subr.mxu1 %v13860_v19 }
 0xb5c   : > { %7591 = vmatpush3.msra.mxu1 %v13860_v19 }
 0xb5d   : > { %7592 = vmatprep.subr.mxu1 %v13848_v63 }
 0xb5e   : > { %7593 = vmatpush3.msra.mxu1 %v13848_v63 }
 0xb5f   : > { %7594 = vmatprep.subr.mxu1 %v13852_v27 }
 0xb60   : > { %7595 = vmatpush3.msra.mxu1 %v13852_v27 }
 0xb61   : > { %7596 = vmatprep.subr.mxu1 %v13840_v23 }
 0xb62   : > { %7597 = vmatpush3.msra.mxu1 %v13840_v23 }
 0xb63   : > { %7598 = vmatprep.subr.mxu1 %v13844_v53 }
 0xb64   : > { %7599 = vmatpush3.msra.mxu1 %v13844_v53 }
 0xb65   : > { %7600 = vmatprep.subr.mxu1 %v13832_v13 }
 0xb66   : > { %7601 = vmatpush3.msra.mxu1 %v13832_v13 }
 0xb67   : > { %7602 = vmatprep.subr.mxu1 %v13836_v60 }
 0xb68   : > { %7603 = vmatpush3.msra.mxu1 %v13836_v60 }
 0xb69   : > { %7604 = vmatprep.subr.mxu1 %v13824_v56 }
 0xb6a   : > { %7605 = vmatpush3.msra.mxu1 %v13824_v56 }
 0xb6b   : > { %7606 = vmatprep.subr.mxu1 %v13828_v22 }
 0xb6c   : > { %7607 = vmatpush3.msra.mxu1 %v13828_v22 }
 0xb6d   : > { %7608 = vmatprep.subr.mxu1 %v13818_v52 }
 0xb6e   : > { %7609 = vmatpush3.msra.mxu1 %v13818_v52 }
 0xb6f   : > { %7610 = vmatprep.subr.mxu1 %v13820_v20 }
 0xb70   : > { %7611 = vmatpush3.msra.mxu1 %v13820_v20 }
 0xb71   : > { %7613 = vmatmul.mubr.msk.f32.vlgmr.msra.gmra.mxu1 %vm3853_vm4, %v8081_v10  ;;  %7680 = vmatprep.subr.mxu1 %v15077_v16  ;;  %vm15083_vm4 = vcmp.le.f32.partialorder %v15082_v3, 49.0  ;;  %v6162_v10 = vpop.permute.xlu1 %6161 }
 0xb72   : > { %7615 = vmatprep.mubr.msk.f32.mxu1 %vm3854_vm9, %v8082_v36  ;;  %vm15085_vm9 = vcmp.le.f32.partialorder %v15084_v31, 49.0  ;;  %v6164_v36 = vpop.permute.xlu0 %6163 }
 0xb75   : > { %7616 = vmatmul.mubr.msk.f32.gmra.mxu1 %vm3855_vm10, %v8083_v35  ;;  %vm15087_vm10 = vcmp.le.f32.partialorder %v15086_v4, 49.0  ;;  %v6166_v2 = vpop.permute.xlu1 %6165 }
 0xb76   : > { %7618 = vmatprep.mubr.msk.f32.mxu1 %vm3856_vm5, %v8084_v14  ;;  %vm15089_vm5 = vcmp.le.f32.partialorder %v15088_v33, 49.0 }
 0xb79   : > { %7619 = vmatmul.mubr.msk.f32.gmra.mxu1 %vm3857_vm12, %v8085_v42  ;;  %vm15091_vm12 = vcmp.le.f32.partialorder %v15090_v39, 49.0 }
 0xb7a   : > { %7621 = vmatprep.mubr.msk.f32.mxu1 %vm15083_vm4, %v8086_v17  ;;  %vm15107_vm4 = vmmov %vm15103_vm1 }
 0xb7d   : > { %7622 = vmatmul.mubr.msk.f32.gmra.mxu1 %vm15085_vm9, %v8087_v6  ;;  %vm15108_vm9 = vmmov %vm15106_vm3  ;;  %v6168_v6 = vpop.permute.xlu0 %6167 }
 0xb7e   : > { %7624 = vmatprep.mubr.msk.f32.mxu1 %vm15087_vm10, %v8088_v26  ;;  %vm15109_vm10 = vmmov %vm15103_vm1  ;;  %v6170_v26 = vpop.permute.xlu1 %6169 }
 0xb81   : > { %7625 = vmatmul.mubr.msk.f32.gmra.mxu1 %vm15089_vm5, %v8089_v12  ;;  %vm15110_vm5 = vmmov %vm15052_vm0  ;;  %v6172_v38 = vpop.permute.xlu0 %6171 }
 0xb82   : > { %7627 = vmatprep.mubr.msk.f32.mxu1 %vm15091_vm12, %v8090_v44  ;;  %vm15111_vm12 = vmmov %vm15106_vm3  ;;  %v6174_v47 = vpop.permute.xlu1 %6173 }
 0xb85   : > { %7628 = vmatmul.mubr.msk.f32.gmra.mxu1 %vm15093_vm8, %v8091_v62  ;;  %vm15112_vm8 = vmmov %vm15052_vm0 }
 0xb86   : > { %7630 = vmatprep.mubr.msk.f32.mxu1 %vm15095_vm2, %v8092_v58  ;;  %vm15113_vm2 = vmmov %vm15103_vm1 }
 0xb89   : > { %7631 = vmatmul.mubr.msk.f32.gmra.mxu1 %vm15097_vm15, %v8093_v21  ;;  %vm15114_vm15 = vmmov %vm15106_vm3 }
 0xb8a   : > { %7633 = vmatprep.mubr.msk.f32.mxu1 %vm15099_vm13, %v8094_v40  ;;  %vm15115_vm13 = vmmov %vm15103_vm1 }
 0xb8d   : > { %7634 = vmatmul.mubr.msk.f32.gmra.mxu1 %vm15101_vm6, %v8095_v48  ;;  %vm15116_vm6 = vmmov %vm15052_vm0 }
 0xb8e   : > { %7712 = vmatprep.mubr.msk.f32.mxu1 %vm15102_vm14, %v15077_v16  ;;  %vm15117_vm14 = vmmov %vm15106_vm3 }
 0xc31   : > { %v7614_v9 = vpop.f32.mrf.mxu1 }
 0xc32   : > { %v6208_v35 = vsel %vm15103_vm1, %v7614_v9, %v6098_v41  ;;  %vm15118_vm1 = vmmov %vm15052_vm0 }
 0xc33   : > { %v6016_v46 = vpop.f32.mrf.mxu1  ;;  %v6224_v15 = vsel %vm15052_vm0, %v6208_v35, %v6162_v10  ;;  %vm15121_vm0 = vmmov %vm15113_vm2 }
 0xc34   : > { %v6207_v14 = vsel %vm15104_vm7, %v6016_v46, %v6096_v29  ;;  %vm15119_vm7 = vmmov %vm15113_vm2 }
 0xc35   : > { %v7617_v54 = vpop.f32.mrf.mxu1  ;;  %v6223_v42 = vsel %vm15105_vm11, %v6207_v14, %v6160_v7  ;;  %vm15120_vm11 = vmmov %vm15106_vm3 }
 0xc36   : > { %7656 = vmatprep.mubr.msk.f32.mxu0 %vm15106_vm3, %v6223_v42  ;;  %v6210_v17 = vsel %vm15107_vm4, %v7617_v54, %v6102_v8  ;;  %vm15122_vm3 = vmmov %vm15118_vm1 }
 0xc37   : > { %v6026_v3 = vpop.f32.mrf.mxu1  ;;  %7657 = vmatmul.mubr.msk.f32.vlgmr.msra.gmra.mxu0 %vm15108_vm9, %v6224_v15  ;;  %v6226_v33 = vsel %vm15112_vm8, %v6210_v17, %v6166_v2  ;;  %vm15123_vm4 = vmmov %vm15108_vm9 }
 0xc38   : > { %v6209_v31 = vsel %vm15109_vm10, %v6026_v3, %v6100_v0  ;;  %vm15124_vm9 = vmmov %vm15118_vm1 }
 0xc39   : > { %v7620_v4 = vpop.f32.mrf.mxu1  ;;  %v6225_v12 = vsel %vm15110_vm5, %v6209_v31, %v6164_v36  ;;  %vm15125_vm10 = vmmov %vm15121_vm0 }
 0xc3a   : > { %7659 = vmatprep.mubr.msk.f32.mxu0 %vm15111_vm12, %v6225_v12  ;;  %v6212_v44 = vsel %vm15113_vm2, %v7620_v4, %v6106_v1  ;;  %vm15126_vm5 = vmmov %vm15123_vm4 }
 0xc3b   : > { %v6036_v39 = vpop.f32.mrf.mxu1  ;;  %7660 = vmatmul.mubr.msk.f32.gmra.mxu0 %vm15114_vm15, %v6226_v33  ;;  %v6228_v21 = vsel %vm15118_vm1, %v6212_v44, %v6170_v26  ;;  %vm15127_vm12 = vmmov %vm15121_vm0 }
 0xc3c   : > { %v6211_v62 = vsel %vm15115_vm13, %v6036_v39, %v6104_v37  ;;  %v6176_v37 = vpop.permute.xlu0 %6175  ;;  %vm15128_vm8 = vmmov %vm15118_vm1 }
 0xc3d   : > { %v7623_v61 = vpop.f32.mrf.mxu1  ;;  %v6227_v58 = vsel %vm15116_vm6, %v6211_v62, %v6168_v6  ;;  %vm15129_vm2 = vmmov %vm15123_vm4 }
 0xc3e   : > { %7662 = vmatprep.mubr.msk.f32.mxu0 %vm15117_vm14, %v6227_v58  ;;  %v6214_v40 = vsel %vm15119_vm7, %v7623_v61, %v6110_v50  ;;  %v6178_v50 = vpop.permute.xlu1 %6177  ;;  %vm15130_vm15 = vmmov %vm15118_vm1 }
 0xc3f   : > { %v6046_v55 = vpop.f32.mrf.mxu1  ;;  %7663 = vmatmul.mubr.msk.f32.gmra.mxu0 %vm15120_vm11, %v6228_v21  ;;  %v6230_v41 = vsel %vm15124_vm9, %v6214_v40, %v6174_v47  ;;  %vm15131_vm13 = vmmov %vm15121_vm0 }
 0xc40   : > { %v6213_v48 = vsel %vm15121_vm0, %v6046_v55, %v6108_v45  ;;  %vm15132_vm6 = vmmov %vm15129_vm2 }
 0xc41   : > { %v7626_v49 = vpop.f32.mrf.mxu1  ;;  %v6229_v29 = vsel %vm15122_vm3, %v6213_v48, %v6172_v38  ;;  %vm15133_vm14 = vmmov %vm15121_vm0 }
 0xc42   : > { %7665 = vmatprep.mubr.msk.f32.mxu0 %vm15123_vm4, %v6229_v29  ;;  %v6216_v0 = vsel %vm15125_vm10, %v7626_v49, %v6114_v59  ;;  %v6180_v59 = vpop.permute.xlu0 %6179  ;;  %v6182_v35 = vpop.permute.xlu1 %6181  ;;  %vm15134_vm7 = vmmov %vm15129_vm2 }
 0xc43   : > { %v6056_v8 = vpop.f32.mrf.mxu1  ;;  %7666 = vmatmul.mubr.msk.f32.gmra.mxu0 %vm15126_vm5, %v6230_v41  ;;  %v6232_v45 = vsel %vm15130_vm15, %v6216_v0, %v6178_v50  ;;  %vm15135_vm11 = vmmov %vm15118_vm1  ;;  %v8096_v41 = vld [vmem:[%s14123_s4 + $0x88] ss:$0 sm:$0xff] }
 0xc44   : > { %v6215_v1 = vsel %vm15127_vm12, %v6056_v8, %v6112_v57  ;;  %vm15136_vm3 = vmmov %vm15129_vm2 }
 0xc45   : > { %v7629_v7 = vpop.f32.mrf.mxu1  ;;  %v6231_v10 = vsel %vm15128_vm8, %v6215_v1, %v6176_v37  ;;  %vm15137_vm4 = vmmov %vm15121_vm0 }
 0xc46   : > { %7668 = vmatprep.mubr.msk.f32.mxu0 %vm15129_vm2, %v6231_v10  ;;  %v6218_v9 = vsel %vm15131_vm13, %v7629_v7, %v6118_v24  ;;  %v6184_v24 = vpop.permute.xlu0 %6183  ;;  %v6186_v17 = vpop.permute.xlu1 %6185  ;;  %vm15138_vm9 = vmmov %vm15118_vm1 }
 0xc47   : > { %v6066_v36 = vpop.f32.mrf.mxu1  ;;  %7669 = vmatmul.mubr.msk.f32.gmra.mxu0 %vm15132_vm6, %v6232_v45  ;;  %v6234_v14 = vsel %vm15135_vm11, %v6218_v9, %v6182_v35  ;;  %vm15139_vm10 = vmmov %vm15129_vm2 }
 0xc48   : > { %v6217_v2 = vsel %vm15133_vm14, %v6066_v36, %v6116_v28  ;;  %vm15140_vm5 = vmmov %vm15118_vm1 }
 0xc49   : > { %v7632_v46 = vpop.f32.mrf.mxu1  ;;  %v6233_v57 = vsel %vm15118_vm1, %v6217_v2, %v6180_v59  ;;  %vm15141_vm12 = vmmov %vm15121_vm0 }
 0xc4a   : > { %7671 = vmatprep.mubr.msk.f32.mxu0 %vm15134_vm7, %v6233_v57  ;;  %v6220_v54 = vsel %vm15121_vm0, %v7632_v46, %v13964_v32  ;;  %vm15142_vm8 = vmmov %vm15129_vm2  ;;  %v6188_v32 = vpop.permute.xlu0 %6187  ;;  %v6190_v12 = vpop.permute.xlu1 %6189 }
 0xc4b   : > { %v6076_v42 = vpop.f32.mrf.mxu1  ;;  %7672 = vmatmul.mubr.msk.f32.gmra.mxu0 %vm15136_vm3, %v6234_v14  ;;  %v6236_v6 = vsel %vm15140_vm5, %v6220_v54, %v6186_v17  ;;  %vm15143_vm2 = vmmov %vm15121_vm0 }
 0xc4c   : > { %v6219_v15 = vsel %vm15137_vm4, %v6076_v42, %v13962_v5  ;;  %vm15144_vm15 = vmmov %vm15118_vm1 }
 0xc4d   : > { %v7635_v28 = vpop.f32.mrf.mxu1  ;;  %v6235_v3 = vsel %vm15138_vm9, %v6219_v15, %v6184_v24  ;;  %vm15145_vm13 = vmmov %vm15136_vm3 }
 0xc4e   : > { %7674 = vmatprep.mubr.msk.f32.mxu0 %vm15139_vm10, %v6235_v3  ;;  %v6222_v31 = vsel %vm15141_vm12, %v7635_v28, %v13968_v43  ;;  %vm15146_vm6 = vmmov %vm15118_vm1  ;;  %vm15148_vm1 = vcmask 257024  }
 0xc4f   : > { %v6086_v26 = vpop.f32.mrf.mxu1  ;;  %7675 = vmatmul.mubr.msk.f32.gmra.mxu0 %vm15142_vm8, %v6236_v6  ;;  %v6238_v33 = vsel %vm15146_vm6, %v6222_v31, %v6190_v12  ;;  %vm15147_vm14 = vmmov %vm15136_vm3 }
 0xc50   : > { %v6221_v4 = vsel %vm15143_vm2, %v6086_v26, %v13966_v34 }
 0xc51   : > { %v6237_v5 = vsel %vm15144_vm15, %v6221_v4, %v6188_v32 }
 0xc52   : > { %7677 = vmatprep.mubr.msk.f32.mxu0 %vm15145_vm13, %v6237_v5 }
 0xc53   : > { %7678 = vmatmul.mubr.msk.f32.gmra.mxu0 %vm15147_vm14, %v6238_v33 }
 0xcf7   : > { %v14022_v44 = vpop.f32.mrf.mxu0 }
 0xcf9   : > { %v14024_v39 = vpop.f32.mrf.mxu0 }
 0xcfb   : > { %v7661_v43 = vpop.f32.mrf.mxu0 }
 0xcfc   : > { %v6369_v32 = vadd.f32 %v8096_v41, %v7661_v43 }
 0xcfd   : > { %v14026_v62 = vpop.f32.mrf.mxu0 }
 0xcfe   : > { %v6364_v12 = vadd.f32 %v8096_v41, %v14026_v62  ;;  %v6435_v33 = vmax.f32 %v6369_v32, 0.0 }
 0xcff   : > { %v7664_v61 = vpop.f32.mrf.mxu0 }
 0xd00   : > { %v6379_v3 = vadd.f32 %v8096_v41, %v7664_v61  ;;  %v6434_v43 = vmax.f32 %v6364_v12, 0.0  ;;  %v6451_v62 = vadd.f32 %v6435_v33, %v13824_v56 }
 0xd01   : > { %v6373_v58 = vpop.f32.mrf.mxu0 }
 0xd02   : > { %v6374_v31 = vadd.f32 %v8096_v41, %v6373_v58  ;;  %v6437_v4 = vmax.f32 %v6379_v3, 0.0 }
 0xd03   : > { %v7667_v38 = vpop.f32.mrf.mxu0 }
 0xd04   : > { %v6453_v61 = vadd.f32 %v6437_v4, %v13832_v13 }
 0xd05   : > { %v6383_v34 = vpop.f32.mrf.mxu0 }
 0xd06   : > { %v6384_v17 = vadd.f32 %v8096_v41, %v6383_v34 }
 0xd07   : > { %v7670_v21 = vpop.f32.mrf.mxu0 }
 0xd08   : > { %v6399_v46 = vadd.f32 %v8096_v41, %v7670_v21  ;;  %v6438_v26 = vmax.f32 %v6384_v17, 0.0 }
 0xd09   : > { %v6393_v47 = vpop.f32.mrf.mxu0 }
 0xd0a   : > { %v6394_v54 = vadd.f32 %v8096_v41, %v6393_v47  ;;  %v6441_v15 = vmax.f32 %v6399_v46, 0.0  ;;  %v6454_v5 = vadd.f32 %v6438_v26, %v13844_v53 }
 0xd0b   : > { %v7673_v40 = vpop.f32.mrf.mxu0 }
 0xd0c   : > { %v6409_v10 = vadd.f32 %v8096_v41, %v7673_v40  ;;  %v6440_v28 = vmax.f32 %v6394_v54, 0.0 }
 0xd0d   : > { %v6403_v55 = vpop.f32.mrf.mxu0 }
 0xd0e   : > { %v6404_v59 = vadd.f32 %v8096_v41, %v6403_v55  ;;  %v6443_v57 = vmax.f32 %v6409_v10, 0.0 }
 0xd0f   : > { %v7676_v48 = vpop.f32.mrf.mxu0 }
 0xd10   : > { %v6419_v0 = vadd.f32 %v8096_v41, %v7676_v48  ;;  %v6442_v42 = vmax.f32 %v6404_v59, 0.0 }
 0xd11   : > { %v6413_v49 = vpop.f32.mrf.mxu0 }
 0xd12   : > { %v6414_v1 = vadd.f32 %v8096_v41, %v6413_v49  ;;  %v6445_v45 = vmax.f32 %v6419_v0, 0.0 }
 0xd13   : > { %v7679_v29 = vpop.f32.mrf.mxu0 }
 0xd14   : > { %v6429_v8 = vadd.f32 %v8096_v41, %v7679_v29  ;;  %v6444_v2 = vmax.f32 %v6414_v1, 0.0  ;;  %v6461_v14 = vadd.f32 %v6445_v45, %v13866_v30  ;;  %v6458_v30 = vadd.f32 %v6442_v42, %v13860_v19 }
 0xd15   : > { %v6423_v37 = vpop.f32.mrf.mxu0 }
 0xd16   : > { %v6447_v50 = vmax.f32 %v6429_v8, 0.0  ;;  %v6424_v7 = vadd.f32 %v8096_v41, %v6423_v37  ;;  %v6460_v24 = vadd.f32 %v6444_v2, %v13868_v51  ;;  %v6457_v51 = vadd.f32 %v6441_v15, %v13848_v63 }
 0xd17   : > { %v6436_v63 = vmax.f32 %v6374_v31, 0.0 }
 0xd18   : > { %v6463_v9 = vadd.f32 %v6447_v50, %v13874_v11  ;;  %v6446_v36 = vmax.f32 %v6424_v7, 0.0  ;;  %v6389_v11 = vadd.f32 %v8096_v41, %v7667_v38 }
 0xd19   : > { %v6452_v58 = vadd.f32 %v6436_v63, %v13836_v60 }
 0xd1a   : > { %v6462_v35 = vadd.f32 %v6446_v36, %v13876_v18  ;;  %7681 = vmatpush3.msra.mxu1 %v6463_v9  ;;  %v6459_v18 = vadd.f32 %v6443_v57, %v13858_v25  ;;  %v6439_v6 = vmax.f32 %v6389_v11, 0.0  ;;  %v6456_v25 = vadd.f32 %v6440_v28, %v13852_v27 }
 0xd1b   : > { %7682 = vmatprep.subr.mxu1 %v15077_v16  ;;  %v6359_v27 = vadd.f32 %v8096_v41, %v14022_v44  ;;  %v6450_v44 = vadd.f32 %v6434_v43, %v13828_v22 }
 0xd1c   : > { %7683 = vmatpush3.msra.mxu1 %v6462_v35  ;;  %v6455_v19 = vadd.f32 %v6439_v6, %v13840_v23  ;;  %v6354_v23 = vadd.f32 %v8096_v41, %v14024_v39  ;;  %v6810_v39 = vld [vmem:[%s11349_s23 + $0x4] sm:$0xf]  ;;  %s14079_s23 = scalar_lea.sflag [#allocation3], %s270_s25 }
 0xd1d   : > { %7684 = vmatprep.subr.mxu1 %v15077_v16  ;;  %v6433_v53 = vmax.f32 %v6359_v27, 0.0 }
 0xd1e   : > { %7685 = vmatpush3.msra.mxu1 %v6461_v14  ;;  %v6432_v13 = vmax.f32 %v6354_v23, 0.0 }
 0xd1f   : > { %7686 = vmatprep.subr.mxu1 %v15077_v16  ;;  %v6449_v60 = vadd.f32 %v6433_v53, %v13818_v52 }
 0xd20   : > { %7687 = vmatpush3.msra.mxu1 %v6460_v24  ;;  %v6448_v56 = vadd.f32 %v6432_v13, %v13820_v20 }
 0xd21   : > { %7688 = vmatprep.subr.mxu1 %v15077_v16 }
 0xd22   : > { %7689 = vmatpush3.msra.mxu1 %v6459_v18 }
 0xd23   : > { %7690 = vmatprep.subr.mxu1 %v15077_v16 }
 0xd24   : > { %7691 = vmatpush3.msra.mxu1 %v6458_v30 }
 0xd25   : > { %7692 = vmatprep.subr.mxu1 %v15077_v16 }
 0xd26   : > { %7693 = vmatpush3.msra.mxu1 %v6457_v51 }
 0xd27   : > { %7694 = vmatprep.subr.mxu1 %v15077_v16 }
 0xd28   : > { %7695 = vmatpush3.msra.mxu1 %v6456_v25 }
 0xd29   : > { %7696 = vmatprep.subr.mxu1 %v15077_v16 }
 0xd2a   : > { %7697 = vmatpush3.msra.mxu1 %v6455_v19 }
 0xd2b   : > { %7698 = vmatprep.subr.mxu1 %v15077_v16 }
 0xd2c   : > { %7699 = vmatpush3.msra.mxu1 %v6454_v5 }
 0xd2d   : > { %7700 = vmatprep.subr.mxu1 %v15077_v16 }
 0xd2e   : > { %7701 = vmatpush3.msra.mxu1 %v6453_v61 }
 0xd2f   : > { %7702 = vmatprep.subr.mxu1 %v15077_v16 }
 0xd30   : > { %7703 = vmatpush3.msra.mxu1 %v6452_v58 }
 0xd31   : > { %7704 = vmatprep.subr.mxu1 %v15077_v16 }
 0xd32   : > { %7705 = vmatpush3.msra.mxu1 %v6451_v62 }
 0xd33   : > { %7706 = vmatprep.subr.mxu1 %v15077_v16 }
 0xd34   : > { %7707 = vmatpush3.msra.mxu1 %v6450_v44 }
 0xd35   : > { %7708 = vmatprep.subr.mxu1 %v15077_v16 }
 0xd36   : > { %7709 = vmatpush3.msra.mxu1 %v6449_v60 }
 0xd37   : > { %7710 = vmatprep.subr.mxu1 %v15077_v16 }
 0xd38   : > { %7711 = vmatpush3.msra.mxu1 %v6448_v56 }
 0xd39   : > { %7713 = vmatmul.mubr.f32.vlgmr.msra.gmra.mxu1 %v6810_v39 }
 0xdf9   : > { %v6530_v52 = vpop.f32.mrf.mxu1 }
 0xdfa   : > { %6907 = vst.msk [vmem:[%s12435_s26 + $0x4] sm:$0xf] %vm15148_vm1, %v6530_v52 }
 0xdfb   : > { %v7714_v20 = vpop.f32.mrf.mxu1 }
 0xdfc   : > { %8110 = shalt.err (!%p8107_p3)
}
 0xdfd   : > { %s8111_s25 = scalar_lea.hbm %s14073_s11, 128  ;;  %s8115_s17 = scalar_lea.hbm %s14124_s5, 256 }
 0xdfe   : > { %p8112_p4 = scmp.ne.s32.totalorder %s14073_s11, %s8111_s25  ;;  %p8116_p9 = scmp.lt.s32.totalorder %s14073_s11, %s14124_s5 }
 0xdff   : > { %p8117_p10 = scmp.lt.s32.totalorder %s8115_s17, %s8111_s25 }
 0xe00   : > { %p8113_p7 = pnand %p8112_p4, %p8235_p5 }
 0xe01   : > { %p8118_p11 = por %p8117_p10, %p8116_p9 }
 0xe02   : > { %p8114_p8 = pneg %p8113_p7 }
 0xe04   : > { %p8119_p12 = pnand %p8118_p11, %p8114_p8 }
 0xe06   : > { %8122 = shalt.err (!%p8119_p12)
}
 0xe07   : > { %s8165_s6 = smov 64   ;;  %s8166_s7 = smov 4  }
 0xe08   : > { %7715 = dma.vmem_to_hbm [thread:$0]  (%p8235_p5), %s14068_s16, 128, %s14073_s11, %s14079_s23, %s8165_s6, %s8165_s6, %s8166_s7  }
 0xe09 PF: > { %p7721_p13 = scmp.ge.s32.totalorder %s8157_s21, 2  ;;  %s6565_s8 = sand.u32 1, %s8145_s18  }
 0xe0a   : > { %s6566_s10 = scalar_lea.sflag [#allocation3], %s6565_s8 }
 0xe0b   : > { %p7718_p0 = pnand %p7721_p13, %p8239_p6 }
 0xe0d   : > { %p7719_p1 = pneg %p7718_p0 }
 0xe0f   : > { %8140 = dma.done.wait (%p7719_p1), %s6566_s10, 128  }
 0xe10   : > { %8142 = vsyncadd (%p7719_p1), %s6566_s10, 4294967168  ;;  %p15_p2 = scmp.ge.s32.totalorder %s8222_s24, 4   ;;  %s15149_s18 = smov %s8149_s19 }
 0xe11   : > { %s15150_s19 = smov %s8153_s20  ;;  %s15151_s20 = smov %s8233_s27 }
 0xe12   : > { %s15152_s21 = smov %s8222_s24  ;;  %17 = sbr.rel (!%p15_p2) target bundleno = 3 (0x3), region = 89 }
 0xe17   :  { %6571 = vsyncpa [#allocation3], 1 }
 0xe18   :  { %6573 = vsyncpa [#allocation3 + $0x1], 1 }

</bundles_post_ra>
